<compile_context>
chip_gen: v7x
topology: tpu7x:2x2x1
jax: 0.10.0
libtpu: 0.0.40
codegen_flags: <defaults>
</compile_context>

<pallas_src>
import jax
import jax.numpy as jnp
import numpy as np
from jax.experimental import pallas as pl
from jax.experimental.pallas import tpu as pltpu

_EPS = 1e-5


def _make_kernel(N, H, W, C):
    R = N * H * W            # rows of the im2col matmul
    inv_r = 1.0 / R

    def fill_patches(xpad_ref, patches_ref):
        # im2col: column block t = ky*3 + kx holds the (ky, kx) tap.
        for ky in range(3):
            for kx in range(3):
                t = ky * 3 + kx
                patches_ref[:, t * C:(t + 1) * C] = (
                    xpad_ref[:, ky:ky + H, kx:kx + W, :].reshape(R, C))

    def conv_bn(patches_ref, w_ref, b_ref, g_ref, beta_ref):
        # single K=9C MXU matmul + bias
        y = jnp.dot(patches_ref[...], w_ref[...],
                    preferred_element_type=jnp.float32) + b_ref[...]
        # one-pass batch stats (sum & sum-of-squares), folded into scale/shift
        mean = jnp.sum(y, axis=0, keepdims=True) * inv_r
        ex2 = jnp.sum(y * y, axis=0, keepdims=True) * inv_r
        var = ex2 - mean * mean                           # biased variance
        scale = g_ref[...] * jax.lax.rsqrt(var + _EPS)
        shift = beta_ref[...] - mean * scale
        return y * scale + shift

    def kernel(x_ref,
               w1_ref, b1_ref, g1_ref, be1_ref,
               w2_ref, b2_ref, g2_ref, be2_ref,
               o_ref,
               xpad_ref, patches_ref):
        x = x_ref[...]                                    # (N, H, W, C)

        # in-kernel 'same' padding: zero the halo once, fill the interior
        xpad_ref[...] = jnp.zeros_like(xpad_ref)
        xpad_ref[:, 1:H + 1, 1:W + 1, :] = x

        # ---- stage 1: conv3x3 + BN + ReLU ----
        fill_patches(xpad_ref, patches_ref)
        h1 = jnp.maximum(
            conv_bn(patches_ref, w1_ref, b1_ref, g1_ref, be1_ref), 0.0)

        # keep h1 in VMEM: reuse the padded scratch (halo is still zero)
        xpad_ref[:, 1:H + 1, 1:W + 1, :] = h1.reshape(N, H, W, C)

        # ---- stage 2: conv3x3 + BN + residual + ReLU ----
        fill_patches(xpad_ref, patches_ref)
        h2 = conv_bn(patches_ref, w2_ref, b2_ref, g2_ref, be2_ref)
        out = jnp.maximum(h2 + x.reshape(R, C), 0.0)
        o_ref[...] = out.reshape(N, H, W, C)

    return kernel


def residual_block(x_nchw, w1, b1, g1, be1, w2, b2, g2, be2):
    """Forward pass matching the PyTorch ResidualBlock. Conv weights are HWIO."""
    N, C, H, W = x_nchw.shape
    x = jnp.transpose(x_nchw, (0, 2, 3, 1))               # NCHW -> NHWC
    # HWIO (3,3,C,C) -> (9C, C); row index ky*3C + kx*C + cin matches the
    # im2col column order built in-kernel.
    w1m = w1.reshape(9 * C, C)
    w2m = w2.reshape(9 * C, C)

    vmem = pl.BlockSpec(memory_space=pltpu.MemorySpace.VMEM)
    out = pl.pallas_call(
        _make_kernel(N, H, W, C),
        out_shape=jax.ShapeDtypeStruct((N, H, W, C), jnp.float32),
        in_specs=[vmem] * 9,
        out_specs=vmem,
        scratch_shapes=[
            pltpu.VMEM((N, H + 2, W + 2, C), jnp.float32),   # padded activations
            pltpu.VMEM((N * H * W, 9 * C), jnp.float32),     # im2col buffer
        ],
        compiler_params=pltpu.CompilerParams(
            vmem_limit_bytes=32 * 1024 * 1024),
    )(x,
      w1m, b1.reshape(1, C), g1.reshape(1, C), be1.reshape(1, C),
      w2m, b2.reshape(1, C), g2.reshape(1, C), be2.reshape(1, C))
    return jnp.transpose(out, (0, 3, 1, 2))                # NHWC -> NCHW


def _reference(x_nchw, w1, b1, g1, be1, w2, b2, g2, be2):
    """Pure-JAX reference (same semantics) for a sanity check."""
    x = jnp.transpose(x_nchw, (0, 2, 3, 1))

    def conv(a, w, b):
        y = jax.lax.conv_general_dilated(
            a, w, (1, 1), 'SAME',
            dimension_numbers=('NHWC', 'HWIO', 'NHWC'))
        return y + b

    def bn(y, g, bt):
        m = y.mean(axis=(0, 1, 2), keepdims=True)
        v = ((y - m) ** 2).mean(axis=(0, 1, 2), keepdims=True)
        return (y - m) * jax.lax.rsqrt(v + _EPS) * g + bt

    h = jnp.maximum(bn(conv(x, w1, b1), g1, be1), 0.0)
    o = bn(conv(h, w2, b2), g2, be2) + x
    o = jnp.maximum(o, 0.0)
    return jnp.transpose(o, (0, 3, 1, 2))


if __name__ == "__main__":
    N, C, H, W = 2, 4, 16, 16
    key = jax.random.PRNGKey(0)
    ks = jax.random.split(key, 9)

    x = jax.random.normal(ks[0], (N, C, H, W), jnp.float32)
    # Conv weights stored HWIO: (kH, kW, C_in, C_out); biases (C,)
    w1 = 0.1 * jax.random.normal(ks[1], (3, 3, C, C), jnp.float32)
    b1 = 0.1 * jax.random.normal(ks[2], (C,), jnp.float32)
    g1 = 1.0 + 0.1 * jax.random.normal(ks[3], (C,), jnp.float32)
    be1 = 0.1 * jax.random.normal(ks[4], (C,), jnp.float32)
    w2 = 0.1 * jax.random.normal(ks[5], (3, 3, C, C), jnp.float32)
    b2 = 0.1 * jax.random.normal(ks[6], (C,), jnp.float32)
    g2 = 1.0 + 0.1 * jax.random.normal(ks[7], (C,), jnp.float32)
    be2 = 0.1 * jax.random.normal(ks[8], (C,), jnp.float32)

    out = residual_block(x, w1, b1, g1, be1, w2, b2, g2, be2)
    out = jax.block_until_ready(out)

    ref = _reference(x, w1, b1, g1, be1, w2, b2, g2, be2)
    np.testing.assert_allclose(np.asarray(out), np.asarray(ref),
                               rtol=2e-3, atol=2e-3)
    assert out.shape == (N, C, H, W) and out.dtype == jnp.float32
    print("KERNEL_OK")
</pallas_src>

<mosaic_0001>
module attributes {stable_mosaic.version = 11 : i64} {
  func.func @kernel(%arg0: memref<2x16x16x4xf32, #tpu.memory_space<vmem>>, %arg1: memref<36x4xf32, #tpu.memory_space<vmem>>, %arg2: memref<1x4xf32, #tpu.memory_space<vmem>>, %arg3: memref<1x4xf32, #tpu.memory_space<vmem>>, %arg4: memref<1x4xf32, #tpu.memory_space<vmem>>, %arg5: memref<36x4xf32, #tpu.memory_space<vmem>>, %arg6: memref<1x4xf32, #tpu.memory_space<vmem>>, %arg7: memref<1x4xf32, #tpu.memory_space<vmem>>, %arg8: memref<1x4xf32, #tpu.memory_space<vmem>>, %arg9: memref<2x16x16x4xf32, #tpu.memory_space<vmem>>, %arg10: memref<2x18x18x4xf32, #tpu.memory_space<vmem>>, %arg11: memref<512x36xf32, #tpu.memory_space<vmem>>) attributes {dimension_semantics = [], scalar_prefetch = 0 : i64, scratch_operands = 2 : i64, tpu.core_type = #tpu.core_type<tc>} {
    %c0 = arith.constant 0 : index
    %c0_0 = arith.constant 0 : index
    %c0_1 = arith.constant 0 : index
    %c0_2 = arith.constant 0 : index
    %0 = vector.load %arg0[%c0, %c0_0, %c0_1, %c0_2] : memref<2x16x16x4xf32, #tpu.memory_space<vmem>>, vector<2x16x16x4xf32>
    %cst = arith.constant 0.000000e+00 : f32
    %1 = vector.broadcast %cst : f32 to vector<2x18x18x4xf32>
    %c0_3 = arith.constant 0 : index
    %c0_4 = arith.constant 0 : index
    %c0_5 = arith.constant 0 : index
    %c0_6 = arith.constant 0 : index
    %2 = vector.load %arg10[%c0_3, %c0_4, %c0_5, %c0_6] : memref<2x18x18x4xf32, #tpu.memory_space<vmem>>, vector<2x18x18x4xf32>
    tpu.vector_store %arg10[%c0_3, %c0_4, %c0_5, %c0_6], %1 {strides = array<i32>} : memref<2x18x18x4xf32, #tpu.memory_space<vmem>>, vector<2x18x18x4xf32>,
    %c0_7 = arith.constant 0 : index
    %c1 = arith.constant 1 : index
    %c1_8 = arith.constant 1 : index
    %c0_9 = arith.constant 0 : index
    %3 = vector.load %arg10[%c0_7, %c1, %c1_8, %c0_9] : memref<2x18x18x4xf32, #tpu.memory_space<vmem>>, vector<2x16x16x4xf32>
    tpu.vector_store %arg10[%c0_7, %c1, %c1_8, %c0_9], %0 {strides = array<i32>} : memref<2x18x18x4xf32, #tpu.memory_space<vmem>>, vector<2x16x16x4xf32>,
    %c0_10 = arith.constant 0 : index
    %c0_11 = arith.constant 0 : index
    %c0_12 = arith.constant 0 : index
    %c0_13 = arith.constant 0 : index
    %4 = vector.load %arg10[%c0_10, %c0_11, %c0_12, %c0_13] : memref<2x18x18x4xf32, #tpu.memory_space<vmem>>, vector<2x16x16x4xf32>
    %5 = vector.shape_cast %4 : vector<2x16x16x4xf32> to vector<512x4xf32>
    %c0_14 = arith.constant 0 : index
    %c0_15 = arith.constant 0 : index
    %6 = vector.load %arg11[%c0_14, %c0_15] : memref<512x36xf32, #tpu.memory_space<vmem>>, vector<512x4xf32>
    tpu.vector_store %arg11[%c0_14, %c0_15], %5 {strides = array<i32>} : memref<512x36xf32, #tpu.memory_space<vmem>>, vector<512x4xf32>,
    %c0_16 = arith.constant 0 : index
    %c0_17 = arith.constant 0 : index
    %c1_18 = arith.constant 1 : index
    %c0_19 = arith.constant 0 : index
    %7 = vector.load %arg10[%c0_16, %c0_17, %c1_18, %c0_19] : memref<2x18x18x4xf32, #tpu.memory_space<vmem>>, vector<2x16x16x4xf32>
    %8 = vector.shape_cast %7 : vector<2x16x16x4xf32> to vector<512x4xf32>
    %c0_20 = arith.constant 0 : index
    %c4 = arith.constant 4 : index
    %9 = vector.load %arg11[%c0_20, %c4] : memref<512x36xf32, #tpu.memory_space<vmem>>, vector<512x4xf32>
    tpu.vector_store %arg11[%c0_20, %c4], %8 {strides = array<i32>} : memref<512x36xf32, #tpu.memory_space<vmem>>, vector<512x4xf32>,
    %c0_21 = arith.constant 0 : index
    %c0_22 = arith.constant 0 : index
    %c2 = arith.constant 2 : index
    %c0_23 = arith.constant 0 : index
    %10 = vector.load %arg10[%c0_21, %c0_22, %c2, %c0_23] : memref<2x18x18x4xf32, #tpu.memory_space<vmem>>, vector<2x16x16x4xf32>
    %11 = vector.shape_cast %10 : vector<2x16x16x4xf32> to vector<512x4xf32>
    %c0_24 = arith.constant 0 : index
    %c8 = arith.constant 8 : index
    %12 = vector.load %arg11[%c0_24, %c8] : memref<512x36xf32, #tpu.memory_space<vmem>>, vector<512x4xf32>
    tpu.vector_store %arg11[%c0_24, %c8], %11 {strides = array<i32>} : memref<512x36xf32, #tpu.memory_space<vmem>>, vector<512x4xf32>,
    %c0_25 = arith.constant 0 : index
    %c1_26 = arith.constant 1 : index
    %c0_27 = arith.constant 0 : index
    %c0_28 = arith.constant 0 : index
    %13 = vector.load %arg10[%c0_25, %c1_26, %c0_27, %c0_28] : memref<2x18x18x4xf32, #tpu.memory_space<vmem>>, vector<2x16x16x4xf32>
    %14 = vector.shape_cast %13 : vector<2x16x16x4xf32> to vector<512x4xf32>
    %c0_29 = arith.constant 0 : index
    %c12 = arith.constant 12 : index
    %15 = vector.load %arg11[%c0_29, %c12] : memref<512x36xf32, #tpu.memory_space<vmem>>, vector<512x4xf32>
    tpu.vector_store %arg11[%c0_29, %c12], %14 {strides = array<i32>} : memref<512x36xf32, #tpu.memory_space<vmem>>, vector<512x4xf32>,
    %c0_30 = arith.constant 0 : index
    %c1_31 = arith.constant 1 : index
    %c1_32 = arith.constant 1 : index
    %c0_33 = arith.constant 0 : index
    %16 = vector.load %arg10[%c0_30, %c1_31, %c1_32, %c0_33] : memref<2x18x18x4xf32, #tpu.memory_space<vmem>>, vector<2x16x16x4xf32>
    %17 = vector.shape_cast %16 : vector<2x16x16x4xf32> to vector<512x4xf32>
    %c0_34 = arith.constant 0 : index
    %c16 = arith.constant 16 : index
    %18 = vector.load %arg11[%c0_34, %c16] : memref<512x36xf32, #tpu.memory_space<vmem>>, vector<512x4xf32>
    tpu.vector_store %arg11[%c0_34, %c16], %17 {strides = array<i32>} : memref<512x36xf32, #tpu.memory_space<vmem>>, vector<512x4xf32>,
    %c0_35 = arith.constant 0 : index
    %c1_36 = arith.constant 1 : index
    %c2_37 = arith.constant 2 : index
    %c0_38 = arith.constant 0 : index
    %19 = vector.load %arg10[%c0_35, %c1_36, %c2_37, %c0_38] : memref<2x18x18x4xf32, #tpu.memory_space<vmem>>, vector<2x16x16x4xf32>
    %20 = vector.shape_cast %19 : vector<2x16x16x4xf32> to vector<512x4xf32>
    %c0_39 = arith.constant 0 : index
    %c20 = arith.constant 20 : index
    %21 = vector.load %arg11[%c0_39, %c20] : memref<512x36xf32, #tpu.memory_space<vmem>>, vector<512x4xf32>
    tpu.vector_store %arg11[%c0_39, %c20], %20 {strides = array<i32>} : memref<512x36xf32, #tpu.memory_space<vmem>>, vector<512x4xf32>,
    %c0_40 = arith.constant 0 : index
    %c2_41 = arith.constant 2 : index
    %c0_42 = arith.constant 0 : index
    %c0_43 = arith.constant 0 : index
    %22 = vector.load %arg10[%c0_40, %c2_41, %c0_42, %c0_43] : memref<2x18x18x4xf32, #tpu.memory_space<vmem>>, vector<2x16x16x4xf32>
    %23 = vector.shape_cast %22 : vector<2x16x16x4xf32> to vector<512x4xf32>
    %c0_44 = arith.constant 0 : index
    %c24 = arith.constant 24 : index
    %24 = vector.load %arg11[%c0_44, %c24] : memref<512x36xf32, #tpu.memory_space<vmem>>, vector<512x4xf32>
    tpu.vector_store %arg11[%c0_44, %c24], %23 {strides = array<i32>} : memref<512x36xf32, #tpu.memory_space<vmem>>, vector<512x4xf32>,
    %c0_45 = arith.constant 0 : index
    %c2_46 = arith.constant 2 : index
    %c1_47 = arith.constant 1 : index
    %c0_48 = arith.constant 0 : index
    %25 = vector.load %arg10[%c0_45, %c2_46, %c1_47, %c0_48] : memref<2x18x18x4xf32, #tpu.memory_space<vmem>>, vector<2x16x16x4xf32>
    %26 = vector.shape_cast %25 : vector<2x16x16x4xf32> to vector<512x4xf32>
    %c0_49 = arith.constant 0 : index
    %c28 = arith.constant 28 : index
    %27 = vector.load %arg11[%c0_49, %c28] : memref<512x36xf32, #tpu.memory_space<vmem>>, vector<512x4xf32>
    tpu.vector_store %arg11[%c0_49, %c28], %26 {strides = array<i32>} : memref<512x36xf32, #tpu.memory_space<vmem>>, vector<512x4xf32>,
    %c0_50 = arith.constant 0 : index
    %c2_51 = arith.constant 2 : index
    %c2_52 = arith.constant 2 : index
    %c0_53 = arith.constant 0 : index
    %28 = vector.load %arg10[%c0_50, %c2_51, %c2_52, %c0_53] : memref<2x18x18x4xf32, #tpu.memory_space<vmem>>, vector<2x16x16x4xf32>
    %29 = vector.shape_cast %28 : vector<2x16x16x4xf32> to vector<512x4xf32>
    %c0_54 = arith.constant 0 : index
    %c32 = arith.constant 32 : index
    %30 = vector.load %arg11[%c0_54, %c32] : memref<512x36xf32, #tpu.memory_space<vmem>>, vector<512x4xf32>
    tpu.vector_store %arg11[%c0_54, %c32], %29 {strides = array<i32>} : memref<512x36xf32, #tpu.memory_space<vmem>>, vector<512x4xf32>,
    %c0_55 = arith.constant 0 : index
    %c0_56 = arith.constant 0 : index
    %31 = vector.load %arg11[%c0_55, %c0_56] : memref<512x36xf32, #tpu.memory_space<vmem>>, vector<512x36xf32>
    %c0_57 = arith.constant 0 : index
    %c0_58 = arith.constant 0 : index
    %32 = vector.load %arg1[%c0_57, %c0_58] : memref<36x4xf32, #tpu.memory_space<vmem>>, vector<36x4xf32>
    %cst_59 = arith.constant dense<0.000000e+00> : vector<512x4xf32>
    %33 = tpu.matmul %31, %32, %cst_59 {dimension_numbers = #tpu.dot_dimension_numbers<[1], [0], [0], [1], [0, 0, 1, 1], [], []>} : vector<512x36xf32>, vector<36x4xf32>, vector<512x4xf32> -> vector<512x4xf32>
    %c0_60 = arith.constant 0 : index
    %c0_61 = arith.constant 0 : index
    %34 = vector.load %arg2[%c0_60, %c0_61] : memref<1x4xf32, #tpu.memory_space<vmem>>, vector<1x4xf32>
    %35 = vector.broadcast %34 : vector<1x4xf32> to vector<512x4xf32>
    %36 = arith.addf %33, %35 : vector<512x4xf32>
    %cst_62 = arith.constant dense<0.000000e+00> : vector<4xf32>
    %37 = vector.multi_reduction <add>, %36, %cst_62 [0] : vector<512x4xf32> to vector<4xf32>
    %38 = vector.shape_cast %37 : vector<4xf32> to vector<1x4xf32>
    %cst_63 = arith.constant 0.001953125 : f32
    %39 = vector.broadcast %cst_63 : f32 to vector<1x4xf32>
    %40 = arith.mulf %38, %39 : vector<1x4xf32>
    %41 = arith.mulf %36, %36 : vector<512x4xf32>
    %cst_64 = arith.constant dense<0.000000e+00> : vector<4xf32>
    %42 = vector.multi_reduction <add>, %41, %cst_64 [0] : vector<512x4xf32> to vector<4xf32>
    %43 = vector.shape_cast %42 : vector<4xf32> to vector<1x4xf32>
    %cst_65 = arith.constant 0.001953125 : f32
    %44 = vector.broadcast %cst_65 : f32 to vector<1x4xf32>
    %45 = arith.mulf %43, %44 : vector<1x4xf32>
    %46 = arith.mulf %40, %40 : vector<1x4xf32>
    %47 = arith.subf %45, %46 : vector<1x4xf32>
    %c0_66 = arith.constant 0 : index
    %c0_67 = arith.constant 0 : index
    %48 = vector.load %arg3[%c0_66, %c0_67] : memref<1x4xf32, #tpu.memory_space<vmem>>, vector<1x4xf32>
    %cst_68 = arith.constant 9.99999974E-6 : f32
    %49 = vector.broadcast %cst_68 : f32 to vector<1x4xf32>
    %50 = arith.addf %47, %49 : vector<1x4xf32>
    %51 = math.rsqrt %50 : vector<1x4xf32>
    %52 = arith.mulf %48, %51 : vector<1x4xf32>
    %c0_69 = arith.constant 0 : index
    %c0_70 = arith.constant 0 : index
    %53 = vector.load %arg4[%c0_69, %c0_70] : memref<1x4xf32, #tpu.memory_space<vmem>>, vector<1x4xf32>
    %54 = arith.mulf %40, %52 : vector<1x4xf32>
    %55 = arith.subf %53, %54 : vector<1x4xf32>
    %56 = vector.broadcast %52 : vector<1x4xf32> to vector<512x4xf32>
    %57 = arith.mulf %36, %56 : vector<512x4xf32>
    %58 = vector.broadcast %55 : vector<1x4xf32> to vector<512x4xf32>
    %59 = arith.addf %57, %58 : vector<512x4xf32>
    %cst_71 = arith.constant 0.000000e+00 : f32
    %60 = vector.broadcast %cst_71 : f32 to vector<512x4xf32>
    %61 = arith.maximumf %59, %60 : vector<512x4xf32>
    %62 = vector.shape_cast %61 : vector<512x4xf32> to vector<2x16x16x4xf32>
    %c0_72 = arith.constant 0 : index
    %c1_73 = arith.constant 1 : index
    %c1_74 = arith.constant 1 : index
    %c0_75 = arith.constant 0 : index
    %63 = vector.load %arg10[%c0_72, %c1_73, %c1_74, %c0_75] : memref<2x18x18x4xf32, #tpu.memory_space<vmem>>, vector<2x16x16x4xf32>
    tpu.vector_store %arg10[%c0_72, %c1_73, %c1_74, %c0_75], %62 {strides = array<i32>} : memref<2x18x18x4xf32, #tpu.memory_space<vmem>>, vector<2x16x16x4xf32>,
    %c0_76 = arith.constant 0 : index
    %c0_77 = arith.constant 0 : index
    %c0_78 = arith.constant 0 : index
    %c0_79 = arith.constant 0 : index
    %64 = vector.load %arg10[%c0_76, %c0_77, %c0_78, %c0_79] : memref<2x18x18x4xf32, #tpu.memory_space<vmem>>, vector<2x16x16x4xf32>
    %65 = vector.shape_cast %64 : vector<2x16x16x4xf32> to vector<512x4xf32>
    %c0_80 = arith.constant 0 : index
    %c0_81 = arith.constant 0 : index
    %66 = vector.load %arg11[%c0_80, %c0_81] : memref<512x36xf32, #tpu.memory_space<vmem>>, vector<512x4xf32>
    tpu.vector_store %arg11[%c0_80, %c0_81], %65 {strides = array<i32>} : memref<512x36xf32, #tpu.memory_space<vmem>>, vector<512x4xf32>,
    %c0_82 = arith.constant 0 : index
    %c0_83 = arith.constant 0 : index
    %c1_84 = arith.constant 1 : index
    %c0_85 = arith.constant 0 : index
    %67 = vector.load %arg10[%c0_82, %c0_83, %c1_84, %c0_85] : memref<2x18x18x4xf32, #tpu.memory_space<vmem>>, vector<2x16x16x4xf32>
    %68 = vector.shape_cast %67 : vector<2x16x16x4xf32> to vector<512x4xf32>
    %c0_86 = arith.constant 0 : index
    %c4_87 = arith.constant 4 : index
    %69 = vector.load %arg11[%c0_86, %c4_87] : memref<512x36xf32, #tpu.memory_space<vmem>>, vector<512x4xf32>
    tpu.vector_store %arg11[%c0_86, %c4_87], %68 {strides = array<i32>} : memref<512x36xf32, #tpu.memory_space<vmem>>, vector<512x4xf32>,
    %c0_88 = arith.constant 0 : index
    %c0_89 = arith.constant 0 : index
    %c2_90 = arith.constant 2 : index
    %c0_91 = arith.constant 0 : index
    %70 = vector.load %arg10[%c0_88, %c0_89, %c2_90, %c0_91] : memref<2x18x18x4xf32, #tpu.memory_space<vmem>>, vector<2x16x16x4xf32>
    %71 = vector.shape_cast %70 : vector<2x16x16x4xf32> to vector<512x4xf32>
    %c0_92 = arith.constant 0 : index
    %c8_93 = arith.constant 8 : index
    %72 = vector.load %arg11[%c0_92, %c8_93] : memref<512x36xf32, #tpu.memory_space<vmem>>, vector<512x4xf32>
    tpu.vector_store %arg11[%c0_92, %c8_93], %71 {strides = array<i32>} : memref<512x36xf32, #tpu.memory_space<vmem>>, vector<512x4xf32>,
    %c0_94 = arith.constant 0 : index
    %c1_95 = arith.constant 1 : index
    %c0_96 = arith.constant 0 : index
    %c0_97 = arith.constant 0 : index
    %73 = vector.load %arg10[%c0_94, %c1_95, %c0_96, %c0_97] : memref<2x18x18x4xf32, #tpu.memory_space<vmem>>, vector<2x16x16x4xf32>
    %74 = vector.shape_cast %73 : vector<2x16x16x4xf32> to vector<512x4xf32>
    %c0_98 = arith.constant 0 : index
    %c12_99 = arith.constant 12 : index
    %75 = vector.load %arg11[%c0_98, %c12_99] : memref<512x36xf32, #tpu.memory_space<vmem>>, vector<512x4xf32>
    tpu.vector_store %arg11[%c0_98, %c12_99], %74 {strides = array<i32>} : memref<512x36xf32, #tpu.memory_space<vmem>>, vector<512x4xf32>,
    %c0_100 = arith.constant 0 : index
    %c1_101 = arith.constant 1 : index
    %c1_102 = arith.constant 1 : index
    %c0_103 = arith.constant 0 : index
    %76 = vector.load %arg10[%c0_100, %c1_101, %c1_102, %c0_103] : memref<2x18x18x4xf32, #tpu.memory_space<vmem>>, vector<2x16x16x4xf32>
    %77 = vector.shape_cast %76 : vector<2x16x16x4xf32> to vector<512x4xf32>
    %c0_104 = arith.constant 0 : index
    %c16_105 = arith.constant 16 : index
    %78 = vector.load %arg11[%c0_104, %c16_105] : memref<512x36xf32, #tpu.memory_space<vmem>>, vector<512x4xf32>
    tpu.vector_store %arg11[%c0_104, %c16_105], %77 {strides = array<i32>} : memref<512x36xf32, #tpu.memory_space<vmem>>, vector<512x4xf32>,
    %c0_106 = arith.constant 0 : index
    %c1_107 = arith.constant 1 : index
    %c2_108 = arith.constant 2 : index
    %c0_109 = arith.constant 0 : index
    %79 = vector.load %arg10[%c0_106, %c1_107, %c2_108, %c0_109] : memref<2x18x18x4xf32, #tpu.memory_space<vmem>>, vector<2x16x16x4xf32>
    %80 = vector.shape_cast %79 : vector<2x16x16x4xf32> to vector<512x4xf32>
    %c0_110 = arith.constant 0 : index
    %c20_111 = arith.constant 20 : index
    %81 = vector.load %arg11[%c0_110, %c20_111] : memref<512x36xf32, #tpu.memory_space<vmem>>, vector<512x4xf32>
    tpu.vector_store %arg11[%c0_110, %c20_111], %80 {strides = array<i32>} : memref<512x36xf32, #tpu.memory_space<vmem>>, vector<512x4xf32>,
    %c0_112 = arith.constant 0 : index
    %c2_113 = arith.constant 2 : index
    %c0_114 = arith.constant 0 : index
    %c0_115 = arith.constant 0 : index
    %82 = vector.load %arg10[%c0_112, %c2_113, %c0_114, %c0_115] : memref<2x18x18x4xf32, #tpu.memory_space<vmem>>, vector<2x16x16x4xf32>
    %83 = vector.shape_cast %82 : vector<2x16x16x4xf32> to vector<512x4xf32>
    %c0_116 = arith.constant 0 : index
    %c24_117 = arith.constant 24 : index
    %84 = vector.load %arg11[%c0_116, %c24_117] : memref<512x36xf32, #tpu.memory_space<vmem>>, vector<512x4xf32>
    tpu.vector_store %arg11[%c0_116, %c24_117], %83 {strides = array<i32>} : memref<512x36xf32, #tpu.memory_space<vmem>>, vector<512x4xf32>,
    %c0_118 = arith.constant 0 : index
    %c2_119 = arith.constant 2 : index
    %c1_120 = arith.constant 1 : index
    %c0_121 = arith.constant 0 : index
    %85 = vector.load %arg10[%c0_118, %c2_119, %c1_120, %c0_121] : memref<2x18x18x4xf32, #tpu.memory_space<vmem>>, vector<2x16x16x4xf32>
    %86 = vector.shape_cast %85 : vector<2x16x16x4xf32> to vector<512x4xf32>
    %c0_122 = arith.constant 0 : index
    %c28_123 = arith.constant 28 : index
    %87 = vector.load %arg11[%c0_122, %c28_123] : memref<512x36xf32, #tpu.memory_space<vmem>>, vector<512x4xf32>
    tpu.vector_store %arg11[%c0_122, %c28_123], %86 {strides = array<i32>} : memref<512x36xf32, #tpu.memory_space<vmem>>, vector<512x4xf32>,
    %c0_124 = arith.constant 0 : index
    %c2_125 = arith.constant 2 : index
    %c2_126 = arith.constant 2 : index
    %c0_127 = arith.constant 0 : index
    %88 = vector.load %arg10[%c0_124, %c2_125, %c2_126, %c0_127] : memref<2x18x18x4xf32, #tpu.memory_space<vmem>>, vector<2x16x16x4xf32>
    %89 = vector.shape_cast %88 : vector<2x16x16x4xf32> to vector<512x4xf32>
    %c0_128 = arith.constant 0 : index
    %c32_129 = arith.constant 32 : index
    %90 = vector.load %arg11[%c0_128, %c32_129] : memref<512x36xf32, #tpu.memory_space<vmem>>, vector<512x4xf32>
    tpu.vector_store %arg11[%c0_128, %c32_129], %89 {strides = array<i32>} : memref<512x36xf32, #tpu.memory_space<vmem>>, vector<512x4xf32>,
    %c0_130 = arith.constant 0 : index
    %c0_131 = arith.constant 0 : index
    %91 = vector.load %arg11[%c0_130, %c0_131] : memref<512x36xf32, #tpu.memory_space<vmem>>, vector<512x36xf32>
    %c0_132 = arith.constant 0 : index
    %c0_133 = arith.constant 0 : index
    %92 = vector.load %arg5[%c0_132, %c0_133] : memref<36x4xf32, #tpu.memory_space<vmem>>, vector<36x4xf32>
    %cst_134 = arith.constant dense<0.000000e+00> : vector<512x4xf32>
    %93 = tpu.matmul %91, %92, %cst_134 {dimension_numbers = #tpu.dot_dimension_numbers<[1], [0], [0], [1], [0, 0, 1, 1], [], []>} : vector<512x36xf32>, vector<36x4xf32>, vector<512x4xf32> -> vector<512x4xf32>
    %c0_135 = arith.constant 0 : index
    %c0_136 = arith.constant 0 : index
    %94 = vector.load %arg6[%c0_135, %c0_136] : memref<1x4xf32, #tpu.memory_space<vmem>>, vector<1x4xf32>
    %95 = vector.broadcast %94 : vector<1x4xf32> to vector<512x4xf32>
    %96 = arith.addf %93, %95 : vector<512x4xf32>
    %cst_137 = arith.constant dense<0.000000e+00> : vector<4xf32>
    %97 = vector.multi_reduction <add>, %96, %cst_137 [0] : vector<512x4xf32> to vector<4xf32>
    %98 = vector.shape_cast %97 : vector<4xf32> to vector<1x4xf32>
    %cst_138 = arith.constant 0.001953125 : f32
    %99 = vector.broadcast %cst_138 : f32 to vector<1x4xf32>
    %100 = arith.mulf %98, %99 : vector<1x4xf32>
    %101 = arith.mulf %96, %96 : vector<512x4xf32>
    %cst_139 = arith.constant dense<0.000000e+00> : vector<4xf32>
    %102 = vector.multi_reduction <add>, %101, %cst_139 [0] : vector<512x4xf32> to vector<4xf32>
    %103 = vector.shape_cast %102 : vector<4xf32> to vector<1x4xf32>
    %cst_140 = arith.constant 0.001953125 : f32
    %104 = vector.broadcast %cst_140 : f32 to vector<1x4xf32>
    %105 = arith.mulf %103, %104 : vector<1x4xf32>
    %106 = arith.mulf %100, %100 : vector<1x4xf32>
    %107 = arith.subf %105, %106 : vector<1x4xf32>
    %c0_141 = arith.constant 0 : index
    %c0_142 = arith.constant 0 : index
    %108 = vector.load %arg7[%c0_141, %c0_142] : memref<1x4xf32, #tpu.memory_space<vmem>>, vector<1x4xf32>
    %cst_143 = arith.constant 9.99999974E-6 : f32
    %109 = vector.broadcast %cst_143 : f32 to vector<1x4xf32>
    %110 = arith.addf %107, %109 : vector<1x4xf32>
    %111 = math.rsqrt %110 : vector<1x4xf32>
    %112 = arith.mulf %108, %111 : vector<1x4xf32>
    %c0_144 = arith.constant 0 : index
    %c0_145 = arith.constant 0 : index
    %113 = vector.load %arg8[%c0_144, %c0_145] : memref<1x4xf32, #tpu.memory_space<vmem>>, vector<1x4xf32>
    %114 = arith.mulf %100, %112 : vector<1x4xf32>
    %115 = arith.subf %113, %114 : vector<1x4xf32>
    %116 = vector.broadcast %112 : vector<1x4xf32> to vector<512x4xf32>
    %117 = arith.mulf %96, %116 : vector<512x4xf32>
    %118 = vector.broadcast %115 : vector<1x4xf32> to vector<512x4xf32>
    %119 = arith.addf %117, %118 : vector<512x4xf32>
    %120 = vector.shape_cast %0 : vector<2x16x16x4xf32> to vector<512x4xf32>
    %121 = arith.addf %119, %120 : vector<512x4xf32>
    %cst_146 = arith.constant 0.000000e+00 : f32
    %122 = vector.broadcast %cst_146 : f32 to vector<512x4xf32>
    %123 = arith.maximumf %121, %122 : vector<512x4xf32>
    %124 = vector.shape_cast %123 : vector<512x4xf32> to vector<2x16x16x4xf32>
    %c0_147 = arith.constant 0 : index
    %c0_148 = arith.constant 0 : index
    %c0_149 = arith.constant 0 : index
    %c0_150 = arith.constant 0 : index
    %125 = vector.load %arg9[%c0_147, %c0_148, %c0_149, %c0_150] : memref<2x16x16x4xf32, #tpu.memory_space<vmem>>, vector<2x16x16x4xf32>
    tpu.vector_store %arg9[%c0_147, %c0_148, %c0_149, %c0_150], %124 {strides = array<i32>} : memref<2x16x16x4xf32, #tpu.memory_space<vmem>>, vector<2x16x16x4xf32>,
    return
  }
}

</mosaic_0001>

<bundles_post_ra>
// kernel: tpu_custom_call.1
= control target key start
LH: loop header
LB: loop body
LE: loop exit
PB: predicated region body
PF: predicated region fallthrough
CT: control target
= control target key end

     0   :  { %vm96_vm0 = vcmask 31744   ;;  %vm99_vm1 = vcmask 25600   ;;  %v9791_v0 = vmov 0.0   ;;  %s9792_s11 = smov 4   ;;  %vm719_vm2 = vcmask 64544   ;;  %s9793_s28 = smov 8   ;;  %s16431_s0 = inlined_call_operand.vmem [shape: f32[2,16,16,4], index: 0, kind: input, shape index: {}]   ;;  %s16432_s1 = inlined_call_operand.vmem [shape: f32[36,4], index: 1, kind: input, shape index: {}]   ;;  %s16433_s2 = inlined_call_operand.vmem [shape: f32[1,4], index: 2, kind: input, shape index: {}]   ;;  %s16434_s3 = inlined_call_operand.vmem [shape: f32[1,4], index: 3, kind: input, shape index: {}]   ;;  %s16435_s4 = inlined_call_operand.vmem [shape: f32[1,4], index: 4, kind: input, shape index: {}]   ;;  %s16436_s5 = inlined_call_operand.vmem [shape: f32[36,4], index: 5, kind: input, shape index: {}]   ;;  %s16437_s6 = inlined_call_operand.vmem [shape: f32[1,4], index: 6, kind: input, shape index: {}]   ;;  %s16438_s7 = inlined_call_operand.vmem [shape: f32[1,4], index: 7, kind: input, shape index: {}]   ;;  %s16439_s8 = inlined_call_operand.vmem [shape: f32[1,4], index: 8, kind: input, shape index: {}]   ;;  %s16440_s9 = inlined_call_operand.vmem [shape: f32[2,16,16,4], index: 9, kind: output, shape index: {}]  }
   0x1   :  { %97 = vst.msk [vmem:[#allocation2] sm:$0xff] %vm96_vm0, %v9791_v0  ;;  %98 = vst.msk [vmem:[#allocation2 + $0x8] sm:$0xff] %vm96_vm0, %v9791_v0  ;;  %v9997_v1 = vld [vmem:[%s16431_s0] sm:$0xff]  ;;  %v10074_v2 = vld [vmem:[%s16431_s0 + $0x8] sm:$0xff]  ;;  %vm1104_vm3 = vcmask 97344   ;;  %vm1489_vm4 = vcmask 130144  }
   0x2   :  { %101 = vst.msk [vmem:[#allocation2 + $0x18] sm:$0xff] %vm96_vm0, %v9791_v0  ;;  %102 = vst.msk [vmem:[#allocation2 + $0x20] sm:$0xff] %vm96_vm0, %v9791_v0  ;;  %v10079_v3 = vld [vmem:[%s16431_s0 + $0x10] sm:$0xff]  ;;  %v10090_v4 = vld [vmem:[%s16431_s0 + $0x18] sm:$0xff]  ;;  %s9795_s17 = smov 16   ;;  %vm1874_vm5 = vcmask 162944  }
   0x3   :  { %104 = vst.msk [vmem:[#allocation2 + $0x30] sm:$0xff] %vm96_vm0, %v9791_v0  ;;  %105 = vst.msk [vmem:[#allocation2 + $0x38] sm:$0xff] %vm96_vm0, %v9791_v0  ;;  %v10095_v5 = vld [vmem:[%s16431_s0 + $0x20] sm:$0xff]  ;;  %v10100_v6 = vld [vmem:[%s16431_s0 + $0x28] sm:$0xff]  ;;  %s9796_s18 = smov 20   ;;  %vm2259_vm6 = vcmask 195744  }
   0x4   :  { %107 = vst.msk [vmem:[#allocation2 + $0x48] sm:$0xff] %vm96_vm0, %v9791_v0  ;;  %108 = vst.msk [vmem:[#allocation2 + $0x50] sm:$0xff] %vm96_vm0, %v9791_v0  ;;  %v10111_v7 = vld [vmem:[%s16431_s0 + $0x30] sm:$0xff]  ;;  %v10116_v8 = vld [vmem:[%s16431_s0 + $0x38] sm:$0xff]  ;;  %s9797_s19 = smov 24   ;;  %vm2645_vm7 = vcmask 228544  }
   0x5   :  { %110 = vst.msk [vmem:[#allocation2 + $0x60] sm:$0xff] %vm96_vm0, %v9791_v0  ;;  %111 = vst.msk [vmem:[#allocation2 + $0x68] sm:$0xff] %vm96_vm0, %v9791_v0  ;;  %v10121_v9 = vld [vmem:[%s16431_s0 + $0x40] sm:$0xff]  ;;  %v10132_v10 = vld [vmem:[%s16431_s0 + $0x48] sm:$0xff]  ;;  %s9798_s20 = smov 28   ;;  %vm3030_vm8 = vcmask 261344  }
   0x6   :  { %113 = vst.msk [vmem:[#allocation2 + $0x78] sm:$0xff] %vm96_vm0, %v9791_v0  ;;  %114 = vst.msk [vmem:[#allocation2 + $0x80] sm:$0xff] %vm96_vm0, %v9791_v0  ;;  %v10137_v11 = vld [vmem:[%s16431_s0 + $0x50] sm:$0xff]  ;;  %v10142_v12 = vld [vmem:[%s16431_s0 + $0x58] sm:$0xff]  ;;  %vm3749_vm9 = vcmask 1043456   ;;  %vm3415_vm10 = vcmask 294144  }
   0x7   :  { %116 = vst.msk [vmem:[#allocation2 + $0x90] sm:$0xff] %vm96_vm0, %v9791_v0  ;;  %117 = vst.msk [vmem:[#allocation2 + $0x98] sm:$0xff] %vm96_vm0, %v9791_v0  ;;  %v10153_v13 = vld [vmem:[%s16431_s0 + $0x60] sm:$0xff]  ;;  %v10158_v14 = vld [vmem:[%s16431_s0 + $0x68] sm:$0xff]  ;;  %vm3556_vm11 = vcmask 293888  }
   0x8   :  { %119 = vst.msk [vmem:[#allocation2 + $0xa8] sm:$0xff] %vm96_vm0, %v9791_v0  ;;  %120 = vst.msk [vmem:[#allocation2 + $0xb0] sm:$0xff] %vm96_vm0, %v9791_v0  ;;  %v10163_v15 = vld [vmem:[%s16431_s0 + $0x70] sm:$0xff]  ;;  %v10174_v16 = vld [vmem:[%s16431_s0 + $0x78] sm:$0xff] }
   0x9   :  { %122 = vst.msk [vmem:[#allocation2 + $0xc0] sm:$0xff] %vm96_vm0, %v9791_v0  ;;  %123 = vst.msk [vmem:[#allocation2 + $0xc8] sm:$0xff] %vm96_vm0, %v9791_v0  ;;  %v10179_v17 = vld [vmem:[%s16431_s0 + $0x80] sm:$0xff]  ;;  %v10184_v18 = vld [vmem:[%s16431_s0 + $0x88] sm:$0xff] }
   0xa   :  { %125 = vst.msk [vmem:[#allocation2 + $0xd8] sm:$0xff] %vm96_vm0, %v9791_v0  ;;  %126 = vst.msk [vmem:[#allocation2 + $0xe0] sm:$0xff] %vm96_vm0, %v9791_v0  ;;  %v10195_v19 = vld [vmem:[%s16431_s0 + $0x90] sm:$0xff]  ;;  %v10200_v20 = vld [vmem:[%s16431_s0 + $0x98] sm:$0xff] }
   0xb   :  { %128 = vst.msk [vmem:[#allocation2 + $0xf0] sm:$0xff] %vm96_vm0, %v9791_v0  ;;  %129 = vst.msk [vmem:[#allocation2 + $0xf8] sm:$0xff] %vm96_vm0, %v9791_v0  ;;  %v10205_v21 = vld [vmem:[%s16431_s0 + $0xa0] sm:$0xff]  ;;  %v10216_v23 = vld [vmem:[%s16431_s0 + $0xa8] sm:$0xff] }
   0xc   :  { %131 = vst.msk [vmem:[#allocation2 + $0x108] sm:$0xff] %vm96_vm0, %v9791_v0  ;;  %132 = vst.msk [vmem:[#allocation2 + $0x110] sm:$0xff] %vm96_vm0, %v9791_v0  ;;  %v399_v22 = vld [vmem:[#allocation2 + $0x1] sm:$0xff]  ;;  %v10227_v30 = vld [vmem:[%s16431_s0 + $0xb0] sm:$0xff] }
   0xd   :  { %134 = vst.msk [vmem:[#allocation2 + $0x120] sm:$0xff] %vm96_vm0, %v9791_v0  ;;  %135 = vst.msk [vmem:[#allocation2 + $0x128] sm:$0xff] %vm96_vm0, %v9791_v0  ;;  %527 = vrot.lane.b32.xlu0 %v399_v22, %s9792_s11  ;;  %v10232_v31 = vld [vmem:[%s16431_s0 + $0xb8] sm:$0xff]  ;;  %v10242_v32 = vld [vmem:[%s16431_s0 + $0xc0] sm:$0xff] }
   0xe   :  { %137 = vst.msk [vmem:[#allocation2 + $0x138] sm:$0xff] %vm96_vm0, %v9791_v0  ;;  %138 = vst.msk [vmem:[#allocation2 + $0x140] sm:$0xff] %vm96_vm0, %v9791_v0  ;;  %v10247_v33 = vld [vmem:[%s16431_s0 + $0xc8] sm:$0xff]  ;;  %v10252_v34 = vld [vmem:[%s16431_s0 + $0xd0] sm:$0xff] }
   0xf   :  { %140 = vst.msk [vmem:[#allocation2 + $0x150] sm:$0xff] %vm96_vm0, %v9791_v0  ;;  %141 = vst.msk [vmem:[#allocation2 + $0x158] sm:$0xff] %vm96_vm0, %v9791_v0  ;;  %v10264_v35 = vld [vmem:[%s16431_s0 + $0xd8] sm:$0xff]  ;;  %v10269_v36 = vld [vmem:[%s16431_s0 + $0xe0] sm:$0xff] }
  0x10   :  { %143 = vst.msk [vmem:[#allocation2 + $0x168] sm:$0xff] %vm96_vm0, %v9791_v0  ;;  %144 = vst.msk [vmem:[#allocation2 + $0x170] sm:$0xff] %vm96_vm0, %v9791_v0  ;;  %v10274_v37 = vld [vmem:[%s16431_s0 + $0xe8] sm:$0xff]  ;;  %v10285_v39 = vld [vmem:[%s16431_s0 + $0x100] sm:$0xff] }
  0x11   :  { %146 = vst.msk [vmem:[#allocation2 + $0x180] sm:$0xff] %vm96_vm0, %v9791_v0  ;;  %147 = vst.msk [vmem:[#allocation2 + $0x188] sm:$0xff] %vm96_vm0, %v9791_v0  ;;  %v10292_v41 = vld [vmem:[%s16431_s0 + $0x108] sm:$0xff]  ;;  %v10297_v42 = vld [vmem:[%s16431_s0 + $0x110] sm:$0xff] }
  0x12   :  { %149 = vst.msk [vmem:[#allocation2 + $0x198] sm:$0xff] %vm96_vm0, %v9791_v0  ;;  %150 = vst.msk [vmem:[#allocation2 + $0x1a0] sm:$0xff] %vm96_vm0, %v9791_v0  ;;  %v10302_v43 = vld [vmem:[%s16431_s0 + $0x118] sm:$0xff]  ;;  %v10314_v45 = vld [vmem:[%s16431_s0 + $0x120] sm:$0xff] }
  0x13   :  { %152 = vst.msk [vmem:[#allocation2 + $0x1b0] sm:$0xff] %vm96_vm0, %v9791_v0  ;;  %153 = vst.msk [vmem:[#allocation2 + $0x1b8] sm:$0xff] %vm96_vm0, %v9791_v0  ;;  %v10319_v46 = vld [vmem:[%s16431_s0 + $0x128] sm:$0xff]  ;;  %v10324_v47 = vld [vmem:[%s16431_s0 + $0x130] sm:$0xff] }
  0x14   :  { %155 = vst.msk [vmem:[#allocation2 + $0x1c8] sm:$0xff] %vm96_vm0, %v9791_v0  ;;  %156 = vst.msk [vmem:[#allocation2 + $0x1d0] sm:$0xff] %vm96_vm0, %v9791_v0  ;;  %v10336_v48 = vld [vmem:[%s16431_s0 + $0x138] sm:$0xff]  ;;  %v10341_v49 = vld [vmem:[%s16431_s0 + $0x140] sm:$0xff] }
  0x15   :  { %158 = vst.msk [vmem:[#allocation2 + $0x1e0] sm:$0xff] %vm96_vm0, %v9791_v0  ;;  %159 = vst.msk [vmem:[#allocation2 + $0x1e8] sm:$0xff] %vm96_vm0, %v9791_v0  ;;  %v10346_v50 = vld [vmem:[%s16431_s0 + $0x148] sm:$0xff]  ;;  %v10357_v51 = vld [vmem:[%s16431_s0 + $0x150] sm:$0xff] }
  0x16   :  { %161 = vst.msk [vmem:[#allocation2 + $0x1f8] sm:$0xff] %vm96_vm0, %v9791_v0  ;;  %162 = vst.msk [vmem:[#allocation2 + $0x200] sm:$0xff] %vm96_vm0, %v9791_v0  ;;  %v10362_v52 = vld [vmem:[%s16431_s0 + $0x158] sm:$0xff]  ;;  %v10367_v53 = vld [vmem:[%s16431_s0 + $0x160] sm:$0xff] }
  0x17   :  { %164 = vst.msk [vmem:[#allocation2 + $0x210] sm:$0xff] %vm96_vm0, %v9791_v0  ;;  %165 = vst.msk [vmem:[#allocation2 + $0x218] sm:$0xff] %vm96_vm0, %v9791_v0  ;;  %v10378_v54 = vld [vmem:[%s16431_s0 + $0x168] sm:$0xff]  ;;  %v10387_v57 = vld [vmem:[%s16431_s0 + $0x170] sm:$0xff] }
  0x18   :  { %167 = vst.msk [vmem:[#allocation2 + $0x228] sm:$0xff] %vm96_vm0, %v9791_v0  ;;  %168 = vst.msk [vmem:[#allocation2 + $0x230] sm:$0xff] %vm96_vm0, %v9791_v0  ;;  %v10392_v58 = vld [vmem:[%s16431_s0 + $0x178] sm:$0xff]  ;;  %v10403_v62 = vld [vmem:[%s16431_s0 + $0x180] sm:$0xff] }
  0x19   :  { %170 = vst.msk [vmem:[#allocation2 + $0x240] sm:$0xff] %vm96_vm0, %v9791_v0  ;;  %171 = vst.msk [vmem:[#allocation2 + $0x248] sm:$0xff] %vm96_vm0, %v9791_v0  ;;  %v10408_v63 = vld [vmem:[%s16431_s0 + $0x188] sm:$0xff]  ;;  %v10423_v22 = vld [vmem:[%s16431_s0 + $0x198] sm:$0xff] }
  0x1a   :  { %173 = vst.msk [vmem:[#allocation2 + $0x258] sm:$0xff] %vm96_vm0, %v9791_v0  ;;  %174 = vst.msk [vmem:[#allocation2 + $0x260] sm:$0xff] %vm96_vm0, %v9791_v0 }
  0x1b   :  { %176 = vst.msk [vmem:[#allocation2 + $0x270] sm:$0xff] %vm96_vm0, %v9791_v0  ;;  %177 = vst.msk [vmem:[#allocation2 + $0x278] sm:$0xff] %vm96_vm0, %v9791_v0 }
  0x1c   :  { %179 = vst.msk [vmem:[#allocation2 + $0x288] sm:$0xff] %vm96_vm0, %v9791_v0  ;;  %180 = vst.msk [vmem:[#allocation2 + $0x290] sm:$0xff] %vm96_vm0, %v9791_v0 }
  0x1d   :  { %182 = vst.msk [vmem:[#allocation2 + $0x2a0] sm:$0xff] %vm96_vm0, %v9791_v0  ;;  %183 = vst.msk [vmem:[#allocation2 + $0x2a8] sm:$0xff] %vm96_vm0, %v9791_v0 }
  0x1e   :  { %185 = vst.msk [vmem:[#allocation2 + $0x2b8] sm:$0xff] %vm96_vm0, %v9791_v0  ;;  %186 = vst.msk [vmem:[#allocation2 + $0x2c0] sm:$0xff] %vm96_vm0, %v9791_v0 }
  0x1f   :  { %188 = vst.msk [vmem:[#allocation2 + $0x2d0] sm:$0xff] %vm96_vm0, %v9791_v0  ;;  %189 = vst.msk [vmem:[#allocation2 + $0x2d8] sm:$0xff] %vm96_vm0, %v9791_v0 }
  0x20   :  { %191 = vst.msk [vmem:[#allocation2 + $0x2e8] sm:$0xff] %vm96_vm0, %v9791_v0  ;;  %192 = vst.msk [vmem:[#allocation2 + $0x2f0] sm:$0xff] %vm96_vm0, %v9791_v0 }
  0x21   :  { %194 = vst.msk [vmem:[#allocation2 + $0x300] sm:$0xff] %vm96_vm0, %v9791_v0  ;;  %195 = vst.msk [vmem:[#allocation2 + $0x308] sm:$0xff] %vm96_vm0, %v9791_v0 }
  0x22   :  { %197 = vst.msk [vmem:[#allocation2 + $0x318] sm:$0xff] %vm96_vm0, %v9791_v0  ;;  %198 = vst.msk [vmem:[#allocation2 + $0x320] sm:$0xff] %vm96_vm0, %v9791_v0 }
  0x23   :  { %200 = vst.msk [vmem:[#allocation2 + $0x330] sm:$0xff] %vm96_vm0, %v9791_v0  ;;  %201 = vst.msk [vmem:[#allocation2 + $0x338] sm:$0xff] %vm96_vm0, %v9791_v0 }
  0x24   :  { %203 = vst.msk [vmem:[#allocation2 + $0x348] sm:$0xff] %vm96_vm0, %v9791_v0  ;;  %204 = vst.msk [vmem:[#allocation2 + $0x350] sm:$0xff] %vm96_vm0, %v9791_v0 }
  0x25   :  { %16567 = vst [vmem:[#allocation4_spill] sm:$0xff] %v9997_v1  ;;  %100 = vst.msk [vmem:[#allocation2 + $0x10] sm:$0x3] %vm99_vm1, %v9791_v0 }
  0x26   :  { %103 = vst.msk [vmem:[#allocation2 + $0x28] sm:$0x3] %vm99_vm1, %v9791_v0  ;;  %106 = vst.msk [vmem:[#allocation2 + $0x40] sm:$0x3] %vm99_vm1, %v9791_v0 }
  0x27   :  { %109 = vst.msk [vmem:[#allocation2 + $0x58] sm:$0x3] %vm99_vm1, %v9791_v0  ;;  %112 = vst.msk [vmem:[#allocation2 + $0x70] sm:$0x3] %vm99_vm1, %v9791_v0 }
  0x28   :  { %115 = vst.msk [vmem:[#allocation2 + $0x88] sm:$0x3] %vm99_vm1, %v9791_v0  ;;  %118 = vst.msk [vmem:[#allocation2 + $0xa0] sm:$0x3] %vm99_vm1, %v9791_v0 }
  0x29   :  { %121 = vst.msk [vmem:[#allocation2 + $0xb8] sm:$0x3] %vm99_vm1, %v9791_v0  ;;  %124 = vst.msk [vmem:[#allocation2 + $0xd0] sm:$0x3] %vm99_vm1, %v9791_v0 }
  0x2a   :  { %127 = vst.msk [vmem:[#allocation2 + $0xe8] sm:$0x3] %vm99_vm1, %v9791_v0  ;;  %130 = vst.msk [vmem:[#allocation2 + $0x100] sm:$0x3] %vm99_vm1, %v9791_v0 }
  0x2b   :  { %133 = vst.msk [vmem:[#allocation2 + $0x118] sm:$0x3] %vm99_vm1, %v9791_v0  ;;  %136 = vst.msk [vmem:[#allocation2 + $0x130] sm:$0x3] %vm99_vm1, %v9791_v0 }
  0x2c   :  { %139 = vst.msk [vmem:[#allocation2 + $0x148] sm:$0x3] %vm99_vm1, %v9791_v0  ;;  %142 = vst.msk [vmem:[#allocation2 + $0x160] sm:$0x3] %vm99_vm1, %v9791_v0  ;;  %v400_v25 = vld [vmem:[#allocation2 + $0x9] sm:$0xff] }
  0x2d   :  { %145 = vst.msk [vmem:[#allocation2 + $0x178] sm:$0x3] %vm99_vm1, %v9791_v0  ;;  %148 = vst.msk [vmem:[#allocation2 + $0x190] sm:$0x3] %vm99_vm1, %v9791_v0  ;;  %529 = vrot.lane.b32.xlu0 %v400_v25, %s9792_s11  ;;  %v10440_v25 = vld [vmem:[%s16431_s0 + $0x1a8] sm:$0xff] }
  0x2e   :  { %151 = vst.msk [vmem:[#allocation2 + $0x1a8] sm:$0x3] %vm99_vm1, %v9791_v0  ;;  %154 = vst.msk [vmem:[#allocation2 + $0x1c0] sm:$0x3] %vm99_vm1, %v9791_v0 }
  0x2f   :  { %157 = vst.msk [vmem:[#allocation2 + $0x1d8] sm:$0x3] %vm99_vm1, %v9791_v0  ;;  %160 = vst.msk [vmem:[#allocation2 + $0x1f0] sm:$0x3] %vm99_vm1, %v9791_v0 }
  0x30   :  { %163 = vst.msk [vmem:[#allocation2 + $0x208] sm:$0x3] %vm99_vm1, %v9791_v0  ;;  %166 = vst.msk [vmem:[#allocation2 + $0x220] sm:$0x3] %vm99_vm1, %v9791_v0 }
  0x31   :  { %169 = vst.msk [vmem:[#allocation2 + $0x238] sm:$0x3] %vm99_vm1, %v9791_v0  ;;  %172 = vst.msk [vmem:[#allocation2 + $0x250] sm:$0x3] %vm99_vm1, %v9791_v0 }
  0x32   :  { %175 = vst.msk [vmem:[#allocation2 + $0x268] sm:$0x3] %vm99_vm1, %v9791_v0  ;;  %178 = vst.msk [vmem:[#allocation2 + $0x280] sm:$0x3] %vm99_vm1, %v9791_v0 }
  0x33   :  { %181 = vst.msk [vmem:[#allocation2 + $0x298] sm:$0x3] %vm99_vm1, %v9791_v0  ;;  %184 = vst.msk [vmem:[#allocation2 + $0x2b0] sm:$0x3] %vm99_vm1, %v9791_v0 }
  0x34   :  { %187 = vst.msk [vmem:[#allocation2 + $0x2c8] sm:$0x3] %vm99_vm1, %v9791_v0  ;;  %190 = vst.msk [vmem:[#allocation2 + $0x2e0] sm:$0x3] %vm99_vm1, %v9791_v0 }
  0x35   :  { %193 = vst.msk [vmem:[#allocation2 + $0x2f8] sm:$0x3] %vm99_vm1, %v9791_v0  ;;  %196 = vst.msk [vmem:[#allocation2 + $0x310] sm:$0x3] %vm99_vm1, %v9791_v0 }
  0x36   :  { %199 = vst.msk [vmem:[#allocation2 + $0x328] sm:$0x3] %vm99_vm1, %v9791_v0  ;;  %202 = vst.msk [vmem:[#allocation2 + $0x340] sm:$0x3] %vm99_vm1, %v9791_v0 }
  0x37   :  { %205 = vst.msk [vmem:[#allocation2 + $0x358] sm:$0x3] %vm99_vm1, %v9791_v0  ;;  %16568 = vst [vmem:[#allocation5_spill] sm:$0xff] %v10074_v2  ;;  %v10418_v0 = vld [vmem:[%s16431_s0 + $0x190] sm:$0xff] }
  0x38   :  { %16569 = vst [vmem:[#allocation6_spill] sm:$0xff] %v10079_v3  ;;  %207 = vst.msk [vmem:[#allocation2 + $0x19] sm:$0xff] %vm96_vm0, %v9997_v1 }
  0x39   :  { %208 = vst.msk [vmem:[#allocation2 + $0x21] sm:$0xff] %vm96_vm0, %v10074_v2  ;;  %209 = vst.msk [vmem:[#allocation2 + $0x31] sm:$0xff] %vm96_vm0, %v10079_v3 }
  0x3a   :  { %16570 = vst [vmem:[#allocation7_spill] sm:$0xff] %v10090_v4  ;;  %16571 = vst [vmem:[#allocation8_spill] sm:$0xff] %v10095_v5 }
  0x3b   :  { %16572 = vst [vmem:[#allocation9_spill] sm:$0xff] %v10100_v6  ;;  %210 = vst.msk [vmem:[#allocation2 + $0x39] sm:$0xff] %vm96_vm0, %v10090_v4 }
  0x3c   :  { %211 = vst.msk [vmem:[#allocation2 + $0x49] sm:$0xff] %vm96_vm0, %v10095_v5  ;;  %212 = vst.msk [vmem:[#allocation2 + $0x51] sm:$0xff] %vm96_vm0, %v10100_v6 }
  0x3d   :  { %16573 = vst [vmem:[#allocation10_spill] sm:$0xff] %v10111_v7  ;;  %16574 = vst [vmem:[#allocation11_spill] sm:$0xff] %v10116_v8 }
  0x3e   :  { %16575 = vst [vmem:[#allocation12_spill] sm:$0xff] %v10121_v9  ;;  %213 = vst.msk [vmem:[#allocation2 + $0x61] sm:$0xff] %vm96_vm0, %v10111_v7 }
  0x3f   :  { %214 = vst.msk [vmem:[#allocation2 + $0x69] sm:$0xff] %vm96_vm0, %v10116_v8  ;;  %215 = vst.msk [vmem:[#allocation2 + $0x79] sm:$0xff] %vm96_vm0, %v10121_v9  ;;  %v401_v24 = vld [vmem:[#allocation2 + $0x19] sm:$0xff] }
  0x40   :  { %16576 = vst [vmem:[#allocation13_spill] sm:$0xff] %v10132_v10  ;;  %16577 = vst [vmem:[#allocation14_spill] sm:$0xff] %v10137_v11  ;;  %531 = vrot.lane.b32.xlu1 %v401_v24, %s9792_s11  ;;  %v402_v26 = vld [vmem:[#allocation2 + $0x21] sm:$0xff]  ;;  %v403_v27 = vld [vmem:[#allocation2 + $0x31] sm:$0xff] }
  0x41   :  { %16578 = vst [vmem:[#allocation15_spill] sm:$0xff] %v10142_v12  ;;  %216 = vst.msk [vmem:[#allocation2 + $0x81] sm:$0xff] %vm96_vm0, %v10132_v10  ;;  %535 = vrot.lane.b32.xlu0 %v403_v27, %s9792_s11  ;;  %v10428_v24 = vld [vmem:[%s16431_s0 + $0x1a0] sm:$0xff]  ;;  %v10450_v27 = vld [vmem:[%s16431_s0 + $0x1b8] sm:$0xff] }
  0x42   :  { %217 = vst.msk [vmem:[#allocation2 + $0x91] sm:$0xff] %vm96_vm0, %v10137_v11  ;;  %218 = vst.msk [vmem:[#allocation2 + $0x99] sm:$0xff] %vm96_vm0, %v10142_v12  ;;  %v404_v28 = vld [vmem:[#allocation2 + $0x39] sm:$0xff] }
  0x43   :  { %16579 = vst [vmem:[#allocation16_spill] sm:$0xff] %v10153_v13  ;;  %16580 = vst [vmem:[#allocation17_spill] sm:$0xff] %v10158_v14  ;;  %v405_v29 = vld [vmem:[#allocation2 + $0x49] sm:$0xff]  ;;  %v406_v38 = vld [vmem:[#allocation2 + $0x51] sm:$0xff] }
  0x44   :  { %16581 = vst [vmem:[#allocation18_spill] sm:$0xff] %v10163_v15  ;;  %219 = vst.msk [vmem:[#allocation2 + $0xa9] sm:$0xff] %vm96_vm0, %v10153_v13  ;;  %533 = vrot.lane.b32.xlu1 %v402_v26, %s9792_s11  ;;  %v10445_v26 = vld [vmem:[%s16431_s0 + $0x1b0] sm:$0xff] }
  0x45   :  { %220 = vst.msk [vmem:[#allocation2 + $0xb1] sm:$0xff] %vm96_vm0, %v10158_v14  ;;  %221 = vst.msk [vmem:[#allocation2 + $0xc1] sm:$0xff] %vm96_vm0, %v10163_v15  ;;  %v407_v40 = vld [vmem:[#allocation2 + $0x61] sm:$0xff]  ;;  %539 = vrot.lane.b32.xlu0 %v405_v29, %s9792_s11 }
  0x46   :  { %16582 = vst [vmem:[#allocation19_spill] sm:$0xff] %v10174_v16  ;;  %16583 = vst [vmem:[#allocation20_spill] sm:$0xff] %v10179_v17  ;;  %v408_v44 = vld [vmem:[#allocation2 + $0x69] sm:$0xff]  ;;  %v409_v55 = vld [vmem:[#allocation2 + $0x79] sm:$0xff] }
  0x47   :  { %16584 = vst [vmem:[#allocation21_spill] sm:$0xff] %v10184_v18  ;;  %222 = vst.msk [vmem:[#allocation2 + $0xc9] sm:$0xff] %vm96_vm0, %v10174_v16  ;;  %v271_v29 = vld [vmem:[#allocation2] sm:$0xff] }
  0x48   :  { %223 = vst.msk [vmem:[#allocation2 + $0xd9] sm:$0xff] %vm96_vm0, %v10179_v17  ;;  %224 = vst.msk [vmem:[#allocation2 + $0xe1] sm:$0xff] %vm96_vm0, %v10184_v18  ;;  %537 = vrot.lane.b32.xlu1 %v404_v28, %s9792_s11  ;;  %v410_v56 = vld [vmem:[#allocation2 + $0x81] sm:$0xff] }
  0x49   :  { %16585 = vst [vmem:[#allocation22_spill] sm:$0xff] %v10195_v19  ;;  %16586 = vst [vmem:[#allocation23_spill] sm:$0xff] %v10200_v20  ;;  %543 = vrot.lane.b32.xlu0 %v407_v40, %s9792_s11  ;;  %v411_v59 = vld [vmem:[#allocation2 + $0x91] sm:$0xff]  ;;  %v412_v60 = vld [vmem:[#allocation2 + $0x99] sm:$0xff] }
  0x4a   :  { %16587 = vst [vmem:[#allocation24_spill] sm:$0xff] %v10205_v21  ;;  %225 = vst.msk [vmem:[#allocation2 + $0xf1] sm:$0xff] %vm96_vm0, %v10195_v19  ;;  %v10459_v40 = vld [vmem:[#allocation2 + $0x18] sm:$0xff] }
  0x4b   :  { %226 = vst.msk [vmem:[#allocation2 + $0xf9] sm:$0xff] %vm96_vm0, %v10200_v20  ;;  %227 = vst.msk [vmem:[#allocation2 + $0x109] sm:$0xff] %vm96_vm0, %v10205_v21  ;;  %v413_v61 = vld [vmem:[#allocation2 + $0xa9] sm:$0xff] }
  0x4c   :  { %16588 = vst [vmem:[#allocation25_spill] sm:$0xff] %v10216_v23  ;;  %228 = vst.msk [vmem:[#allocation2 + $0x111] sm:$0xff] %vm96_vm0, %v10216_v23  ;;  %541 = vrot.lane.b32.xlu1 %v406_v38, %s9792_s11  ;;  %v414_v28 = vld [vmem:[#allocation2 + $0xb1] sm:$0xff]  ;;  %v415_v38 = vld [vmem:[#allocation2 + $0xc1] sm:$0xff] }
  0x4d   :  { %16589 = vst [vmem:[#allocation26_spill] sm:$0xff] %v10227_v30  ;;  %16590 = vst [vmem:[#allocation27_spill] sm:$0xff] %v10232_v31  ;;  %547 = vrot.lane.b32.xlu0 %v409_v55, %s9792_s11  ;;  %v10469_v55 = vld [vmem:[%s16431_s0 + $0x1c8] sm:$0xff] }
  0x4e   :  { %229 = vst.msk [vmem:[#allocation2 + $0x121] sm:$0xff] %vm96_vm0, %v10227_v30  ;;  %230 = vst.msk [vmem:[#allocation2 + $0x129] sm:$0xff] %vm96_vm0, %v10232_v31 }
  0x4f   :  { %16591 = vst [vmem:[#allocation28_spill] sm:$0xff] %v10242_v32  ;;  %16592 = vst [vmem:[#allocation29_spill] sm:$0xff] %v10247_v33 }
  0x50   :  { %16593 = vst [vmem:[#allocation30_spill] sm:$0xff] %v10252_v34  ;;  %231 = vst.msk [vmem:[#allocation2 + $0x139] sm:$0xff] %vm96_vm0, %v10242_v32  ;;  %545 = vrot.lane.b32.xlu1 %v408_v44, %s9792_s11  ;;  %v10464_v44 = vld [vmem:[%s16431_s0 + $0x1c0] sm:$0xff] }
  0x51   :  { %232 = vst.msk [vmem:[#allocation2 + $0x141] sm:$0xff] %vm96_vm0, %v10247_v33  ;;  %233 = vst.msk [vmem:[#allocation2 + $0x151] sm:$0xff] %vm96_vm0, %v10252_v34  ;;  %551 = vrot.lane.b32.xlu0 %v411_v59, %s9792_s11  ;;  %v272_v59 = vld [vmem:[#allocation2 + $0x8] sm:$0xff]  ;;  %v431_v33 = vld [vmem:[#allocation2 + $0x1b1] sm:$0xff] }
  0x52   :  { %16594 = vst [vmem:[#allocation31_spill] sm:$0xff] %v10264_v35  ;;  %16595 = vst [vmem:[#allocation32_spill] sm:$0xff] %v10269_v36 }
  0x53   :  { %16596 = vst [vmem:[#allocation33_spill] sm:$0xff] %v10274_v37  ;;  %234 = vst.msk [vmem:[#allocation2 + $0x159] sm:$0xff] %vm96_vm0, %v10264_v35 }
  0x54   :  { %235 = vst.msk [vmem:[#allocation2 + $0x169] sm:$0xff] %vm96_vm0, %v10269_v36  ;;  %236 = vst.msk [vmem:[#allocation2 + $0x171] sm:$0xff] %vm96_vm0, %v10274_v37  ;;  %549 = vrot.lane.b32.xlu1 %v410_v56, %s9792_s11  ;;  %v416_v56 = vld [vmem:[#allocation2 + $0xc9] sm:$0xff]  ;;  %v304_v37 = vld [vmem:[#allocation2 + $0x1b8] sm:$0xff] }
  0x55   :  { %16597 = vst [vmem:[#allocation34_spill] sm:$0xff] %v10285_v39  ;;  %239 = vst.msk [vmem:[#allocation2 + $0x1c9] sm:$0xff] %vm96_vm0, %v10285_v39  ;;  %555 = vrot.lane.b32.xlu0 %v413_v61, %s9792_s11  ;;  %v10494_v61 = vld [vmem:[%s16431_s0 + $0x1d8] sm:$0xff] }
  0x56   :  { %16598 = vst [vmem:[#allocation35_spill] sm:$0xff] %v10292_v41  ;;  %16599 = vst [vmem:[#allocation36_spill] sm:$0xff] %v10297_v42 }
  0x57   :  { %16600 = vst [vmem:[#allocation37_spill] sm:$0xff] %v10302_v43  ;;  %240 = vst.msk [vmem:[#allocation2 + $0x1d1] sm:$0xff] %vm96_vm0, %v10292_v41  ;;  %v303_v41 = vld [vmem:[#allocation2 + $0x1b0] sm:$0xff] }
  0x58   :  { %241 = vst.msk [vmem:[#allocation2 + $0x1e1] sm:$0xff] %vm96_vm0, %v10297_v42  ;;  %242 = vst.msk [vmem:[#allocation2 + $0x1e9] sm:$0xff] %vm96_vm0, %v10302_v43  ;;  %553 = vrot.lane.b32.xlu1 %v412_v60, %s9792_s11  ;;  %v10478_v60 = vld [vmem:[#allocation2 + $0x20] sm:$0xff]  ;;  %v427_v39 = vld [vmem:[#allocation2 + $0x151] sm:$0xff] }
  0x59   :  { %16601 = vst [vmem:[#allocation38_spill] sm:$0xff] %v10314_v45  ;;  %16602 = vst [vmem:[#allocation39_spill] sm:$0xff] %v10319_v46  ;;  %559 = vrot.lane.b32.xlu0 %v415_v38, %s9792_s11  ;;  %v419_v38 = vld [vmem:[#allocation2 + $0xf1] sm:$0xff] }
  0x5a   :  { %16603 = vst [vmem:[#allocation40_spill] sm:$0xff] %v10324_v47  ;;  %243 = vst.msk [vmem:[#allocation2 + $0x1f9] sm:$0xff] %vm96_vm0, %v10314_v45  ;;  %v426_v45 = vld [vmem:[#allocation2 + $0x141] sm:$0xff]  ;;  %v10620_v43 = vld [vmem:[#allocation2 + $0x158] sm:$0xff] }
  0x5b   :  { %244 = vst.msk [vmem:[#allocation2 + $0x201] sm:$0xff] %vm96_vm0, %v10319_v46  ;;  %245 = vst.msk [vmem:[#allocation2 + $0x211] sm:$0xff] %vm96_vm0, %v10324_v47  ;;  %v425_v47 = vld [vmem:[#allocation2 + $0x139] sm:$0xff]  ;;  %v10628_v42 = vld [vmem:[#allocation2 + $0x170] sm:$0xff] }
  0x5c   :  { %16604 = vst [vmem:[#allocation41_spill] sm:$0xff] %v10336_v48  ;;  %16605 = vst [vmem:[#allocation42_spill] sm:$0xff] %v10341_v49  ;;  %557 = vrot.lane.b32.xlu1 %v414_v28, %s9792_s11  ;;  %v10509_v28 = vld [vmem:[%s16431_s0 + $0x1e0] sm:$0xff]  ;;  %v10638_v35 = vld [vmem:[#allocation2 + $0x1c8] sm:$0xff] }
  0x5d   :  { %16606 = vst [vmem:[#allocation43_spill] sm:$0xff] %v10346_v50  ;;  %246 = vst.msk [vmem:[#allocation2 + $0x219] sm:$0xff] %vm96_vm0, %v10336_v48  ;;  %v10609_v48 = vld [vmem:[#allocation2 + $0x138] sm:$0xff]  ;;  %v10614_v46 = vld [vmem:[#allocation2 + $0x140] sm:$0xff] }
  0x5e   :  { %247 = vst.msk [vmem:[#allocation2 + $0x229] sm:$0xff] %vm96_vm0, %v10341_v49  ;;  %248 = vst.msk [vmem:[#allocation2 + $0x231] sm:$0xff] %vm96_vm0, %v10346_v50  ;;  %v10594_v50 = vld [vmem:[#allocation2 + $0x110] sm:$0xff]  ;;  %v10602_v49 = vld [vmem:[#allocation2 + $0x128] sm:$0xff] }
  0x5f   :  { %16607 = vst [vmem:[#allocation44_spill] sm:$0xff] %v10357_v51  ;;  %16608 = vst [vmem:[#allocation45_spill] sm:$0xff] %v10362_v52  ;;  %v428_v36 = vld [vmem:[#allocation2 + $0x159] sm:$0xff]  ;;  %v10640_v34 = vld [vmem:[#allocation2 + $0x1d0] sm:$0xff] }
  0x60   :  { %16609 = vst [vmem:[#allocation46_spill] sm:$0xff] %v10367_v53  ;;  %249 = vst.msk [vmem:[#allocation2 + $0x241] sm:$0xff] %vm96_vm0, %v10357_v51  ;;  %561 = vrot.lane.b32.xlu1 %v416_v56, %s9792_s11  ;;  %v10542_v56 = vld [vmem:[#allocation2 + $0x80] sm:$0xff]  ;;  %v424_v51 = vld [vmem:[#allocation2 + $0x129] sm:$0xff] }
  0x61   :  { %250 = vst.msk [vmem:[#allocation2 + $0x249] sm:$0xff] %vm96_vm0, %v10362_v52  ;;  %251 = vst.msk [vmem:[#allocation2 + $0x259] sm:$0xff] %vm96_vm0, %v10367_v53  ;;  %v423_v53 = vld [vmem:[#allocation2 + $0x121] sm:$0xff]  ;;  %v10588_v52 = vld [vmem:[#allocation2 + $0xf8] sm:$0xff] }
  0x62   :  { %16610 = vst [vmem:[#allocation47_spill] sm:$0xff] %v10378_v54  ;;  %252 = vst.msk [vmem:[#allocation2 + $0x261] sm:$0xff] %vm96_vm0, %v10378_v54  ;;  %v10583_v54 = vld [vmem:[#allocation2 + $0xf0] sm:$0xff]  ;;  %v10662_v32 = vld [vmem:[#allocation2 + $0x200] sm:$0xff] }
  0x63   :  { %16611 = vst [vmem:[#allocation48_spill] sm:$0xff] %v10387_v57  ;;  %16612 = vst [vmem:[#allocation49_spill] sm:$0xff] %v10392_v58  ;;  %v433_v31 = vld [vmem:[#allocation2 + $0x1c9] sm:$0xff]  ;;  %v435_v23 = vld [vmem:[#allocation2 + $0x1e1] sm:$0xff] }
  0x64   :  { %253 = vst.msk [vmem:[#allocation2 + $0x271] sm:$0xff] %vm96_vm0, %v10387_v57  ;;  %254 = vst.msk [vmem:[#allocation2 + $0x279] sm:$0xff] %vm96_vm0, %v10392_v58  ;;  %v10568_v58 = vld [vmem:[#allocation2 + $0xc8] sm:$0xff]  ;;  %v10576_v57 = vld [vmem:[#allocation2 + $0xe0] sm:$0xff] }
  0x65   :  { %16613 = vst [vmem:[#allocation50_spill] sm:$0xff] %v10403_v62  ;;  %16614 = vst [vmem:[#allocation51_spill] sm:$0xff] %v10408_v63  ;;  %v10672_v30 = vld [vmem:[#allocation2 + $0x218] sm:$0xff]  ;;  %v10682_v21 = vld [vmem:[#allocation2 + $0x230] sm:$0xff] }
  0x66   :  { %255 = vst.msk [vmem:[#allocation2 + $0x289] sm:$0xff] %vm96_vm0, %v10403_v62  ;;  %256 = vst.msk [vmem:[#allocation2 + $0x291] sm:$0xff] %vm96_vm0, %v10408_v63  ;;  %v10562_v63 = vld [vmem:[#allocation2 + $0xb0] sm:$0xff]  ;;  %v437_v20 = vld [vmem:[#allocation2 + $0x1f9] sm:$0xff] }
  0x67   :  { %16615 = vst [vmem:[#allocation52_spill] sm:$0xff] %v10418_v0  ;;  %16616 = vst [vmem:[#allocation53_spill] sm:$0xff] %v10423_v22  ;;  %v422_v62 = vld [vmem:[#allocation2 + $0x111] sm:$0xff]  ;;  %v441_v16 = vld [vmem:[#allocation2 + $0x229] sm:$0xff] }
  0x68   :  { %16617 = vst [vmem:[#allocation54_spill] sm:$0xff] %v10428_v24  ;;  %257 = vst.msk [vmem:[#allocation2 + $0x2a1] sm:$0xff] %vm96_vm0, %v10418_v0  ;;  %v421_v0 = vld [vmem:[#allocation2 + $0x109] sm:$0xff]  ;;  %v439_v18 = vld [vmem:[#allocation2 + $0x211] sm:$0xff] }
  0x69   :  { %258 = vst.msk [vmem:[#allocation2 + $0x2a9] sm:$0xff] %vm96_vm0, %v10423_v22  ;;  %259 = vst.msk [vmem:[#allocation2 + $0x2b9] sm:$0xff] %vm96_vm0, %v10428_v24  ;;  %v420_v24 = vld [vmem:[#allocation2 + $0xf9] sm:$0xff]  ;;  %v10548_v22 = vld [vmem:[#allocation2 + $0x90] sm:$0xff] }
  0x6a   :  { %16618 = vst [vmem:[#allocation55_spill] sm:$0xff] %v10440_v25  ;;  %16619 = vst [vmem:[#allocation56_spill] sm:$0xff] %v10445_v26  ;;  %v10692_v19 = vld [vmem:[#allocation2 + $0x248] sm:$0xff]  ;;  %v10702_v17 = vld [vmem:[#allocation2 + $0x260] sm:$0xff] }
  0x6b   :  { %16620 = vst [vmem:[#allocation57_spill] sm:$0xff] %v10450_v27  ;;  %260 = vst.msk [vmem:[#allocation2 + $0x2c1] sm:$0xff] %vm96_vm0, %v10440_v25  ;;  %v10530_v25 = vld [vmem:[#allocation2 + $0x60] sm:$0xff]  ;;  %v10712_v15 = vld [vmem:[#allocation2 + $0x278] sm:$0xff] }
  0x6c   :  { %261 = vst.msk [vmem:[#allocation2 + $0x2d1] sm:$0xff] %vm96_vm0, %v10445_v26  ;;  %262 = vst.msk [vmem:[#allocation2 + $0x2d9] sm:$0xff] %vm96_vm0, %v10450_v27  ;;  %v417_v27 = vld [vmem:[#allocation2 + $0xd9] sm:$0xff]  ;;  %v418_v26 = vld [vmem:[#allocation2 + $0xe1] sm:$0xff] }
  0x6d   :  { %335 = vst.msk [vmem:[#allocation3] sm:$0xff] %vm96_vm0, %v271_v29  ;;  %16621 = vst [vmem:[#allocation58_spill] sm:$0xff] %v10464_v44  ;;  %v10483_v29 = vld [vmem:[%s16431_s0 + $0x1d0] sm:$0xff]  ;;  %563 = vrot.lane.b32.xlu0 %v417_v27, %s9792_s11  ;;  %565 = vrot.lane.b32.xlu1 %v418_v26, %s9792_s11  ;;  %v10550_v27 = vld [vmem:[#allocation2 + $0x98] sm:$0xff] }
  0x6e   :  { %16622 = vst [vmem:[#allocation59_spill] sm:$0xff] %v10469_v55  ;;  %337 = vst.msk [vmem:[#allocation3 + $0x10] sm:$0xff] %vm96_vm0, %v10459_v40  ;;  %v10557_v26 = vld [vmem:[#allocation2 + $0xa8] sm:$0xff]  ;;  %v10722_v13 = vld [vmem:[#allocation2 + $0x290] sm:$0xff] }
  0x6f   :  { %263 = vst.msk [vmem:[#allocation2 + $0x2e9] sm:$0xff] %vm96_vm0, %v10464_v44  ;;  %264 = vst.msk [vmem:[#allocation2 + $0x2f1] sm:$0xff] %vm96_vm0, %v10469_v55  ;;  %v10496_v55 = vld [vmem:[#allocation2 + $0x30] sm:$0xff]  ;;  %v10498_v44 = vld [vmem:[#allocation2 + $0x38] sm:$0xff] }
  0x70   :  { %16623 = vst [vmem:[#allocation60_spill] sm:$0xff] %v10483_v29  ;;  %336 = vst.msk [vmem:[#allocation3 + $0x8] sm:$0xff] %vm96_vm0, %v272_v59  ;;  %v10514_v59 = vld [vmem:[%s16431_s0 + $0x1e8] sm:$0xff]  ;;  %v445_v12 = vld [vmem:[#allocation2 + $0x259] sm:$0xff] }
  0x71   :  { %338 = vst.msk [vmem:[#allocation3 + $0x18] sm:$0xff] %vm96_vm0, %v10478_v60  ;;  %265 = vst.msk [vmem:[#allocation2 + $0x301] sm:$0xff] %vm96_vm0, %v10483_v29  ;;  %v10516_v29 = vld [vmem:[#allocation2 + $0x48] sm:$0xff]  ;;  %567 = vrot.lane.b32.xlu0 %v419_v38, %s9792_s11  ;;  %569 = vrot.lane.b32.xlu1 %v420_v24, %s9792_s11  ;;  %v10566_v38 = vld [vmem:[#allocation2 + $0xc0] sm:$0xff] }
  0x72   :  { %16624 = vst [vmem:[#allocation61_spill] sm:$0xff] %v10494_v61  ;;  %266 = vst.msk [vmem:[#allocation2 + $0x309] sm:$0xff] %vm96_vm0, %v10494_v61  ;;  %v10524_v61 = vld [vmem:[#allocation2 + $0x50] sm:$0xff]  ;;  %v10574_v24 = vld [vmem:[#allocation2 + $0xd8] sm:$0xff] }
  0x73   :  { %339 = vst.msk [vmem:[#allocation3 + $0x20] sm:$0xff] %vm96_vm0, %v10496_v55  ;;  %340 = vst.msk [vmem:[#allocation3 + $0x28] sm:$0xff] %vm96_vm0, %v10498_v44  ;;  %v443_v14 = vld [vmem:[#allocation2 + $0x241] sm:$0xff]  ;;  %v447_v10 = vld [vmem:[#allocation2 + $0x271] sm:$0xff] }
  0x74   :  { %16625 = vst [vmem:[#allocation62_spill] sm:$0xff] %v10509_v28  ;;  %16626 = vst [vmem:[#allocation63_spill] sm:$0xff] %v10514_v59  ;;  %v10732_v11 = vld [vmem:[#allocation2 + $0x2a8] sm:$0xff]  ;;  %v10742_v9 = vld [vmem:[#allocation2 + $0x2c0] sm:$0xff] }
  0x75   :  { %267 = vst.msk [vmem:[#allocation2 + $0x319] sm:$0xff] %vm96_vm0, %v10509_v28  ;;  %268 = vst.msk [vmem:[#allocation2 + $0x321] sm:$0xff] %vm96_vm0, %v10514_v59  ;;  %v10534_v59 = vld [vmem:[#allocation2 + $0x68] sm:$0xff]  ;;  %v10540_v28 = vld [vmem:[#allocation2 + $0x78] sm:$0xff]  ;;  %571 = vrot.lane.b32.xlu0 %v421_v0, %s9792_s11  ;;  %573 = vrot.lane.b32.xlu1 %v422_v62, %s9792_s11 }
  0x76   :  { %341 = vst.msk [vmem:[#allocation3 + $0x30] sm:$0xff] %vm96_vm0, %v10516_v29  ;;  %342 = vst.msk [vmem:[#allocation3 + $0x38] sm:$0xff] %vm96_vm0, %v10524_v61  ;;  %v10592_v0 = vld [vmem:[#allocation2 + $0x108] sm:$0xff]  ;;  %v10600_v62 = vld [vmem:[#allocation2 + $0x120] sm:$0xff] }
  0x77   :  { %343 = vst.msk [vmem:[#allocation3 + $0x40] sm:$0xff] %vm96_vm0, %v10530_v25  ;;  %344 = vst.msk [vmem:[#allocation3 + $0x48] sm:$0xff] %vm96_vm0, %v10534_v59  ;;  %v449_v8 = vld [vmem:[#allocation2 + $0x289] sm:$0xff]  ;;  %v10752_v7 = vld [vmem:[#allocation2 + $0x2d8] sm:$0xff] }
  0x78   :  { %345 = vst.msk [vmem:[#allocation3 + $0x50] sm:$0xff] %vm96_vm0, %v10540_v28  ;;  %346 = vst.msk [vmem:[#allocation3 + $0x58] sm:$0xff] %vm96_vm0, %v10542_v56  ;;  %v451_v6 = vld [vmem:[#allocation2 + $0x2a1] sm:$0xff]  ;;  %v10762_v5 = vld [vmem:[#allocation2 + $0x2f0] sm:$0xff] }
  0x79   :  { %347 = vst.msk [vmem:[#allocation3 + $0x60] sm:$0xff] %vm96_vm0, %v10548_v22  ;;  %348 = vst.msk [vmem:[#allocation3 + $0x68] sm:$0xff] %vm96_vm0, %v10550_v27  ;;  %575 = vrot.lane.b32.xlu0 %v423_v53, %s9792_s11  ;;  %577 = vrot.lane.b32.xlu1 %v424_v51, %s9792_s11  ;;  %v10618_v53 = vld [vmem:[#allocation2 + $0x150] sm:$0xff]  ;;  %v10626_v51 = vld [vmem:[#allocation2 + $0x168] sm:$0xff] }
  0x7a   :  { %349 = vst.msk [vmem:[#allocation3 + $0x70] sm:$0xff] %vm96_vm0, %v10557_v26  ;;  %350 = vst.msk [vmem:[#allocation3 + $0x78] sm:$0xff] %vm96_vm0, %v10562_v63  ;;  %v453_v4 = vld [vmem:[#allocation2 + $0x2b9] sm:$0xff]  ;;  %v10772_v3 = vld [vmem:[#allocation2 + $0x308] sm:$0xff] }
  0x7b   :  { %351 = vst.msk [vmem:[#allocation3 + $0x80] sm:$0xff] %vm96_vm0, %v10566_v38  ;;  %352 = vst.msk [vmem:[#allocation3 + $0x88] sm:$0xff] %vm96_vm0, %v10568_v58  ;;  %v455_v2 = vld [vmem:[#allocation2 + $0x2d1] sm:$0xff] }
  0x7c   :  { %353 = vst.msk [vmem:[#allocation3 + $0x90] sm:$0xff] %vm96_vm0, %v10574_v24  ;;  %354 = vst.msk [vmem:[#allocation3 + $0x98] sm:$0xff] %vm96_vm0, %v10576_v57  ;;  %v10782_v1 = vld [vmem:[#allocation2 + $0x320] sm:$0xff] }
  0x7d   :  { %355 = vst.msk [vmem:[#allocation3 + $0xa0] sm:$0xff] %vm96_vm0, %v10583_v54  ;;  %356 = vst.msk [vmem:[#allocation3 + $0xa8] sm:$0xff] %vm96_vm0, %v10588_v52  ;;  %579 = vrot.lane.b32.xlu0 %v425_v47, %s9792_s11  ;;  %581 = vrot.lane.b32.xlu1 %v426_v45, %s9792_s11  ;;  %v429_v45 = vld [vmem:[#allocation2 + $0x169] sm:$0xff]  ;;  %v430_v47 = vld [vmem:[#allocation2 + $0x171] sm:$0xff] }
  0x7e   :  { %357 = vst.msk [vmem:[#allocation3 + $0xb0] sm:$0xff] %vm96_vm0, %v10592_v0  ;;  %358 = vst.msk [vmem:[#allocation3 + $0xb8] sm:$0xff] %vm96_vm0, %v10594_v50 }
  0x7f   :  { %359 = vst.msk [vmem:[#allocation3 + $0xc0] sm:$0xff] %vm96_vm0, %v10600_v62  ;;  %360 = vst.msk [vmem:[#allocation3 + $0xc8] sm:$0xff] %vm96_vm0, %v10602_v49 }
  0x80   :  { %361 = vst.msk [vmem:[#allocation3 + $0xd0] sm:$0xff] %vm96_vm0, %v10609_v48  ;;  %362 = vst.msk [vmem:[#allocation3 + $0xd8] sm:$0xff] %vm96_vm0, %v10614_v46 }
  0x81   :  { %363 = vst.msk [vmem:[#allocation3 + $0xe0] sm:$0xff] %vm96_vm0, %v10618_v53  ;;  %364 = vst.msk [vmem:[#allocation3 + $0xe8] sm:$0xff] %vm96_vm0, %v10620_v43  ;;  %583 = vrot.lane.b32.xlu0 %v427_v39, %s9792_s11  ;;  %585 = vrot.lane.b32.xlu1 %v428_v36, %s9792_s11  ;;  %v10658_v39 = vld [vmem:[#allocation2 + $0x1f8] sm:$0xff] }
  0x82   :  { %365 = vst.msk [vmem:[#allocation3 + $0xf0] sm:$0xff] %vm96_vm0, %v10626_v51  ;;  %366 = vst.msk [vmem:[#allocation3 + $0xf8] sm:$0xff] %vm96_vm0, %v10628_v42  ;;  %v432_v36 = vld [vmem:[#allocation2 + $0x1b9] sm:$0xff] }
  0x83   :  { %367 = vst.msk [vmem:[#allocation3 + $0x100] sm:$0xff] %vm96_vm0, %v303_v41  ;;  %368 = vst.msk [vmem:[#allocation3 + $0x108] sm:$0xff] %vm96_vm0, %v304_v37  ;;  %v10648_v41 = vld [vmem:[#allocation2 + $0x1e0] sm:$0xff]  ;;  %v10652_v37 = vld [vmem:[#allocation2 + $0x1e8] sm:$0xff] }
  0x84   :  { %369 = vst.msk [vmem:[#allocation3 + $0x110] sm:$0xff] %vm96_vm0, %v10638_v35  ;;  %370 = vst.msk [vmem:[#allocation3 + $0x118] sm:$0xff] %vm96_vm0, %v10640_v34 }
  0x85   :  { %371 = vst.msk [vmem:[#allocation3 + $0x120] sm:$0xff] %vm96_vm0, %v10648_v41  ;;  %372 = vst.msk [vmem:[#allocation3 + $0x128] sm:$0xff] %vm96_vm0, %v10652_v37  ;;  %587 = vrot.lane.b32.xlu0 %v429_v45, %s9792_s11  ;;  %589 = vrot.lane.b32.xlu1 %v430_v47, %s9792_s11  ;;  %v10668_v45 = vld [vmem:[#allocation2 + $0x210] sm:$0xff] }
  0x86   :  { %373 = vst.msk [vmem:[#allocation3 + $0x130] sm:$0xff] %vm96_vm0, %v10658_v39  ;;  %374 = vst.msk [vmem:[#allocation3 + $0x138] sm:$0xff] %vm96_vm0, %v10662_v32  ;;  %v434_v47 = vld [vmem:[#allocation2 + $0x1d1] sm:$0xff] }
  0x87   :  { %375 = vst.msk [vmem:[#allocation3 + $0x140] sm:$0xff] %vm96_vm0, %v10668_v45  ;;  %376 = vst.msk [vmem:[#allocation3 + $0x148] sm:$0xff] %vm96_vm0, %v10672_v30 }
  0x88   :  { %378 = vst.msk [vmem:[#allocation3 + $0x158] sm:$0xff] %vm96_vm0, %v10682_v21  ;;  %380 = vst.msk [vmem:[#allocation3 + $0x168] sm:$0xff] %vm96_vm0, %v10692_v19 }
  0x89   :  { %591 = vrot.lane.b32.xlu0 %v431_v33, %s9792_s11  ;;  %593 = vrot.lane.b32.xlu1 %v432_v36, %s9792_s11  ;;  %v10678_v33 = vld [vmem:[#allocation2 + $0x228] sm:$0xff]  ;;  %382 = vst.msk [vmem:[#allocation3 + $0x178] sm:$0xff] %vm96_vm0, %v10702_v17  ;;  %384 = vst.msk [vmem:[#allocation3 + $0x188] sm:$0xff] %vm96_vm0, %v10712_v15 }
  0x8a   :  { %v436_v36 = vld [vmem:[#allocation2 + $0x1e9] sm:$0xff]  ;;  %377 = vst.msk [vmem:[#allocation3 + $0x150] sm:$0xff] %vm96_vm0, %v10678_v33  ;;  %386 = vst.msk [vmem:[#allocation3 + $0x198] sm:$0xff] %vm96_vm0, %v10722_v13 }
  0x8b   :  { %388 = vst.msk [vmem:[#allocation3 + $0x1a8] sm:$0xff] %vm96_vm0, %v10732_v11  ;;  %390 = vst.msk [vmem:[#allocation3 + $0x1b8] sm:$0xff] %vm96_vm0, %v10742_v9 }
  0x8c   :  { %392 = vst.msk [vmem:[#allocation3 + $0x1c8] sm:$0xff] %vm96_vm0, %v10752_v7  ;;  %16628 = vst [vmem:[#allocation65_spill] sm:$0xff] %v10762_v5 }
  0x8d   :  { %595 = vrot.lane.b32.xlu0 %v433_v31, %s9792_s11  ;;  %597 = vrot.lane.b32.xlu1 %v434_v47, %s9792_s11  ;;  %v10688_v31 = vld [vmem:[#allocation2 + $0x240] sm:$0xff]  ;;  %394 = vst.msk [vmem:[#allocation3 + $0x1d8] sm:$0xff] %vm96_vm0, %v10762_v5  ;;  %16630 = vst [vmem:[#allocation67_spill] sm:$0xff] %v10772_v3 }
  0x8e   :  { %v438_v47 = vld [vmem:[#allocation2 + $0x201] sm:$0xff]  ;;  %379 = vst.msk [vmem:[#allocation3 + $0x160] sm:$0xff] %vm96_vm0, %v10688_v31  ;;  %396 = vst.msk [vmem:[#allocation3 + $0x1e8] sm:$0xff] %vm96_vm0, %v10772_v3  ;;  %v528_v3 = vpop.permute.xlu0 %527 }
  0x8f   :  { %16632 = vst [vmem:[#allocation69_spill] sm:$0xff] %v10782_v1  ;;  %398 = vst.msk [vmem:[#allocation3 + $0x1f8] sm:$0xff] %vm96_vm0, %v10782_v1  ;;  %v460_v1 = vld [vmem:[#allocation2 + $0x309] sm:$0xff] }
  0x90   :  { %720 = vst.msk [vmem:[#allocation3] sm:$0xff] %vm719_vm2, %v528_v3  ;;  %v461_v3 = vld [vmem:[#allocation2 + $0x319] sm:$0xff] }
  0x91   :  { %599 = vrot.lane.b32.xlu0 %v435_v23, %s9792_s11  ;;  %601 = vrot.lane.b32.xlu1 %v436_v36, %s9792_s11  ;;  %v10698_v23 = vld [vmem:[#allocation2 + $0x258] sm:$0xff] }
  0x92   :  { %v440_v36 = vld [vmem:[#allocation2 + $0x219] sm:$0xff]  ;;  %381 = vst.msk [vmem:[#allocation3 + $0x170] sm:$0xff] %vm96_vm0, %v10698_v23 }
  0x95   :  { %603 = vrot.lane.b32.xlu0 %v437_v20, %s9792_s11  ;;  %605 = vrot.lane.b32.xlu1 %v438_v47, %s9792_s11  ;;  %v10708_v20 = vld [vmem:[#allocation2 + $0x270] sm:$0xff] }
  0x96   :  { %v442_v47 = vld [vmem:[#allocation2 + $0x231] sm:$0xff]  ;;  %383 = vst.msk [vmem:[#allocation3 + $0x180] sm:$0xff] %vm96_vm0, %v10708_v20 }
  0x99   :  { %607 = vrot.lane.b32.xlu0 %v439_v18, %s9792_s11  ;;  %609 = vrot.lane.b32.xlu1 %v440_v36, %s9792_s11  ;;  %v10718_v18 = vld [vmem:[#allocation2 + $0x288] sm:$0xff] }
  0x9a   :  { %v444_v36 = vld [vmem:[#allocation2 + $0x249] sm:$0xff]  ;;  %385 = vst.msk [vmem:[#allocation3 + $0x190] sm:$0xff] %vm96_vm0, %v10718_v18 }
  0x9d   :  { %611 = vrot.lane.b32.xlu0 %v441_v16, %s9792_s11  ;;  %613 = vrot.lane.b32.xlu1 %v442_v47, %s9792_s11  ;;  %v10728_v16 = vld [vmem:[#allocation2 + $0x2a0] sm:$0xff] }
  0x9e   :  { %v446_v47 = vld [vmem:[#allocation2 + $0x261] sm:$0xff]  ;;  %387 = vst.msk [vmem:[#allocation3 + $0x1a0] sm:$0xff] %vm96_vm0, %v10728_v16 }
  0x9f   :  { %v530_v5 = vpop.permute.xlu0 %529 }
  0xa0   :  { %721 = vst.msk [vmem:[#allocation3 + $0x8] sm:$0xff] %vm719_vm2, %v530_v5  ;;  %v784_v5 = vld [vmem:[#allocation2 + $0x2] sm:$0xff] }
  0xa1   :  { %615 = vrot.lane.b32.xlu0 %v443_v14, %s9792_s11  ;;  %617 = vrot.lane.b32.xlu1 %v444_v36, %s9792_s11  ;;  %v10738_v14 = vld [vmem:[#allocation2 + $0x2b8] sm:$0xff] }
  0xa2   :  { %v448_v36 = vld [vmem:[#allocation2 + $0x279] sm:$0xff]  ;;  %389 = vst.msk [vmem:[#allocation3 + $0x1b0] sm:$0xff] %vm96_vm0, %v10738_v14 }
  0xa5   :  { %619 = vrot.lane.b32.xlu0 %v445_v12, %s9792_s11  ;;  %621 = vrot.lane.b32.xlu1 %v446_v47, %s9792_s11  ;;  %v10748_v12 = vld [vmem:[#allocation2 + $0x2d0] sm:$0xff] }
  0xa6   :  { %v450_v47 = vld [vmem:[#allocation2 + $0x291] sm:$0xff]  ;;  %391 = vst.msk [vmem:[#allocation3 + $0x1c0] sm:$0xff] %vm96_vm0, %v10748_v12 }
  0xa9   :  { %623 = vrot.lane.b32.xlu0 %v447_v10, %s9792_s11  ;;  %625 = vrot.lane.b32.xlu1 %v448_v36, %s9792_s11  ;;  %v10758_v10 = vld [vmem:[#allocation2 + $0x2e8] sm:$0xff] }
  0xaa   :  { %16627 = vst [vmem:[#allocation64_spill] sm:$0xff] %v10758_v10  ;;  %v452_v36 = vld [vmem:[#allocation2 + $0x2a9] sm:$0xff]  ;;  %393 = vst.msk [vmem:[#allocation3 + $0x1d0] sm:$0xff] %vm96_vm0, %v10758_v10  ;;  %v462_v10 = vld [vmem:[#allocation2 + $0x321] sm:$0xff] }
  0xad   :  { %627 = vrot.lane.b32.xlu0 %v449_v8, %s9792_s11  ;;  %629 = vrot.lane.b32.xlu1 %v450_v47, %s9792_s11  ;;  %v10768_v8 = vld [vmem:[#allocation2 + $0x300] sm:$0xff] }
  0xae   :  { %16629 = vst [vmem:[#allocation66_spill] sm:$0xff] %v10768_v8  ;;  %v454_v47 = vld [vmem:[#allocation2 + $0x2c1] sm:$0xff]  ;;  %395 = vst.msk [vmem:[#allocation3 + $0x1e0] sm:$0xff] %vm96_vm0, %v10768_v8 }
  0xb1   :  { %631 = vrot.lane.b32.xlu0 %v451_v6, %s9792_s11  ;;  %633 = vrot.lane.b32.xlu1 %v452_v36, %s9792_s11  ;;  %v10778_v6 = vld [vmem:[#allocation2 + $0x318] sm:$0xff] }
  0xb2   :  { %16631 = vst [vmem:[#allocation68_spill] sm:$0xff] %v10778_v6  ;;  %v456_v36 = vld [vmem:[#allocation2 + $0x2d9] sm:$0xff]  ;;  %397 = vst.msk [vmem:[#allocation3 + $0x1f0] sm:$0xff] %vm96_vm0, %v10778_v6  ;;  %v532_v8 = vpop.permute.xlu1 %531  ;;  %v459_v6 = vld [vmem:[#allocation2 + $0x301] sm:$0xff] }
  0xb3   :  { %722 = vst.msk [vmem:[#allocation3 + $0x10] sm:$0xff] %vm719_vm2, %v532_v8 }
  0xb5   :  { %635 = vrot.lane.b32.xlu0 %v453_v4, %s9792_s11  ;;  %637 = vrot.lane.b32.xlu1 %v454_v47, %s9792_s11  ;;  %v457_v4 = vld [vmem:[#allocation2 + $0x2e9] sm:$0xff]  ;;  %v458_v47 = vld [vmem:[#allocation2 + $0x2f1] sm:$0xff] }
  0xb9   :  { %639 = vrot.lane.b32.xlu0 %v455_v2, %s9792_s11  ;;  %641 = vrot.lane.b32.xlu1 %v456_v36, %s9792_s11  ;;  %v534_v2 = vpop.permute.xlu1 %533  ;;  %v536_v36 = vpop.permute.xlu0 %535 }
  0xba   :  { %723 = vst.msk [vmem:[#allocation3 + $0x18] sm:$0xff] %vm719_vm2, %v534_v2  ;;  %724 = vst.msk [vmem:[#allocation3 + $0x20] sm:$0xff] %vm719_vm2, %v536_v36  ;;  %v787_v36 = vld [vmem:[#allocation2 + $0x22] sm:$0xff] }
  0xbd   :  { %643 = vrot.lane.b32.xlu0 %v457_v4, %s9792_s11  ;;  %645 = vrot.lane.b32.xlu1 %v458_v47, %s9792_s11  ;;  %v538_v8 = vpop.permute.xlu1 %537  ;;  %v540_v4 = vpop.permute.xlu0 %539  ;;  %v785_v47 = vld [vmem:[#allocation2 + $0xa] sm:$0xff] }
  0xbe   :  { %725 = vst.msk [vmem:[#allocation3 + $0x28] sm:$0xff] %vm719_vm2, %v538_v8  ;;  %726 = vst.msk [vmem:[#allocation3 + $0x30] sm:$0xff] %vm719_vm2, %v540_v4  ;;  %v789_v4 = vld [vmem:[#allocation2 + $0x3a] sm:$0xff] }
  0xc1   :  { %647 = vrot.lane.b32.xlu0 %v459_v6, %s9792_s11  ;;  %649 = vrot.lane.b32.xlu1 %v460_v1, %s9792_s11  ;;  %v542_v6 = vpop.permute.xlu1 %541  ;;  %v786_v1 = vld [vmem:[#allocation2 + $0x1a] sm:$0xff]  ;;  %v544_v2 = vpop.permute.xlu0 %543 }
  0xc2   :  { %727 = vst.msk [vmem:[#allocation3 + $0x38] sm:$0xff] %vm719_vm2, %v542_v6  ;;  %728 = vst.msk [vmem:[#allocation3 + $0x40] sm:$0xff] %vm719_vm2, %v544_v2  ;;  %v791_v2 = vld [vmem:[#allocation2 + $0x52] sm:$0xff] }
  0xc5   :  { %651 = vrot.lane.b32.xlu0 %v461_v3, %s9792_s11  ;;  %653 = vrot.lane.b32.xlu1 %v462_v10, %s9792_s11  ;;  %v546_v3 = vpop.permute.xlu1 %545  ;;  %v788_v10 = vld [vmem:[#allocation2 + $0x32] sm:$0xff]  ;;  %v548_v8 = vpop.permute.xlu0 %547 }
  0xc6   :  { %729 = vst.msk [vmem:[#allocation3 + $0x48] sm:$0xff] %vm719_vm2, %v546_v3  ;;  %730 = vst.msk [vmem:[#allocation3 + $0x50] sm:$0xff] %vm719_vm2, %v548_v8  ;;  %v793_v8 = vld [vmem:[#allocation2 + $0x6a] sm:$0xff] }
  0xc9   :  { %912 = vrot.lane.b32.xlu0 %v784_v5, %s9793_s28  ;;  %914 = vrot.lane.b32.xlu1 %v785_v47, %s9793_s28  ;;  %v550_v5 = vpop.permute.xlu1 %549  ;;  %v790_v47 = vld [vmem:[#allocation2 + $0x4a] sm:$0xff]  ;;  %v552_v6 = vpop.permute.xlu0 %551 }
  0xca   :  { %731 = vst.msk [vmem:[#allocation3 + $0x58] sm:$0xff] %vm719_vm2, %v550_v5  ;;  %732 = vst.msk [vmem:[#allocation3 + $0x60] sm:$0xff] %vm719_vm2, %v552_v6  ;;  %v795_v6 = vld [vmem:[#allocation2 + $0x82] sm:$0xff] }
  0xcd   :  { %916 = vrot.lane.b32.xlu0 %v786_v1, %s9793_s28  ;;  %918 = vrot.lane.b32.xlu1 %v787_v36, %s9793_s28  ;;  %v554_v1 = vpop.permute.xlu1 %553  ;;  %v792_v36 = vld [vmem:[#allocation2 + $0x62] sm:$0xff]  ;;  %v556_v3 = vpop.permute.xlu0 %555 }
  0xce   :  { %733 = vst.msk [vmem:[#allocation3 + $0x68] sm:$0xff] %vm719_vm2, %v554_v1  ;;  %734 = vst.msk [vmem:[#allocation3 + $0x70] sm:$0xff] %vm719_vm2, %v556_v3  ;;  %v797_v3 = vld [vmem:[#allocation2 + $0x9a] sm:$0xff] }
  0xd1   :  { %920 = vrot.lane.b32.xlu0 %v788_v10, %s9793_s28  ;;  %922 = vrot.lane.b32.xlu1 %v789_v4, %s9793_s28  ;;  %v558_v10 = vpop.permute.xlu1 %557  ;;  %v794_v4 = vld [vmem:[#allocation2 + $0x7a] sm:$0xff]  ;;  %v560_v5 = vpop.permute.xlu0 %559 }
  0xd2   :  { %735 = vst.msk [vmem:[#allocation3 + $0x78] sm:$0xff] %vm719_vm2, %v558_v10  ;;  %736 = vst.msk [vmem:[#allocation3 + $0x80] sm:$0xff] %vm719_vm2, %v560_v5  ;;  %v799_v5 = vld [vmem:[#allocation2 + $0xb2] sm:$0xff] }
  0xd5   :  { %924 = vrot.lane.b32.xlu0 %v790_v47, %s9793_s28  ;;  %926 = vrot.lane.b32.xlu1 %v791_v2, %s9793_s28  ;;  %v562_v47 = vpop.permute.xlu1 %561  ;;  %v796_v2 = vld [vmem:[#allocation2 + $0x92] sm:$0xff] }
  0xd6   :  { %737 = vst.msk [vmem:[#allocation3 + $0x88] sm:$0xff] %vm719_vm2, %v562_v47 }
  0xd9   :  { %928 = vrot.lane.b32.xlu0 %v792_v36, %s9793_s28  ;;  %930 = vrot.lane.b32.xlu1 %v793_v8, %s9793_s28  ;;  %v798_v8 = vld [vmem:[#allocation2 + $0xaa] sm:$0xff] }
  0xdd   :  { %932 = vrot.lane.b32.xlu0 %v794_v4, %s9793_s28  ;;  %934 = vrot.lane.b32.xlu1 %v795_v6, %s9793_s28  ;;  %v800_v6 = vld [vmem:[#allocation2 + $0xc2] sm:$0xff] }
  0xdf   :  { %v564_v1 = vpop.permute.xlu0 %563  ;;  %v566_v36 = vpop.permute.xlu1 %565 }
  0xe0   :  { %738 = vst.msk [vmem:[#allocation3 + $0x90] sm:$0xff] %vm719_vm2, %v564_v1  ;;  %739 = vst.msk [vmem:[#allocation3 + $0x98] sm:$0xff] %vm719_vm2, %v566_v36  ;;  %v801_v1 = vld [vmem:[#allocation2 + $0xca] sm:$0xff] }
  0xe1   :  { %936 = vrot.lane.b32.xlu0 %v796_v2, %s9793_s28  ;;  %938 = vrot.lane.b32.xlu1 %v797_v3, %s9793_s28  ;;  %v802_v3 = vld [vmem:[#allocation2 + $0xda] sm:$0xff] }
  0xe3   :  { %v568_v10 = vpop.permute.xlu0 %567  ;;  %v570_v4 = vpop.permute.xlu1 %569 }
  0xe4   :  { %740 = vst.msk [vmem:[#allocation3 + $0xa0] sm:$0xff] %vm719_vm2, %v568_v10  ;;  %741 = vst.msk [vmem:[#allocation3 + $0xa8] sm:$0xff] %vm719_vm2, %v570_v4  ;;  %v803_v10 = vld [vmem:[#allocation2 + $0xe2] sm:$0xff] }
  0xe5   :  { %940 = vrot.lane.b32.xlu0 %v798_v8, %s9793_s28  ;;  %942 = vrot.lane.b32.xlu1 %v799_v5, %s9793_s28  ;;  %v804_v5 = vld [vmem:[#allocation2 + $0xf2] sm:$0xff] }
  0xe7   :  { %v572_v47 = vpop.permute.xlu0 %571  ;;  %v574_v2 = vpop.permute.xlu1 %573 }
  0xe8   :  { %742 = vst.msk [vmem:[#allocation3 + $0xb0] sm:$0xff] %vm719_vm2, %v572_v47  ;;  %743 = vst.msk [vmem:[#allocation3 + $0xb8] sm:$0xff] %vm719_vm2, %v574_v2  ;;  %v805_v47 = vld [vmem:[#allocation2 + $0xfa] sm:$0xff] }
  0xe9   :  { %944 = vrot.lane.b32.xlu0 %v800_v6, %s9793_s28  ;;  %946 = vrot.lane.b32.xlu1 %v801_v1, %s9793_s28  ;;  %v806_v1 = vld [vmem:[#allocation2 + $0x10a] sm:$0xff] }
  0xeb   :  { %v576_v36 = vpop.permute.xlu0 %575  ;;  %v578_v8 = vpop.permute.xlu1 %577 }
  0xec   :  { %744 = vst.msk [vmem:[#allocation3 + $0xc0] sm:$0xff] %vm719_vm2, %v576_v36  ;;  %745 = vst.msk [vmem:[#allocation3 + $0xc8] sm:$0xff] %vm719_vm2, %v578_v8  ;;  %v807_v36 = vld [vmem:[#allocation2 + $0x112] sm:$0xff] }
  0xed   :  { %948 = vrot.lane.b32.xlu0 %v802_v3, %s9793_s28  ;;  %950 = vrot.lane.b32.xlu1 %v803_v10, %s9793_s28  ;;  %v808_v10 = vld [vmem:[#allocation2 + $0x122] sm:$0xff] }
  0xef   :  { %v580_v4 = vpop.permute.xlu0 %579  ;;  %v582_v6 = vpop.permute.xlu1 %581 }
  0xf0   :  { %746 = vst.msk [vmem:[#allocation3 + $0xd0] sm:$0xff] %vm719_vm2, %v580_v4  ;;  %747 = vst.msk [vmem:[#allocation3 + $0xd8] sm:$0xff] %vm719_vm2, %v582_v6  ;;  %v809_v4 = vld [vmem:[#allocation2 + $0x12a] sm:$0xff] }
  0xf1   :  { %952 = vrot.lane.b32.xlu0 %v804_v5, %s9793_s28  ;;  %954 = vrot.lane.b32.xlu1 %v805_v47, %s9793_s28  ;;  %v810_v47 = vld [vmem:[#allocation2 + $0x13a] sm:$0xff] }
  0xf3   :  { %v584_v2 = vpop.permute.xlu0 %583  ;;  %v586_v3 = vpop.permute.xlu1 %585 }
  0xf4   :  { %748 = vst.msk [vmem:[#allocation3 + $0xe0] sm:$0xff] %vm719_vm2, %v584_v2  ;;  %749 = vst.msk [vmem:[#allocation3 + $0xe8] sm:$0xff] %vm719_vm2, %v586_v3  ;;  %v811_v2 = vld [vmem:[#allocation2 + $0x142] sm:$0xff]  ;;  %v10865_v3 = vld [vmem:[%s16431_s0 + $0xf8] sm:$0xff] }
  0xf5   :  { %956 = vrot.lane.b32.xlu0 %v806_v1, %s9793_s28  ;;  %958 = vrot.lane.b32.xlu1 %v807_v36, %s9793_s28  ;;  %v10856_v36 = vld [vmem:[%s16431_s0 + $0xf0] sm:$0xff]  ;;  %16634 = vst [vmem:[#allocation71_spill] sm:$0xff] %v10865_v3  ;;  %238 = vst.msk [vmem:[#allocation2 + $0x189] sm:$0xff] %vm96_vm0, %v10865_v3 }
  0xf6   :  { %16633 = vst [vmem:[#allocation70_spill] sm:$0xff] %v10856_v36  ;;  %237 = vst.msk [vmem:[#allocation2 + $0x181] sm:$0xff] %vm96_vm0, %v10856_v36  ;;  %v817_v36 = vld [vmem:[#allocation2 + $0x1ba] sm:$0xff] }
  0xf7   :  { %v588_v8 = vpop.permute.xlu0 %587  ;;  %v590_v5 = vpop.permute.xlu1 %589 }
  0xf8   :  { %750 = vst.msk [vmem:[#allocation3 + $0xf0] sm:$0xff] %vm719_vm2, %v588_v8  ;;  %751 = vst.msk [vmem:[#allocation3 + $0xf8] sm:$0xff] %vm719_vm2, %v590_v5 }
  0xf9   :  { %960 = vrot.lane.b32.xlu0 %v808_v10, %s9793_s28  ;;  %962 = vrot.lane.b32.xlu1 %v809_v4, %s9793_s28  ;;  %v812_v10 = vld [vmem:[#allocation2 + $0x152] sm:$0xff]  ;;  %v813_v4 = vld [vmem:[#allocation2 + $0x15a] sm:$0xff] }
  0xfb   :  { %v592_v6 = vpop.permute.xlu0 %591  ;;  %v594_v1 = vpop.permute.xlu1 %593 }
  0xfc   :  { %752 = vst.msk [vmem:[#allocation3 + $0x100] sm:$0xff] %vm719_vm2, %v592_v6  ;;  %753 = vst.msk [vmem:[#allocation3 + $0x108] sm:$0xff] %vm719_vm2, %v594_v1  ;;  %v815_v1 = vld [vmem:[#allocation2 + $0x172] sm:$0xff] }
  0xfd   :  { %964 = vrot.lane.b32.xlu0 %v810_v47, %s9793_s28  ;;  %966 = vrot.lane.b32.xlu1 %v811_v2, %s9793_s28  ;;  %v814_v47 = vld [vmem:[#allocation2 + $0x16a] sm:$0xff] }
  0xff   :  { %v596_v8 = vpop.permute.xlu0 %595  ;;  %v598_v5 = vpop.permute.xlu1 %597 }
 0x100   :  { %754 = vst.msk [vmem:[#allocation3 + $0x110] sm:$0xff] %vm719_vm2, %v596_v8  ;;  %755 = vst.msk [vmem:[#allocation3 + $0x118] sm:$0xff] %vm719_vm2, %v598_v5  ;;  %v816_v8 = vld [vmem:[#allocation2 + $0x1b2] sm:$0xff] }
 0x101   :  { %968 = vrot.lane.b32.xlu0 %v812_v10, %s9793_s28  ;;  %970 = vrot.lane.b32.xlu1 %v813_v4, %s9793_s28  ;;  %v818_v4 = vld [vmem:[#allocation2 + $0x1ca] sm:$0xff] }
 0x103   :  { %v600_v6 = vpop.permute.xlu0 %599  ;;  %v602_v2 = vpop.permute.xlu1 %601 }
 0x104   :  { %756 = vst.msk [vmem:[#allocation3 + $0x120] sm:$0xff] %vm719_vm2, %v600_v6  ;;  %757 = vst.msk [vmem:[#allocation3 + $0x128] sm:$0xff] %vm719_vm2, %v602_v2  ;;  %v819_v6 = vld [vmem:[#allocation2 + $0x1d2] sm:$0xff]  ;;  %v821_v2 = vld [vmem:[#allocation2 + $0x1ea] sm:$0xff] }
 0x105   :  { %972 = vrot.lane.b32.xlu0 %v814_v47, %s9793_s28  ;;  %974 = vrot.lane.b32.xlu1 %v815_v1, %s9793_s28 }
 0x107   :  { %v604_v3 = vpop.permute.xlu0 %603  ;;  %v606_v10 = vpop.permute.xlu1 %605 }
 0x108   :  { %758 = vst.msk [vmem:[#allocation3 + $0x130] sm:$0xff] %vm719_vm2, %v604_v3  ;;  %759 = vst.msk [vmem:[#allocation3 + $0x138] sm:$0xff] %vm719_vm2, %v606_v10  ;;  %v820_v3 = vld [vmem:[#allocation2 + $0x1e2] sm:$0xff] }
 0x109   :  { %976 = vrot.lane.b32.xlu0 %v816_v8, %s9793_s28  ;;  %978 = vrot.lane.b32.xlu1 %v817_v36, %s9793_s28  ;;  %v822_v36 = vld [vmem:[#allocation2 + $0x1fa] sm:$0xff] }
 0x10b   :  { %v608_v5 = vpop.permute.xlu0 %607  ;;  %v610_v47 = vpop.permute.xlu1 %609 }
 0x10c   :  { %760 = vst.msk [vmem:[#allocation3 + $0x140] sm:$0xff] %vm719_vm2, %v608_v5  ;;  %761 = vst.msk [vmem:[#allocation3 + $0x148] sm:$0xff] %vm719_vm2, %v610_v47  ;;  %v823_v5 = vld [vmem:[#allocation2 + $0x202] sm:$0xff] }
 0x10d   :  { %980 = vrot.lane.b32.xlu0 %v818_v4, %s9793_s28  ;;  %982 = vrot.lane.b32.xlu1 %v819_v6, %s9793_s28  ;;  %v824_v6 = vld [vmem:[#allocation2 + $0x212] sm:$0xff] }
 0x10f   :  { %v612_v1 = vpop.permute.xlu0 %611  ;;  %v614_v8 = vpop.permute.xlu1 %613 }
 0x110   :  { %762 = vst.msk [vmem:[#allocation3 + $0x150] sm:$0xff] %vm719_vm2, %v612_v1  ;;  %763 = vst.msk [vmem:[#allocation3 + $0x158] sm:$0xff] %vm719_vm2, %v614_v8  ;;  %v825_v1 = vld [vmem:[#allocation2 + $0x21a] sm:$0xff] }
 0x111   :  { %984 = vrot.lane.b32.xlu0 %v820_v3, %s9793_s28  ;;  %986 = vrot.lane.b32.xlu1 %v821_v2, %s9793_s28  ;;  %v826_v2 = vld [vmem:[#allocation2 + $0x22a] sm:$0xff] }
 0x113   :  { %v616_v10 = vpop.permute.xlu0 %615  ;;  %v618_v4 = vpop.permute.xlu1 %617 }
 0x114   :  { %764 = vst.msk [vmem:[#allocation3 + $0x160] sm:$0xff] %vm719_vm2, %v616_v10  ;;  %765 = vst.msk [vmem:[#allocation3 + $0x168] sm:$0xff] %vm719_vm2, %v618_v4  ;;  %v827_v10 = vld [vmem:[#allocation2 + $0x232] sm:$0xff] }
 0x115   :  { %988 = vrot.lane.b32.xlu0 %v822_v36, %s9793_s28  ;;  %990 = vrot.lane.b32.xlu1 %v823_v5, %s9793_s28  ;;  %v828_v5 = vld [vmem:[#allocation2 + $0x242] sm:$0xff] }
 0x117   :  { %v620_v47 = vpop.permute.xlu0 %619  ;;  %v622_v3 = vpop.permute.xlu1 %621 }
 0x118   :  { %766 = vst.msk [vmem:[#allocation3 + $0x170] sm:$0xff] %vm719_vm2, %v620_v47  ;;  %767 = vst.msk [vmem:[#allocation3 + $0x178] sm:$0xff] %vm719_vm2, %v622_v3  ;;  %v829_v47 = vld [vmem:[#allocation2 + $0x24a] sm:$0xff] }
 0x119   :  { %992 = vrot.lane.b32.xlu0 %v824_v6, %s9793_s28  ;;  %994 = vrot.lane.b32.xlu1 %v825_v1, %s9793_s28  ;;  %v830_v1 = vld [vmem:[#allocation2 + $0x25a] sm:$0xff] }
 0x11b   :  { %v624_v8 = vpop.permute.xlu0 %623  ;;  %v626_v36 = vpop.permute.xlu1 %625 }
 0x11c   :  { %768 = vst.msk [vmem:[#allocation3 + $0x180] sm:$0xff] %vm719_vm2, %v624_v8  ;;  %769 = vst.msk [vmem:[#allocation3 + $0x188] sm:$0xff] %vm719_vm2, %v626_v36  ;;  %v831_v8 = vld [vmem:[#allocation2 + $0x262] sm:$0xff] }
 0x11d   :  { %996 = vrot.lane.b32.xlu0 %v826_v2, %s9793_s28  ;;  %998 = vrot.lane.b32.xlu1 %v827_v10, %s9793_s28  ;;  %v832_v10 = vld [vmem:[#allocation2 + $0x272] sm:$0xff] }
 0x11f   :  { %v628_v4 = vpop.permute.xlu0 %627  ;;  %v630_v6 = vpop.permute.xlu1 %629 }
 0x120   :  { %770 = vst.msk [vmem:[#allocation3 + $0x190] sm:$0xff] %vm719_vm2, %v628_v4  ;;  %771 = vst.msk [vmem:[#allocation3 + $0x198] sm:$0xff] %vm719_vm2, %v630_v6  ;;  %v833_v4 = vld [vmem:[#allocation2 + $0x27a] sm:$0xff] }
 0x121   :  { %1000 = vrot.lane.b32.xlu0 %v828_v5, %s9793_s28  ;;  %1002 = vrot.lane.b32.xlu1 %v829_v47, %s9793_s28  ;;  %v834_v47 = vld [vmem:[#allocation2 + $0x28a] sm:$0xff] }
 0x123   :  { %v632_v3 = vpop.permute.xlu0 %631  ;;  %v634_v2 = vpop.permute.xlu1 %633 }
 0x124   :  { %772 = vst.msk [vmem:[#allocation3 + $0x1a0] sm:$0xff] %vm719_vm2, %v632_v3  ;;  %773 = vst.msk [vmem:[#allocation3 + $0x1a8] sm:$0xff] %vm719_vm2, %v634_v2  ;;  %v835_v3 = vld [vmem:[#allocation2 + $0x292] sm:$0xff] }
 0x125   :  { %1004 = vrot.lane.b32.xlu0 %v830_v1, %s9793_s28  ;;  %1006 = vrot.lane.b32.xlu1 %v831_v8, %s9793_s28  ;;  %v836_v8 = vld [vmem:[#allocation2 + $0x2a2] sm:$0xff] }
 0x127   :  { %v636_v36 = vpop.permute.xlu0 %635  ;;  %v638_v5 = vpop.permute.xlu1 %637 }
 0x128   :  { %774 = vst.msk [vmem:[#allocation3 + $0x1b0] sm:$0xff] %vm719_vm2, %v636_v36  ;;  %775 = vst.msk [vmem:[#allocation3 + $0x1b8] sm:$0xff] %vm719_vm2, %v638_v5  ;;  %v837_v36 = vld [vmem:[#allocation2 + $0x2aa] sm:$0xff] }
 0x129   :  { %1008 = vrot.lane.b32.xlu0 %v832_v10, %s9793_s28  ;;  %1010 = vrot.lane.b32.xlu1 %v833_v4, %s9793_s28  ;;  %v838_v4 = vld [vmem:[#allocation2 + $0x2ba] sm:$0xff] }
 0x12b   :  { %v640_v6 = vpop.permute.xlu0 %639  ;;  %v642_v1 = vpop.permute.xlu1 %641 }
 0x12c   :  { %776 = vst.msk [vmem:[#allocation3 + $0x1c0] sm:$0xff] %vm719_vm2, %v640_v6  ;;  %777 = vst.msk [vmem:[#allocation3 + $0x1c8] sm:$0xff] %vm719_vm2, %v642_v1  ;;  %v839_v6 = vld [vmem:[#allocation2 + $0x2c2] sm:$0xff] }
 0x12d   :  { %1012 = vrot.lane.b32.xlu0 %v834_v47, %s9793_s28  ;;  %1014 = vrot.lane.b32.xlu1 %v835_v3, %s9793_s28  ;;  %v840_v3 = vld [vmem:[#allocation2 + $0x2d2] sm:$0xff] }
 0x12f   :  { %v644_v2 = vpop.permute.xlu0 %643  ;;  %v646_v10 = vpop.permute.xlu1 %645 }
 0x130   :  { %778 = vst.msk [vmem:[#allocation3 + $0x1d0] sm:$0xff] %vm719_vm2, %v644_v2  ;;  %779 = vst.msk [vmem:[#allocation3 + $0x1d8] sm:$0xff] %vm719_vm2, %v646_v10  ;;  %v841_v2 = vld [vmem:[#allocation2 + $0x2da] sm:$0xff] }
 0x131   :  { %1016 = vrot.lane.b32.xlu0 %v836_v8, %s9793_s28  ;;  %1018 = vrot.lane.b32.xlu1 %v837_v36, %s9793_s28  ;;  %v842_v36 = vld [vmem:[#allocation2 + $0x2ea] sm:$0xff] }
 0x133   :  { %v648_v5 = vpop.permute.xlu0 %647  ;;  %v650_v47 = vpop.permute.xlu1 %649 }
 0x134   :  { %780 = vst.msk [vmem:[#allocation3 + $0x1e0] sm:$0xff] %vm719_vm2, %v648_v5  ;;  %781 = vst.msk [vmem:[#allocation3 + $0x1e8] sm:$0xff] %vm719_vm2, %v650_v47  ;;  %v843_v5 = vld [vmem:[#allocation2 + $0x2f2] sm:$0xff] }
 0x135   :  { %1020 = vrot.lane.b32.xlu0 %v838_v4, %s9793_s28  ;;  %1022 = vrot.lane.b32.xlu1 %v839_v6, %s9793_s28  ;;  %v10934_v6 = vld [vmem:[%s16431_s0 + $0x1f0] sm:$0xff]  ;;  %v10943_v47 = vld [vmem:[%s16431_s0 + $0x1f8] sm:$0xff]  ;;  %s9794_s0 = smov 12  }
 0x136   :  { %16635 = vst [vmem:[#allocation72_spill] sm:$0xff] %v10934_v6  ;;  %269 = vst.msk [vmem:[#allocation2 + $0x331] sm:$0xff] %vm96_vm0, %v10934_v6 }
 0x137   :  { %v652_v1 = vpop.permute.xlu0 %651  ;;  %v654_v8 = vpop.permute.xlu1 %653  ;;  %16636 = vst [vmem:[#allocation73_spill] sm:$0xff] %v10943_v47  ;;  %270 = vst.msk [vmem:[#allocation2 + $0x339] sm:$0xff] %vm96_vm0, %v10943_v47 }
 0x138   :  { %782 = vst.msk [vmem:[#allocation3 + $0x1f0] sm:$0xff] %vm719_vm2, %v652_v1  ;;  %783 = vst.msk [vmem:[#allocation3 + $0x1f8] sm:$0xff] %vm719_vm2, %v654_v8 }
 0x139   :  { %1024 = vrot.lane.b32.xlu0 %v840_v3, %s9793_s28  ;;  %1026 = vrot.lane.b32.xlu1 %v841_v2, %s9793_s28  ;;  %v844_v3 = vld [vmem:[#allocation2 + $0x302] sm:$0xff]  ;;  %v845_v2 = vld [vmem:[#allocation2 + $0x30a] sm:$0xff] }
 0x13b   :  { %v913_v10 = vpop.permute.xlu0 %912  ;;  %v915_v4 = vpop.permute.xlu1 %914 }
 0x13c   :  { %1105 = vst.msk [vmem:[#allocation3] sm:$0xff] %vm1104_vm3, %v913_v10  ;;  %1106 = vst.msk [vmem:[#allocation3 + $0x8] sm:$0xff] %vm1104_vm3, %v915_v4  ;;  %v847_v4 = vld [vmem:[#allocation2 + $0x322] sm:$0xff] }
 0x13d   :  { %1028 = vrot.lane.b32.xlu0 %v842_v36, %s9793_s28  ;;  %1030 = vrot.lane.b32.xlu1 %v843_v5, %s9793_s28  ;;  %v846_v36 = vld [vmem:[#allocation2 + $0x31a] sm:$0xff] }
 0x13f   :  { %v917_v1 = vpop.permute.xlu0 %916  ;;  %v919_v8 = vpop.permute.xlu1 %918 }
 0x140   :  { %1107 = vst.msk [vmem:[#allocation3 + $0x10] sm:$0xff] %vm1104_vm3, %v917_v1  ;;  %1108 = vst.msk [vmem:[#allocation3 + $0x18] sm:$0xff] %vm1104_vm3, %v919_v8 }
 0x141   :  { %1032 = vrot.lane.b32.xlu0 %v844_v3, %s9793_s28  ;;  %1034 = vrot.lane.b32.xlu1 %v845_v2, %s9793_s28 }
 0x143   :  { %v921_v10 = vpop.permute.xlu0 %920  ;;  %v923_v5 = vpop.permute.xlu1 %922 }
 0x144   :  { %1109 = vst.msk [vmem:[#allocation3 + $0x20] sm:$0xff] %vm1104_vm3, %v921_v10  ;;  %1110 = vst.msk [vmem:[#allocation3 + $0x28] sm:$0xff] %vm1104_vm3, %v923_v5 }
 0x145   :  { %1036 = vrot.lane.b32.xlu0 %v846_v36, %s9793_s28  ;;  %1038 = vrot.lane.b32.xlu1 %v847_v4, %s9793_s28  ;;  %v1200_v4 = vld [vmem:[#allocation2 + $0x188] sm:$0xff] }
 0x147   :  { %v925_v1 = vpop.permute.xlu0 %924  ;;  %v927_v8 = vpop.permute.xlu1 %926 }
 0x148   :  { %1111 = vst.msk [vmem:[#allocation3 + $0x30] sm:$0xff] %vm1104_vm3, %v925_v1  ;;  %1112 = vst.msk [vmem:[#allocation3 + $0x38] sm:$0xff] %vm1104_vm3, %v927_v8 }
 0x149   :  { %1297 = vrot.lane.b32.xlu0 %v10459_v40, %s9794_s0  ;;  %1299 = vrot.lane.b32.xlu1 %v10478_v60, %s9794_s0 }
 0x14b   :  { %v929_v3 = vpop.permute.xlu0 %928  ;;  %v931_v2 = vpop.permute.xlu1 %930 }
 0x14c   :  { %1113 = vst.msk [vmem:[#allocation3 + $0x40] sm:$0xff] %vm1104_vm3, %v929_v3  ;;  %1114 = vst.msk [vmem:[#allocation3 + $0x48] sm:$0xff] %vm1104_vm3, %v931_v2  ;;  %v16640_v2 = vld [vmem:[#allocation67_spill] sm:$0xff] }
 0x14d   :  { %1301 = vrot.lane.b32.xlu0 %v10496_v55, %s9794_s0  ;;  %1303 = vrot.lane.b32.xlu1 %v10498_v44, %s9794_s0 }
 0x14f   :  { %v933_v36 = vpop.permute.xlu0 %932  ;;  %v935_v10 = vpop.permute.xlu1 %934 }
 0x150   :  { %1115 = vst.msk [vmem:[#allocation3 + $0x50] sm:$0xff] %vm1104_vm3, %v933_v36  ;;  %1116 = vst.msk [vmem:[#allocation3 + $0x58] sm:$0xff] %vm1104_vm3, %v935_v10 }
 0x151   :  { %1305 = vrot.lane.b32.xlu0 %v10516_v29, %s9794_s0  ;;  %1307 = vrot.lane.b32.xlu1 %v10524_v61, %s9794_s0 }
 0x153   :  { %v937_v40 = vpop.permute.xlu0 %936  ;;  %v939_v60 = vpop.permute.xlu1 %938 }
 0x154   :  { %1117 = vst.msk [vmem:[#allocation3 + $0x60] sm:$0xff] %vm1104_vm3, %v937_v40  ;;  %1118 = vst.msk [vmem:[#allocation3 + $0x68] sm:$0xff] %vm1104_vm3, %v939_v60  ;;  %v16641_v40 = vld [vmem:[#allocation68_spill] sm:$0xff]  ;;  %v16642_v60 = vld [vmem:[#allocation69_spill] sm:$0xff] }
 0x155   :  { %1309 = vrot.lane.b32.xlu0 %v10530_v25, %s9794_s0  ;;  %1311 = vrot.lane.b32.xlu1 %v10534_v59, %s9794_s0 }
 0x157   :  { %v941_v44 = vpop.permute.xlu0 %940  ;;  %v943_v55 = vpop.permute.xlu1 %942 }
 0x158   :  { %1119 = vst.msk [vmem:[#allocation3 + $0x70] sm:$0xff] %vm1104_vm3, %v941_v44  ;;  %1120 = vst.msk [vmem:[#allocation3 + $0x78] sm:$0xff] %vm1104_vm3, %v943_v55  ;;  %v1231_v44 = vld [vmem:[#allocation2 + $0x330] sm:$0xff] }
 0x159   :  { %1313 = vrot.lane.b32.xlu0 %v10540_v28, %s9794_s0  ;;  %1315 = vrot.lane.b32.xlu1 %v10542_v56, %s9794_s0 }
 0x15b   :  { %v945_v29 = vpop.permute.xlu0 %944  ;;  %v947_v61 = vpop.permute.xlu1 %946 }
 0x15c   :  { %1121 = vst.msk [vmem:[#allocation3 + $0x80] sm:$0xff] %vm1104_vm3, %v945_v29  ;;  %1122 = vst.msk [vmem:[#allocation3 + $0x88] sm:$0xff] %vm1104_vm3, %v947_v61  ;;  %v1232_v29 = vld [vmem:[#allocation2 + $0x338] sm:$0xff] }
 0x15d   :  { %1317 = vrot.lane.b32.xlu0 %v10548_v22, %s9794_s0  ;;  %1319 = vrot.lane.b32.xlu1 %v10550_v27, %s9794_s0 }
 0x15f   :  { %v949_v25 = vpop.permute.xlu0 %948  ;;  %v951_v59 = vpop.permute.xlu1 %950 }
 0x160   :  { %1123 = vst.msk [vmem:[#allocation3 + $0x90] sm:$0xff] %vm1104_vm3, %v949_v25  ;;  %1124 = vst.msk [vmem:[#allocation3 + $0x98] sm:$0xff] %vm1104_vm3, %v951_v59  ;;  %v1554_v25 = vld [vmem:[#allocation2 + $0x19] sm:$0xff] }
 0x161   :  { %1321 = vrot.lane.b32.xlu0 %v10557_v26, %s9794_s0  ;;  %1323 = vrot.lane.b32.xlu1 %v10562_v63, %s9794_s0 }
 0x163   :  { %v953_v28 = vpop.permute.xlu0 %952  ;;  %v955_v56 = vpop.permute.xlu1 %954 }
 0x164   :  { %1125 = vst.msk [vmem:[#allocation3 + $0xa0] sm:$0xff] %vm1104_vm3, %v953_v28  ;;  %1126 = vst.msk [vmem:[#allocation3 + $0xa8] sm:$0xff] %vm1104_vm3, %v955_v56  ;;  %v1555_v28 = vld [vmem:[#allocation2 + $0x21] sm:$0xff] }
 0x165   :  { %1325 = vrot.lane.b32.xlu0 %v10566_v38, %s9794_s0  ;;  %1327 = vrot.lane.b32.xlu1 %v10568_v58, %s9794_s0 }
 0x167   :  { %v957_v22 = vpop.permute.xlu0 %956  ;;  %v959_v27 = vpop.permute.xlu1 %958 }
 0x168   :  { %1127 = vst.msk [vmem:[#allocation3 + $0xb0] sm:$0xff] %vm1104_vm3, %v957_v22  ;;  %1128 = vst.msk [vmem:[#allocation3 + $0xb8] sm:$0xff] %vm1104_vm3, %v959_v27  ;;  %v1556_v22 = vld [vmem:[#allocation2 + $0x31] sm:$0xff] }
 0x169   :  { %1329 = vrot.lane.b32.xlu0 %v10574_v24, %s9794_s0  ;;  %1331 = vrot.lane.b32.xlu1 %v10576_v57, %s9794_s0 }
 0x16b   :  { %v961_v63 = vpop.permute.xlu0 %960  ;;  %v963_v26 = vpop.permute.xlu1 %962 }
 0x16c   :  { %1129 = vst.msk [vmem:[#allocation3 + $0xc0] sm:$0xff] %vm1104_vm3, %v961_v63  ;;  %1130 = vst.msk [vmem:[#allocation3 + $0xc8] sm:$0xff] %vm1104_vm3, %v963_v26  ;;  %v1557_v63 = vld [vmem:[#allocation2 + $0x39] sm:$0xff] }
 0x16d   :  { %1333 = vrot.lane.b32.xlu0 %v10583_v54, %s9794_s0  ;;  %1335 = vrot.lane.b32.xlu1 %v10588_v52, %s9794_s0 }
 0x16f   :  { %v965_v58 = vpop.permute.xlu0 %964  ;;  %v967_v38 = vpop.permute.xlu1 %966 }
 0x170   :  { %1131 = vst.msk [vmem:[#allocation3 + $0xd0] sm:$0xff] %vm1104_vm3, %v965_v58  ;;  %1132 = vst.msk [vmem:[#allocation3 + $0xd8] sm:$0xff] %vm1104_vm3, %v967_v38  ;;  %v1558_v58 = vld [vmem:[#allocation2 + $0x49] sm:$0xff] }
 0x171   :  { %1337 = vrot.lane.b32.xlu0 %v10592_v0, %s9794_s0  ;;  %1339 = vrot.lane.b32.xlu1 %v10594_v50, %s9794_s0 }
 0x173   :  { %v969_v57 = vpop.permute.xlu0 %968  ;;  %v971_v24 = vpop.permute.xlu1 %970 }
 0x174   :  { %1133 = vst.msk [vmem:[#allocation3 + $0xe0] sm:$0xff] %vm1104_vm3, %v969_v57  ;;  %1134 = vst.msk [vmem:[#allocation3 + $0xe8] sm:$0xff] %vm1104_vm3, %v971_v24  ;;  %v1559_v57 = vld [vmem:[#allocation2 + $0x51] sm:$0xff] }
 0x175   :  { %1341 = vrot.lane.b32.xlu0 %v10600_v62, %s9794_s0  ;;  %1343 = vrot.lane.b32.xlu1 %v10602_v49, %s9794_s0 }
 0x177   :  { %v973_v52 = vpop.permute.xlu0 %972  ;;  %v975_v54 = vpop.permute.xlu1 %974 }
 0x178   :  { %1135 = vst.msk [vmem:[#allocation3 + $0xf0] sm:$0xff] %vm1104_vm3, %v973_v52  ;;  %1136 = vst.msk [vmem:[#allocation3 + $0xf8] sm:$0xff] %vm1104_vm3, %v975_v54  ;;  %v1560_v52 = vld [vmem:[#allocation2 + $0x61] sm:$0xff] }
 0x179   :  { %1345 = vrot.lane.b32.xlu0 %v10609_v48, %s9794_s0  ;;  %1347 = vrot.lane.b32.xlu1 %v10614_v46, %s9794_s0  ;;  %v1199_v46 = vld [vmem:[#allocation2 + $0x180] sm:$0xff] }
 0x17b   :  { %v977_v50 = vpop.permute.xlu0 %976  ;;  %v979_v0 = vpop.permute.xlu1 %978 }
 0x17c   :  { %1137 = vst.msk [vmem:[#allocation3 + $0x100] sm:$0xff] %vm1104_vm3, %v977_v50  ;;  %1138 = vst.msk [vmem:[#allocation3 + $0x108] sm:$0xff] %vm1104_vm3, %v979_v0  ;;  %v1561_v50 = vld [vmem:[#allocation2 + $0x69] sm:$0xff] }
 0x17d   :  { %1349 = vrot.lane.b32.xlu0 %v10618_v53, %s9794_s0  ;;  %1351 = vrot.lane.b32.xlu1 %v10620_v43, %s9794_s0 }
 0x17f   :  { %v981_v49 = vpop.permute.xlu0 %980  ;;  %v983_v62 = vpop.permute.xlu1 %982 }
 0x180   :  { %1139 = vst.msk [vmem:[#allocation3 + $0x110] sm:$0xff] %vm1104_vm3, %v981_v49  ;;  %1140 = vst.msk [vmem:[#allocation3 + $0x118] sm:$0xff] %vm1104_vm3, %v983_v62  ;;  %v1562_v49 = vld [vmem:[#allocation2 + $0x79] sm:$0xff] }
 0x181   :  { %1353 = vrot.lane.b32.xlu0 %v10626_v51, %s9794_s0  ;;  %1355 = vrot.lane.b32.xlu1 %v10628_v42, %s9794_s0 }
 0x183   :  { %v985_v48 = vpop.permute.xlu0 %984  ;;  %v987_v53 = vpop.permute.xlu1 %986 }
 0x184   :  { %1141 = vst.msk [vmem:[#allocation3 + $0x120] sm:$0xff] %vm1104_vm3, %v985_v48  ;;  %1142 = vst.msk [vmem:[#allocation3 + $0x128] sm:$0xff] %vm1104_vm3, %v987_v53 }
 0x185   :  { %1357 = vrot.lane.b32.xlu0 %v1199_v46, %s9794_s0  ;;  %1359 = vrot.lane.b32.xlu1 %v1200_v4, %s9794_s0  ;;  %v1563_v46 = vld [vmem:[#allocation2 + $0x81] sm:$0xff]  ;;  %v1564_v4 = vld [vmem:[#allocation2 + $0x91] sm:$0xff] }
 0x187   :  { %v989_v43 = vpop.permute.xlu0 %988  ;;  %v991_v5 = vpop.permute.xlu1 %990 }
 0x188   :  { %1143 = vst.msk [vmem:[#allocation3 + $0x130] sm:$0xff] %vm1104_vm3, %v989_v43  ;;  %1144 = vst.msk [vmem:[#allocation3 + $0x138] sm:$0xff] %vm1104_vm3, %v991_v5  ;;  %v1565_v43 = vld [vmem:[#allocation2 + $0x99] sm:$0xff] }
 0x189   :  { %1361 = vrot.lane.b32.xlu0 %v10638_v35, %s9794_s0  ;;  %1363 = vrot.lane.b32.xlu1 %v10640_v34, %s9794_s0 }
 0x18b   :  { %v993_v42 = vpop.permute.xlu0 %992  ;;  %v995_v51 = vpop.permute.xlu1 %994 }
 0x18c   :  { %1145 = vst.msk [vmem:[#allocation3 + $0x140] sm:$0xff] %vm1104_vm3, %v993_v42  ;;  %1146 = vst.msk [vmem:[#allocation3 + $0x148] sm:$0xff] %vm1104_vm3, %v995_v51  ;;  %v1566_v42 = vld [vmem:[#allocation2 + $0xa9] sm:$0xff] }
 0x18d   :  { %1365 = vrot.lane.b32.xlu0 %v10648_v41, %s9794_s0  ;;  %1367 = vrot.lane.b32.xlu1 %v10652_v37, %s9794_s0 }
 0x18f   :  { %v997_v1 = vpop.permute.xlu0 %996  ;;  %v999_v8 = vpop.permute.xlu1 %998 }
 0x190   :  { %1147 = vst.msk [vmem:[#allocation3 + $0x150] sm:$0xff] %vm1104_vm3, %v997_v1  ;;  %1148 = vst.msk [vmem:[#allocation3 + $0x158] sm:$0xff] %vm1104_vm3, %v999_v8  ;;  %v1567_v1 = vld [vmem:[#allocation2 + $0xb1] sm:$0xff] }
 0x191   :  { %1369 = vrot.lane.b32.xlu0 %v10658_v39, %s9794_s0  ;;  %1371 = vrot.lane.b32.xlu1 %v10662_v32, %s9794_s0 }
 0x193   :  { %v1001_v34 = vpop.permute.xlu0 %1000  ;;  %v1003_v35 = vpop.permute.xlu1 %1002 }
 0x194   :  { %1149 = vst.msk [vmem:[#allocation3 + $0x160] sm:$0xff] %vm1104_vm3, %v1001_v34  ;;  %1150 = vst.msk [vmem:[#allocation3 + $0x168] sm:$0xff] %vm1104_vm3, %v1003_v35  ;;  %v1568_v34 = vld [vmem:[#allocation2 + $0xc1] sm:$0xff] }
 0x195   :  { %1373 = vrot.lane.b32.xlu0 %v10668_v45, %s9794_s0  ;;  %1375 = vrot.lane.b32.xlu1 %v10672_v30, %s9794_s0 }
 0x197   :  { %v1005_v41 = vpop.permute.xlu0 %1004  ;;  %v1007_v37 = vpop.permute.xlu1 %1006 }
 0x198   :  { %1151 = vst.msk [vmem:[#allocation3 + $0x170] sm:$0xff] %vm1104_vm3, %v1005_v41  ;;  %1152 = vst.msk [vmem:[#allocation3 + $0x178] sm:$0xff] %vm1104_vm3, %v1007_v37  ;;  %v1569_v41 = vld [vmem:[#allocation2 + $0xc9] sm:$0xff] }
 0x199   :  { %1377 = vrot.lane.b32.xlu0 %v10678_v33, %s9794_s0  ;;  %1379 = vrot.lane.b32.xlu1 %v10682_v21, %s9794_s0 }
 0x19b   :  { %v1009_v32 = vpop.permute.xlu0 %1008  ;;  %v1011_v39 = vpop.permute.xlu1 %1010 }
 0x19c   :  { %1153 = vst.msk [vmem:[#allocation3 + $0x180] sm:$0xff] %vm1104_vm3, %v1009_v32  ;;  %1154 = vst.msk [vmem:[#allocation3 + $0x188] sm:$0xff] %vm1104_vm3, %v1011_v39  ;;  %v1570_v32 = vld [vmem:[#allocation2 + $0xd9] sm:$0xff] }
 0x19d   :  { %1381 = vrot.lane.b32.xlu0 %v10688_v31, %s9794_s0  ;;  %1383 = vrot.lane.b32.xlu1 %v10692_v19, %s9794_s0 }
 0x19f   :  { %v1013_v30 = vpop.permute.xlu0 %1012  ;;  %v1015_v45 = vpop.permute.xlu1 %1014 }
 0x1a0   :  { %1155 = vst.msk [vmem:[#allocation3 + $0x190] sm:$0xff] %vm1104_vm3, %v1013_v30  ;;  %1156 = vst.msk [vmem:[#allocation3 + $0x198] sm:$0xff] %vm1104_vm3, %v1015_v45  ;;  %v1571_v30 = vld [vmem:[#allocation2 + $0xe1] sm:$0xff] }
 0x1a1   :  { %1385 = vrot.lane.b32.xlu0 %v10698_v23, %s9794_s0  ;;  %1387 = vrot.lane.b32.xlu1 %v10702_v17, %s9794_s0 }
 0x1a3   :  { %v1017_v21 = vpop.permute.xlu0 %1016  ;;  %v1019_v33 = vpop.permute.xlu1 %1018 }
 0x1a4   :  { %1157 = vst.msk [vmem:[#allocation3 + $0x1a0] sm:$0xff] %vm1104_vm3, %v1017_v21  ;;  %1158 = vst.msk [vmem:[#allocation3 + $0x1a8] sm:$0xff] %vm1104_vm3, %v1019_v33  ;;  %v1572_v21 = vld [vmem:[#allocation2 + $0xf1] sm:$0xff] }
 0x1a5   :  { %1389 = vrot.lane.b32.xlu0 %v10708_v20, %s9794_s0  ;;  %1391 = vrot.lane.b32.xlu1 %v10712_v15, %s9794_s0 }
 0x1a7   :  { %v1021_v19 = vpop.permute.xlu0 %1020  ;;  %v1023_v31 = vpop.permute.xlu1 %1022 }
 0x1a8   :  { %1159 = vst.msk [vmem:[#allocation3 + $0x1b0] sm:$0xff] %vm1104_vm3, %v1021_v19  ;;  %1160 = vst.msk [vmem:[#allocation3 + $0x1b8] sm:$0xff] %vm1104_vm3, %v1023_v31  ;;  %v1573_v19 = vld [vmem:[#allocation2 + $0xf9] sm:$0xff] }
 0x1a9   :  { %1393 = vrot.lane.b32.xlu0 %v10718_v18, %s9794_s0  ;;  %1395 = vrot.lane.b32.xlu1 %v10722_v13, %s9794_s0 }
 0x1ab   :  { %v1025_v17 = vpop.permute.xlu0 %1024  ;;  %v1027_v23 = vpop.permute.xlu1 %1026 }
 0x1ac   :  { %1161 = vst.msk [vmem:[#allocation3 + $0x1c0] sm:$0xff] %vm1104_vm3, %v1025_v17  ;;  %1162 = vst.msk [vmem:[#allocation3 + $0x1c8] sm:$0xff] %vm1104_vm3, %v1027_v23  ;;  %v1574_v17 = vld [vmem:[#allocation2 + $0x109] sm:$0xff] }
 0x1ad   :  { %1397 = vrot.lane.b32.xlu0 %v10728_v16, %s9794_s0  ;;  %1399 = vrot.lane.b32.xlu1 %v10732_v11, %s9794_s0 }
 0x1af   :  { %v1029_v15 = vpop.permute.xlu0 %1028  ;;  %v1031_v20 = vpop.permute.xlu1 %1030 }
 0x1b0   :  { %1163 = vst.msk [vmem:[#allocation3 + $0x1d0] sm:$0xff] %vm1104_vm3, %v1029_v15  ;;  %1164 = vst.msk [vmem:[#allocation3 + $0x1d8] sm:$0xff] %vm1104_vm3, %v1031_v20  ;;  %v1575_v15 = vld [vmem:[#allocation2 + $0x111] sm:$0xff] }
 0x1b1   :  { %1401 = vrot.lane.b32.xlu0 %v10738_v14, %s9794_s0  ;;  %1403 = vrot.lane.b32.xlu1 %v10742_v9, %s9794_s0  ;;  %v16637_v9 = vld [vmem:[#allocation64_spill] sm:$0xff]  ;;  %v16638_v14 = vld [vmem:[#allocation65_spill] sm:$0xff] }
 0x1b3   :  { %v1033_v13 = vpop.permute.xlu0 %1032  ;;  %v1035_v18 = vpop.permute.xlu1 %1034 }
 0x1b4   :  { %1165 = vst.msk [vmem:[#allocation3 + $0x1e0] sm:$0xff] %vm1104_vm3, %v1033_v13  ;;  %1166 = vst.msk [vmem:[#allocation3 + $0x1e8] sm:$0xff] %vm1104_vm3, %v1035_v18  ;;  %v1576_v13 = vld [vmem:[#allocation2 + $0x121] sm:$0xff] }
 0x1b5   :  { %1405 = vrot.lane.b32.xlu0 %v10748_v12, %s9794_s0  ;;  %1407 = vrot.lane.b32.xlu1 %v10752_v7, %s9794_s0  ;;  %v16639_v7 = vld [vmem:[#allocation66_spill] sm:$0xff] }
 0x1b7   :  { %v1037_v11 = vpop.permute.xlu0 %1036  ;;  %v1039_v16 = vpop.permute.xlu1 %1038 }
 0x1b8   :  { %1167 = vst.msk [vmem:[#allocation3 + $0x1f0] sm:$0xff] %vm1104_vm3, %v1037_v11  ;;  %1168 = vst.msk [vmem:[#allocation3 + $0x1f8] sm:$0xff] %vm1104_vm3, %v1039_v16  ;;  %v1577_v11 = vld [vmem:[#allocation2 + $0x129] sm:$0xff] }
 0x1b9   :  { %1409 = vrot.lane.b32.xlu0 %v16637_v9, %s9794_s0  ;;  %1411 = vrot.lane.b32.xlu1 %v16638_v14, %s9794_s0  ;;  %v1578_v9 = vld [vmem:[#allocation2 + $0x139] sm:$0xff] }
 0x1bb   :  { %v1298_v3 = vpop.permute.xlu0 %1297  ;;  %v1300_v12 = vpop.permute.xlu1 %1299 }
 0x1bc   :  { %1490 = vst.msk [vmem:[#allocation3] sm:$0xff] %vm1489_vm4, %v1298_v3  ;;  %1491 = vst.msk [vmem:[#allocation3 + $0x8] sm:$0xff] %vm1489_vm4, %v1300_v12  ;;  %v1579_v3 = vld [vmem:[#allocation2 + $0x141] sm:$0xff] }
 0x1bd   :  { %1413 = vrot.lane.b32.xlu0 %v16639_v7, %s9794_s0  ;;  %1415 = vrot.lane.b32.xlu1 %v16640_v2, %s9794_s0  ;;  %v1580_v7 = vld [vmem:[#allocation2 + $0x151] sm:$0xff] }
 0x1bf   :  { %v1302_v36 = vpop.permute.xlu0 %1301  ;;  %v1304_v10 = vpop.permute.xlu1 %1303 }
 0x1c0   :  { %1492 = vst.msk [vmem:[#allocation3 + $0x10] sm:$0xff] %vm1489_vm4, %v1302_v36  ;;  %1493 = vst.msk [vmem:[#allocation3 + $0x18] sm:$0xff] %vm1489_vm4, %v1304_v10  ;;  %v1581_v36 = vld [vmem:[#allocation2 + $0x159] sm:$0xff] }
 0x1c1   :  { %1417 = vrot.lane.b32.xlu0 %v16641_v40, %s9794_s0  ;;  %1419 = vrot.lane.b32.xlu1 %v16642_v60, %s9794_s0  ;;  %v1582_v40 = vld [vmem:[#allocation2 + $0x169] sm:$0xff] }
 0x1c3   :  { %v1306_v55 = vpop.permute.xlu0 %1305  ;;  %v1308_v61 = vpop.permute.xlu1 %1307 }
 0x1c4   :  { %1494 = vst.msk [vmem:[#allocation3 + $0x20] sm:$0xff] %vm1489_vm4, %v1306_v55  ;;  %1495 = vst.msk [vmem:[#allocation3 + $0x28] sm:$0xff] %vm1489_vm4, %v1308_v61 }
 0x1c5   :  { %1421 = vrot.lane.b32.xlu0 %v1231_v44, %s9794_s0  ;;  %1423 = vrot.lane.b32.xlu1 %v1232_v29, %s9794_s0  ;;  %v1583_v44 = vld [vmem:[#allocation2 + $0x171] sm:$0xff]  ;;  %v1584_v29 = vld [vmem:[#allocation2 + $0x181] sm:$0xff] }
 0x1c7   :  { %v1310_v59 = vpop.permute.xlu0 %1309  ;;  %v1312_v56 = vpop.permute.xlu1 %1311 }
 0x1c8   :  { %1496 = vst.msk [vmem:[#allocation3 + $0x30] sm:$0xff] %vm1489_vm4, %v1310_v59  ;;  %1497 = vst.msk [vmem:[#allocation3 + $0x38] sm:$0xff] %vm1489_vm4, %v1312_v56 }
 0x1c9   :  { %1682 = vrot.lane.b32.xlu0 %v1554_v25, %s9795_s17  ;;  %1684 = vrot.lane.b32.xlu1 %v1555_v28, %s9795_s17  ;;  %v1585_v25 = vld [vmem:[#allocation2 + $0x189] sm:$0xff] }
 0x1ca   :  { %v1586_v28 = vld [vmem:[#allocation2 + $0x1c9] sm:$0xff] }
 0x1cb   :  { %v1314_v27 = vpop.permute.xlu0 %1313  ;;  %v1316_v26 = vpop.permute.xlu1 %1315 }
 0x1cc   :  { %1498 = vst.msk [vmem:[#allocation3 + $0x40] sm:$0xff] %vm1489_vm4, %v1314_v27  ;;  %1499 = vst.msk [vmem:[#allocation3 + $0x48] sm:$0xff] %vm1489_vm4, %v1316_v26 }
 0x1cd   :  { %1686 = vrot.lane.b32.xlu0 %v1556_v22, %s9795_s17  ;;  %1688 = vrot.lane.b32.xlu1 %v1557_v63, %s9795_s17  ;;  %v1587_v22 = vld [vmem:[#allocation2 + $0x1d1] sm:$0xff]  ;;  %v1588_v63 = vld [vmem:[#allocation2 + $0x1e1] sm:$0xff] }
 0x1cf   :  { %v1318_v38 = vpop.permute.xlu0 %1317  ;;  %v1320_v24 = vpop.permute.xlu1 %1319 }
 0x1d0   :  { %1500 = vst.msk [vmem:[#allocation3 + $0x50] sm:$0xff] %vm1489_vm4, %v1318_v38  ;;  %1501 = vst.msk [vmem:[#allocation3 + $0x58] sm:$0xff] %vm1489_vm4, %v1320_v24 }
 0x1d1   :  { %1690 = vrot.lane.b32.xlu0 %v1558_v58, %s9795_s17  ;;  %1692 = vrot.lane.b32.xlu1 %v1559_v57, %s9795_s17  ;;  %v1589_v58 = vld [vmem:[#allocation2 + $0x1e9] sm:$0xff]  ;;  %v1590_v57 = vld [vmem:[#allocation2 + $0x1f9] sm:$0xff] }
 0x1d3   :  { %v1322_v54 = vpop.permute.xlu0 %1321  ;;  %v1324_v0 = vpop.permute.xlu1 %1323 }
 0x1d4   :  { %1502 = vst.msk [vmem:[#allocation3 + $0x60] sm:$0xff] %vm1489_vm4, %v1322_v54  ;;  %1503 = vst.msk [vmem:[#allocation3 + $0x68] sm:$0xff] %vm1489_vm4, %v1324_v0 }
 0x1d5   :  { %1694 = vrot.lane.b32.xlu0 %v1560_v52, %s9795_s17  ;;  %1696 = vrot.lane.b32.xlu1 %v1561_v50, %s9795_s17  ;;  %v1591_v52 = vld [vmem:[#allocation2 + $0x201] sm:$0xff]  ;;  %v1592_v50 = vld [vmem:[#allocation2 + $0x211] sm:$0xff] }
 0x1d7   :  { %v1326_v62 = vpop.permute.xlu0 %1325  ;;  %v1328_v48 = vpop.permute.xlu1 %1327 }
 0x1d8   :  { %1504 = vst.msk [vmem:[#allocation3 + $0x70] sm:$0xff] %vm1489_vm4, %v1326_v62  ;;  %1505 = vst.msk [vmem:[#allocation3 + $0x78] sm:$0xff] %vm1489_vm4, %v1328_v48 }
 0x1d9   :  { %1698 = vrot.lane.b32.xlu0 %v1562_v49, %s9795_s17  ;;  %1700 = vrot.lane.b32.xlu1 %v1563_v46, %s9795_s17  ;;  %v1593_v49 = vld [vmem:[#allocation2 + $0x219] sm:$0xff]  ;;  %v1594_v46 = vld [vmem:[#allocation2 + $0x229] sm:$0xff] }
 0x1db   :  { %v1330_v53 = vpop.permute.xlu0 %1329  ;;  %v1332_v5 = vpop.permute.xlu1 %1331 }
 0x1dc   :  { %1506 = vst.msk [vmem:[#allocation3 + $0x80] sm:$0xff] %vm1489_vm4, %v1330_v53  ;;  %1507 = vst.msk [vmem:[#allocation3 + $0x88] sm:$0xff] %vm1489_vm4, %v1332_v5 }
 0x1dd   :  { %1702 = vrot.lane.b32.xlu0 %v1564_v4, %s9795_s17  ;;  %1704 = vrot.lane.b32.xlu1 %v1565_v43, %s9795_s17  ;;  %v1595_v4 = vld [vmem:[#allocation2 + $0x231] sm:$0xff]  ;;  %v1596_v43 = vld [vmem:[#allocation2 + $0x241] sm:$0xff] }
 0x1df   :  { %v1334_v51 = vpop.permute.xlu0 %1333  ;;  %v1336_v8 = vpop.permute.xlu1 %1335 }
 0x1e0   :  { %1508 = vst.msk [vmem:[#allocation3 + $0x90] sm:$0xff] %vm1489_vm4, %v1334_v51  ;;  %1509 = vst.msk [vmem:[#allocation3 + $0x98] sm:$0xff] %vm1489_vm4, %v1336_v8 }
 0x1e1   :  { %1706 = vrot.lane.b32.xlu0 %v1566_v42, %s9795_s17  ;;  %1708 = vrot.lane.b32.xlu1 %v1567_v1, %s9795_s17  ;;  %v1597_v42 = vld [vmem:[#allocation2 + $0x249] sm:$0xff]  ;;  %v1598_v1 = vld [vmem:[#allocation2 + $0x259] sm:$0xff] }
 0x1e3   :  { %v1338_v35 = vpop.permute.xlu0 %1337  ;;  %v1340_v37 = vpop.permute.xlu1 %1339 }
 0x1e4   :  { %1510 = vst.msk [vmem:[#allocation3 + $0xa0] sm:$0xff] %vm1489_vm4, %v1338_v35  ;;  %1511 = vst.msk [vmem:[#allocation3 + $0xa8] sm:$0xff] %vm1489_vm4, %v1340_v37 }
 0x1e5   :  { %1710 = vrot.lane.b32.xlu0 %v1568_v34, %s9795_s17  ;;  %1712 = vrot.lane.b32.xlu1 %v1569_v41, %s9795_s17  ;;  %v1599_v34 = vld [vmem:[#allocation2 + $0x261] sm:$0xff]  ;;  %v1600_v41 = vld [vmem:[#allocation2 + $0x271] sm:$0xff] }
 0x1e7   :  { %v1342_v39 = vpop.permute.xlu0 %1341  ;;  %v1344_v45 = vpop.permute.xlu1 %1343 }
 0x1e8   :  { %1512 = vst.msk [vmem:[#allocation3 + $0xb0] sm:$0xff] %vm1489_vm4, %v1342_v39  ;;  %1513 = vst.msk [vmem:[#allocation3 + $0xb8] sm:$0xff] %vm1489_vm4, %v1344_v45 }
 0x1e9   :  { %1714 = vrot.lane.b32.xlu0 %v1570_v32, %s9795_s17  ;;  %1716 = vrot.lane.b32.xlu1 %v1571_v30, %s9795_s17  ;;  %v1601_v32 = vld [vmem:[#allocation2 + $0x279] sm:$0xff]  ;;  %v1602_v30 = vld [vmem:[#allocation2 + $0x289] sm:$0xff] }
 0x1eb   :  { %v1346_v33 = vpop.permute.xlu0 %1345  ;;  %v1348_v31 = vpop.permute.xlu1 %1347 }
 0x1ec   :  { %1514 = vst.msk [vmem:[#allocation3 + $0xc0] sm:$0xff] %vm1489_vm4, %v1346_v33  ;;  %1515 = vst.msk [vmem:[#allocation3 + $0xc8] sm:$0xff] %vm1489_vm4, %v1348_v31 }
 0x1ed   :  { %1718 = vrot.lane.b32.xlu0 %v1572_v21, %s9795_s17  ;;  %1720 = vrot.lane.b32.xlu1 %v1573_v19, %s9795_s17  ;;  %v1603_v21 = vld [vmem:[#allocation2 + $0x291] sm:$0xff]  ;;  %v1604_v19 = vld [vmem:[#allocation2 + $0x2a1] sm:$0xff] }
 0x1ef   :  { %v1350_v23 = vpop.permute.xlu0 %1349  ;;  %v1352_v20 = vpop.permute.xlu1 %1351 }
 0x1f0   :  { %1516 = vst.msk [vmem:[#allocation3 + $0xd0] sm:$0xff] %vm1489_vm4, %v1350_v23  ;;  %1517 = vst.msk [vmem:[#allocation3 + $0xd8] sm:$0xff] %vm1489_vm4, %v1352_v20 }
 0x1f1   :  { %1722 = vrot.lane.b32.xlu0 %v1574_v17, %s9795_s17  ;;  %1724 = vrot.lane.b32.xlu1 %v1575_v15, %s9795_s17  ;;  %v1605_v17 = vld [vmem:[#allocation2 + $0x2a9] sm:$0xff]  ;;  %v1606_v15 = vld [vmem:[#allocation2 + $0x2b9] sm:$0xff] }
 0x1f3   :  { %v1354_v18 = vpop.permute.xlu0 %1353  ;;  %v1356_v16 = vpop.permute.xlu1 %1355 }
 0x1f4   :  { %1518 = vst.msk [vmem:[#allocation3 + $0xe0] sm:$0xff] %vm1489_vm4, %v1354_v18  ;;  %1519 = vst.msk [vmem:[#allocation3 + $0xe8] sm:$0xff] %vm1489_vm4, %v1356_v16 }
 0x1f5   :  { %1726 = vrot.lane.b32.xlu0 %v1576_v13, %s9795_s17  ;;  %1728 = vrot.lane.b32.xlu1 %v1577_v11, %s9795_s17  ;;  %v1607_v13 = vld [vmem:[#allocation2 + $0x2c1] sm:$0xff]  ;;  %v1608_v11 = vld [vmem:[#allocation2 + $0x2d1] sm:$0xff] }
 0x1f7   :  { %v1358_v14 = vpop.permute.xlu0 %1357  ;;  %v1360_v12 = vpop.permute.xlu1 %1359 }
 0x1f8   :  { %1520 = vst.msk [vmem:[#allocation3 + $0xf0] sm:$0xff] %vm1489_vm4, %v1358_v14  ;;  %1521 = vst.msk [vmem:[#allocation3 + $0xf8] sm:$0xff] %vm1489_vm4, %v1360_v12 }
 0x1f9   :  { %1730 = vrot.lane.b32.xlu0 %v1578_v9, %s9795_s17  ;;  %1732 = vrot.lane.b32.xlu1 %v1579_v3, %s9795_s17  ;;  %v1609_v9 = vld [vmem:[#allocation2 + $0x2d9] sm:$0xff]  ;;  %v1610_v3 = vld [vmem:[#allocation2 + $0x2e9] sm:$0xff] }
 0x1fb   :  { %v1362_v2 = vpop.permute.xlu0 %1361  ;;  %v1364_v10 = vpop.permute.xlu1 %1363 }
 0x1fc   :  { %1522 = vst.msk [vmem:[#allocation3 + $0x100] sm:$0xff] %vm1489_vm4, %v1362_v2  ;;  %1523 = vst.msk [vmem:[#allocation3 + $0x108] sm:$0xff] %vm1489_vm4, %v1364_v10 }
 0x1fd   :  { %1734 = vrot.lane.b32.xlu0 %v1580_v7, %s9795_s17  ;;  %1736 = vrot.lane.b32.xlu1 %v1581_v36, %s9795_s17  ;;  %v1611_v7 = vld [vmem:[#allocation2 + $0x2f1] sm:$0xff]  ;;  %v1612_v36 = vld [vmem:[#allocation2 + $0x301] sm:$0xff] }
 0x1ff   :  { %v1366_v60 = vpop.permute.xlu0 %1365  ;;  %v1368_v55 = vpop.permute.xlu1 %1367 }
 0x200   :  { %1524 = vst.msk [vmem:[#allocation3 + $0x110] sm:$0xff] %vm1489_vm4, %v1366_v60  ;;  %1525 = vst.msk [vmem:[#allocation3 + $0x118] sm:$0xff] %vm1489_vm4, %v1368_v55 }
 0x201   :  { %1738 = vrot.lane.b32.xlu0 %v1582_v40, %s9795_s17  ;;  %1740 = vrot.lane.b32.xlu1 %v1583_v44, %s9795_s17  ;;  %v1613_v40 = vld [vmem:[#allocation2 + $0x309] sm:$0xff]  ;;  %v1614_v44 = vld [vmem:[#allocation2 + $0x319] sm:$0xff] }
 0x203   :  { %v1370_v61 = vpop.permute.xlu0 %1369  ;;  %v1372_v59 = vpop.permute.xlu1 %1371 }
 0x204   :  { %1526 = vst.msk [vmem:[#allocation3 + $0x120] sm:$0xff] %vm1489_vm4, %v1370_v61  ;;  %1527 = vst.msk [vmem:[#allocation3 + $0x128] sm:$0xff] %vm1489_vm4, %v1372_v59 }
 0x205   :  { %1742 = vrot.lane.b32.xlu0 %v1584_v29, %s9795_s17  ;;  %1744 = vrot.lane.b32.xlu1 %v1585_v25, %s9795_s17  ;;  %v1615_v29 = vld [vmem:[#allocation2 + $0x321] sm:$0xff]  ;;  %v1616_v25 = vld [vmem:[#allocation2 + $0x331] sm:$0xff] }
 0x207   :  { %v1374_v56 = vpop.permute.xlu0 %1373  ;;  %v1376_v27 = vpop.permute.xlu1 %1375 }
 0x208   :  { %1528 = vst.msk [vmem:[#allocation3 + $0x130] sm:$0xff] %vm1489_vm4, %v1374_v56  ;;  %1529 = vst.msk [vmem:[#allocation3 + $0x138] sm:$0xff] %vm1489_vm4, %v1376_v27 }
 0x209   :  { %1746 = vrot.lane.b32.xlu0 %v1586_v28, %s9795_s17  ;;  %1748 = vrot.lane.b32.xlu1 %v1587_v22, %s9795_s17  ;;  %v1617_v28 = vld [vmem:[#allocation2 + $0x339] sm:$0xff] }
 0x20a   :  { %v1939_v22 = vld [vmem:[#allocation2 + $0x1a] sm:$0xff] }
 0x20b   :  { %v1378_v26 = vpop.permute.xlu0 %1377  ;;  %v1380_v38 = vpop.permute.xlu1 %1379 }
 0x20c   :  { %1530 = vst.msk [vmem:[#allocation3 + $0x140] sm:$0xff] %vm1489_vm4, %v1378_v26  ;;  %1531 = vst.msk [vmem:[#allocation3 + $0x148] sm:$0xff] %vm1489_vm4, %v1380_v38 }
 0x20d   :  { %1750 = vrot.lane.b32.xlu0 %v1588_v63, %s9795_s17  ;;  %1752 = vrot.lane.b32.xlu1 %v1589_v58, %s9795_s17  ;;  %v1940_v63 = vld [vmem:[#allocation2 + $0x22] sm:$0xff]  ;;  %v1941_v58 = vld [vmem:[#allocation2 + $0x32] sm:$0xff] }
 0x20f   :  { %v1382_v24 = vpop.permute.xlu0 %1381  ;;  %v1384_v54 = vpop.permute.xlu1 %1383 }
 0x210   :  { %1532 = vst.msk [vmem:[#allocation3 + $0x150] sm:$0xff] %vm1489_vm4, %v1382_v24  ;;  %1533 = vst.msk [vmem:[#allocation3 + $0x158] sm:$0xff] %vm1489_vm4, %v1384_v54 }
 0x211   :  { %1754 = vrot.lane.b32.xlu0 %v1590_v57, %s9795_s17  ;;  %1756 = vrot.lane.b32.xlu1 %v1591_v52, %s9795_s17  ;;  %v1942_v57 = vld [vmem:[#allocation2 + $0x3a] sm:$0xff]  ;;  %v1943_v52 = vld [vmem:[#allocation2 + $0x4a] sm:$0xff] }
 0x213   :  { %v1386_v0 = vpop.permute.xlu0 %1385  ;;  %v1388_v62 = vpop.permute.xlu1 %1387 }
 0x214   :  { %1534 = vst.msk [vmem:[#allocation3 + $0x160] sm:$0xff] %vm1489_vm4, %v1386_v0  ;;  %1535 = vst.msk [vmem:[#allocation3 + $0x168] sm:$0xff] %vm1489_vm4, %v1388_v62 }
 0x215   :  { %1758 = vrot.lane.b32.xlu0 %v1592_v50, %s9795_s17  ;;  %1760 = vrot.lane.b32.xlu1 %v1593_v49, %s9795_s17  ;;  %v1944_v50 = vld [vmem:[#allocation2 + $0x52] sm:$0xff]  ;;  %v1945_v49 = vld [vmem:[#allocation2 + $0x62] sm:$0xff] }
 0x217   :  { %v1390_v48 = vpop.permute.xlu0 %1389  ;;  %v1392_v53 = vpop.permute.xlu1 %1391 }
 0x218   :  { %1536 = vst.msk [vmem:[#allocation3 + $0x170] sm:$0xff] %vm1489_vm4, %v1390_v48  ;;  %1537 = vst.msk [vmem:[#allocation3 + $0x178] sm:$0xff] %vm1489_vm4, %v1392_v53 }
 0x219   :  { %1762 = vrot.lane.b32.xlu0 %v1594_v46, %s9795_s17  ;;  %1764 = vrot.lane.b32.xlu1 %v1595_v4, %s9795_s17  ;;  %v1946_v46 = vld [vmem:[#allocation2 + $0x6a] sm:$0xff]  ;;  %v1947_v4 = vld [vmem:[#allocation2 + $0x7a] sm:$0xff] }
 0x21b   :  { %v1394_v5 = vpop.permute.xlu0 %1393  ;;  %v1396_v51 = vpop.permute.xlu1 %1395 }
 0x21c   :  { %1538 = vst.msk [vmem:[#allocation3 + $0x180] sm:$0xff] %vm1489_vm4, %v1394_v5  ;;  %1539 = vst.msk [vmem:[#allocation3 + $0x188] sm:$0xff] %vm1489_vm4, %v1396_v51 }
 0x21d   :  { %1766 = vrot.lane.b32.xlu0 %v1596_v43, %s9795_s17  ;;  %1768 = vrot.lane.b32.xlu1 %v1597_v42, %s9795_s17  ;;  %v1948_v43 = vld [vmem:[#allocation2 + $0x82] sm:$0xff]  ;;  %v1949_v42 = vld [vmem:[#allocation2 + $0x92] sm:$0xff] }
 0x21f   :  { %v1398_v8 = vpop.permute.xlu0 %1397  ;;  %v1400_v35 = vpop.permute.xlu1 %1399 }
 0x220   :  { %1540 = vst.msk [vmem:[#allocation3 + $0x190] sm:$0xff] %vm1489_vm4, %v1398_v8  ;;  %1541 = vst.msk [vmem:[#allocation3 + $0x198] sm:$0xff] %vm1489_vm4, %v1400_v35 }
 0x221   :  { %1770 = vrot.lane.b32.xlu0 %v1598_v1, %s9795_s17  ;;  %1772 = vrot.lane.b32.xlu1 %v1599_v34, %s9795_s17  ;;  %v1950_v1 = vld [vmem:[#allocation2 + $0x9a] sm:$0xff]  ;;  %v1951_v34 = vld [vmem:[#allocation2 + $0xaa] sm:$0xff] }
 0x223   :  { %v1402_v37 = vpop.permute.xlu0 %1401  ;;  %v1404_v39 = vpop.permute.xlu1 %1403 }
 0x224   :  { %1542 = vst.msk [vmem:[#allocation3 + $0x1a0] sm:$0xff] %vm1489_vm4, %v1402_v37  ;;  %1543 = vst.msk [vmem:[#allocation3 + $0x1a8] sm:$0xff] %vm1489_vm4, %v1404_v39 }
 0x225   :  { %1774 = vrot.lane.b32.xlu0 %v1600_v41, %s9795_s17  ;;  %1776 = vrot.lane.b32.xlu1 %v1601_v32, %s9795_s17  ;;  %v1952_v41 = vld [vmem:[#allocation2 + $0xb2] sm:$0xff]  ;;  %v1953_v32 = vld [vmem:[#allocation2 + $0xc2] sm:$0xff] }
 0x227   :  { %v1406_v45 = vpop.permute.xlu0 %1405  ;;  %v1408_v33 = vpop.permute.xlu1 %1407 }
 0x228   :  { %1544 = vst.msk [vmem:[#allocation3 + $0x1b0] sm:$0xff] %vm1489_vm4, %v1406_v45  ;;  %1545 = vst.msk [vmem:[#allocation3 + $0x1b8] sm:$0xff] %vm1489_vm4, %v1408_v33 }
 0x229   :  { %1778 = vrot.lane.b32.xlu0 %v1602_v30, %s9795_s17  ;;  %1780 = vrot.lane.b32.xlu1 %v1603_v21, %s9795_s17  ;;  %v1954_v30 = vld [vmem:[#allocation2 + $0xca] sm:$0xff]  ;;  %v1955_v21 = vld [vmem:[#allocation2 + $0xda] sm:$0xff] }
 0x22b   :  { %v1410_v31 = vpop.permute.xlu0 %1409  ;;  %v1412_v23 = vpop.permute.xlu1 %1411 }
 0x22c   :  { %1546 = vst.msk [vmem:[#allocation3 + $0x1c0] sm:$0xff] %vm1489_vm4, %v1410_v31  ;;  %1547 = vst.msk [vmem:[#allocation3 + $0x1c8] sm:$0xff] %vm1489_vm4, %v1412_v23 }
 0x22d   :  { %1782 = vrot.lane.b32.xlu0 %v1604_v19, %s9795_s17  ;;  %1784 = vrot.lane.b32.xlu1 %v1605_v17, %s9795_s17  ;;  %v1956_v19 = vld [vmem:[#allocation2 + $0xe2] sm:$0xff]  ;;  %v1957_v17 = vld [vmem:[#allocation2 + $0xf2] sm:$0xff] }
 0x22f   :  { %v1414_v20 = vpop.permute.xlu0 %1413  ;;  %v1416_v18 = vpop.permute.xlu1 %1415 }
 0x230   :  { %1548 = vst.msk [vmem:[#allocation3 + $0x1d0] sm:$0xff] %vm1489_vm4, %v1414_v20  ;;  %1549 = vst.msk [vmem:[#allocation3 + $0x1d8] sm:$0xff] %vm1489_vm4, %v1416_v18 }
 0x231   :  { %1786 = vrot.lane.b32.xlu0 %v1606_v15, %s9795_s17  ;;  %1788 = vrot.lane.b32.xlu1 %v1607_v13, %s9795_s17  ;;  %v1958_v15 = vld [vmem:[#allocation2 + $0xfa] sm:$0xff]  ;;  %v1959_v13 = vld [vmem:[#allocation2 + $0x10a] sm:$0xff] }
 0x233   :  { %v1418_v16 = vpop.permute.xlu0 %1417  ;;  %v1420_v14 = vpop.permute.xlu1 %1419 }
 0x234   :  { %1550 = vst.msk [vmem:[#allocation3 + $0x1e0] sm:$0xff] %vm1489_vm4, %v1418_v16  ;;  %1551 = vst.msk [vmem:[#allocation3 + $0x1e8] sm:$0xff] %vm1489_vm4, %v1420_v14 }
 0x235   :  { %1790 = vrot.lane.b32.xlu0 %v1608_v11, %s9795_s17  ;;  %1792 = vrot.lane.b32.xlu1 %v1609_v9, %s9795_s17  ;;  %v1960_v11 = vld [vmem:[#allocation2 + $0x112] sm:$0xff]  ;;  %v1961_v9 = vld [vmem:[#allocation2 + $0x122] sm:$0xff] }
 0x237   :  { %v1422_v12 = vpop.permute.xlu0 %1421  ;;  %v1424_v2 = vpop.permute.xlu1 %1423 }
 0x238   :  { %1552 = vst.msk [vmem:[#allocation3 + $0x1f0] sm:$0xff] %vm1489_vm4, %v1422_v12  ;;  %1553 = vst.msk [vmem:[#allocation3 + $0x1f8] sm:$0xff] %vm1489_vm4, %v1424_v2 }
 0x239   :  { %1794 = vrot.lane.b32.xlu0 %v1610_v3, %s9795_s17  ;;  %1796 = vrot.lane.b32.xlu1 %v1611_v7, %s9795_s17  ;;  %v1962_v3 = vld [vmem:[#allocation2 + $0x12a] sm:$0xff]  ;;  %v1963_v7 = vld [vmem:[#allocation2 + $0x13a] sm:$0xff] }
 0x23b   :  { %v1683_v10 = vpop.permute.xlu0 %1682  ;;  %v1685_v60 = vpop.permute.xlu1 %1684 }
 0x23c   :  { %1875 = vst.msk [vmem:[#allocation3] sm:$0xff] %vm1874_vm5, %v1683_v10  ;;  %1876 = vst.msk [vmem:[#allocation3 + $0x8] sm:$0xff] %vm1874_vm5, %v1685_v60 }
 0x23d   :  { %1798 = vrot.lane.b32.xlu0 %v1612_v36, %s9795_s17  ;;  %1800 = vrot.lane.b32.xlu1 %v1613_v40, %s9795_s17  ;;  %v1964_v36 = vld [vmem:[#allocation2 + $0x142] sm:$0xff]  ;;  %v1965_v40 = vld [vmem:[#allocation2 + $0x152] sm:$0xff] }
 0x23f   :  { %v1687_v55 = vpop.permute.xlu0 %1686  ;;  %v1689_v61 = vpop.permute.xlu1 %1688 }
 0x240   :  { %1877 = vst.msk [vmem:[#allocation3 + $0x10] sm:$0xff] %vm1874_vm5, %v1687_v55  ;;  %1878 = vst.msk [vmem:[#allocation3 + $0x18] sm:$0xff] %vm1874_vm5, %v1689_v61 }
 0x241   :  { %1802 = vrot.lane.b32.xlu0 %v1614_v44, %s9795_s17  ;;  %1804 = vrot.lane.b32.xlu1 %v1615_v29, %s9795_s17  ;;  %v1966_v44 = vld [vmem:[#allocation2 + $0x15a] sm:$0xff]  ;;  %v1967_v29 = vld [vmem:[#allocation2 + $0x16a] sm:$0xff] }
 0x243   :  { %v1691_v59 = vpop.permute.xlu0 %1690  ;;  %v1693_v56 = vpop.permute.xlu1 %1692 }
 0x244   :  { %1879 = vst.msk [vmem:[#allocation3 + $0x20] sm:$0xff] %vm1874_vm5, %v1691_v59  ;;  %1880 = vst.msk [vmem:[#allocation3 + $0x28] sm:$0xff] %vm1874_vm5, %v1693_v56 }
 0x245   :  { %1806 = vrot.lane.b32.xlu0 %v1616_v25, %s9795_s17  ;;  %1808 = vrot.lane.b32.xlu1 %v1617_v28, %s9795_s17  ;;  %v1968_v25 = vld [vmem:[#allocation2 + $0x172] sm:$0xff]  ;;  %v1969_v28 = vld [vmem:[#allocation2 + $0x182] sm:$0xff] }
 0x247   :  { %v1695_v27 = vpop.permute.xlu0 %1694  ;;  %v1697_v26 = vpop.permute.xlu1 %1696 }
 0x248   :  { %1881 = vst.msk [vmem:[#allocation3 + $0x30] sm:$0xff] %vm1874_vm5, %v1695_v27  ;;  %1882 = vst.msk [vmem:[#allocation3 + $0x38] sm:$0xff] %vm1874_vm5, %v1697_v26 }
 0x249   :  { %2067 = vrot.lane.b32.xlu0 %v1939_v22, %s9796_s18  ;;  %2069 = vrot.lane.b32.xlu1 %v1940_v63, %s9796_s18  ;;  %v1970_v22 = vld [vmem:[#allocation2 + $0x18a] sm:$0xff] }
 0x24a   :  { %v1971_v63 = vld [vmem:[#allocation2 + $0x1ca] sm:$0xff] }
 0x24b   :  { %v1699_v38 = vpop.permute.xlu0 %1698  ;;  %v1701_v24 = vpop.permute.xlu1 %1700 }
 0x24c   :  { %1883 = vst.msk [vmem:[#allocation3 + $0x40] sm:$0xff] %vm1874_vm5, %v1699_v38  ;;  %1884 = vst.msk [vmem:[#allocation3 + $0x48] sm:$0xff] %vm1874_vm5, %v1701_v24 }
 0x24d   :  { %2071 = vrot.lane.b32.xlu0 %v1941_v58, %s9796_s18  ;;  %2073 = vrot.lane.b32.xlu1 %v1942_v57, %s9796_s18  ;;  %v1972_v58 = vld [vmem:[#allocation2 + $0x1d2] sm:$0xff]  ;;  %v1973_v57 = vld [vmem:[#allocation2 + $0x1e2] sm:$0xff] }
 0x24f   :  { %v1703_v54 = vpop.permute.xlu0 %1702  ;;  %v1705_v0 = vpop.permute.xlu1 %1704 }
 0x250   :  { %1885 = vst.msk [vmem:[#allocation3 + $0x50] sm:$0xff] %vm1874_vm5, %v1703_v54  ;;  %1886 = vst.msk [vmem:[#allocation3 + $0x58] sm:$0xff] %vm1874_vm5, %v1705_v0 }
 0x251   :  { %2075 = vrot.lane.b32.xlu0 %v1943_v52, %s9796_s18  ;;  %2077 = vrot.lane.b32.xlu1 %v1944_v50, %s9796_s18  ;;  %v1974_v52 = vld [vmem:[#allocation2 + $0x1ea] sm:$0xff]  ;;  %v1975_v50 = vld [vmem:[#allocation2 + $0x1fa] sm:$0xff] }
 0x253   :  { %v1707_v62 = vpop.permute.xlu0 %1706  ;;  %v1709_v48 = vpop.permute.xlu1 %1708 }
 0x254   :  { %1887 = vst.msk [vmem:[#allocation3 + $0x60] sm:$0xff] %vm1874_vm5, %v1707_v62  ;;  %1888 = vst.msk [vmem:[#allocation3 + $0x68] sm:$0xff] %vm1874_vm5, %v1709_v48 }
 0x255   :  { %2079 = vrot.lane.b32.xlu0 %v1945_v49, %s9796_s18  ;;  %2081 = vrot.lane.b32.xlu1 %v1946_v46, %s9796_s18  ;;  %v1976_v49 = vld [vmem:[#allocation2 + $0x202] sm:$0xff]  ;;  %v1977_v46 = vld [vmem:[#allocation2 + $0x212] sm:$0xff] }
 0x257   :  { %v1711_v53 = vpop.permute.xlu0 %1710  ;;  %v1713_v5 = vpop.permute.xlu1 %1712 }
 0x258   :  { %1889 = vst.msk [vmem:[#allocation3 + $0x70] sm:$0xff] %vm1874_vm5, %v1711_v53  ;;  %1890 = vst.msk [vmem:[#allocation3 + $0x78] sm:$0xff] %vm1874_vm5, %v1713_v5 }
 0x259   :  { %2083 = vrot.lane.b32.xlu0 %v1947_v4, %s9796_s18  ;;  %2085 = vrot.lane.b32.xlu1 %v1948_v43, %s9796_s18  ;;  %v1978_v4 = vld [vmem:[#allocation2 + $0x21a] sm:$0xff]  ;;  %v1979_v43 = vld [vmem:[#allocation2 + $0x22a] sm:$0xff] }
 0x25b   :  { %v1715_v51 = vpop.permute.xlu0 %1714  ;;  %v1717_v8 = vpop.permute.xlu1 %1716 }
 0x25c   :  { %1891 = vst.msk [vmem:[#allocation3 + $0x80] sm:$0xff] %vm1874_vm5, %v1715_v51  ;;  %1892 = vst.msk [vmem:[#allocation3 + $0x88] sm:$0xff] %vm1874_vm5, %v1717_v8 }
 0x25d   :  { %2087 = vrot.lane.b32.xlu0 %v1949_v42, %s9796_s18  ;;  %2089 = vrot.lane.b32.xlu1 %v1950_v1, %s9796_s18  ;;  %v1980_v42 = vld [vmem:[#allocation2 + $0x232] sm:$0xff]  ;;  %v1981_v1 = vld [vmem:[#allocation2 + $0x242] sm:$0xff] }
 0x25f   :  { %v1719_v35 = vpop.permute.xlu0 %1718  ;;  %v1721_v37 = vpop.permute.xlu1 %1720 }
 0x260   :  { %1893 = vst.msk [vmem:[#allocation3 + $0x90] sm:$0xff] %vm1874_vm5, %v1719_v35  ;;  %1894 = vst.msk [vmem:[#allocation3 + $0x98] sm:$0xff] %vm1874_vm5, %v1721_v37 }
 0x261   :  { %2091 = vrot.lane.b32.xlu0 %v1951_v34, %s9796_s18  ;;  %2093 = vrot.lane.b32.xlu1 %v1952_v41, %s9796_s18  ;;  %v1982_v34 = vld [vmem:[#allocation2 + $0x24a] sm:$0xff]  ;;  %v1983_v41 = vld [vmem:[#allocation2 + $0x25a] sm:$0xff] }
 0x263   :  { %v1723_v39 = vpop.permute.xlu0 %1722  ;;  %v1725_v45 = vpop.permute.xlu1 %1724 }
 0x264   :  { %1895 = vst.msk [vmem:[#allocation3 + $0xa0] sm:$0xff] %vm1874_vm5, %v1723_v39  ;;  %1896 = vst.msk [vmem:[#allocation3 + $0xa8] sm:$0xff] %vm1874_vm5, %v1725_v45 }
 0x265   :  { %2095 = vrot.lane.b32.xlu0 %v1953_v32, %s9796_s18  ;;  %2097 = vrot.lane.b32.xlu1 %v1954_v30, %s9796_s18  ;;  %v1984_v32 = vld [vmem:[#allocation2 + $0x262] sm:$0xff]  ;;  %v1985_v30 = vld [vmem:[#allocation2 + $0x272] sm:$0xff] }
 0x267   :  { %v1727_v33 = vpop.permute.xlu0 %1726  ;;  %v1729_v31 = vpop.permute.xlu1 %1728 }
 0x268   :  { %1897 = vst.msk [vmem:[#allocation3 + $0xb0] sm:$0xff] %vm1874_vm5, %v1727_v33  ;;  %1898 = vst.msk [vmem:[#allocation3 + $0xb8] sm:$0xff] %vm1874_vm5, %v1729_v31 }
 0x269   :  { %2099 = vrot.lane.b32.xlu0 %v1955_v21, %s9796_s18  ;;  %2101 = vrot.lane.b32.xlu1 %v1956_v19, %s9796_s18  ;;  %v1986_v21 = vld [vmem:[#allocation2 + $0x27a] sm:$0xff]  ;;  %v1987_v19 = vld [vmem:[#allocation2 + $0x28a] sm:$0xff] }
 0x26b   :  { %v1731_v23 = vpop.permute.xlu0 %1730  ;;  %v1733_v20 = vpop.permute.xlu1 %1732 }
 0x26c   :  { %1899 = vst.msk [vmem:[#allocation3 + $0xc0] sm:$0xff] %vm1874_vm5, %v1731_v23  ;;  %1900 = vst.msk [vmem:[#allocation3 + $0xc8] sm:$0xff] %vm1874_vm5, %v1733_v20 }
 0x26d   :  { %2103 = vrot.lane.b32.xlu0 %v1957_v17, %s9796_s18  ;;  %2105 = vrot.lane.b32.xlu1 %v1958_v15, %s9796_s18  ;;  %v1988_v17 = vld [vmem:[#allocation2 + $0x292] sm:$0xff]  ;;  %v1989_v15 = vld [vmem:[#allocation2 + $0x2a2] sm:$0xff] }
 0x26f   :  { %v1735_v18 = vpop.permute.xlu0 %1734  ;;  %v1737_v16 = vpop.permute.xlu1 %1736 }
 0x270   :  { %1901 = vst.msk [vmem:[#allocation3 + $0xd0] sm:$0xff] %vm1874_vm5, %v1735_v18  ;;  %1902 = vst.msk [vmem:[#allocation3 + $0xd8] sm:$0xff] %vm1874_vm5, %v1737_v16 }
 0x271   :  { %2107 = vrot.lane.b32.xlu0 %v1959_v13, %s9796_s18  ;;  %2109 = vrot.lane.b32.xlu1 %v1960_v11, %s9796_s18  ;;  %v1990_v13 = vld [vmem:[#allocation2 + $0x2aa] sm:$0xff]  ;;  %v1991_v11 = vld [vmem:[#allocation2 + $0x2ba] sm:$0xff] }
 0x273   :  { %v1739_v14 = vpop.permute.xlu0 %1738  ;;  %v1741_v12 = vpop.permute.xlu1 %1740 }
 0x274   :  { %1903 = vst.msk [vmem:[#allocation3 + $0xe0] sm:$0xff] %vm1874_vm5, %v1739_v14  ;;  %1904 = vst.msk [vmem:[#allocation3 + $0xe8] sm:$0xff] %vm1874_vm5, %v1741_v12 }
 0x275   :  { %2111 = vrot.lane.b32.xlu0 %v1961_v9, %s9796_s18  ;;  %2113 = vrot.lane.b32.xlu1 %v1962_v3, %s9796_s18  ;;  %v1992_v9 = vld [vmem:[#allocation2 + $0x2c2] sm:$0xff]  ;;  %v1993_v3 = vld [vmem:[#allocation2 + $0x2d2] sm:$0xff] }
 0x277   :  { %v1743_v2 = vpop.permute.xlu0 %1742  ;;  %v1745_v10 = vpop.permute.xlu1 %1744 }
 0x278   :  { %1905 = vst.msk [vmem:[#allocation3 + $0xf0] sm:$0xff] %vm1874_vm5, %v1743_v2  ;;  %1906 = vst.msk [vmem:[#allocation3 + $0xf8] sm:$0xff] %vm1874_vm5, %v1745_v10 }
 0x279   :  { %2115 = vrot.lane.b32.xlu0 %v1963_v7, %s9796_s18  ;;  %2117 = vrot.lane.b32.xlu1 %v1964_v36, %s9796_s18  ;;  %v1994_v7 = vld [vmem:[#allocation2 + $0x2da] sm:$0xff]  ;;  %v1995_v36 = vld [vmem:[#allocation2 + $0x2ea] sm:$0xff] }
 0x27b   :  { %v1747_v60 = vpop.permute.xlu0 %1746  ;;  %v1749_v55 = vpop.permute.xlu1 %1748 }
 0x27c   :  { %1907 = vst.msk [vmem:[#allocation3 + $0x100] sm:$0xff] %vm1874_vm5, %v1747_v60  ;;  %1908 = vst.msk [vmem:[#allocation3 + $0x108] sm:$0xff] %vm1874_vm5, %v1749_v55 }
 0x27d   :  { %2119 = vrot.lane.b32.xlu0 %v1965_v40, %s9796_s18  ;;  %2121 = vrot.lane.b32.xlu1 %v1966_v44, %s9796_s18  ;;  %v1996_v40 = vld [vmem:[#allocation2 + $0x2f2] sm:$0xff]  ;;  %v1997_v44 = vld [vmem:[#allocation2 + $0x302] sm:$0xff] }
 0x27f   :  { %v1751_v61 = vpop.permute.xlu0 %1750  ;;  %v1753_v59 = vpop.permute.xlu1 %1752 }
 0x280   :  { %1909 = vst.msk [vmem:[#allocation3 + $0x110] sm:$0xff] %vm1874_vm5, %v1751_v61  ;;  %1910 = vst.msk [vmem:[#allocation3 + $0x118] sm:$0xff] %vm1874_vm5, %v1753_v59 }
 0x281   :  { %2123 = vrot.lane.b32.xlu0 %v1967_v29, %s9796_s18  ;;  %2125 = vrot.lane.b32.xlu1 %v1968_v25, %s9796_s18  ;;  %v1998_v29 = vld [vmem:[#allocation2 + $0x30a] sm:$0xff]  ;;  %v1999_v25 = vld [vmem:[#allocation2 + $0x31a] sm:$0xff] }
 0x283   :  { %v1755_v56 = vpop.permute.xlu0 %1754  ;;  %v1757_v27 = vpop.permute.xlu1 %1756 }
 0x284   :  { %1911 = vst.msk [vmem:[#allocation3 + $0x120] sm:$0xff] %vm1874_vm5, %v1755_v56  ;;  %1912 = vst.msk [vmem:[#allocation3 + $0x128] sm:$0xff] %vm1874_vm5, %v1757_v27 }
 0x285   :  { %2127 = vrot.lane.b32.xlu0 %v1969_v28, %s9796_s18  ;;  %2129 = vrot.lane.b32.xlu1 %v1970_v22, %s9796_s18  ;;  %v2000_v28 = vld [vmem:[#allocation2 + $0x322] sm:$0xff]  ;;  %v2001_v22 = vld [vmem:[#allocation2 + $0x332] sm:$0xff] }
 0x287   :  { %v1759_v26 = vpop.permute.xlu0 %1758  ;;  %v1761_v38 = vpop.permute.xlu1 %1760 }
 0x288   :  { %1913 = vst.msk [vmem:[#allocation3 + $0x130] sm:$0xff] %vm1874_vm5, %v1759_v26  ;;  %1914 = vst.msk [vmem:[#allocation3 + $0x138] sm:$0xff] %vm1874_vm5, %v1761_v38 }
 0x289   :  { %2131 = vrot.lane.b32.xlu0 %v1971_v63, %s9796_s18  ;;  %2133 = vrot.lane.b32.xlu1 %v1972_v58, %s9796_s18  ;;  %v2002_v63 = vld [vmem:[#allocation2 + $0x33a] sm:$0xff]  ;;  %v2325_v58 = vld [vmem:[#allocation2 + $0x30] sm:$0xff] }
 0x28b   :  { %v1763_v24 = vpop.permute.xlu0 %1762  ;;  %v1765_v54 = vpop.permute.xlu1 %1764 }
 0x28c   :  { %1915 = vst.msk [vmem:[#allocation3 + $0x140] sm:$0xff] %vm1874_vm5, %v1763_v24  ;;  %1916 = vst.msk [vmem:[#allocation3 + $0x148] sm:$0xff] %vm1874_vm5, %v1765_v54 }
 0x28d   :  { %2135 = vrot.lane.b32.xlu0 %v1973_v57, %s9796_s18  ;;  %2137 = vrot.lane.b32.xlu1 %v1974_v52, %s9796_s18  ;;  %v2326_v57 = vld [vmem:[#allocation2 + $0x38] sm:$0xff]  ;;  %v2327_v52 = vld [vmem:[#allocation2 + $0x48] sm:$0xff] }
 0x28f   :  { %v1767_v0 = vpop.permute.xlu0 %1766  ;;  %v1769_v62 = vpop.permute.xlu1 %1768 }
 0x290   :  { %1917 = vst.msk [vmem:[#allocation3 + $0x150] sm:$0xff] %vm1874_vm5, %v1767_v0  ;;  %1918 = vst.msk [vmem:[#allocation3 + $0x158] sm:$0xff] %vm1874_vm5, %v1769_v62 }
 0x291   :  { %2139 = vrot.lane.b32.xlu0 %v1975_v50, %s9796_s18  ;;  %2141 = vrot.lane.b32.xlu1 %v1976_v49, %s9796_s18  ;;  %v2328_v50 = vld [vmem:[#allocation2 + $0x50] sm:$0xff]  ;;  %v2329_v49 = vld [vmem:[#allocation2 + $0x60] sm:$0xff] }
 0x293   :  { %v1771_v48 = vpop.permute.xlu0 %1770  ;;  %v1773_v53 = vpop.permute.xlu1 %1772 }
 0x294   :  { %1919 = vst.msk [vmem:[#allocation3 + $0x160] sm:$0xff] %vm1874_vm5, %v1771_v48  ;;  %1920 = vst.msk [vmem:[#allocation3 + $0x168] sm:$0xff] %vm1874_vm5, %v1773_v53 }
 0x295   :  { %2143 = vrot.lane.b32.xlu0 %v1977_v46, %s9796_s18  ;;  %2145 = vrot.lane.b32.xlu1 %v1978_v4, %s9796_s18  ;;  %v2330_v46 = vld [vmem:[#allocation2 + $0x68] sm:$0xff]  ;;  %v2331_v4 = vld [vmem:[#allocation2 + $0x78] sm:$0xff] }
 0x297   :  { %v1775_v5 = vpop.permute.xlu0 %1774  ;;  %v1777_v51 = vpop.permute.xlu1 %1776 }
 0x298   :  { %1921 = vst.msk [vmem:[#allocation3 + $0x170] sm:$0xff] %vm1874_vm5, %v1775_v5  ;;  %1922 = vst.msk [vmem:[#allocation3 + $0x178] sm:$0xff] %vm1874_vm5, %v1777_v51 }
 0x299   :  { %2147 = vrot.lane.b32.xlu0 %v1979_v43, %s9796_s18  ;;  %2149 = vrot.lane.b32.xlu1 %v1980_v42, %s9796_s18  ;;  %v2332_v43 = vld [vmem:[#allocation2 + $0x80] sm:$0xff]  ;;  %v2333_v42 = vld [vmem:[#allocation2 + $0x90] sm:$0xff] }
 0x29b   :  { %v1779_v8 = vpop.permute.xlu0 %1778  ;;  %v1781_v35 = vpop.permute.xlu1 %1780 }
 0x29c   :  { %1923 = vst.msk [vmem:[#allocation3 + $0x180] sm:$0xff] %vm1874_vm5, %v1779_v8  ;;  %1924 = vst.msk [vmem:[#allocation3 + $0x188] sm:$0xff] %vm1874_vm5, %v1781_v35 }
 0x29d   :  { %2151 = vrot.lane.b32.xlu0 %v1981_v1, %s9796_s18  ;;  %2153 = vrot.lane.b32.xlu1 %v1982_v34, %s9796_s18  ;;  %v2334_v1 = vld [vmem:[#allocation2 + $0x98] sm:$0xff]  ;;  %v2335_v34 = vld [vmem:[#allocation2 + $0xa8] sm:$0xff] }
 0x29f   :  { %v1783_v37 = vpop.permute.xlu0 %1782  ;;  %v1785_v39 = vpop.permute.xlu1 %1784 }
 0x2a0   :  { %1925 = vst.msk [vmem:[#allocation3 + $0x190] sm:$0xff] %vm1874_vm5, %v1783_v37  ;;  %1926 = vst.msk [vmem:[#allocation3 + $0x198] sm:$0xff] %vm1874_vm5, %v1785_v39 }
 0x2a1   :  { %2155 = vrot.lane.b32.xlu0 %v1983_v41, %s9796_s18  ;;  %2157 = vrot.lane.b32.xlu1 %v1984_v32, %s9796_s18  ;;  %v2336_v41 = vld [vmem:[#allocation2 + $0xb0] sm:$0xff]  ;;  %v2337_v32 = vld [vmem:[#allocation2 + $0xc0] sm:$0xff] }
 0x2a3   :  { %v1787_v45 = vpop.permute.xlu0 %1786  ;;  %v1789_v33 = vpop.permute.xlu1 %1788 }
 0x2a4   :  { %1927 = vst.msk [vmem:[#allocation3 + $0x1a0] sm:$0xff] %vm1874_vm5, %v1787_v45  ;;  %1928 = vst.msk [vmem:[#allocation3 + $0x1a8] sm:$0xff] %vm1874_vm5, %v1789_v33 }
 0x2a5   :  { %2159 = vrot.lane.b32.xlu0 %v1985_v30, %s9796_s18  ;;  %2161 = vrot.lane.b32.xlu1 %v1986_v21, %s9796_s18  ;;  %v2338_v30 = vld [vmem:[#allocation2 + $0xc8] sm:$0xff]  ;;  %v2339_v21 = vld [vmem:[#allocation2 + $0xd8] sm:$0xff] }
 0x2a7   :  { %v1791_v31 = vpop.permute.xlu0 %1790  ;;  %v1793_v23 = vpop.permute.xlu1 %1792 }
 0x2a8   :  { %1929 = vst.msk [vmem:[#allocation3 + $0x1b0] sm:$0xff] %vm1874_vm5, %v1791_v31  ;;  %1930 = vst.msk [vmem:[#allocation3 + $0x1b8] sm:$0xff] %vm1874_vm5, %v1793_v23 }
 0x2a9   :  { %2163 = vrot.lane.b32.xlu0 %v1987_v19, %s9796_s18  ;;  %2165 = vrot.lane.b32.xlu1 %v1988_v17, %s9796_s18  ;;  %v2340_v19 = vld [vmem:[#allocation2 + $0xe0] sm:$0xff]  ;;  %v2341_v17 = vld [vmem:[#allocation2 + $0xf0] sm:$0xff] }
 0x2ab   :  { %v1795_v20 = vpop.permute.xlu0 %1794  ;;  %v1797_v18 = vpop.permute.xlu1 %1796 }
 0x2ac   :  { %1931 = vst.msk [vmem:[#allocation3 + $0x1c0] sm:$0xff] %vm1874_vm5, %v1795_v20  ;;  %1932 = vst.msk [vmem:[#allocation3 + $0x1c8] sm:$0xff] %vm1874_vm5, %v1797_v18 }
 0x2ad   :  { %2167 = vrot.lane.b32.xlu0 %v1989_v15, %s9796_s18  ;;  %2169 = vrot.lane.b32.xlu1 %v1990_v13, %s9796_s18  ;;  %v2342_v15 = vld [vmem:[#allocation2 + $0xf8] sm:$0xff]  ;;  %v2343_v13 = vld [vmem:[#allocation2 + $0x108] sm:$0xff] }
 0x2af   :  { %v1799_v16 = vpop.permute.xlu0 %1798  ;;  %v1801_v14 = vpop.permute.xlu1 %1800 }
 0x2b0   :  { %1933 = vst.msk [vmem:[#allocation3 + $0x1d0] sm:$0xff] %vm1874_vm5, %v1799_v16  ;;  %1934 = vst.msk [vmem:[#allocation3 + $0x1d8] sm:$0xff] %vm1874_vm5, %v1801_v14 }
 0x2b1   :  { %2171 = vrot.lane.b32.xlu0 %v1991_v11, %s9796_s18  ;;  %2173 = vrot.lane.b32.xlu1 %v1992_v9, %s9796_s18  ;;  %v2344_v11 = vld [vmem:[#allocation2 + $0x110] sm:$0xff]  ;;  %v2345_v9 = vld [vmem:[#allocation2 + $0x120] sm:$0xff] }
 0x2b3   :  { %v1803_v12 = vpop.permute.xlu0 %1802  ;;  %v1805_v2 = vpop.permute.xlu1 %1804 }
 0x2b4   :  { %1935 = vst.msk [vmem:[#allocation3 + $0x1e0] sm:$0xff] %vm1874_vm5, %v1803_v12  ;;  %1936 = vst.msk [vmem:[#allocation3 + $0x1e8] sm:$0xff] %vm1874_vm5, %v1805_v2 }
 0x2b5   :  { %2175 = vrot.lane.b32.xlu0 %v1993_v3, %s9796_s18  ;;  %2177 = vrot.lane.b32.xlu1 %v1994_v7, %s9796_s18  ;;  %v2346_v3 = vld [vmem:[#allocation2 + $0x128] sm:$0xff]  ;;  %v2347_v7 = vld [vmem:[#allocation2 + $0x138] sm:$0xff] }
 0x2b7   :  { %v1807_v10 = vpop.permute.xlu0 %1806  ;;  %v1809_v60 = vpop.permute.xlu1 %1808 }
 0x2b8   :  { %1937 = vst.msk [vmem:[#allocation3 + $0x1f0] sm:$0xff] %vm1874_vm5, %v1807_v10  ;;  %1938 = vst.msk [vmem:[#allocation3 + $0x1f8] sm:$0xff] %vm1874_vm5, %v1809_v60 }
 0x2b9   :  { %2179 = vrot.lane.b32.xlu0 %v1995_v36, %s9796_s18  ;;  %2181 = vrot.lane.b32.xlu1 %v1996_v40, %s9796_s18  ;;  %v2348_v36 = vld [vmem:[#allocation2 + $0x140] sm:$0xff]  ;;  %v2349_v40 = vld [vmem:[#allocation2 + $0x150] sm:$0xff] }
 0x2bb   :  { %v2068_v55 = vpop.permute.xlu0 %2067  ;;  %v2070_v61 = vpop.permute.xlu1 %2069 }
 0x2bc   :  { %2260 = vst.msk [vmem:[#allocation3] sm:$0xff] %vm2259_vm6, %v2068_v55  ;;  %2261 = vst.msk [vmem:[#allocation3 + $0x8] sm:$0xff] %vm2259_vm6, %v2070_v61 }
 0x2bd   :  { %2183 = vrot.lane.b32.xlu0 %v1997_v44, %s9796_s18  ;;  %2185 = vrot.lane.b32.xlu1 %v1998_v29, %s9796_s18  ;;  %v2350_v44 = vld [vmem:[#allocation2 + $0x158] sm:$0xff]  ;;  %v2351_v29 = vld [vmem:[#allocation2 + $0x168] sm:$0xff] }
 0x2bf   :  { %v2072_v59 = vpop.permute.xlu0 %2071  ;;  %v2074_v56 = vpop.permute.xlu1 %2073 }
 0x2c0   :  { %2262 = vst.msk [vmem:[#allocation3 + $0x10] sm:$0xff] %vm2259_vm6, %v2072_v59  ;;  %2263 = vst.msk [vmem:[#allocation3 + $0x18] sm:$0xff] %vm2259_vm6, %v2074_v56 }
 0x2c1   :  { %2187 = vrot.lane.b32.xlu0 %v1999_v25, %s9796_s18  ;;  %2189 = vrot.lane.b32.xlu1 %v2000_v28, %s9796_s18  ;;  %v2352_v25 = vld [vmem:[#allocation2 + $0x170] sm:$0xff]  ;;  %v2353_v28 = vld [vmem:[#allocation2 + $0x180] sm:$0xff] }
 0x2c3   :  { %v2076_v27 = vpop.permute.xlu0 %2075  ;;  %v2078_v26 = vpop.permute.xlu1 %2077 }
 0x2c4   :  { %2264 = vst.msk [vmem:[#allocation3 + $0x20] sm:$0xff] %vm2259_vm6, %v2076_v27  ;;  %2265 = vst.msk [vmem:[#allocation3 + $0x28] sm:$0xff] %vm2259_vm6, %v2078_v26 }
 0x2c5   :  { %2191 = vrot.lane.b32.xlu0 %v2001_v22, %s9796_s18  ;;  %2193 = vrot.lane.b32.xlu1 %v2002_v63, %s9796_s18  ;;  %v2354_v22 = vld [vmem:[#allocation2 + $0x188] sm:$0xff]  ;;  %v2355_v63 = vld [vmem:[#allocation2 + $0x198] sm:$0xff] }
 0x2c7   :  { %v2080_v38 = vpop.permute.xlu0 %2079  ;;  %v2082_v24 = vpop.permute.xlu1 %2081 }
 0x2c8   :  { %2266 = vst.msk [vmem:[#allocation3 + $0x30] sm:$0xff] %vm2259_vm6, %v2080_v38  ;;  %2267 = vst.msk [vmem:[#allocation3 + $0x38] sm:$0xff] %vm2259_vm6, %v2082_v24 }
 0x2c9   :  { %2453 = vrot.lane.b32.xlu0 %v2325_v58, %s9797_s19  ;;  %2455 = vrot.lane.b32.xlu1 %v2326_v57, %s9797_s19  ;;  %v2356_v58 = vld [vmem:[#allocation2 + $0x1a0] sm:$0xff] }
 0x2ca   :  { %v2357_v57 = vld [vmem:[#allocation2 + $0x1e0] sm:$0xff] }
 0x2cb   :  { %v2084_v54 = vpop.permute.xlu0 %2083  ;;  %v2086_v0 = vpop.permute.xlu1 %2085 }
 0x2cc   :  { %2268 = vst.msk [vmem:[#allocation3 + $0x40] sm:$0xff] %vm2259_vm6, %v2084_v54  ;;  %2269 = vst.msk [vmem:[#allocation3 + $0x48] sm:$0xff] %vm2259_vm6, %v2086_v0 }
 0x2cd   :  { %2457 = vrot.lane.b32.xlu0 %v2327_v52, %s9797_s19  ;;  %2459 = vrot.lane.b32.xlu1 %v2328_v50, %s9797_s19  ;;  %v2358_v52 = vld [vmem:[#allocation2 + $0x1e8] sm:$0xff]  ;;  %v2359_v50 = vld [vmem:[#allocation2 + $0x1f8] sm:$0xff] }
 0x2cf   :  { %v2088_v62 = vpop.permute.xlu0 %2087  ;;  %v2090_v48 = vpop.permute.xlu1 %2089 }
 0x2d0   :  { %2270 = vst.msk [vmem:[#allocation3 + $0x50] sm:$0xff] %vm2259_vm6, %v2088_v62  ;;  %2271 = vst.msk [vmem:[#allocation3 + $0x58] sm:$0xff] %vm2259_vm6, %v2090_v48 }
 0x2d1   :  { %2461 = vrot.lane.b32.xlu0 %v2329_v49, %s9797_s19  ;;  %2463 = vrot.lane.b32.xlu1 %v2330_v46, %s9797_s19  ;;  %v2360_v49 = vld [vmem:[#allocation2 + $0x200] sm:$0xff]  ;;  %v2361_v46 = vld [vmem:[#allocation2 + $0x210] sm:$0xff] }
 0x2d3   :  { %v2092_v53 = vpop.permute.xlu0 %2091  ;;  %v2094_v5 = vpop.permute.xlu1 %2093 }
 0x2d4   :  { %2272 = vst.msk [vmem:[#allocation3 + $0x60] sm:$0xff] %vm2259_vm6, %v2092_v53  ;;  %2273 = vst.msk [vmem:[#allocation3 + $0x68] sm:$0xff] %vm2259_vm6, %v2094_v5 }
 0x2d5   :  { %2465 = vrot.lane.b32.xlu0 %v2331_v4, %s9797_s19  ;;  %2467 = vrot.lane.b32.xlu1 %v2332_v43, %s9797_s19  ;;  %v2362_v4 = vld [vmem:[#allocation2 + $0x218] sm:$0xff]  ;;  %v2363_v43 = vld [vmem:[#allocation2 + $0x228] sm:$0xff] }
 0x2d7   :  { %v2096_v51 = vpop.permute.xlu0 %2095  ;;  %v2098_v8 = vpop.permute.xlu1 %2097 }
 0x2d8   :  { %2274 = vst.msk [vmem:[#allocation3 + $0x70] sm:$0xff] %vm2259_vm6, %v2096_v51  ;;  %2275 = vst.msk [vmem:[#allocation3 + $0x78] sm:$0xff] %vm2259_vm6, %v2098_v8 }
 0x2d9   :  { %2469 = vrot.lane.b32.xlu0 %v2333_v42, %s9797_s19  ;;  %2471 = vrot.lane.b32.xlu1 %v2334_v1, %s9797_s19  ;;  %v2364_v42 = vld [vmem:[#allocation2 + $0x230] sm:$0xff]  ;;  %v2365_v1 = vld [vmem:[#allocation2 + $0x240] sm:$0xff] }
 0x2db   :  { %v2100_v35 = vpop.permute.xlu0 %2099  ;;  %v2102_v37 = vpop.permute.xlu1 %2101 }
 0x2dc   :  { %2276 = vst.msk [vmem:[#allocation3 + $0x80] sm:$0xff] %vm2259_vm6, %v2100_v35  ;;  %2277 = vst.msk [vmem:[#allocation3 + $0x88] sm:$0xff] %vm2259_vm6, %v2102_v37 }
 0x2dd   :  { %2473 = vrot.lane.b32.xlu0 %v2335_v34, %s9797_s19  ;;  %2475 = vrot.lane.b32.xlu1 %v2336_v41, %s9797_s19  ;;  %v2366_v34 = vld [vmem:[#allocation2 + $0x248] sm:$0xff]  ;;  %v2367_v41 = vld [vmem:[#allocation2 + $0x258] sm:$0xff] }
 0x2df   :  { %v2104_v39 = vpop.permute.xlu0 %2103  ;;  %v2106_v45 = vpop.permute.xlu1 %2105 }
 0x2e0   :  { %2278 = vst.msk [vmem:[#allocation3 + $0x90] sm:$0xff] %vm2259_vm6, %v2104_v39  ;;  %2279 = vst.msk [vmem:[#allocation3 + $0x98] sm:$0xff] %vm2259_vm6, %v2106_v45 }
 0x2e1   :  { %2477 = vrot.lane.b32.xlu0 %v2337_v32, %s9797_s19  ;;  %2479 = vrot.lane.b32.xlu1 %v2338_v30, %s9797_s19  ;;  %v2368_v32 = vld [vmem:[#allocation2 + $0x260] sm:$0xff]  ;;  %v2369_v30 = vld [vmem:[#allocation2 + $0x270] sm:$0xff] }
 0x2e3   :  { %v2108_v33 = vpop.permute.xlu0 %2107  ;;  %v2110_v31 = vpop.permute.xlu1 %2109 }
 0x2e4   :  { %2280 = vst.msk [vmem:[#allocation3 + $0xa0] sm:$0xff] %vm2259_vm6, %v2108_v33  ;;  %2281 = vst.msk [vmem:[#allocation3 + $0xa8] sm:$0xff] %vm2259_vm6, %v2110_v31 }
 0x2e5   :  { %2481 = vrot.lane.b32.xlu0 %v2339_v21, %s9797_s19  ;;  %2483 = vrot.lane.b32.xlu1 %v2340_v19, %s9797_s19  ;;  %v2370_v21 = vld [vmem:[#allocation2 + $0x278] sm:$0xff]  ;;  %v2371_v19 = vld [vmem:[#allocation2 + $0x288] sm:$0xff] }
 0x2e7   :  { %v2112_v23 = vpop.permute.xlu0 %2111  ;;  %v2114_v20 = vpop.permute.xlu1 %2113 }
 0x2e8   :  { %2282 = vst.msk [vmem:[#allocation3 + $0xb0] sm:$0xff] %vm2259_vm6, %v2112_v23  ;;  %2283 = vst.msk [vmem:[#allocation3 + $0xb8] sm:$0xff] %vm2259_vm6, %v2114_v20 }
 0x2e9   :  { %2485 = vrot.lane.b32.xlu0 %v2341_v17, %s9797_s19  ;;  %2487 = vrot.lane.b32.xlu1 %v2342_v15, %s9797_s19  ;;  %v2372_v17 = vld [vmem:[#allocation2 + $0x290] sm:$0xff]  ;;  %v2373_v15 = vld [vmem:[#allocation2 + $0x2a0] sm:$0xff] }
 0x2eb   :  { %v2116_v18 = vpop.permute.xlu0 %2115  ;;  %v2118_v16 = vpop.permute.xlu1 %2117 }
 0x2ec   :  { %2284 = vst.msk [vmem:[#allocation3 + $0xc0] sm:$0xff] %vm2259_vm6, %v2116_v18  ;;  %2285 = vst.msk [vmem:[#allocation3 + $0xc8] sm:$0xff] %vm2259_vm6, %v2118_v16 }
 0x2ed   :  { %2489 = vrot.lane.b32.xlu0 %v2343_v13, %s9797_s19  ;;  %2491 = vrot.lane.b32.xlu1 %v2344_v11, %s9797_s19  ;;  %v2374_v13 = vld [vmem:[#allocation2 + $0x2a8] sm:$0xff]  ;;  %v2375_v11 = vld [vmem:[#allocation2 + $0x2b8] sm:$0xff] }
 0x2ef   :  { %v2120_v14 = vpop.permute.xlu0 %2119  ;;  %v2122_v12 = vpop.permute.xlu1 %2121 }
 0x2f0   :  { %2286 = vst.msk [vmem:[#allocation3 + $0xd0] sm:$0xff] %vm2259_vm6, %v2120_v14  ;;  %2287 = vst.msk [vmem:[#allocation3 + $0xd8] sm:$0xff] %vm2259_vm6, %v2122_v12 }
 0x2f1   :  { %2493 = vrot.lane.b32.xlu0 %v2345_v9, %s9797_s19  ;;  %2495 = vrot.lane.b32.xlu1 %v2346_v3, %s9797_s19  ;;  %v2376_v9 = vld [vmem:[#allocation2 + $0x2c0] sm:$0xff]  ;;  %v2377_v3 = vld [vmem:[#allocation2 + $0x2d0] sm:$0xff] }
 0x2f3   :  { %v2124_v2 = vpop.permute.xlu0 %2123  ;;  %v2126_v10 = vpop.permute.xlu1 %2125 }
 0x2f4   :  { %2288 = vst.msk [vmem:[#allocation3 + $0xe0] sm:$0xff] %vm2259_vm6, %v2124_v2  ;;  %2289 = vst.msk [vmem:[#allocation3 + $0xe8] sm:$0xff] %vm2259_vm6, %v2126_v10 }
 0x2f5   :  { %2497 = vrot.lane.b32.xlu0 %v2347_v7, %s9797_s19  ;;  %2499 = vrot.lane.b32.xlu1 %v2348_v36, %s9797_s19  ;;  %v2378_v7 = vld [vmem:[#allocation2 + $0x2d8] sm:$0xff]  ;;  %v2379_v36 = vld [vmem:[#allocation2 + $0x2e8] sm:$0xff] }
 0x2f7   :  { %v2128_v60 = vpop.permute.xlu0 %2127  ;;  %v2130_v55 = vpop.permute.xlu1 %2129 }
 0x2f8   :  { %2290 = vst.msk [vmem:[#allocation3 + $0xf0] sm:$0xff] %vm2259_vm6, %v2128_v60  ;;  %2291 = vst.msk [vmem:[#allocation3 + $0xf8] sm:$0xff] %vm2259_vm6, %v2130_v55 }
 0x2f9   :  { %2501 = vrot.lane.b32.xlu0 %v2349_v40, %s9797_s19  ;;  %2503 = vrot.lane.b32.xlu1 %v2350_v44, %s9797_s19  ;;  %v2380_v40 = vld [vmem:[#allocation2 + $0x2f0] sm:$0xff]  ;;  %v2381_v44 = vld [vmem:[#allocation2 + $0x300] sm:$0xff] }
 0x2fb   :  { %v2132_v61 = vpop.permute.xlu0 %2131  ;;  %v2134_v59 = vpop.permute.xlu1 %2133 }
 0x2fc   :  { %2292 = vst.msk [vmem:[#allocation3 + $0x100] sm:$0xff] %vm2259_vm6, %v2132_v61  ;;  %2293 = vst.msk [vmem:[#allocation3 + $0x108] sm:$0xff] %vm2259_vm6, %v2134_v59 }
 0x2fd   :  { %2505 = vrot.lane.b32.xlu0 %v2351_v29, %s9797_s19  ;;  %2507 = vrot.lane.b32.xlu1 %v2352_v25, %s9797_s19  ;;  %v2382_v29 = vld [vmem:[#allocation2 + $0x308] sm:$0xff]  ;;  %v2383_v25 = vld [vmem:[#allocation2 + $0x318] sm:$0xff] }
 0x2ff   :  { %v2136_v56 = vpop.permute.xlu0 %2135  ;;  %v2138_v27 = vpop.permute.xlu1 %2137 }
 0x300   :  { %2294 = vst.msk [vmem:[#allocation3 + $0x110] sm:$0xff] %vm2259_vm6, %v2136_v56  ;;  %2295 = vst.msk [vmem:[#allocation3 + $0x118] sm:$0xff] %vm2259_vm6, %v2138_v27 }
 0x301   :  { %2509 = vrot.lane.b32.xlu0 %v2353_v28, %s9797_s19  ;;  %2511 = vrot.lane.b32.xlu1 %v2354_v22, %s9797_s19  ;;  %v2384_v28 = vld [vmem:[#allocation2 + $0x320] sm:$0xff]  ;;  %v2385_v22 = vld [vmem:[#allocation2 + $0x330] sm:$0xff] }
 0x303   :  { %v2140_v26 = vpop.permute.xlu0 %2139  ;;  %v2142_v38 = vpop.permute.xlu1 %2141 }
 0x304   :  { %2296 = vst.msk [vmem:[#allocation3 + $0x120] sm:$0xff] %vm2259_vm6, %v2140_v26  ;;  %2297 = vst.msk [vmem:[#allocation3 + $0x128] sm:$0xff] %vm2259_vm6, %v2142_v38 }
 0x305   :  { %2513 = vrot.lane.b32.xlu0 %v2355_v63, %s9797_s19  ;;  %2515 = vrot.lane.b32.xlu1 %v2356_v58, %s9797_s19  ;;  %v2386_v63 = vld [vmem:[#allocation2 + $0x338] sm:$0xff]  ;;  %v2387_v58 = vld [vmem:[#allocation2 + $0x348] sm:$0xff] }
 0x307   :  { %v2144_v24 = vpop.permute.xlu0 %2143  ;;  %v2146_v54 = vpop.permute.xlu1 %2145 }
 0x308   :  { %2298 = vst.msk [vmem:[#allocation3 + $0x130] sm:$0xff] %vm2259_vm6, %v2144_v24  ;;  %2299 = vst.msk [vmem:[#allocation3 + $0x138] sm:$0xff] %vm2259_vm6, %v2146_v54 }
 0x309   :  { %2517 = vrot.lane.b32.xlu0 %v2357_v57, %s9797_s19  ;;  %2519 = vrot.lane.b32.xlu1 %v2358_v52, %s9797_s19  ;;  %v2388_v57 = vld [vmem:[#allocation2 + $0x350] sm:$0xff] }
 0x30a   :  { %v2710_v52 = vld [vmem:[#allocation2 + $0x31] sm:$0xff] }
 0x30b   :  { %v2148_v0 = vpop.permute.xlu0 %2147  ;;  %v2150_v62 = vpop.permute.xlu1 %2149 }
 0x30c   :  { %2300 = vst.msk [vmem:[#allocation3 + $0x140] sm:$0xff] %vm2259_vm6, %v2148_v0  ;;  %2301 = vst.msk [vmem:[#allocation3 + $0x148] sm:$0xff] %vm2259_vm6, %v2150_v62 }
 0x30d   :  { %2521 = vrot.lane.b32.xlu0 %v2359_v50, %s9797_s19  ;;  %2523 = vrot.lane.b32.xlu1 %v2360_v49, %s9797_s19  ;;  %v2711_v50 = vld [vmem:[#allocation2 + $0x39] sm:$0xff]  ;;  %v2712_v49 = vld [vmem:[#allocation2 + $0x49] sm:$0xff] }
 0x30f   :  { %v2152_v48 = vpop.permute.xlu0 %2151  ;;  %v2154_v53 = vpop.permute.xlu1 %2153 }
 0x310   :  { %2302 = vst.msk [vmem:[#allocation3 + $0x150] sm:$0xff] %vm2259_vm6, %v2152_v48  ;;  %2303 = vst.msk [vmem:[#allocation3 + $0x158] sm:$0xff] %vm2259_vm6, %v2154_v53 }
 0x311   :  { %2525 = vrot.lane.b32.xlu0 %v2361_v46, %s9797_s19  ;;  %2527 = vrot.lane.b32.xlu1 %v2362_v4, %s9797_s19  ;;  %v2713_v46 = vld [vmem:[#allocation2 + $0x51] sm:$0xff]  ;;  %v2714_v4 = vld [vmem:[#allocation2 + $0x61] sm:$0xff] }
 0x313   :  { %v2156_v5 = vpop.permute.xlu0 %2155  ;;  %v2158_v51 = vpop.permute.xlu1 %2157 }
 0x314   :  { %2304 = vst.msk [vmem:[#allocation3 + $0x160] sm:$0xff] %vm2259_vm6, %v2156_v5  ;;  %2305 = vst.msk [vmem:[#allocation3 + $0x168] sm:$0xff] %vm2259_vm6, %v2158_v51 }
 0x315   :  { %2529 = vrot.lane.b32.xlu0 %v2363_v43, %s9797_s19  ;;  %2531 = vrot.lane.b32.xlu1 %v2364_v42, %s9797_s19  ;;  %v2715_v43 = vld [vmem:[#allocation2 + $0x69] sm:$0xff]  ;;  %v2716_v42 = vld [vmem:[#allocation2 + $0x79] sm:$0xff] }
 0x317   :  { %v2160_v8 = vpop.permute.xlu0 %2159  ;;  %v2162_v35 = vpop.permute.xlu1 %2161 }
 0x318   :  { %2306 = vst.msk [vmem:[#allocation3 + $0x170] sm:$0xff] %vm2259_vm6, %v2160_v8  ;;  %2307 = vst.msk [vmem:[#allocation3 + $0x178] sm:$0xff] %vm2259_vm6, %v2162_v35 }
 0x319   :  { %2533 = vrot.lane.b32.xlu0 %v2365_v1, %s9797_s19  ;;  %2535 = vrot.lane.b32.xlu1 %v2366_v34, %s9797_s19  ;;  %v2717_v1 = vld [vmem:[#allocation2 + $0x81] sm:$0xff]  ;;  %v2718_v34 = vld [vmem:[#allocation2 + $0x91] sm:$0xff] }
 0x31b   :  { %v2164_v37 = vpop.permute.xlu0 %2163  ;;  %v2166_v39 = vpop.permute.xlu1 %2165 }
 0x31c   :  { %2308 = vst.msk [vmem:[#allocation3 + $0x180] sm:$0xff] %vm2259_vm6, %v2164_v37  ;;  %2309 = vst.msk [vmem:[#allocation3 + $0x188] sm:$0xff] %vm2259_vm6, %v2166_v39 }
 0x31d   :  { %2537 = vrot.lane.b32.xlu0 %v2367_v41, %s9797_s19  ;;  %2539 = vrot.lane.b32.xlu1 %v2368_v32, %s9797_s19  ;;  %v2719_v41 = vld [vmem:[#allocation2 + $0x99] sm:$0xff]  ;;  %v2720_v32 = vld [vmem:[#allocation2 + $0xa9] sm:$0xff] }
 0x31f   :  { %v2168_v45 = vpop.permute.xlu0 %2167  ;;  %v2170_v33 = vpop.permute.xlu1 %2169 }
 0x320   :  { %2310 = vst.msk [vmem:[#allocation3 + $0x190] sm:$0xff] %vm2259_vm6, %v2168_v45  ;;  %2311 = vst.msk [vmem:[#allocation3 + $0x198] sm:$0xff] %vm2259_vm6, %v2170_v33 }
 0x321   :  { %2541 = vrot.lane.b32.xlu0 %v2369_v30, %s9797_s19  ;;  %2543 = vrot.lane.b32.xlu1 %v2370_v21, %s9797_s19  ;;  %v2721_v30 = vld [vmem:[#allocation2 + $0xb1] sm:$0xff]  ;;  %v2722_v21 = vld [vmem:[#allocation2 + $0xc1] sm:$0xff] }
 0x323   :  { %v2172_v31 = vpop.permute.xlu0 %2171  ;;  %v2174_v23 = vpop.permute.xlu1 %2173 }
 0x324   :  { %2312 = vst.msk [vmem:[#allocation3 + $0x1a0] sm:$0xff] %vm2259_vm6, %v2172_v31  ;;  %2313 = vst.msk [vmem:[#allocation3 + $0x1a8] sm:$0xff] %vm2259_vm6, %v2174_v23 }
 0x325   :  { %2545 = vrot.lane.b32.xlu0 %v2371_v19, %s9797_s19  ;;  %2547 = vrot.lane.b32.xlu1 %v2372_v17, %s9797_s19  ;;  %v2723_v19 = vld [vmem:[#allocation2 + $0xc9] sm:$0xff]  ;;  %v2724_v17 = vld [vmem:[#allocation2 + $0xd9] sm:$0xff] }
 0x327   :  { %v2176_v20 = vpop.permute.xlu0 %2175  ;;  %v2178_v18 = vpop.permute.xlu1 %2177 }
 0x328   :  { %2314 = vst.msk [vmem:[#allocation3 + $0x1b0] sm:$0xff] %vm2259_vm6, %v2176_v20  ;;  %2315 = vst.msk [vmem:[#allocation3 + $0x1b8] sm:$0xff] %vm2259_vm6, %v2178_v18 }
 0x329   :  { %2549 = vrot.lane.b32.xlu0 %v2373_v15, %s9797_s19  ;;  %2551 = vrot.lane.b32.xlu1 %v2374_v13, %s9797_s19  ;;  %v2725_v15 = vld [vmem:[#allocation2 + $0xe1] sm:$0xff]  ;;  %v2726_v13 = vld [vmem:[#allocation2 + $0xf1] sm:$0xff] }
 0x32b   :  { %v2180_v16 = vpop.permute.xlu0 %2179  ;;  %v2182_v14 = vpop.permute.xlu1 %2181 }
 0x32c   :  { %2316 = vst.msk [vmem:[#allocation3 + $0x1c0] sm:$0xff] %vm2259_vm6, %v2180_v16  ;;  %2317 = vst.msk [vmem:[#allocation3 + $0x1c8] sm:$0xff] %vm2259_vm6, %v2182_v14 }
 0x32d   :  { %2553 = vrot.lane.b32.xlu0 %v2375_v11, %s9797_s19  ;;  %2555 = vrot.lane.b32.xlu1 %v2376_v9, %s9797_s19  ;;  %v2727_v11 = vld [vmem:[#allocation2 + $0xf9] sm:$0xff]  ;;  %v2728_v9 = vld [vmem:[#allocation2 + $0x109] sm:$0xff] }
 0x32f   :  { %v2184_v12 = vpop.permute.xlu0 %2183  ;;  %v2186_v2 = vpop.permute.xlu1 %2185 }
 0x330   :  { %2318 = vst.msk [vmem:[#allocation3 + $0x1d0] sm:$0xff] %vm2259_vm6, %v2184_v12  ;;  %2319 = vst.msk [vmem:[#allocation3 + $0x1d8] sm:$0xff] %vm2259_vm6, %v2186_v2 }
 0x331   :  { %2557 = vrot.lane.b32.xlu0 %v2377_v3, %s9797_s19  ;;  %2559 = vrot.lane.b32.xlu1 %v2378_v7, %s9797_s19  ;;  %v2729_v3 = vld [vmem:[#allocation2 + $0x111] sm:$0xff]  ;;  %v2730_v7 = vld [vmem:[#allocation2 + $0x121] sm:$0xff] }
 0x333   :  { %v2188_v10 = vpop.permute.xlu0 %2187  ;;  %v2190_v60 = vpop.permute.xlu1 %2189 }
 0x334   :  { %2320 = vst.msk [vmem:[#allocation3 + $0x1e0] sm:$0xff] %vm2259_vm6, %v2188_v10  ;;  %2321 = vst.msk [vmem:[#allocation3 + $0x1e8] sm:$0xff] %vm2259_vm6, %v2190_v60 }
 0x335   :  { %2561 = vrot.lane.b32.xlu0 %v2379_v36, %s9797_s19  ;;  %2563 = vrot.lane.b32.xlu1 %v2380_v40, %s9797_s19  ;;  %v2731_v36 = vld [vmem:[#allocation2 + $0x129] sm:$0xff]  ;;  %v2732_v40 = vld [vmem:[#allocation2 + $0x139] sm:$0xff] }
 0x337   :  { %v2192_v55 = vpop.permute.xlu0 %2191  ;;  %v2194_v61 = vpop.permute.xlu1 %2193 }
 0x338   :  { %2322 = vst.msk [vmem:[#allocation3 + $0x1f0] sm:$0xff] %vm2259_vm6, %v2192_v55  ;;  %2323 = vst.msk [vmem:[#allocation3 + $0x1f8] sm:$0xff] %vm2259_vm6, %v2194_v61 }
 0x339   :  { %2565 = vrot.lane.b32.xlu0 %v2381_v44, %s9797_s19  ;;  %2567 = vrot.lane.b32.xlu1 %v2382_v29, %s9797_s19  ;;  %v2733_v44 = vld [vmem:[#allocation2 + $0x141] sm:$0xff]  ;;  %v2734_v29 = vld [vmem:[#allocation2 + $0x151] sm:$0xff] }
 0x33b   :  { %v2454_v59 = vpop.permute.xlu0 %2453  ;;  %v2456_v56 = vpop.permute.xlu1 %2455 }
 0x33c   :  { %2646 = vst.msk [vmem:[#allocation3] sm:$0xff] %vm2645_vm7, %v2454_v59  ;;  %2647 = vst.msk [vmem:[#allocation3 + $0x8] sm:$0xff] %vm2645_vm7, %v2456_v56 }
 0x33d   :  { %2569 = vrot.lane.b32.xlu0 %v2383_v25, %s9797_s19  ;;  %2571 = vrot.lane.b32.xlu1 %v2384_v28, %s9797_s19  ;;  %v2735_v25 = vld [vmem:[#allocation2 + $0x159] sm:$0xff]  ;;  %v2736_v28 = vld [vmem:[#allocation2 + $0x169] sm:$0xff] }
 0x33f   :  { %v2458_v27 = vpop.permute.xlu0 %2457  ;;  %v2460_v26 = vpop.permute.xlu1 %2459 }
 0x340   :  { %2648 = vst.msk [vmem:[#allocation3 + $0x10] sm:$0xff] %vm2645_vm7, %v2458_v27  ;;  %2649 = vst.msk [vmem:[#allocation3 + $0x18] sm:$0xff] %vm2645_vm7, %v2460_v26 }
 0x341   :  { %2573 = vrot.lane.b32.xlu0 %v2385_v22, %s9797_s19  ;;  %2575 = vrot.lane.b32.xlu1 %v2386_v63, %s9797_s19  ;;  %v2737_v22 = vld [vmem:[#allocation2 + $0x171] sm:$0xff]  ;;  %v2738_v63 = vld [vmem:[#allocation2 + $0x181] sm:$0xff] }
 0x343   :  { %v2462_v38 = vpop.permute.xlu0 %2461  ;;  %v2464_v24 = vpop.permute.xlu1 %2463 }
 0x344   :  { %2650 = vst.msk [vmem:[#allocation3 + $0x20] sm:$0xff] %vm2645_vm7, %v2462_v38  ;;  %2651 = vst.msk [vmem:[#allocation3 + $0x28] sm:$0xff] %vm2645_vm7, %v2464_v24 }
 0x345   :  { %2577 = vrot.lane.b32.xlu0 %v2387_v58, %s9797_s19  ;;  %2579 = vrot.lane.b32.xlu1 %v2388_v57, %s9797_s19  ;;  %v2739_v58 = vld [vmem:[#allocation2 + $0x189] sm:$0xff]  ;;  %v2740_v57 = vld [vmem:[#allocation2 + $0x199] sm:$0xff] }
 0x347   :  { %v2466_v54 = vpop.permute.xlu0 %2465  ;;  %v2468_v0 = vpop.permute.xlu1 %2467 }
 0x348   :  { %2652 = vst.msk [vmem:[#allocation3 + $0x30] sm:$0xff] %vm2645_vm7, %v2466_v54  ;;  %2653 = vst.msk [vmem:[#allocation3 + $0x38] sm:$0xff] %vm2645_vm7, %v2468_v0 }
 0x349   :  { %2838 = vrot.lane.b32.xlu0 %v2710_v52, %s9798_s20  ;;  %2840 = vrot.lane.b32.xlu1 %v2711_v50, %s9798_s20  ;;  %v2741_v52 = vld [vmem:[#allocation2 + $0x1a1] sm:$0xff] }
 0x34a   :  { %v2742_v50 = vld [vmem:[#allocation2 + $0x1e1] sm:$0xff] }
 0x34b   :  { %v2470_v62 = vpop.permute.xlu0 %2469  ;;  %v2472_v48 = vpop.permute.xlu1 %2471 }
 0x34c   :  { %2654 = vst.msk [vmem:[#allocation3 + $0x40] sm:$0xff] %vm2645_vm7, %v2470_v62  ;;  %2655 = vst.msk [vmem:[#allocation3 + $0x48] sm:$0xff] %vm2645_vm7, %v2472_v48 }
 0x34d   :  { %2842 = vrot.lane.b32.xlu0 %v2712_v49, %s9798_s20  ;;  %2844 = vrot.lane.b32.xlu1 %v2713_v46, %s9798_s20  ;;  %v2743_v49 = vld [vmem:[#allocation2 + $0x1e9] sm:$0xff]  ;;  %v2744_v46 = vld [vmem:[#allocation2 + $0x1f9] sm:$0xff] }
 0x34f   :  { %v2474_v53 = vpop.permute.xlu0 %2473  ;;  %v2476_v5 = vpop.permute.xlu1 %2475 }
 0x350   :  { %2656 = vst.msk [vmem:[#allocation3 + $0x50] sm:$0xff] %vm2645_vm7, %v2474_v53  ;;  %2657 = vst.msk [vmem:[#allocation3 + $0x58] sm:$0xff] %vm2645_vm7, %v2476_v5 }
 0x351   :  { %2846 = vrot.lane.b32.xlu0 %v2714_v4, %s9798_s20  ;;  %2848 = vrot.lane.b32.xlu1 %v2715_v43, %s9798_s20  ;;  %v2745_v4 = vld [vmem:[#allocation2 + $0x201] sm:$0xff]  ;;  %v2746_v43 = vld [vmem:[#allocation2 + $0x211] sm:$0xff] }
 0x353   :  { %v2478_v51 = vpop.permute.xlu0 %2477  ;;  %v2480_v8 = vpop.permute.xlu1 %2479 }
 0x354   :  { %2658 = vst.msk [vmem:[#allocation3 + $0x60] sm:$0xff] %vm2645_vm7, %v2478_v51  ;;  %2659 = vst.msk [vmem:[#allocation3 + $0x68] sm:$0xff] %vm2645_vm7, %v2480_v8 }
 0x355   :  { %2850 = vrot.lane.b32.xlu0 %v2716_v42, %s9798_s20  ;;  %2852 = vrot.lane.b32.xlu1 %v2717_v1, %s9798_s20  ;;  %v2747_v42 = vld [vmem:[#allocation2 + $0x219] sm:$0xff]  ;;  %v2748_v1 = vld [vmem:[#allocation2 + $0x229] sm:$0xff] }
 0x357   :  { %v2482_v35 = vpop.permute.xlu0 %2481  ;;  %v2484_v37 = vpop.permute.xlu1 %2483 }
 0x358   :  { %2660 = vst.msk [vmem:[#allocation3 + $0x70] sm:$0xff] %vm2645_vm7, %v2482_v35  ;;  %2661 = vst.msk [vmem:[#allocation3 + $0x78] sm:$0xff] %vm2645_vm7, %v2484_v37 }
 0x359   :  { %2854 = vrot.lane.b32.xlu0 %v2718_v34, %s9798_s20  ;;  %2856 = vrot.lane.b32.xlu1 %v2719_v41, %s9798_s20  ;;  %v2749_v34 = vld [vmem:[#allocation2 + $0x231] sm:$0xff]  ;;  %v2750_v41 = vld [vmem:[#allocation2 + $0x241] sm:$0xff] }
 0x35b   :  { %v2486_v39 = vpop.permute.xlu0 %2485  ;;  %v2488_v45 = vpop.permute.xlu1 %2487 }
 0x35c   :  { %2662 = vst.msk [vmem:[#allocation3 + $0x80] sm:$0xff] %vm2645_vm7, %v2486_v39  ;;  %2663 = vst.msk [vmem:[#allocation3 + $0x88] sm:$0xff] %vm2645_vm7, %v2488_v45 }
 0x35d   :  { %2858 = vrot.lane.b32.xlu0 %v2720_v32, %s9798_s20  ;;  %2860 = vrot.lane.b32.xlu1 %v2721_v30, %s9798_s20  ;;  %v2751_v32 = vld [vmem:[#allocation2 + $0x249] sm:$0xff]  ;;  %v2752_v30 = vld [vmem:[#allocation2 + $0x259] sm:$0xff] }
 0x35f   :  { %v2490_v33 = vpop.permute.xlu0 %2489  ;;  %v2492_v31 = vpop.permute.xlu1 %2491 }
 0x360   :  { %2664 = vst.msk [vmem:[#allocation3 + $0x90] sm:$0xff] %vm2645_vm7, %v2490_v33  ;;  %2665 = vst.msk [vmem:[#allocation3 + $0x98] sm:$0xff] %vm2645_vm7, %v2492_v31 }
 0x361   :  { %2862 = vrot.lane.b32.xlu0 %v2722_v21, %s9798_s20  ;;  %2864 = vrot.lane.b32.xlu1 %v2723_v19, %s9798_s20  ;;  %v2753_v21 = vld [vmem:[#allocation2 + $0x261] sm:$0xff]  ;;  %v2754_v19 = vld [vmem:[#allocation2 + $0x271] sm:$0xff] }
 0x363   :  { %v2494_v23 = vpop.permute.xlu0 %2493  ;;  %v2496_v20 = vpop.permute.xlu1 %2495 }
 0x364   :  { %2666 = vst.msk [vmem:[#allocation3 + $0xa0] sm:$0xff] %vm2645_vm7, %v2494_v23  ;;  %2667 = vst.msk [vmem:[#allocation3 + $0xa8] sm:$0xff] %vm2645_vm7, %v2496_v20 }
 0x365   :  { %2866 = vrot.lane.b32.xlu0 %v2724_v17, %s9798_s20  ;;  %2868 = vrot.lane.b32.xlu1 %v2725_v15, %s9798_s20  ;;  %v2755_v17 = vld [vmem:[#allocation2 + $0x279] sm:$0xff]  ;;  %v2756_v15 = vld [vmem:[#allocation2 + $0x289] sm:$0xff] }
 0x367   :  { %v2498_v18 = vpop.permute.xlu0 %2497  ;;  %v2500_v16 = vpop.permute.xlu1 %2499 }
 0x368   :  { %2668 = vst.msk [vmem:[#allocation3 + $0xb0] sm:$0xff] %vm2645_vm7, %v2498_v18  ;;  %2669 = vst.msk [vmem:[#allocation3 + $0xb8] sm:$0xff] %vm2645_vm7, %v2500_v16 }
 0x369   :  { %2870 = vrot.lane.b32.xlu0 %v2726_v13, %s9798_s20  ;;  %2872 = vrot.lane.b32.xlu1 %v2727_v11, %s9798_s20  ;;  %v2757_v13 = vld [vmem:[#allocation2 + $0x291] sm:$0xff]  ;;  %v2758_v11 = vld [vmem:[#allocation2 + $0x2a1] sm:$0xff] }
 0x36b   :  { %v2502_v14 = vpop.permute.xlu0 %2501  ;;  %v2504_v12 = vpop.permute.xlu1 %2503 }
 0x36c   :  { %2670 = vst.msk [vmem:[#allocation3 + $0xc0] sm:$0xff] %vm2645_vm7, %v2502_v14  ;;  %2671 = vst.msk [vmem:[#allocation3 + $0xc8] sm:$0xff] %vm2645_vm7, %v2504_v12 }
 0x36d   :  { %2874 = vrot.lane.b32.xlu0 %v2728_v9, %s9798_s20  ;;  %2876 = vrot.lane.b32.xlu1 %v2729_v3, %s9798_s20  ;;  %v2759_v9 = vld [vmem:[#allocation2 + $0x2a9] sm:$0xff]  ;;  %v2760_v3 = vld [vmem:[#allocation2 + $0x2b9] sm:$0xff] }
 0x36f   :  { %v2506_v2 = vpop.permute.xlu0 %2505  ;;  %v2508_v10 = vpop.permute.xlu1 %2507 }
 0x370   :  { %2672 = vst.msk [vmem:[#allocation3 + $0xd0] sm:$0xff] %vm2645_vm7, %v2506_v2  ;;  %2673 = vst.msk [vmem:[#allocation3 + $0xd8] sm:$0xff] %vm2645_vm7, %v2508_v10 }
 0x371   :  { %2878 = vrot.lane.b32.xlu0 %v2730_v7, %s9798_s20  ;;  %2880 = vrot.lane.b32.xlu1 %v2731_v36, %s9798_s20  ;;  %v2761_v7 = vld [vmem:[#allocation2 + $0x2c1] sm:$0xff]  ;;  %v2762_v36 = vld [vmem:[#allocation2 + $0x2d1] sm:$0xff] }
 0x373   :  { %v2510_v60 = vpop.permute.xlu0 %2509  ;;  %v2512_v55 = vpop.permute.xlu1 %2511 }
 0x374   :  { %2674 = vst.msk [vmem:[#allocation3 + $0xe0] sm:$0xff] %vm2645_vm7, %v2510_v60  ;;  %2675 = vst.msk [vmem:[#allocation3 + $0xe8] sm:$0xff] %vm2645_vm7, %v2512_v55 }
 0x375   :  { %2882 = vrot.lane.b32.xlu0 %v2732_v40, %s9798_s20  ;;  %2884 = vrot.lane.b32.xlu1 %v2733_v44, %s9798_s20  ;;  %v2763_v40 = vld [vmem:[#allocation2 + $0x2d9] sm:$0xff]  ;;  %v2764_v44 = vld [vmem:[#allocation2 + $0x2e9] sm:$0xff] }
 0x377   :  { %v2514_v61 = vpop.permute.xlu0 %2513  ;;  %v2516_v59 = vpop.permute.xlu1 %2515 }
 0x378   :  { %2676 = vst.msk [vmem:[#allocation3 + $0xf0] sm:$0xff] %vm2645_vm7, %v2514_v61  ;;  %2677 = vst.msk [vmem:[#allocation3 + $0xf8] sm:$0xff] %vm2645_vm7, %v2516_v59 }
 0x379   :  { %2886 = vrot.lane.b32.xlu0 %v2734_v29, %s9798_s20  ;;  %2888 = vrot.lane.b32.xlu1 %v2735_v25, %s9798_s20  ;;  %v2765_v29 = vld [vmem:[#allocation2 + $0x2f1] sm:$0xff]  ;;  %v2766_v25 = vld [vmem:[#allocation2 + $0x301] sm:$0xff] }
 0x37b   :  { %v2518_v56 = vpop.permute.xlu0 %2517  ;;  %v2520_v27 = vpop.permute.xlu1 %2519 }
 0x37c   :  { %2678 = vst.msk [vmem:[#allocation3 + $0x100] sm:$0xff] %vm2645_vm7, %v2518_v56  ;;  %2679 = vst.msk [vmem:[#allocation3 + $0x108] sm:$0xff] %vm2645_vm7, %v2520_v27  ;;  %v3545_v27 = vld [vmem:[%s16432_s1 + $0x8] sm:$0xff] }
 0x37d   :  { %2890 = vrot.lane.b32.xlu0 %v2736_v28, %s9798_s20  ;;  %2892 = vrot.lane.b32.xlu1 %v2737_v22, %s9798_s20  ;;  %v2767_v28 = vld [vmem:[#allocation2 + $0x309] sm:$0xff]  ;;  %v3544_v22 = vld [vmem:[%s16432_s1] sm:$0xff] }
 0x37f   :  { %v2522_v26 = vpop.permute.xlu0 %2521  ;;  %v2524_v38 = vpop.permute.xlu1 %2523 }
 0x380   :  { %2680 = vst.msk [vmem:[#allocation3 + $0x110] sm:$0xff] %vm2645_vm7, %v2522_v26  ;;  %2681 = vst.msk [vmem:[#allocation3 + $0x118] sm:$0xff] %vm2645_vm7, %v2524_v38  ;;  %v2768_v26 = vld [vmem:[#allocation2 + $0x319] sm:$0xff]  ;;  %v2769_v38 = vld [vmem:[#allocation2 + $0x321] sm:$0xff] }
 0x381   :  { %2894 = vrot.lane.b32.xlu0 %v2738_v63, %s9798_s20  ;;  %2896 = vrot.lane.b32.xlu1 %v2739_v58, %s9798_s20  ;;  %v9762_v63 = vpack.c.bf16 %v3545_v27, %v3544_v22  ;;  %v3117_v27 = vld [vmem:[#allocation2 + $0x13a] sm:$0xff] }
 0x383   :  { %v2526_v24 = vpop.permute.xlu0 %2525  ;;  %v2528_v54 = vpop.permute.xlu1 %2527  ;;  %9763 = vmatprep.subr.bf16.mxu0 %v9762_v63 }
 0x384   :  { %2682 = vst.msk [vmem:[#allocation3 + $0x120] sm:$0xff] %vm2645_vm7, %v2526_v24  ;;  %2683 = vst.msk [vmem:[#allocation3 + $0x128] sm:$0xff] %vm2645_vm7, %v2528_v54  ;;  %9765 = vmatpush3.bf16.msra.mxu0 %v9762_v63  ;;  %v3546_v24 = vld [vmem:[%s16432_s1 + $0x10] sm:$0xff] }
 0x385   :  { %2898 = vrot.lane.b32.xlu0 %v2740_v57, %s9798_s20  ;;  %2900 = vrot.lane.b32.xlu1 %v2741_v52, %s9798_s20  ;;  %v3547_v52 = vld [vmem:[%s16432_s1 + $0x18] sm:$0xff] }
 0x386   :  { %v9766_v54 = vpack.c.bf16 %v3547_v52, %v3546_v24  ;;  %v3120_v24 = vld [vmem:[#allocation2 + $0x15a] sm:$0xff] }
 0x387   :  { %v2530_v0 = vpop.permute.xlu0 %2529  ;;  %v2532_v62 = vpop.permute.xlu1 %2531 }
 0x388   :  { %2684 = vst.msk [vmem:[#allocation3 + $0x130] sm:$0xff] %vm2645_vm7, %v2530_v0  ;;  %2685 = vst.msk [vmem:[#allocation3 + $0x138] sm:$0xff] %vm2645_vm7, %v2532_v62  ;;  %9767 = vmatprep.subr.bf16.mxu0 %v9766_v54 }
 0x389   :  { %2902 = vrot.lane.b32.xlu0 %v2742_v50, %s9798_s20  ;;  %2904 = vrot.lane.b32.xlu1 %v2743_v49, %s9798_s20  ;;  %v2770_v50 = vld [vmem:[#allocation2 + $0x331] sm:$0xff]  ;;  %v2771_v49 = vld [vmem:[#allocation2 + $0x339] sm:$0xff] }
 0x38a   :  { %9769 = vmatpush3.bf16.msra.mxu0 %v9766_v54  ;;  %v3121_v54 = vld [vmem:[#allocation2 + $0x16a] sm:$0xff] }
 0x38b   :  { %v2534_v48 = vpop.permute.xlu0 %2533  ;;  %v2536_v53 = vpop.permute.xlu1 %2535 }
 0x38c   :  { %2686 = vst.msk [vmem:[#allocation3 + $0x140] sm:$0xff] %vm2645_vm7, %v2534_v48  ;;  %2687 = vst.msk [vmem:[#allocation3 + $0x148] sm:$0xff] %vm2645_vm7, %v2536_v53  ;;  %v3548_v48 = vld [vmem:[%s16432_s1 + $0x20] sm:$0xf]  ;;  %v2773_v53 = vld [vmem:[#allocation2 + $0x351] sm:$0xff]  ;;  %s9799_s1 = smov 32  }
 0x38d   :  { %2906 = vrot.lane.b32.xlu0 %v2744_v46, %s9798_s20  ;;  %2908 = vrot.lane.b32.xlu1 %v2745_v4, %s9798_s20  ;;  %v2772_v46 = vld [vmem:[#allocation2 + $0x349] sm:$0xff] }
 0x38e   :  { %9558 = vmatprep.subr.msk.mxu0 %vm3749_vm9, %v3548_v48 }
 0x38f   :  { %v2538_v5 = vpop.permute.xlu0 %2537  ;;  %v2540_v51 = vpop.permute.xlu1 %2539  ;;  %9559 = vmatpush3.msk.msra.mxu0 %vm3749_vm9, %v3548_v48  ;;  %v3124_v48 = vld [vmem:[#allocation2 + $0x18a] sm:$0xff] }
 0x390   :  { %2688 = vst.msk [vmem:[#allocation3 + $0x150] sm:$0xff] %vm2645_vm7, %v2538_v5  ;;  %2689 = vst.msk [vmem:[#allocation3 + $0x158] sm:$0xff] %vm2645_vm7, %v2540_v51  ;;  %v3095_v5 = vld [vmem:[#allocation2 + $0x32] sm:$0xff]  ;;  %v3096_v51 = vld [vmem:[#allocation2 + $0x3a] sm:$0xff] }
 0x391   :  { %2910 = vrot.lane.b32.xlu0 %v2746_v43, %s9798_s20  ;;  %2912 = vrot.lane.b32.xlu1 %v2747_v42, %s9798_s20 }
 0x393   :  { %v2542_v8 = vpop.permute.xlu0 %2541  ;;  %v2544_v35 = vpop.permute.xlu1 %2543 }
 0x394   :  { %2690 = vst.msk [vmem:[#allocation3 + $0x160] sm:$0xff] %vm2645_vm7, %v2542_v8  ;;  %2691 = vst.msk [vmem:[#allocation3 + $0x168] sm:$0xff] %vm2645_vm7, %v2544_v35  ;;  %v3097_v8 = vld [vmem:[#allocation2 + $0x4a] sm:$0xff]  ;;  %v3098_v35 = vld [vmem:[#allocation2 + $0x52] sm:$0xff] }
 0x395   :  { %2914 = vrot.lane.b32.xlu0 %v2748_v1, %s9798_s20  ;;  %2916 = vrot.lane.b32.xlu1 %v2749_v34, %s9798_s20 }
 0x397   :  { %v2546_v37 = vpop.permute.xlu0 %2545  ;;  %v2548_v39 = vpop.permute.xlu1 %2547 }
 0x398   :  { %2692 = vst.msk [vmem:[#allocation3 + $0x170] sm:$0xff] %vm2645_vm7, %v2546_v37  ;;  %2693 = vst.msk [vmem:[#allocation3 + $0x178] sm:$0xff] %vm2645_vm7, %v2548_v39  ;;  %v3099_v37 = vld [vmem:[#allocation2 + $0x62] sm:$0xff]  ;;  %v3100_v39 = vld [vmem:[#allocation2 + $0x6a] sm:$0xff] }
 0x399   :  { %2918 = vrot.lane.b32.xlu0 %v2750_v41, %s9798_s20  ;;  %2920 = vrot.lane.b32.xlu1 %v2751_v32, %s9798_s20 }
 0x39b   :  { %v2550_v45 = vpop.permute.xlu0 %2549  ;;  %v2552_v33 = vpop.permute.xlu1 %2551 }
 0x39c   :  { %2694 = vst.msk [vmem:[#allocation3 + $0x180] sm:$0xff] %vm2645_vm7, %v2550_v45  ;;  %2695 = vst.msk [vmem:[#allocation3 + $0x188] sm:$0xff] %vm2645_vm7, %v2552_v33  ;;  %v3101_v45 = vld [vmem:[#allocation2 + $0x7a] sm:$0xff]  ;;  %v3102_v33 = vld [vmem:[#allocation2 + $0x82] sm:$0xff] }
 0x39d   :  { %2922 = vrot.lane.b32.xlu0 %v2752_v30, %s9798_s20  ;;  %2924 = vrot.lane.b32.xlu1 %v2753_v21, %s9798_s20 }
 0x39f   :  { %v2554_v31 = vpop.permute.xlu0 %2553  ;;  %v2556_v23 = vpop.permute.xlu1 %2555 }
 0x3a0   :  { %2696 = vst.msk [vmem:[#allocation3 + $0x190] sm:$0xff] %vm2645_vm7, %v2554_v31  ;;  %2697 = vst.msk [vmem:[#allocation3 + $0x198] sm:$0xff] %vm2645_vm7, %v2556_v23  ;;  %v3103_v31 = vld [vmem:[#allocation2 + $0x92] sm:$0xff]  ;;  %v3104_v23 = vld [vmem:[#allocation2 + $0x9a] sm:$0xff] }
 0x3a1   :  { %2926 = vrot.lane.b32.xlu0 %v2754_v19, %s9798_s20  ;;  %2928 = vrot.lane.b32.xlu1 %v2755_v17, %s9798_s20 }
 0x3a3   :  { %v2558_v20 = vpop.permute.xlu0 %2557  ;;  %v2560_v18 = vpop.permute.xlu1 %2559 }
 0x3a4   :  { %2698 = vst.msk [vmem:[#allocation3 + $0x1a0] sm:$0xff] %vm2645_vm7, %v2558_v20  ;;  %2699 = vst.msk [vmem:[#allocation3 + $0x1a8] sm:$0xff] %vm2645_vm7, %v2560_v18  ;;  %v3105_v20 = vld [vmem:[#allocation2 + $0xaa] sm:$0xff]  ;;  %v3106_v18 = vld [vmem:[#allocation2 + $0xb2] sm:$0xff] }
 0x3a5   :  { %2930 = vrot.lane.b32.xlu0 %v2756_v15, %s9798_s20  ;;  %2932 = vrot.lane.b32.xlu1 %v2757_v13, %s9798_s20 }
 0x3a7   :  { %v2562_v16 = vpop.permute.xlu0 %2561  ;;  %v2564_v14 = vpop.permute.xlu1 %2563 }
 0x3a8   :  { %2700 = vst.msk [vmem:[#allocation3 + $0x1b0] sm:$0xff] %vm2645_vm7, %v2562_v16  ;;  %2701 = vst.msk [vmem:[#allocation3 + $0x1b8] sm:$0xff] %vm2645_vm7, %v2564_v14  ;;  %v3107_v16 = vld [vmem:[#allocation2 + $0xc2] sm:$0xff]  ;;  %v3108_v14 = vld [vmem:[#allocation2 + $0xca] sm:$0xff] }
 0x3a9   :  { %2934 = vrot.lane.b32.xlu0 %v2758_v11, %s9798_s20  ;;  %2936 = vrot.lane.b32.xlu1 %v2759_v9, %s9798_s20 }
 0x3ab   :  { %v2566_v12 = vpop.permute.xlu0 %2565  ;;  %v2568_v2 = vpop.permute.xlu1 %2567 }
 0x3ac   :  { %2702 = vst.msk [vmem:[#allocation3 + $0x1c0] sm:$0xff] %vm2645_vm7, %v2566_v12  ;;  %2703 = vst.msk [vmem:[#allocation3 + $0x1c8] sm:$0xff] %vm2645_vm7, %v2568_v2  ;;  %v3109_v12 = vld [vmem:[#allocation2 + $0xda] sm:$0xff]  ;;  %v3110_v2 = vld [vmem:[#allocation2 + $0xe2] sm:$0xff] }
 0x3ad   :  { %2938 = vrot.lane.b32.xlu0 %v2760_v3, %s9798_s20  ;;  %2940 = vrot.lane.b32.xlu1 %v2761_v7, %s9798_s20 }
 0x3af   :  { %v2570_v10 = vpop.permute.xlu0 %2569  ;;  %v2572_v60 = vpop.permute.xlu1 %2571 }
 0x3b0   :  { %2704 = vst.msk [vmem:[#allocation3 + $0x1d0] sm:$0xff] %vm2645_vm7, %v2570_v10  ;;  %2705 = vst.msk [vmem:[#allocation3 + $0x1d8] sm:$0xff] %vm2645_vm7, %v2572_v60  ;;  %v3111_v10 = vld [vmem:[#allocation2 + $0xf2] sm:$0xff]  ;;  %v3112_v60 = vld [vmem:[#allocation2 + $0xfa] sm:$0xff] }
 0x3b1   :  { %2942 = vrot.lane.b32.xlu0 %v2762_v36, %s9798_s20  ;;  %2944 = vrot.lane.b32.xlu1 %v2763_v40, %s9798_s20 }
 0x3b3   :  { %v2574_v55 = vpop.permute.xlu0 %2573  ;;  %v2576_v61 = vpop.permute.xlu1 %2575 }
 0x3b4   :  { %2706 = vst.msk [vmem:[#allocation3 + $0x1e0] sm:$0xff] %vm2645_vm7, %v2574_v55  ;;  %2707 = vst.msk [vmem:[#allocation3 + $0x1e8] sm:$0xff] %vm2645_vm7, %v2576_v61  ;;  %v3113_v55 = vld [vmem:[#allocation2 + $0x10a] sm:$0xff]  ;;  %v3114_v61 = vld [vmem:[#allocation2 + $0x112] sm:$0xff] }
 0x3b5   :  { %2946 = vrot.lane.b32.xlu0 %v2764_v44, %s9798_s20  ;;  %2948 = vrot.lane.b32.xlu1 %v2765_v29, %s9798_s20 }
 0x3b7   :  { %v2578_v59 = vpop.permute.xlu0 %2577  ;;  %v2580_v56 = vpop.permute.xlu1 %2579 }
 0x3b8   :  { %2708 = vst.msk [vmem:[#allocation3 + $0x1f0] sm:$0xff] %vm2645_vm7, %v2578_v59  ;;  %2709 = vst.msk [vmem:[#allocation3 + $0x1f8] sm:$0xff] %vm2645_vm7, %v2580_v56  ;;  %v3115_v59 = vld [vmem:[#allocation2 + $0x122] sm:$0xff]  ;;  %v3116_v56 = vld [vmem:[#allocation2 + $0x12a] sm:$0xff] }
 0x3b9   :  { %2950 = vrot.lane.b32.xlu0 %v2766_v25, %s9798_s20  ;;  %2952 = vrot.lane.b32.xlu1 %v2767_v28, %s9798_s20 }
 0x3bb   :  { %v2839_v58 = vpop.permute.xlu0 %2838  ;;  %v2841_v57 = vpop.permute.xlu1 %2840 }
 0x3bc   :  { %3031 = vst.msk [vmem:[#allocation3] sm:$0xff] %vm3030_vm8, %v2839_v58  ;;  %3032 = vst.msk [vmem:[#allocation3 + $0x8] sm:$0xff] %vm3030_vm8, %v2841_v57 }
 0x3bd   :  { %2954 = vrot.lane.b32.xlu0 %v2768_v26, %s9798_s20  ;;  %2956 = vrot.lane.b32.xlu1 %v2769_v38, %s9798_s20  ;;  %v3118_v26 = vld [vmem:[#allocation2 + $0x142] sm:$0xff]  ;;  %v3119_v38 = vld [vmem:[#allocation2 + $0x152] sm:$0xff] }
 0x3bf   :  { %v2843_v0 = vpop.permute.xlu0 %2842  ;;  %v2845_v62 = vpop.permute.xlu1 %2844 }
 0x3c0   :  { %3033 = vst.msk [vmem:[#allocation3 + $0x10] sm:$0xff] %vm3030_vm8, %v2843_v0  ;;  %3034 = vst.msk [vmem:[#allocation3 + $0x18] sm:$0xff] %vm3030_vm8, %v2845_v62  ;;  %v3122_v0 = vld [vmem:[#allocation2 + $0x172] sm:$0xff]  ;;  %v3123_v62 = vld [vmem:[#allocation2 + $0x182] sm:$0xff] }
 0x3c1   :  { %2958 = vrot.lane.b32.xlu0 %v2770_v50, %s9798_s20  ;;  %2960 = vrot.lane.b32.xlu1 %v2771_v49, %s9798_s20 }
 0x3c3   :  { %v2847_v4 = vpop.permute.xlu0 %2846  ;;  %v2849_v43 = vpop.permute.xlu1 %2848 }
 0x3c4   :  { %3035 = vst.msk [vmem:[#allocation3 + $0x20] sm:$0xff] %vm3030_vm8, %v2847_v4  ;;  %3036 = vst.msk [vmem:[#allocation3 + $0x28] sm:$0xff] %vm3030_vm8, %v2849_v43 }
 0x3c5   :  { %2962 = vrot.lane.b32.xlu0 %v2772_v46, %s9798_s20  ;;  %2964 = vrot.lane.b32.xlu1 %v2773_v53, %s9798_s20  ;;  %v3125_v53 = vld [vmem:[#allocation2 + $0x19a] sm:$0xff] }
 0x3c7   :  { %v2851_v42 = vpop.permute.xlu0 %2850  ;;  %v2853_v1 = vpop.permute.xlu1 %2852 }
 0x3c8   :  { %3037 = vst.msk [vmem:[#allocation3 + $0x30] sm:$0xff] %vm3030_vm8, %v2851_v42  ;;  %3038 = vst.msk [vmem:[#allocation3 + $0x38] sm:$0xff] %vm3030_vm8, %v2853_v1 }
 0x3c9   :  { %3223 = vrot.lane.b32.xlu0 %v3095_v5, %s9799_s1  ;;  %3225 = vrot.lane.b32.xlu1 %v3096_v51, %s9799_s1  ;;  %v3126_v5 = vld [vmem:[#allocation2 + $0x1a2] sm:$0xff] }
 0x3ca   :  { %v3127_v51 = vld [vmem:[#allocation2 + $0x1e2] sm:$0xff] }
 0x3cb   :  { %v2855_v34 = vpop.permute.xlu0 %2854  ;;  %v2857_v41 = vpop.permute.xlu1 %2856 }
 0x3cc   :  { %3039 = vst.msk [vmem:[#allocation3 + $0x40] sm:$0xff] %vm3030_vm8, %v2855_v34  ;;  %3040 = vst.msk [vmem:[#allocation3 + $0x48] sm:$0xff] %vm3030_vm8, %v2857_v41 }
 0x3cd   :  { %3227 = vrot.lane.b32.xlu0 %v3097_v8, %s9799_s1  ;;  %3229 = vrot.lane.b32.xlu1 %v3098_v35, %s9799_s1  ;;  %v3128_v8 = vld [vmem:[#allocation2 + $0x1ea] sm:$0xff]  ;;  %v3129_v35 = vld [vmem:[#allocation2 + $0x1fa] sm:$0xff] }
 0x3cf   :  { %v2859_v32 = vpop.permute.xlu0 %2858  ;;  %v2861_v30 = vpop.permute.xlu1 %2860 }
 0x3d0   :  { %3041 = vst.msk [vmem:[#allocation3 + $0x50] sm:$0xff] %vm3030_vm8, %v2859_v32  ;;  %3042 = vst.msk [vmem:[#allocation3 + $0x58] sm:$0xff] %vm3030_vm8, %v2861_v30 }
 0x3d1   :  { %3231 = vrot.lane.b32.xlu0 %v3099_v37, %s9799_s1  ;;  %3233 = vrot.lane.b32.xlu1 %v3100_v39, %s9799_s1  ;;  %v3130_v37 = vld [vmem:[#allocation2 + $0x202] sm:$0xff]  ;;  %v3131_v39 = vld [vmem:[#allocation2 + $0x212] sm:$0xff] }
 0x3d3   :  { %v2863_v21 = vpop.permute.xlu0 %2862  ;;  %v2865_v19 = vpop.permute.xlu1 %2864 }
 0x3d4   :  { %3043 = vst.msk [vmem:[#allocation3 + $0x60] sm:$0xff] %vm3030_vm8, %v2863_v21  ;;  %3044 = vst.msk [vmem:[#allocation3 + $0x68] sm:$0xff] %vm3030_vm8, %v2865_v19 }
 0x3d5   :  { %3235 = vrot.lane.b32.xlu0 %v3101_v45, %s9799_s1  ;;  %3237 = vrot.lane.b32.xlu1 %v3102_v33, %s9799_s1  ;;  %v3132_v45 = vld [vmem:[#allocation2 + $0x21a] sm:$0xff]  ;;  %v3133_v33 = vld [vmem:[#allocation2 + $0x22a] sm:$0xff] }
 0x3d7   :  { %v2867_v17 = vpop.permute.xlu0 %2866  ;;  %v2869_v15 = vpop.permute.xlu1 %2868 }
 0x3d8   :  { %3045 = vst.msk [vmem:[#allocation3 + $0x70] sm:$0xff] %vm3030_vm8, %v2867_v17  ;;  %3046 = vst.msk [vmem:[#allocation3 + $0x78] sm:$0xff] %vm3030_vm8, %v2869_v15 }
 0x3d9   :  { %3239 = vrot.lane.b32.xlu0 %v3103_v31, %s9799_s1  ;;  %3241 = vrot.lane.b32.xlu1 %v3104_v23, %s9799_s1  ;;  %v3134_v31 = vld [vmem:[#allocation2 + $0x232] sm:$0xff]  ;;  %v3135_v23 = vld [vmem:[#allocation2 + $0x242] sm:$0xff] }
 0x3db   :  { %v2871_v13 = vpop.permute.xlu0 %2870  ;;  %v2873_v11 = vpop.permute.xlu1 %2872 }
 0x3dc   :  { %3047 = vst.msk [vmem:[#allocation3 + $0x80] sm:$0xff] %vm3030_vm8, %v2871_v13  ;;  %3048 = vst.msk [vmem:[#allocation3 + $0x88] sm:$0xff] %vm3030_vm8, %v2873_v11 }
 0x3dd   :  { %3243 = vrot.lane.b32.xlu0 %v3105_v20, %s9799_s1  ;;  %3245 = vrot.lane.b32.xlu1 %v3106_v18, %s9799_s1  ;;  %v3136_v20 = vld [vmem:[#allocation2 + $0x24a] sm:$0xff]  ;;  %v3137_v18 = vld [vmem:[#allocation2 + $0x25a] sm:$0xff] }
 0x3df   :  { %v2875_v9 = vpop.permute.xlu0 %2874  ;;  %v2877_v3 = vpop.permute.xlu1 %2876 }
 0x3e0   :  { %3049 = vst.msk [vmem:[#allocation3 + $0x90] sm:$0xff] %vm3030_vm8, %v2875_v9  ;;  %3050 = vst.msk [vmem:[#allocation3 + $0x98] sm:$0xff] %vm3030_vm8, %v2877_v3 }
 0x3e1   :  { %3247 = vrot.lane.b32.xlu0 %v3107_v16, %s9799_s1  ;;  %3249 = vrot.lane.b32.xlu1 %v3108_v14, %s9799_s1  ;;  %v3138_v16 = vld [vmem:[#allocation2 + $0x262] sm:$0xff]  ;;  %v3139_v14 = vld [vmem:[#allocation2 + $0x272] sm:$0xff] }
 0x3e3   :  { %v2879_v7 = vpop.permute.xlu0 %2878  ;;  %v2881_v36 = vpop.permute.xlu1 %2880 }
 0x3e4   :  { %3051 = vst.msk [vmem:[#allocation3 + $0xa0] sm:$0xff] %vm3030_vm8, %v2879_v7  ;;  %3052 = vst.msk [vmem:[#allocation3 + $0xa8] sm:$0xff] %vm3030_vm8, %v2881_v36 }
 0x3e5   :  { %3251 = vrot.lane.b32.xlu0 %v3109_v12, %s9799_s1  ;;  %3253 = vrot.lane.b32.xlu1 %v3110_v2, %s9799_s1  ;;  %v3140_v12 = vld [vmem:[#allocation2 + $0x27a] sm:$0xff]  ;;  %v3141_v2 = vld [vmem:[#allocation2 + $0x28a] sm:$0xff] }
 0x3e7   :  { %v2883_v40 = vpop.permute.xlu0 %2882  ;;  %v2885_v44 = vpop.permute.xlu1 %2884 }
 0x3e8   :  { %3053 = vst.msk [vmem:[#allocation3 + $0xb0] sm:$0xff] %vm3030_vm8, %v2883_v40  ;;  %3054 = vst.msk [vmem:[#allocation3 + $0xb8] sm:$0xff] %vm3030_vm8, %v2885_v44 }
 0x3e9   :  { %3255 = vrot.lane.b32.xlu0 %v3111_v10, %s9799_s1  ;;  %3257 = vrot.lane.b32.xlu1 %v3112_v60, %s9799_s1  ;;  %v3142_v10 = vld [vmem:[#allocation2 + $0x292] sm:$0xff]  ;;  %v3143_v60 = vld [vmem:[#allocation2 + $0x2a2] sm:$0xff] }
 0x3eb   :  { %v2887_v29 = vpop.permute.xlu0 %2886  ;;  %v2889_v25 = vpop.permute.xlu1 %2888 }
 0x3ec   :  { %3055 = vst.msk [vmem:[#allocation3 + $0xc0] sm:$0xff] %vm3030_vm8, %v2887_v29  ;;  %3056 = vst.msk [vmem:[#allocation3 + $0xc8] sm:$0xff] %vm3030_vm8, %v2889_v25 }
 0x3ed   :  { %3259 = vrot.lane.b32.xlu0 %v3113_v55, %s9799_s1  ;;  %3261 = vrot.lane.b32.xlu1 %v3114_v61, %s9799_s1  ;;  %v3144_v55 = vld [vmem:[#allocation2 + $0x2aa] sm:$0xff]  ;;  %v3145_v61 = vld [vmem:[#allocation2 + $0x2ba] sm:$0xff] }
 0x3ef   :  { %v2891_v28 = vpop.permute.xlu0 %2890  ;;  %v2893_v22 = vpop.permute.xlu1 %2892 }
 0x3f0   :  { %3057 = vst.msk [vmem:[#allocation3 + $0xd0] sm:$0xff] %vm3030_vm8, %v2891_v28  ;;  %3058 = vst.msk [vmem:[#allocation3 + $0xd8] sm:$0xff] %vm3030_vm8, %v2893_v22 }
 0x3f1   :  { %3263 = vrot.lane.b32.xlu0 %v3115_v59, %s9799_s1  ;;  %3265 = vrot.lane.b32.xlu1 %v3116_v56, %s9799_s1  ;;  %v3146_v59 = vld [vmem:[#allocation2 + $0x2c2] sm:$0xff]  ;;  %v3147_v56 = vld [vmem:[#allocation2 + $0x2d2] sm:$0xff] }
 0x3f3   :  { %v2895_v63 = vpop.permute.xlu0 %2894  ;;  %v2897_v58 = vpop.permute.xlu1 %2896 }
 0x3f4   :  { %3059 = vst.msk [vmem:[#allocation3 + $0xe0] sm:$0xff] %vm3030_vm8, %v2895_v63  ;;  %3060 = vst.msk [vmem:[#allocation3 + $0xe8] sm:$0xff] %vm3030_vm8, %v2897_v58 }
 0x3f5   :  { %3267 = vrot.lane.b32.xlu0 %v3117_v27, %s9799_s1  ;;  %3269 = vrot.lane.b32.xlu1 %v3118_v26, %s9799_s1  ;;  %v3148_v27 = vld [vmem:[#allocation2 + $0x2da] sm:$0xff]  ;;  %v3149_v26 = vld [vmem:[#allocation2 + $0x2ea] sm:$0xff] }
 0x3f7   :  { %v2899_v57 = vpop.permute.xlu0 %2898  ;;  %v2901_v52 = vpop.permute.xlu1 %2900 }
 0x3f8   :  { %3061 = vst.msk [vmem:[#allocation3 + $0xf0] sm:$0xff] %vm3030_vm8, %v2899_v57  ;;  %3062 = vst.msk [vmem:[#allocation3 + $0xf8] sm:$0xff] %vm3030_vm8, %v2901_v52 }
 0x3f9   :  { %3271 = vrot.lane.b32.xlu0 %v3119_v38, %s9799_s1  ;;  %3273 = vrot.lane.b32.xlu1 %v3120_v24, %s9799_s1  ;;  %v3150_v38 = vld [vmem:[#allocation2 + $0x2f2] sm:$0xff]  ;;  %v3151_v24 = vld [vmem:[#allocation2 + $0x302] sm:$0xff] }
 0x3fb   :  { %v2903_v50 = vpop.permute.xlu0 %2902  ;;  %v2905_v49 = vpop.permute.xlu1 %2904 }
 0x3fc   :  { %3063 = vst.msk [vmem:[#allocation3 + $0x100] sm:$0xff] %vm3030_vm8, %v2903_v50  ;;  %3064 = vst.msk [vmem:[#allocation3 + $0x108] sm:$0xff] %vm3030_vm8, %v2905_v49 }
 0x3fd   :  { %3275 = vrot.lane.b32.xlu0 %v3121_v54, %s9799_s1  ;;  %3277 = vrot.lane.b32.xlu1 %v3122_v0, %s9799_s1  ;;  %v3152_v54 = vld [vmem:[#allocation2 + $0x30a] sm:$0xff]  ;;  %v3153_v0 = vld [vmem:[#allocation2 + $0x31a] sm:$0xff] }
 0x3ff   :  { %v2907_v46 = vpop.permute.xlu0 %2906  ;;  %v2909_v4 = vpop.permute.xlu1 %2908 }
 0x400   :  { %3065 = vst.msk [vmem:[#allocation3 + $0x110] sm:$0xff] %vm3030_vm8, %v2907_v46  ;;  %3066 = vst.msk [vmem:[#allocation3 + $0x118] sm:$0xff] %vm3030_vm8, %v2909_v4 }
 0x401   :  { %3279 = vrot.lane.b32.xlu0 %v3123_v62, %s9799_s1  ;;  %3281 = vrot.lane.b32.xlu1 %v3124_v48, %s9799_s1  ;;  %v3154_v62 = vld [vmem:[#allocation2 + $0x322] sm:$0xff]  ;;  %v3155_v48 = vld [vmem:[#allocation2 + $0x332] sm:$0xff] }
 0x403   :  { %v2911_v43 = vpop.permute.xlu0 %2910  ;;  %v2913_v42 = vpop.permute.xlu1 %2912 }
 0x404   :  { %3067 = vst.msk [vmem:[#allocation3 + $0x120] sm:$0xff] %vm3030_vm8, %v2911_v43  ;;  %3068 = vst.msk [vmem:[#allocation3 + $0x128] sm:$0xff] %vm3030_vm8, %v2913_v42 }
 0x405   :  { %3283 = vrot.lane.b32.xlu0 %v3125_v53, %s9799_s1  ;;  %3285 = vrot.lane.b32.xlu1 %v3126_v5, %s9799_s1  ;;  %v3156_v53 = vld [vmem:[#allocation2 + $0x33a] sm:$0xff]  ;;  %v3157_v5 = vld [vmem:[#allocation2 + $0x34a] sm:$0xff] }
 0x407   :  { %v2915_v1 = vpop.permute.xlu0 %2914  ;;  %v2917_v34 = vpop.permute.xlu1 %2916 }
 0x408   :  { %3069 = vst.msk [vmem:[#allocation3 + $0x130] sm:$0xff] %vm3030_vm8, %v2915_v1  ;;  %3070 = vst.msk [vmem:[#allocation3 + $0x138] sm:$0xff] %vm3030_vm8, %v2917_v34  ;;  %v3158_v1 = vld [vmem:[#allocation2 + $0x352] sm:$0xff] }
 0x409   :  { %3287 = vrot.lane.b32.xlu0 %v3127_v51, %s9799_s1  ;;  %3289 = vrot.lane.b32.xlu1 %v3128_v8, %s9799_s1 }
 0x40b   :  { %v2919_v41 = vpop.permute.xlu0 %2918  ;;  %v2921_v32 = vpop.permute.xlu1 %2920 }
 0x40c   :  { %3071 = vst.msk [vmem:[#allocation3 + $0x140] sm:$0xff] %vm3030_vm8, %v2919_v41  ;;  %3072 = vst.msk [vmem:[#allocation3 + $0x148] sm:$0xff] %vm3030_vm8, %v2921_v32 }
 0x40d   :  { %3291 = vrot.lane.b32.xlu0 %v3129_v35, %s9799_s1  ;;  %3293 = vrot.lane.b32.xlu1 %v3130_v37, %s9799_s1 }
 0x40f   :  { %v2923_v30 = vpop.permute.xlu0 %2922  ;;  %v2925_v21 = vpop.permute.xlu1 %2924 }
 0x410   :  { %3073 = vst.msk [vmem:[#allocation3 + $0x150] sm:$0xff] %vm3030_vm8, %v2923_v30  ;;  %3074 = vst.msk [vmem:[#allocation3 + $0x158] sm:$0xff] %vm3030_vm8, %v2925_v21 }
 0x411   :  { %3295 = vrot.lane.b32.xlu0 %v3131_v39, %s9799_s1  ;;  %3297 = vrot.lane.b32.xlu1 %v3132_v45, %s9799_s1 }
 0x413   :  { %v2927_v19 = vpop.permute.xlu0 %2926  ;;  %v2929_v17 = vpop.permute.xlu1 %2928 }
 0x414   :  { %3075 = vst.msk [vmem:[#allocation3 + $0x160] sm:$0xff] %vm3030_vm8, %v2927_v19  ;;  %3076 = vst.msk [vmem:[#allocation3 + $0x168] sm:$0xff] %vm3030_vm8, %v2929_v17 }
 0x415   :  { %3299 = vrot.lane.b32.xlu0 %v3133_v33, %s9799_s1  ;;  %3301 = vrot.lane.b32.xlu1 %v3134_v31, %s9799_s1 }
 0x417   :  { %v2931_v15 = vpop.permute.xlu0 %2930  ;;  %v2933_v13 = vpop.permute.xlu1 %2932 }
 0x418   :  { %3077 = vst.msk [vmem:[#allocation3 + $0x170] sm:$0xff] %vm3030_vm8, %v2931_v15  ;;  %3078 = vst.msk [vmem:[#allocation3 + $0x178] sm:$0xff] %vm3030_vm8, %v2933_v13 }
 0x419   :  { %3303 = vrot.lane.b32.xlu0 %v3135_v23, %s9799_s1  ;;  %3305 = vrot.lane.b32.xlu1 %v3136_v20, %s9799_s1 }
 0x41b   :  { %v2935_v11 = vpop.permute.xlu0 %2934  ;;  %v2937_v9 = vpop.permute.xlu1 %2936 }
 0x41c   :  { %3079 = vst.msk [vmem:[#allocation3 + $0x180] sm:$0xff] %vm3030_vm8, %v2935_v11  ;;  %3080 = vst.msk [vmem:[#allocation3 + $0x188] sm:$0xff] %vm3030_vm8, %v2937_v9 }
 0x41d   :  { %3307 = vrot.lane.b32.xlu0 %v3137_v18, %s9799_s1  ;;  %3309 = vrot.lane.b32.xlu1 %v3138_v16, %s9799_s1 }
 0x41f   :  { %v2939_v3 = vpop.permute.xlu0 %2938  ;;  %v2941_v7 = vpop.permute.xlu1 %2940 }
 0x420   :  { %3081 = vst.msk [vmem:[#allocation3 + $0x190] sm:$0xff] %vm3030_vm8, %v2939_v3  ;;  %3082 = vst.msk [vmem:[#allocation3 + $0x198] sm:$0xff] %vm3030_vm8, %v2941_v7 }
 0x421   :  { %3311 = vrot.lane.b32.xlu0 %v3139_v14, %s9799_s1  ;;  %3313 = vrot.lane.b32.xlu1 %v3140_v12, %s9799_s1 }
 0x423   :  { %v2943_v36 = vpop.permute.xlu0 %2942  ;;  %v2945_v40 = vpop.permute.xlu1 %2944 }
 0x424   :  { %3083 = vst.msk [vmem:[#allocation3 + $0x1a0] sm:$0xff] %vm3030_vm8, %v2943_v36  ;;  %3084 = vst.msk [vmem:[#allocation3 + $0x1a8] sm:$0xff] %vm3030_vm8, %v2945_v40 }
 0x425   :  { %3315 = vrot.lane.b32.xlu0 %v3141_v2, %s9799_s1  ;;  %3317 = vrot.lane.b32.xlu1 %v3142_v10, %s9799_s1 }
 0x427   :  { %v2947_v44 = vpop.permute.xlu0 %2946  ;;  %v2949_v29 = vpop.permute.xlu1 %2948 }
 0x428   :  { %3085 = vst.msk [vmem:[#allocation3 + $0x1b0] sm:$0xff] %vm3030_vm8, %v2947_v44  ;;  %3086 = vst.msk [vmem:[#allocation3 + $0x1b8] sm:$0xff] %vm3030_vm8, %v2949_v29 }
 0x429   :  { %3319 = vrot.lane.b32.xlu0 %v3143_v60, %s9799_s1  ;;  %3321 = vrot.lane.b32.xlu1 %v3144_v55, %s9799_s1 }
 0x42b   :  { %v2951_v25 = vpop.permute.xlu0 %2950  ;;  %v2953_v28 = vpop.permute.xlu1 %2952 }
 0x42c   :  { %3087 = vst.msk [vmem:[#allocation3 + $0x1c0] sm:$0xff] %vm3030_vm8, %v2951_v25  ;;  %3088 = vst.msk [vmem:[#allocation3 + $0x1c8] sm:$0xff] %vm3030_vm8, %v2953_v28 }
 0x42d   :  { %3323 = vrot.lane.b32.xlu0 %v3145_v61, %s9799_s1  ;;  %3325 = vrot.lane.b32.xlu1 %v3146_v59, %s9799_s1 }
 0x42f   :  { %v2955_v22 = vpop.permute.xlu0 %2954  ;;  %v2957_v63 = vpop.permute.xlu1 %2956 }
 0x430   :  { %3089 = vst.msk [vmem:[#allocation3 + $0x1d0] sm:$0xff] %vm3030_vm8, %v2955_v22  ;;  %3090 = vst.msk [vmem:[#allocation3 + $0x1d8] sm:$0xff] %vm3030_vm8, %v2957_v63 }
 0x431   :  { %3327 = vrot.lane.b32.xlu0 %v3147_v56, %s9799_s1  ;;  %3329 = vrot.lane.b32.xlu1 %v3148_v27, %s9799_s1 }
 0x433   :  { %v2959_v58 = vpop.permute.xlu0 %2958  ;;  %v2961_v57 = vpop.permute.xlu1 %2960 }
 0x434   :  { %3091 = vst.msk [vmem:[#allocation3 + $0x1e0] sm:$0xff] %vm3030_vm8, %v2959_v58  ;;  %3092 = vst.msk [vmem:[#allocation3 + $0x1e8] sm:$0xff] %vm3030_vm8, %v2961_v57 }
 0x435   :  { %3331 = vrot.lane.b32.xlu0 %v3149_v26, %s9799_s1  ;;  %3333 = vrot.lane.b32.xlu1 %v3150_v38, %s9799_s1 }
 0x437   :  { %v2963_v52 = vpop.permute.xlu0 %2962  ;;  %v2965_v50 = vpop.permute.xlu1 %2964 }
 0x438   :  { %3093 = vst.msk [vmem:[#allocation3 + $0x1f0] sm:$0xff] %vm3030_vm8, %v2963_v52  ;;  %3094 = vst.msk [vmem:[#allocation3 + $0x1f8] sm:$0xff] %vm3030_vm8, %v2965_v50 }
 0x439   :  { %3335 = vrot.lane.b32.xlu0 %v3151_v24, %s9799_s1  ;;  %3337 = vrot.lane.b32.xlu1 %v3152_v54, %s9799_s1 }
 0x43b   :  { %v3224_v49 = vpop.permute.xlu0 %3223  ;;  %v3226_v46 = vpop.permute.xlu1 %3225 }
 0x43c   :  { %3416 = vst.msk [vmem:[#allocation3] sm:$0xff] %vm3415_vm10, %v3224_v49  ;;  %3417 = vst.msk [vmem:[#allocation3 + $0x8] sm:$0xff] %vm3415_vm10, %v3226_v46 }
 0x43d   :  { %3339 = vrot.lane.b32.xlu0 %v3153_v0, %s9799_s1  ;;  %3341 = vrot.lane.b32.xlu1 %v3154_v62, %s9799_s1 }
 0x43f   :  { %v3228_v4 = vpop.permute.xlu0 %3227  ;;  %v3230_v43 = vpop.permute.xlu1 %3229 }
 0x440   :  { %3418 = vst.msk [vmem:[#allocation3 + $0x10] sm:$0xff] %vm3415_vm10, %v3228_v4  ;;  %3419 = vst.msk [vmem:[#allocation3 + $0x18] sm:$0xff] %vm3415_vm10, %v3230_v43 }
 0x441   :  { %3343 = vrot.lane.b32.xlu0 %v3155_v48, %s9799_s1  ;;  %3345 = vrot.lane.b32.xlu1 %v3156_v53, %s9799_s1 }
 0x443   :  { %v3232_v42 = vpop.permute.xlu0 %3231  ;;  %v3480_v51 = vld [vmem:[#allocation3] sm:$0xff]  ;;  %v3234_v8 = vpop.permute.xlu1 %3233  ;;  %v3481_v34 = vld [vmem:[#allocation3 + $0x8] sm:$0xff] }
 0x444   :  { %3420 = vst.msk [vmem:[#allocation3 + $0x20] sm:$0xff] %vm3415_vm10, %v3232_v42  ;;  %9560 = vmatprep.mubr.msk.f32.mxu0 %vm3556_vm11, %v3480_v51  ;;  %3421 = vst.msk [vmem:[#allocation3 + $0x28] sm:$0xff] %vm3415_vm10, %v3234_v8 }
 0x445   :  { %3347 = vrot.lane.b32.xlu0 %v3157_v5, %s9799_s1  ;;  %9561 = vmatmul.mubr.msk.f32.vlgmr.msra.gmra.mrb[0].mxu0 %vm3556_vm11, %v3481_v34 }
 0x446   :  { %3349 = vrot.lane.b32.xlu1 %v3158_v1, %s9799_s1 }
 0x447   :  { %v3236_v35 = vpop.permute.xlu0 %3235  ;;  %v3482_v41 = vld [vmem:[#allocation3 + $0x10] sm:$0xff]  ;;  %v3238_v37 = vpop.permute.xlu1 %3237  ;;  %v3483_v32 = vld [vmem:[#allocation3 + $0x18] sm:$0xff] }
 0x448   :  { %3422 = vst.msk [vmem:[#allocation3 + $0x30] sm:$0xff] %vm3415_vm10, %v3236_v35  ;;  %9563 = vmatprep.mubr.msk.f32.mxu0 %vm3556_vm11, %v3482_v41  ;;  %3423 = vst.msk [vmem:[#allocation3 + $0x38] sm:$0xff] %vm3415_vm10, %v3238_v37 }
 0x449   :  { %9564 = vmatmul.mubr.msk.f32.gmra.mrb[2].mxu0 %vm3556_vm11, %v3483_v32 }
 0x44b   :  { %v3240_v39 = vpop.permute.xlu0 %3239  ;;  %v3484_v30 = vld [vmem:[#allocation3 + $0x20] sm:$0xff]  ;;  %v3242_v45 = vpop.permute.xlu1 %3241  ;;  %v3485_v21 = vld [vmem:[#allocation3 + $0x28] sm:$0xff] }
 0x44c   :  { %3424 = vst.msk [vmem:[#allocation3 + $0x40] sm:$0xff] %vm3415_vm10, %v3240_v39  ;;  %9566 = vmatprep.mubr.msk.f32.mxu0 %vm3556_vm11, %v3484_v30  ;;  %3425 = vst.msk [vmem:[#allocation3 + $0x48] sm:$0xff] %vm3415_vm10, %v3242_v45 }
 0x44d   :  { %9567 = vmatmul.mubr.msk.f32.gmra.mrb[4].mxu0 %vm3556_vm11, %v3485_v21 }
 0x44f   :  { %v3244_v33 = vpop.permute.xlu0 %3243  ;;  %v3486_v19 = vld [vmem:[#allocation3 + $0x30] sm:$0xff]  ;;  %v3246_v31 = vpop.permute.xlu1 %3245  ;;  %v3487_v17 = vld [vmem:[#allocation3 + $0x38] sm:$0xff] }
 0x450   :  { %3426 = vst.msk [vmem:[#allocation3 + $0x50] sm:$0xff] %vm3415_vm10, %v3244_v33  ;;  %9569 = vmatprep.mubr.msk.f32.mxu0 %vm3556_vm11, %v3486_v19  ;;  %3427 = vst.msk [vmem:[#allocation3 + $0x58] sm:$0xff] %vm3415_vm10, %v3246_v31 }
 0x451   :  { %9570 = vmatmul.mubr.msk.f32.gmra.mrb[6].mxu0 %vm3556_vm11, %v3487_v17 }
 0x453   :  { %v3248_v23 = vpop.permute.xlu0 %3247  ;;  %v3488_v15 = vld [vmem:[#allocation3 + $0x40] sm:$0xff]  ;;  %v3250_v20 = vpop.permute.xlu1 %3249  ;;  %v3489_v13 = vld [vmem:[#allocation3 + $0x48] sm:$0xff] }
 0x454   :  { %3428 = vst.msk [vmem:[#allocation3 + $0x60] sm:$0xff] %vm3415_vm10, %v3248_v23  ;;  %9572 = vmatprep.mubr.msk.f32.mxu0 %vm3556_vm11, %v3488_v15  ;;  %3429 = vst.msk [vmem:[#allocation3 + $0x68] sm:$0xff] %vm3415_vm10, %v3250_v20 }
 0x455   :  { %9573 = vmatmul.mubr.msk.f32.gmra.mrb[8].mxu0 %vm3556_vm11, %v3489_v13 }
 0x457   :  { %v3252_v18 = vpop.permute.xlu0 %3251  ;;  %v3490_v11 = vld [vmem:[#allocation3 + $0x50] sm:$0xff]  ;;  %v3254_v16 = vpop.permute.xlu1 %3253  ;;  %v3491_v9 = vld [vmem:[#allocation3 + $0x58] sm:$0xff] }
 0x458   :  { %3430 = vst.msk [vmem:[#allocation3 + $0x70] sm:$0xff] %vm3415_vm10, %v3252_v18  ;;  %9575 = vmatprep.mubr.msk.f32.mxu0 %vm3556_vm11, %v3490_v11  ;;  %3431 = vst.msk [vmem:[#allocation3 + $0x78] sm:$0xff] %vm3415_vm10, %v3254_v16 }
 0x459   :  { %9576 = vmatmul.mubr.msk.f32.gmra.mrb[10].mxu0 %vm3556_vm11, %v3491_v9 }
 0x45b   :  { %v3256_v14 = vpop.permute.xlu0 %3255  ;;  %v3492_v3 = vld [vmem:[#allocation3 + $0x60] sm:$0xff]  ;;  %v3258_v12 = vpop.permute.xlu1 %3257  ;;  %v3493_v7 = vld [vmem:[#allocation3 + $0x68] sm:$0xff] }
 0x45c   :  { %3432 = vst.msk [vmem:[#allocation3 + $0x80] sm:$0xff] %vm3415_vm10, %v3256_v14  ;;  %9578 = vmatprep.mubr.msk.f32.mxu0 %vm3556_vm11, %v3492_v3  ;;  %3433 = vst.msk [vmem:[#allocation3 + $0x88] sm:$0xff] %vm3415_vm10, %v3258_v12 }
 0x45d   :  { %9579 = vmatmul.mubr.msk.f32.gmra.mrb[12].mxu0 %vm3556_vm11, %v3493_v7 }
 0x45f   :  { %v3260_v2 = vpop.permute.xlu0 %3259  ;;  %v3494_v36 = vld [vmem:[#allocation3 + $0x70] sm:$0xff]  ;;  %v3262_v10 = vpop.permute.xlu1 %3261  ;;  %v3495_v40 = vld [vmem:[#allocation3 + $0x78] sm:$0xff] }
 0x460   :  { %3434 = vst.msk [vmem:[#allocation3 + $0x90] sm:$0xff] %vm3415_vm10, %v3260_v2  ;;  %9581 = vmatprep.mubr.msk.f32.mxu0 %vm3556_vm11, %v3494_v36  ;;  %3435 = vst.msk [vmem:[#allocation3 + $0x98] sm:$0xff] %vm3415_vm10, %v3262_v10 }
 0x461   :  { %9582 = vmatmul.mubr.msk.f32.gmra.mrb[14].mxu0 %vm3556_vm11, %v3495_v40 }
 0x463   :  { %v3264_v60 = vpop.permute.xlu0 %3263  ;;  %v3496_v44 = vld [vmem:[#allocation3 + $0x80] sm:$0xff]  ;;  %v3266_v55 = vpop.permute.xlu1 %3265  ;;  %v3497_v29 = vld [vmem:[#allocation3 + $0x88] sm:$0xff] }
 0x464   :  { %3436 = vst.msk [vmem:[#allocation3 + $0xa0] sm:$0xff] %vm3415_vm10, %v3264_v60  ;;  %9584 = vmatprep.mubr.msk.f32.mxu0 %vm3556_vm11, %v3496_v44  ;;  %3437 = vst.msk [vmem:[#allocation3 + $0xa8] sm:$0xff] %vm3415_vm10, %v3266_v55 }
 0x465   :  { %9585 = vmatmul.mubr.msk.f32.gmra.mrb[16].mxu0 %vm3556_vm11, %v3497_v29 }
 0x467   :  { %v3268_v61 = vpop.permute.xlu0 %3267  ;;  %v3498_v25 = vld [vmem:[#allocation3 + $0x90] sm:$0xff]  ;;  %v3270_v59 = vpop.permute.xlu1 %3269  ;;  %v3499_v28 = vld [vmem:[#allocation3 + $0x98] sm:$0xff] }
 0x468   :  { %3438 = vst.msk [vmem:[#allocation3 + $0xb0] sm:$0xff] %vm3415_vm10, %v3268_v61  ;;  %9587 = vmatprep.mubr.msk.f32.mxu0 %vm3556_vm11, %v3498_v25  ;;  %3439 = vst.msk [vmem:[#allocation3 + $0xb8] sm:$0xff] %vm3415_vm10, %v3270_v59 }
 0x469   :  { %9588 = vmatmul.mubr.msk.f32.gmra.mrb[18].mxu0 %vm3556_vm11, %v3499_v28 }
 0x46b   :  { %v3272_v56 = vpop.permute.xlu0 %3271  ;;  %v3500_v22 = vld [vmem:[#allocation3 + $0xa0] sm:$0xff]  ;;  %v3274_v27 = vpop.permute.xlu1 %3273  ;;  %v3501_v63 = vld [vmem:[#allocation3 + $0xa8] sm:$0xff] }
 0x46c   :  { %3440 = vst.msk [vmem:[#allocation3 + $0xc0] sm:$0xff] %vm3415_vm10, %v3272_v56  ;;  %9590 = vmatprep.mubr.msk.f32.mxu0 %vm3556_vm11, %v3500_v22  ;;  %3441 = vst.msk [vmem:[#allocation3 + $0xc8] sm:$0xff] %vm3415_vm10, %v3274_v27 }
 0x46d   :  { %9591 = vmatmul.mubr.msk.f32.gmra.mrb[20].mxu0 %vm3556_vm11, %v3501_v63 }
 0x46f   :  { %v3276_v26 = vpop.permute.xlu0 %3275  ;;  %v3502_v58 = vld [vmem:[#allocation3 + $0xb0] sm:$0xff]  ;;  %v3278_v38 = vpop.permute.xlu1 %3277  ;;  %v3503_v57 = vld [vmem:[#allocation3 + $0xb8] sm:$0xff] }
 0x470   :  { %3442 = vst.msk [vmem:[#allocation3 + $0xd0] sm:$0xff] %vm3415_vm10, %v3276_v26  ;;  %9593 = vmatprep.mubr.msk.f32.mxu0 %vm3556_vm11, %v3502_v58  ;;  %3443 = vst.msk [vmem:[#allocation3 + $0xd8] sm:$0xff] %vm3415_vm10, %v3278_v38 }
 0x471   :  { %9594 = vmatmul.mubr.msk.f32.gmra.mrb[22].mxu0 %vm3556_vm11, %v3503_v57 }
 0x473   :  { %v3280_v24 = vpop.permute.xlu0 %3279  ;;  %v3504_v52 = vld [vmem:[#allocation3 + $0xc0] sm:$0xff]  ;;  %v3282_v54 = vpop.permute.xlu1 %3281  ;;  %v3505_v50 = vld [vmem:[#allocation3 + $0xc8] sm:$0xff] }
 0x474   :  { %3444 = vst.msk [vmem:[#allocation3 + $0xe0] sm:$0xff] %vm3415_vm10, %v3280_v24  ;;  %9596 = vmatprep.mubr.msk.f32.mxu0 %vm3556_vm11, %v3504_v52  ;;  %3445 = vst.msk [vmem:[#allocation3 + $0xe8] sm:$0xff] %vm3415_vm10, %v3282_v54 }
 0x475   :  { %9597 = vmatmul.mubr.msk.f32.gmra.mrb[24].mxu0 %vm3556_vm11, %v3505_v50 }
 0x477   :  { %v3284_v0 = vpop.permute.xlu0 %3283  ;;  %v3506_v49 = vld [vmem:[#allocation3 + $0xd0] sm:$0xff]  ;;  %v3286_v62 = vpop.permute.xlu1 %3285  ;;  %v3507_v46 = vld [vmem:[#allocation3 + $0xd8] sm:$0xff] }
 0x478   :  { %3446 = vst.msk [vmem:[#allocation3 + $0xf0] sm:$0xff] %vm3415_vm10, %v3284_v0  ;;  %9599 = vmatprep.mubr.msk.f32.mxu0 %vm3556_vm11, %v3506_v49  ;;  %3447 = vst.msk [vmem:[#allocation3 + $0xf8] sm:$0xff] %vm3415_vm10, %v3286_v62 }
 0x479   :  { %9600 = vmatmul.mubr.msk.f32.gmra.mrb[26].mxu0 %vm3556_vm11, %v3507_v46 }
 0x47b   :  { %v3288_v48 = vpop.permute.xlu0 %3287  ;;  %v3508_v4 = vld [vmem:[#allocation3 + $0xe0] sm:$0xff]  ;;  %v3290_v53 = vpop.permute.xlu1 %3289  ;;  %v3509_v43 = vld [vmem:[#allocation3 + $0xe8] sm:$0xff] }
 0x47c   :  { %3448 = vst.msk [vmem:[#allocation3 + $0x100] sm:$0xff] %vm3415_vm10, %v3288_v48  ;;  %9602 = vmatprep.mubr.msk.f32.mxu0 %vm3556_vm11, %v3508_v4  ;;  %3449 = vst.msk [vmem:[#allocation3 + $0x108] sm:$0xff] %vm3415_vm10, %v3290_v53 }
 0x47d   :  { %9603 = vmatmul.mubr.msk.f32.gmra.mrb[28].mxu0 %vm3556_vm11, %v3509_v43 }
 0x47f   :  { %v3292_v5 = vpop.permute.xlu0 %3291  ;;  %v3510_v42 = vld [vmem:[#allocation3 + $0xf0] sm:$0xff]  ;;  %v3294_v51 = vpop.permute.xlu1 %3293  ;;  %v3511_v1 = vld [vmem:[#allocation3 + $0xf8] sm:$0xff] }
 0x480   :  { %3450 = vst.msk [vmem:[#allocation3 + $0x110] sm:$0xff] %vm3415_vm10, %v3292_v5  ;;  %9605 = vmatprep.mubr.msk.f32.mxu0 %vm3556_vm11, %v3510_v42  ;;  %3451 = vst.msk [vmem:[#allocation3 + $0x118] sm:$0xff] %vm3415_vm10, %v3294_v51  ;;  %v11926_v51 = vld [vmem:[%s16433_s2] ss:$0 sm:$0xff] }
 0x481   :  { %9606 = vmatmul.mubr.msk.f32.gmra.mrb[30].mxu0 %vm3556_vm11, %v3511_v1 }
 0x483   :  { %v3296_v8 = vpop.permute.xlu0 %3295  ;;  %v3512_v34 = vld [vmem:[#allocation3 + $0x100] sm:$0xff]  ;;  %v3298_v35 = vpop.permute.xlu1 %3297  ;;  %v3513_v41 = vld [vmem:[#allocation3 + $0x108] sm:$0xff] }
 0x484   :  { %3452 = vst.msk [vmem:[#allocation3 + $0x120] sm:$0xff] %vm3415_vm10, %v3296_v8  ;;  %9608 = vmatprep.mubr.msk.f32.mxu0 %vm3556_vm11, %v3512_v34  ;;  %3453 = vst.msk [vmem:[#allocation3 + $0x128] sm:$0xff] %vm3415_vm10, %v3298_v35 }
 0x485   :  { %9609 = vmatmul.mubr.msk.f32.gmra.mrb[32].mxu0 %vm3556_vm11, %v3513_v41 }
 0x487   :  { %v3300_v37 = vpop.permute.xlu0 %3299  ;;  %v3514_v32 = vld [vmem:[#allocation3 + $0x110] sm:$0xff]  ;;  %v3302_v39 = vpop.permute.xlu1 %3301  ;;  %v3515_v30 = vld [vmem:[#allocation3 + $0x118] sm:$0xff] }
 0x488   :  { %3454 = vst.msk [vmem:[#allocation3 + $0x130] sm:$0xff] %vm3415_vm10, %v3300_v37  ;;  %9611 = vmatprep.mubr.msk.f32.mxu0 %vm3556_vm11, %v3514_v32  ;;  %3455 = vst.msk [vmem:[#allocation3 + $0x138] sm:$0xff] %vm3415_vm10, %v3302_v39 }
 0x489   :  { %9612 = vmatmul.mubr.msk.f32.gmra.mrb[34].mxu0 %vm3556_vm11, %v3515_v30 }
 0x48b   :  { %v3304_v45 = vpop.permute.xlu0 %3303  ;;  %v3516_v21 = vld [vmem:[#allocation3 + $0x120] sm:$0xff]  ;;  %v3306_v33 = vpop.permute.xlu1 %3305  ;;  %v3517_v19 = vld [vmem:[#allocation3 + $0x128] sm:$0xff] }
 0x48c   :  { %3456 = vst.msk [vmem:[#allocation3 + $0x140] sm:$0xff] %vm3415_vm10, %v3304_v45  ;;  %9614 = vmatprep.mubr.msk.f32.mxu0 %vm3556_vm11, %v3516_v21  ;;  %3457 = vst.msk [vmem:[#allocation3 + $0x148] sm:$0xff] %vm3415_vm10, %v3306_v33 }
 0x48d   :  { %9615 = vmatmul.mubr.msk.f32.gmra.mrb[36].mxu0 %vm3556_vm11, %v3517_v19 }
 0x48f   :  { %v3308_v31 = vpop.permute.xlu0 %3307  ;;  %v3518_v17 = vld [vmem:[#allocation3 + $0x130] sm:$0xff]  ;;  %v3310_v23 = vpop.permute.xlu1 %3309  ;;  %v3519_v15 = vld [vmem:[#allocation3 + $0x138] sm:$0xff] }
 0x490   :  { %3458 = vst.msk [vmem:[#allocation3 + $0x150] sm:$0xff] %vm3415_vm10, %v3308_v31  ;;  %9617 = vmatprep.mubr.msk.f32.mxu0 %vm3556_vm11, %v3518_v17  ;;  %3459 = vst.msk [vmem:[#allocation3 + $0x158] sm:$0xff] %vm3415_vm10, %v3310_v23 }
 0x491   :  { %9618 = vmatmul.mubr.msk.f32.gmra.mrb[38].mxu0 %vm3556_vm11, %v3519_v15 }
 0x493   :  { %v3312_v20 = vpop.permute.xlu0 %3311  ;;  %v3520_v13 = vld [vmem:[#allocation3 + $0x140] sm:$0xff]  ;;  %v3314_v18 = vpop.permute.xlu1 %3313  ;;  %v3521_v11 = vld [vmem:[#allocation3 + $0x148] sm:$0xff] }
 0x494   :  { %3460 = vst.msk [vmem:[#allocation3 + $0x160] sm:$0xff] %vm3415_vm10, %v3312_v20  ;;  %9620 = vmatprep.mubr.msk.f32.mxu0 %vm3556_vm11, %v3520_v13  ;;  %3461 = vst.msk [vmem:[#allocation3 + $0x168] sm:$0xff] %vm3415_vm10, %v3314_v18 }
 0x495   :  { %9621 = vmatmul.mubr.msk.f32.gmra.mrb[40].mxu0 %vm3556_vm11, %v3521_v11 }
 0x497   :  { %v3316_v16 = vpop.permute.xlu0 %3315  ;;  %v3522_v9 = vld [vmem:[#allocation3 + $0x150] sm:$0xff]  ;;  %v3318_v14 = vpop.permute.xlu1 %3317  ;;  %v3523_v3 = vld [vmem:[#allocation3 + $0x158] sm:$0xff] }
 0x498   :  { %3462 = vst.msk [vmem:[#allocation3 + $0x170] sm:$0xff] %vm3415_vm10, %v3316_v16  ;;  %9623 = vmatprep.mubr.msk.f32.mxu0 %vm3556_vm11, %v3522_v9  ;;  %3463 = vst.msk [vmem:[#allocation3 + $0x178] sm:$0xff] %vm3415_vm10, %v3318_v14 }
 0x499   :  { %9624 = vmatmul.mubr.msk.f32.gmra.mrb[42].mxu0 %vm3556_vm11, %v3523_v3 }
 0x49b   :  { %v3320_v12 = vpop.permute.xlu0 %3319  ;;  %v3524_v7 = vld [vmem:[#allocation3 + $0x160] sm:$0xff]  ;;  %v3322_v2 = vpop.permute.xlu1 %3321  ;;  %v3525_v36 = vld [vmem:[#allocation3 + $0x168] sm:$0xff] }
 0x49c   :  { %3464 = vst.msk [vmem:[#allocation3 + $0x180] sm:$0xff] %vm3415_vm10, %v3320_v12  ;;  %9626 = vmatprep.mubr.msk.f32.mxu0 %vm3556_vm11, %v3524_v7  ;;  %3465 = vst.msk [vmem:[#allocation3 + $0x188] sm:$0xff] %vm3415_vm10, %v3322_v2 }
 0x49d   :  { %9627 = vmatmul.mubr.msk.f32.gmra.mrb[44].mxu0 %vm3556_vm11, %v3525_v36 }
 0x49f   :  { %v3324_v10 = vpop.permute.xlu0 %3323  ;;  %v3526_v40 = vld [vmem:[#allocation3 + $0x170] sm:$0xff]  ;;  %v3326_v60 = vpop.permute.xlu1 %3325  ;;  %v3527_v44 = vld [vmem:[#allocation3 + $0x178] sm:$0xff] }
 0x4a0   :  { %3466 = vst.msk [vmem:[#allocation3 + $0x190] sm:$0xff] %vm3415_vm10, %v3324_v10  ;;  %9629 = vmatprep.mubr.msk.f32.mxu0 %vm3556_vm11, %v3526_v40  ;;  %3467 = vst.msk [vmem:[#allocation3 + $0x198] sm:$0xff] %vm3415_vm10, %v3326_v60 }
 0x4a1   :  { %9630 = vmatmul.mubr.msk.f32.gmra.mrb[46].mxu0 %vm3556_vm11, %v3527_v44 }
 0x4a3   :  { %v3328_v55 = vpop.permute.xlu0 %3327  ;;  %v3528_v29 = vld [vmem:[#allocation3 + $0x180] sm:$0xff]  ;;  %v3330_v61 = vpop.permute.xlu1 %3329  ;;  %v3529_v25 = vld [vmem:[#allocation3 + $0x188] sm:$0xff] }
 0x4a4   :  { %3468 = vst.msk [vmem:[#allocation3 + $0x1a0] sm:$0xff] %vm3415_vm10, %v3328_v55  ;;  %9632 = vmatprep.mubr.msk.f32.mxu0 %vm3556_vm11, %v3528_v29  ;;  %3469 = vst.msk [vmem:[#allocation3 + $0x1a8] sm:$0xff] %vm3415_vm10, %v3330_v61 }
 0x4a5   :  { %9633 = vmatmul.mubr.msk.f32.gmra.mrb[48].mxu0 %vm3556_vm11, %v3529_v25 }
 0x4a7   :  { %v3332_v59 = vpop.permute.xlu0 %3331  ;;  %v3530_v28 = vld [vmem:[#allocation3 + $0x190] sm:$0xff]  ;;  %v3334_v56 = vpop.permute.xlu1 %3333  ;;  %v3531_v22 = vld [vmem:[#allocation3 + $0x198] sm:$0xff] }
 0x4a8   :  { %3470 = vst.msk [vmem:[#allocation3 + $0x1b0] sm:$0xff] %vm3415_vm10, %v3332_v59  ;;  %9635 = vmatprep.mubr.msk.f32.mxu0 %vm3556_vm11, %v3530_v28  ;;  %3471 = vst.msk [vmem:[#allocation3 + $0x1b8] sm:$0xff] %vm3415_vm10, %v3334_v56 }
 0x4a9   :  { %9636 = vmatmul.mubr.msk.f32.gmra.mrb[50].mxu0 %vm3556_vm11, %v3531_v22 }
 0x4ab   :  { %v3336_v27 = vpop.permute.xlu0 %3335  ;;  %v3532_v63 = vld [vmem:[#allocation3 + $0x1a0] sm:$0xff]  ;;  %v3338_v26 = vpop.permute.xlu1 %3337  ;;  %v3533_v58 = vld [vmem:[#allocation3 + $0x1a8] sm:$0xff] }
 0x4ac   :  { %3472 = vst.msk [vmem:[#allocation3 + $0x1c0] sm:$0xff] %vm3415_vm10, %v3336_v27  ;;  %9638 = vmatprep.mubr.msk.f32.mxu0 %vm3556_vm11, %v3532_v63  ;;  %3473 = vst.msk [vmem:[#allocation3 + $0x1c8] sm:$0xff] %vm3415_vm10, %v3338_v26 }
 0x4ad   :  { %9639 = vmatmul.mubr.msk.f32.gmra.mrb[52].mxu0 %vm3556_vm11, %v3533_v58 }
 0x4af   :  { %v3340_v38 = vpop.permute.xlu0 %3339  ;;  %v3534_v57 = vld [vmem:[#allocation3 + $0x1b0] sm:$0xff]  ;;  %v3342_v24 = vpop.permute.xlu1 %3341  ;;  %v3535_v52 = vld [vmem:[#allocation3 + $0x1b8] sm:$0xff] }
 0x4b0   :  { %3474 = vst.msk [vmem:[#allocation3 + $0x1d0] sm:$0xff] %vm3415_vm10, %v3340_v38  ;;  %9641 = vmatprep.mubr.msk.f32.mxu0 %vm3556_vm11, %v3534_v57  ;;  %3475 = vst.msk [vmem:[#allocation3 + $0x1d8] sm:$0xff] %vm3415_vm10, %v3342_v24 }
 0x4b1   :  { %9642 = vmatmul.mubr.msk.f32.gmra.mrb[54].mxu0 %vm3556_vm11, %v3535_v52 }
 0x4b3   :  { %v3344_v54 = vpop.permute.xlu0 %3343  ;;  %v3536_v50 = vld [vmem:[#allocation3 + $0x1c0] sm:$0xff]  ;;  %v3346_v0 = vpop.permute.xlu1 %3345  ;;  %v3537_v49 = vld [vmem:[#allocation3 + $0x1c8] sm:$0xff] }
 0x4b4   :  { %3476 = vst.msk [vmem:[#allocation3 + $0x1e0] sm:$0xff] %vm3415_vm10, %v3344_v54  ;;  %9644 = vmatprep.mubr.msk.f32.mxu0 %vm3556_vm11, %v3536_v50  ;;  %3477 = vst.msk [vmem:[#allocation3 + $0x1e8] sm:$0xff] %vm3415_vm10, %v3346_v0 }
 0x4b5   :  { %9645 = vmatmul.mubr.msk.f32.gmra.mrb[56].mxu0 %vm3556_vm11, %v3537_v49 }
 0x4b7   :  { %v3348_v62 = vpop.permute.xlu0 %3347  ;;  %v3538_v46 = vld [vmem:[#allocation3 + $0x1d0] sm:$0xff]  ;;  %v3539_v4 = vld [vmem:[#allocation3 + $0x1d8] sm:$0xff] }
 0x4b8   :  { %3478 = vst.msk [vmem:[#allocation3 + $0x1f0] sm:$0xff] %vm3415_vm10, %v3348_v62  ;;  %v3350_v48 = vpop.permute.xlu1 %3349  ;;  %9647 = vmatprep.mubr.msk.f32.mxu0 %vm3556_vm11, %v3538_v46 }
 0x4b9   :  { %3479 = vst.msk [vmem:[#allocation3 + $0x1f8] sm:$0xff] %vm3415_vm10, %v3350_v48  ;;  %9648 = vmatmul.mubr.msk.f32.gmra.mrb[58].mxu0 %vm3556_vm11, %v3539_v4 }
 0x4bb   :  { %v3540_v53 = vld [vmem:[#allocation3 + $0x1e0] sm:$0xff]  ;;  %v3541_v43 = vld [vmem:[#allocation3 + $0x1e8] sm:$0xff] }
 0x4bc   :  { %9650 = vmatprep.mubr.msk.f32.mxu0 %vm3556_vm11, %v3540_v53 }
 0x4bd   :  { %9651 = vmatmul.mubr.msk.f32.gmra.mrb[60].mxu0 %vm3556_vm11, %v3541_v43 }
 0x4bf   :  { %v3542_v5 = vld [vmem:[#allocation3 + $0x1f0] sm:$0xff] }
 0x4c0   :  { %9653 = vmatprep.mubr.msk.f32.mxu0 %vm3556_vm11, %v3542_v5  ;;  %v3543_v42 = vld [vmem:[#allocation3 + $0x1f8] sm:$0xff] }
 0x4c1   :  { %9654 = vmatmul.mubr.msk.f32.gmra.mrb[62].mxu0 %vm3556_vm11, %v3543_v42 }
 0x518   :  { %v9562_v1 = vpop.f32.mrb[0].mxu0 }
 0x519   :  { %v11929_v8 = vadd.f32 %v9562_v1, %v11926_v51  ;;  %v3819_v34 = vpop.f32.mrb[1].mxu0 }
 0x51a   :  { %v11932_v35 = vadd.f32 %v11926_v51, %v3819_v34 }
 0x51b   :  { %v4273_v41 = vmul.f32 %v11929_v8, %v11929_v8  ;;  %v4139_v37 = vsel %vm96_vm0, %v11929_v8, 0.0 }
 0x51c   :  { %v4138_v32 = vsel %vm96_vm0, %v11932_v35, 0.0  ;;  %v4272_v39 = vmul.f32 %v11932_v35, %v11932_v35  ;;  %v9565_v30 = vpop.f32.mrb[2].mxu0 }
 0x51d   :  { %v11943_v45 = vadd.f32 %v9565_v30, %v11926_v51  ;;  %v3829_v21 = vpop.f32.mrb[3].mxu0  ;;  %v4337_v33 = vsel %vm96_vm0, %v4273_v41, 0.0  ;;  %v4140_v17 = vadd.f32 %v4139_v37, %v4138_v32 }
 0x51e   :  { %v4336_v19 = vsel %vm96_vm0, %v4272_v39, 0.0  ;;  %v11948_v31 = vadd.f32 %v11926_v51, %v3829_v21 }
 0x51f   :  { %v4275_v23 = vmul.f32 %v11943_v45, %v11943_v45  ;;  %v4338_v18 = vadd.f32 %v4337_v33, %v4336_v19  ;;  %v4143_v14 = vsel %vm96_vm0, %v11943_v45, 0.0 }
 0x520   :  { %v4141_v15 = vsel %vm96_vm0, %v11948_v31, 0.0  ;;  %v4274_v20 = vmul.f32 %v11948_v31, %v11948_v31  ;;  %v9568_v13 = vpop.f32.mrb[4].mxu0 }
 0x521   :  { %v4142_v11 = vadd.f32 %v4141_v15, %v4140_v17  ;;  %v11957_v16 = vadd.f32 %v9568_v13, %v11926_v51  ;;  %v3839_v9 = vpop.f32.mrb[5].mxu0  ;;  %v4341_v36 = vsel %vm96_vm0, %v4275_v23, 0.0 }
 0x522   :  { %v4339_v3 = vsel %vm96_vm0, %v4274_v20, 0.0  ;;  %v11963_v12 = vadd.f32 %v11926_v51, %v3839_v9 }
 0x523   :  { %v4144_v7 = vadd.f32 %v4143_v14, %v4142_v11  ;;  %v4340_v2 = vadd.f32 %v4339_v3, %v4338_v18  ;;  %v4277_v10 = vmul.f32 %v11957_v16, %v11957_v16  ;;  %v4147_v59 = vsel %vm96_vm0, %v11957_v16, 0.0 }
 0x524   :  { %v4145_v40 = vsel %vm96_vm0, %v11963_v12, 0.0  ;;  %v4276_v60 = vmul.f32 %v11963_v12, %v11963_v12  ;;  %v9571_v44 = vpop.f32.mrb[6].mxu0 }
 0x525   :  { %v4342_v55 = vadd.f32 %v4341_v36, %v4340_v2  ;;  %v4146_v29 = vadd.f32 %v4145_v40, %v4144_v7  ;;  %v11973_v61 = vadd.f32 %v9571_v44, %v11926_v51  ;;  %v3849_v25 = vpop.f32.mrb[7].mxu0  ;;  %v4345_v63 = vsel %vm96_vm0, %v4277_v10, 0.0 }
 0x526   :  { %v4343_v28 = vsel %vm96_vm0, %v4276_v60, 0.0  ;;  %v11979_v56 = vadd.f32 %v11926_v51, %v3849_v25 }
 0x527   :  { %v4344_v22 = vadd.f32 %v4343_v28, %v4342_v55  ;;  %v4148_v27 = vadd.f32 %v4147_v59, %v4146_v29  ;;  %v4279_v26 = vmul.f32 %v11973_v61, %v11973_v61  ;;  %v4151_v0 = vsel %vm96_vm0, %v11973_v61, 0.0 }
 0x528   :  { %v4149_v58 = vsel %vm96_vm0, %v11979_v56, 0.0  ;;  %v4278_v38 = vmul.f32 %v11979_v56, %v11979_v56  ;;  %v9574_v57 = vpop.f32.mrb[8].mxu0 }
 0x529   :  { %v4150_v24 = vadd.f32 %v4149_v58, %v4148_v27  ;;  %v4346_v52 = vadd.f32 %v4345_v63, %v4344_v22  ;;  %v11989_v54 = vadd.f32 %v9574_v57, %v11926_v51  ;;  %v3859_v50 = vpop.f32.mrb[9].mxu0  ;;  %v4349_v4 = vsel %vm96_vm0, %v4279_v26, 0.0 }
 0x52a   :  { %v4347_v49 = vsel %vm96_vm0, %v4278_v38, 0.0  ;;  %v11995_v62 = vadd.f32 %v11926_v51, %v3859_v50 }
 0x52b   :  { %v4348_v46 = vadd.f32 %v4347_v49, %v4346_v52  ;;  %v4152_v48 = vadd.f32 %v4151_v0, %v4150_v24  ;;  %v4281_v53 = vmul.f32 %v11989_v54, %v11989_v54  ;;  %v4155_v32 = vsel %vm96_vm0, %v11989_v54, 0.0 }
 0x52c   :  { %v4153_v43 = vsel %vm96_vm0, %v11995_v62, 0.0  ;;  %v4280_v5 = vmul.f32 %v11995_v62, %v11995_v62  ;;  %v9577_v42 = vpop.f32.mrb[10].mxu0 }
 0x52d   :  { %v4154_v1 = vadd.f32 %v4153_v43, %v4152_v48  ;;  %v4350_v34 = vadd.f32 %v4349_v4, %v4348_v46  ;;  %v12005_v41 = vadd.f32 %v9577_v42, %v11926_v51  ;;  %v3869_v37 = vpop.f32.mrb[11].mxu0  ;;  %v4353_v19 = vsel %vm96_vm0, %v4281_v53, 0.0 }
 0x52e   :  { %v4351_v39 = vsel %vm96_vm0, %v4280_v5, 0.0  ;;  %v12011_v30 = vadd.f32 %v11926_v51, %v3869_v37 }
 0x52f   :  { %v4352_v21 = vadd.f32 %v4351_v39, %v4350_v34  ;;  %v4156_v33 = vadd.f32 %v4155_v32, %v4154_v1  ;;  %v4283_v17 = vmul.f32 %v12005_v41, %v12005_v41  ;;  %v4159_v14 = vsel %vm96_vm0, %v12005_v41, 0.0 }
 0x530   :  { %v4157_v23 = vsel %vm96_vm0, %v12011_v30, 0.0  ;;  %v4282_v15 = vmul.f32 %v12011_v30, %v12011_v30  ;;  %v9580_v20 = vpop.f32.mrb[12].mxu0 }
 0x531   :  { %v4158_v13 = vadd.f32 %v4157_v23, %v4156_v33  ;;  %v4354_v18 = vadd.f32 %v4353_v19, %v4352_v21  ;;  %v12021_v11 = vadd.f32 %v9580_v20, %v11926_v51  ;;  %v3879_v9 = vpop.f32.mrb[13].mxu0  ;;  %v4357_v10 = vsel %vm96_vm0, %v4283_v17, 0.0 }
 0x532   :  { %v4355_v3 = vsel %vm96_vm0, %v4282_v15, 0.0  ;;  %v12027_v7 = vadd.f32 %v11926_v51, %v3879_v9 }
 0x533   :  { %v4356_v2 = vadd.f32 %v4355_v3, %v4354_v18  ;;  %v4160_v36 = vadd.f32 %v4159_v14, %v4158_v13  ;;  %v4285_v40 = vmul.f32 %v12021_v11, %v12021_v11  ;;  %v4163_v22 = vsel %vm96_vm0, %v12021_v11, 0.0 }
 0x534   :  { %v4161_v60 = vsel %vm96_vm0, %v12027_v7, 0.0  ;;  %v4284_v44 = vmul.f32 %v12027_v7, %v12027_v7  ;;  %v9583_v55 = vpop.f32.mrb[14].mxu0 }
 0x535   :  { %v4162_v29 = vadd.f32 %v4161_v60, %v4160_v36  ;;  %v4358_v25 = vadd.f32 %v4357_v10, %v4356_v2  ;;  %v12037_v59 = vadd.f32 %v9583_v55, %v11926_v51  ;;  %v3889_v28 = vpop.f32.mrb[15].mxu0  ;;  %v4361_v38 = vsel %vm96_vm0, %v4285_v40, 0.0 }
 0x536   :  { %v4359_v27 = vsel %vm96_vm0, %v4284_v44, 0.0  ;;  %v12043_v63 = vadd.f32 %v11926_v51, %v3889_v28 }
 0x537   :  { %v4360_v26 = vadd.f32 %v4359_v27, %v4358_v25  ;;  %v4164_v58 = vadd.f32 %v4163_v22, %v4162_v29  ;;  %v4287_v57 = vmul.f32 %v12037_v59, %v12037_v59  ;;  %v4167_v4 = vsel %vm96_vm0, %v12037_v59, 0.0 }
 0x538   :  { %v4165_v24 = vsel %vm96_vm0, %v12043_v63, 0.0  ;;  %v4286_v52 = vmul.f32 %v12043_v63, %v12043_v63  ;;  %v9586_v50 = vpop.f32.mrb[16].mxu0 }
 0x539   :  { %v4166_v0 = vadd.f32 %v4165_v24, %v4164_v58  ;;  %v4362_v49 = vadd.f32 %v4361_v38, %v4360_v26  ;;  %v12053_v46 = vadd.f32 %v9586_v50, %v11926_v51  ;;  %v3899_v48 = vpop.f32.mrb[17].mxu0  ;;  %v4365_v1 = vsel %vm96_vm0, %v4287_v57, 0.0 }
 0x53a   :  { %v4363_v53 = vsel %vm96_vm0, %v4286_v52, 0.0  ;;  %v12059_v43 = vadd.f32 %v11926_v51, %v3899_v48 }
 0x53b   :  { %v4364_v5 = vadd.f32 %v4363_v53, %v4362_v49  ;;  %v4168_v42 = vadd.f32 %v4167_v4, %v4166_v0  ;;  %v4289_v34 = vmul.f32 %v12053_v46, %v12053_v46  ;;  %v4171_v23 = vsel %vm96_vm0, %v12053_v46, 0.0 }
 0x53c   :  { %v4169_v37 = vsel %vm96_vm0, %v12059_v43, 0.0  ;;  %v4288_v32 = vmul.f32 %v12059_v43, %v12059_v43  ;;  %v9589_v39 = vpop.f32.mrb[18].mxu0 }
 0x53d   :  { %v4170_v21 = vadd.f32 %v4169_v37, %v4168_v42  ;;  %v4366_v33 = vadd.f32 %v4365_v1, %v4364_v5  ;;  %v12069_v19 = vadd.f32 %v9589_v39, %v11926_v51  ;;  %v3909_v17 = vpop.f32.mrb[19].mxu0  ;;  %v4369_v9 = vsel %vm96_vm0, %v4289_v34, 0.0 }
 0x53e   :  { %v4367_v15 = vsel %vm96_vm0, %v4288_v32, 0.0  ;;  %v12075_v20 = vadd.f32 %v11926_v51, %v3909_v17 }
 0x53f   :  { %v4368_v13 = vadd.f32 %v4367_v15, %v4366_v33  ;;  %v4172_v18 = vadd.f32 %v4171_v23, %v4170_v21  ;;  %v4291_v14 = vmul.f32 %v12069_v19, %v12069_v19  ;;  %v4175_v55 = vsel %vm96_vm0, %v12069_v19, 0.0 }
 0x540   :  { %v4173_v3 = vsel %vm96_vm0, %v12075_v20, 0.0  ;;  %v4290_v2 = vmul.f32 %v12075_v20, %v12075_v20  ;;  %v9592_v36 = vpop.f32.mrb[20].mxu0 }
 0x541   :  { %v4174_v10 = vadd.f32 %v4173_v3, %v4172_v18  ;;  %v4370_v40 = vadd.f32 %v4369_v9, %v4368_v13  ;;  %v12085_v60 = vadd.f32 %v9592_v36, %v11926_v51  ;;  %v3919_v44 = vpop.f32.mrb[21].mxu0  ;;  %v4373_v27 = vsel %vm96_vm0, %v4291_v14, 0.0 }
 0x542   :  { %v4371_v29 = vsel %vm96_vm0, %v4290_v2, 0.0  ;;  %v12091_v25 = vadd.f32 %v11926_v51, %v3919_v44 }
 0x543   :  { %v4372_v28 = vadd.f32 %v4371_v29, %v4370_v40  ;;  %v4176_v22 = vadd.f32 %v4175_v55, %v4174_v10  ;;  %v4293_v26 = vmul.f32 %v12085_v60, %v12085_v60  ;;  %v4179_v49 = vsel %vm96_vm0, %v12085_v60, 0.0 }
 0x544   :  { %v4177_v58 = vsel %vm96_vm0, %v12091_v25, 0.0  ;;  %v4292_v38 = vmul.f32 %v12091_v25, %v12091_v25  ;;  %v9595_v57 = vpop.f32.mrb[22].mxu0 }
 0x545   :  { %v4178_v24 = vadd.f32 %v4177_v58, %v4176_v22  ;;  %v4374_v52 = vadd.f32 %v4373_v27, %v4372_v28  ;;  %v12101_v50 = vadd.f32 %v9595_v57, %v11926_v51  ;;  %v3929_v0 = vpop.f32.mrb[23].mxu0  ;;  %v4377_v42 = vsel %vm96_vm0, %v4293_v26, 0.0 }
 0x546   :  { %v4375_v48 = vsel %vm96_vm0, %v4292_v38, 0.0  ;;  %v12107_v4 = vadd.f32 %v11926_v51, %v3929_v0 }
 0x547   :  { %v4376_v53 = vadd.f32 %v4375_v48, %v4374_v52  ;;  %v4180_v5 = vadd.f32 %v4179_v49, %v4178_v24  ;;  %v4295_v1 = vmul.f32 %v12101_v50, %v12101_v50  ;;  %v4183_v23 = vsel %vm96_vm0, %v12101_v50, 0.0  ;;  %v4875_v49 = vld [vmem:[#allocation2 + $0x1] sm:$0xff] }
 0x548   :  { %v4181_v34 = vsel %vm96_vm0, %v12107_v4, 0.0  ;;  %v4294_v37 = vmul.f32 %v12107_v4, %v12107_v4  ;;  %v9598_v32 = vpop.f32.mrb[24].mxu0  ;;  %5003 = vrot.lane.b32.xlu0 %v4875_v49, %s9792_s11 }
 0x549   :  { %v4182_v39 = vadd.f32 %v4181_v34, %v4180_v5  ;;  %v4378_v21 = vadd.f32 %v4377_v42, %v4376_v53  ;;  %v12117_v33 = vadd.f32 %v9598_v32, %v11926_v51  ;;  %v3939_v17 = vpop.f32.mrb[25].mxu0  ;;  %v4381_v14 = vsel %vm96_vm0, %v4295_v1, 0.0 }
 0x54a   :  { %v4379_v15 = vsel %vm96_vm0, %v4294_v37, 0.0  ;;  %v12123_v13 = vadd.f32 %v11926_v51, %v3939_v17 }
 0x54b   :  { %v4380_v18 = vadd.f32 %v4379_v15, %v4378_v21  ;;  %v4184_v9 = vadd.f32 %v4183_v23, %v4182_v39  ;;  %v4297_v3 = vmul.f32 %v12117_v33, %v12117_v33  ;;  %v4187_v28 = vsel %vm96_vm0, %v12117_v33, 0.0 }
 0x54c   :  { %v4185_v2 = vsel %vm96_vm0, %v12123_v13, 0.0  ;;  %v4296_v36 = vmul.f32 %v12123_v13, %v12123_v13  ;;  %v9601_v10 = vpop.f32.mrb[26].mxu0 }
 0x54d   :  { %v4186_v40 = vadd.f32 %v4185_v2, %v4184_v9  ;;  %v4382_v44 = vadd.f32 %v4381_v14, %v4380_v18  ;;  %v12133_v55 = vadd.f32 %v9601_v10, %v11926_v51  ;;  %v3949_v29 = vpop.f32.mrb[27].mxu0  ;;  %v4385_v38 = vsel %vm96_vm0, %v4297_v3, 0.0 }
 0x54e   :  { %v4383_v22 = vsel %vm96_vm0, %v4296_v36, 0.0  ;;  %v12139_v27 = vadd.f32 %v11926_v51, %v3949_v29 }
 0x54f   :  { %v4384_v26 = vadd.f32 %v4383_v22, %v4382_v44  ;;  %v4188_v58 = vadd.f32 %v4187_v28, %v4186_v40  ;;  %v4299_v57 = vmul.f32 %v12133_v55, %v12133_v55  ;;  %v4191_v1 = vsel %vm96_vm0, %v12133_v55, 0.0 }
 0x550   :  { %v4189_v24 = vsel %vm96_vm0, %v12139_v27, 0.0  ;;  %v4298_v52 = vmul.f32 %v12139_v27, %v12139_v27  ;;  %v9604_v0 = vpop.f32.mrb[28].mxu0 }
 0x551   :  { %v4190_v48 = vadd.f32 %v4189_v24, %v4188_v58  ;;  %v4386_v53 = vadd.f32 %v4385_v38, %v4384_v26  ;;  %v12149_v5 = vadd.f32 %v9604_v0, %v11926_v51  ;;  %v3959_v42 = vpop.f32.mrb[29].mxu0  ;;  %v4389_v21 = vsel %vm96_vm0, %v4299_v57, 0.0 }
 0x552   :  { %v4387_v34 = vsel %vm96_vm0, %v4298_v52, 0.0  ;;  %v12156_v37 = vadd.f32 %v11926_v51, %v3959_v42 }
 0x553   :  { %v4388_v32 = vadd.f32 %v4387_v34, %v4386_v53  ;;  %v4192_v39 = vadd.f32 %v4191_v1, %v4190_v48  ;;  %v4301_v17 = vmul.f32 %v12149_v5, %v12149_v5  ;;  %v4195_v36 = vsel %vm96_vm0, %v12149_v5, 0.0 }
 0x554   :  { %v4193_v23 = vsel %vm96_vm0, %v12156_v37, 0.0  ;;  %v4300_v15 = vmul.f32 %v12156_v37, %v12156_v37  ;;  %v9607_v18 = vpop.f32.mrb[30].mxu0 }
 0x555   :  { %v4194_v9 = vadd.f32 %v4193_v23, %v4192_v39  ;;  %v4390_v14 = vadd.f32 %v4389_v21, %v4388_v32  ;;  %v12166_v3 = vadd.f32 %v9607_v18, %v11926_v51  ;;  %v3969_v2 = vpop.f32.mrb[31].mxu0  ;;  %v4393_v28 = vsel %vm96_vm0, %v4301_v17, 0.0 }
 0x556   :  { %v4391_v10 = vsel %vm96_vm0, %v4300_v15, 0.0  ;;  %v12172_v40 = vadd.f32 %v11926_v51, %v3969_v2 }
 0x557   :  { %v4392_v44 = vadd.f32 %v4391_v10, %v4390_v14  ;;  %v4196_v29 = vadd.f32 %v4195_v36, %v4194_v9  ;;  %v4303_v22 = vmul.f32 %v12166_v3, %v12166_v3  ;;  %v4199_v49 = vsel %vm96_vm0, %v12166_v3, 0.0 }
 0x558   :  { %v4197_v26 = vsel %vm96_vm0, %v12172_v40, 0.0  ;;  %v4302_v58 = vmul.f32 %v12172_v40, %v12172_v40  ;;  %v9610_v38 = vpop.f32.mrb[32].mxu0 }
 0x559   :  { %v4198_v57 = vadd.f32 %v4197_v26, %v4196_v29  ;;  %v4394_v24 = vadd.f32 %v4393_v28, %v4392_v44  ;;  %v12182_v52 = vadd.f32 %v9610_v38, %v11926_v51  ;;  %v3979_v0 = vpop.f32.mrb[33].mxu0  ;;  %v4397_v34 = vsel %vm96_vm0, %v4303_v22, 0.0  ;;  %v4876_v38 = vld [vmem:[#allocation2 + $0x9] sm:$0xff] }
 0x55a   :  { %v4395_v48 = vsel %vm96_vm0, %v4302_v58, 0.0  ;;  %v12188_v53 = vadd.f32 %v11926_v51, %v3979_v0  ;;  %5005 = vrot.lane.b32.xlu1 %v4876_v38, %s9792_s11 }
 0x55b   :  { %v4396_v42 = vadd.f32 %v4395_v48, %v4394_v24  ;;  %v4200_v1 = vadd.f32 %v4199_v49, %v4198_v57  ;;  %v4305_v32 = vmul.f32 %v12182_v52, %v12182_v52  ;;  %v4203_v14 = vsel %vm96_vm0, %v12182_v52, 0.0 }
 0x55c   :  { %v4201_v39 = vsel %vm96_vm0, %v12188_v53, 0.0  ;;  %v4304_v21 = vmul.f32 %v12188_v53, %v12188_v53  ;;  %v9613_v17 = vpop.f32.mrb[34].mxu0 }
 0x55d   :  { %v4202_v23 = vadd.f32 %v4201_v39, %v4200_v1  ;;  %v4398_v15 = vadd.f32 %v4397_v34, %v4396_v42  ;;  %v12198_v18 = vadd.f32 %v9613_v17, %v11926_v51  ;;  %v3989_v9 = vpop.f32.mrb[35].mxu0  ;;  %v4401_v29 = vsel %vm96_vm0, %v4305_v32, 0.0 }
 0x55e   :  { %v4399_v2 = vsel %vm96_vm0, %v4304_v21, 0.0  ;;  %v12204_v36 = vadd.f32 %v11926_v51, %v3989_v9 }
 0x55f   :  { %v4400_v10 = vadd.f32 %v4399_v2, %v4398_v15  ;;  %v4204_v44 = vadd.f32 %v4203_v14, %v4202_v23  ;;  %v4307_v28 = vmul.f32 %v12198_v18, %v12198_v18  ;;  %v4207_v48 = vsel %vm96_vm0, %v12198_v18, 0.0 }
 0x560   :  { %v4205_v22 = vsel %vm96_vm0, %v12204_v36, 0.0  ;;  %v4306_v26 = vmul.f32 %v12204_v36, %v12204_v36  ;;  %v9616_v58 = vpop.f32.mrb[36].mxu0 }
 0x561   :  { %v4206_v57 = vadd.f32 %v4205_v22, %v4204_v44  ;;  %v4402_v24 = vadd.f32 %v4401_v29, %v4400_v10  ;;  %v12214_v0 = vadd.f32 %v9616_v58, %v11926_v51  ;;  %v3999_v49 = vpop.f32.mrb[37].mxu0  ;;  %v4405_v39 = vsel %vm96_vm0, %v4307_v28, 0.0 }
 0x562   :  { %v4403_v42 = vsel %vm96_vm0, %v4306_v26, 0.0  ;;  %v12221_v1 = vadd.f32 %v11926_v51, %v3999_v49 }
 0x563   :  { %v4404_v34 = vadd.f32 %v4403_v42, %v4402_v24  ;;  %v4208_v32 = vadd.f32 %v4207_v48, %v4206_v57  ;;  %v4309_v21 = vmul.f32 %v12214_v0, %v12214_v0  ;;  %v4211_v44 = vsel %vm96_vm0, %v12214_v0, 0.0 }
 0x564   :  { %v4209_v17 = vsel %vm96_vm0, %v12221_v1, 0.0  ;;  %v4308_v23 = vmul.f32 %v12221_v1, %v12221_v1  ;;  %v9619_v15 = vpop.f32.mrb[38].mxu0 }
 0x565   :  { %v4210_v9 = vadd.f32 %v4209_v17, %v4208_v32  ;;  %v4406_v14 = vadd.f32 %v4405_v39, %v4404_v34  ;;  %v12231_v2 = vadd.f32 %v9619_v15, %v11926_v51  ;;  %v4009_v10 = vpop.f32.mrb[39].mxu0  ;;  %v4409_v58 = vsel %vm96_vm0, %v4309_v21, 0.0 }
 0x566   :  { %v4407_v29 = vsel %vm96_vm0, %v4308_v23, 0.0  ;;  %v12237_v28 = vadd.f32 %v11926_v51, %v4009_v10 }
 0x567   :  { %16643 = vst [vmem:[#allocation64_spill] sm:$0xff] %v12231_v2  ;;  %v4408_v22 = vadd.f32 %v4407_v29, %v4406_v14  ;;  %v4212_v26 = vadd.f32 %v4211_v44, %v4210_v9  ;;  %v4311_v38 = vmul.f32 %v12231_v2, %v12231_v2  ;;  %v4215_v39 = vsel %vm96_vm0, %v12231_v2, 0.0 }
 0x568   :  { %v4213_v57 = vsel %vm96_vm0, %v12237_v28, 0.0  ;;  %v4310_v24 = vmul.f32 %v12237_v28, %v12237_v28  ;;  %v9622_v49 = vpop.f32.mrb[40].mxu0 }
 0x569   :  { %v4214_v48 = vadd.f32 %v4213_v57, %v4212_v26  ;;  %v4410_v42 = vadd.f32 %v4409_v58, %v4408_v22  ;;  %v12247_v34 = vadd.f32 %v9622_v49, %v11926_v51  ;;  %v4019_v32 = vpop.f32.mrb[41].mxu0  ;;  %v4413_v9 = vsel %vm96_vm0, %v4311_v38, 0.0 }
 0x56a   :  { %v4411_v21 = vsel %vm96_vm0, %v4310_v24, 0.0  ;;  %v12253_v17 = vadd.f32 %v11926_v51, %v4019_v32 }
 0x56b   :  { %16644 = vst [vmem:[#allocation65_spill] sm:$0xff] %v12247_v34  ;;  %v4412_v23 = vadd.f32 %v4411_v21, %v4410_v42  ;;  %v4216_v15 = vadd.f32 %v4215_v39, %v4214_v48  ;;  %v4313_v14 = vmul.f32 %v12247_v34, %v12247_v34  ;;  %v4219_v24 = vsel %vm96_vm0, %v12247_v34, 0.0 }
 0x56c   :  { %16645 = vst [vmem:[#allocation66_spill] sm:$0xff] %v12253_v17  ;;  %v4217_v10 = vsel %vm96_vm0, %v12253_v17, 0.0  ;;  %v4312_v44 = vmul.f32 %v12253_v17, %v12253_v17  ;;  %v9625_v29 = vpop.f32.mrb[42].mxu0 }
 0x56d   :  { %v4218_v22 = vadd.f32 %v4217_v10, %v4216_v15  ;;  %v4414_v26 = vadd.f32 %v4413_v9, %v4412_v23  ;;  %v12263_v58 = vadd.f32 %v9625_v29, %v11926_v51  ;;  %v4029_v57 = vpop.f32.mrb[43].mxu0  ;;  %v4417_v32 = vsel %vm96_vm0, %v4313_v14, 0.0 }
 0x56e   :  { %v4415_v38 = vsel %vm96_vm0, %v4312_v44, 0.0  ;;  %v12269_v49 = vadd.f32 %v11926_v51, %v4029_v57 }
 0x56f   :  { %16646 = vst [vmem:[#allocation67_spill] sm:$0xff] %v12263_v58  ;;  %v4416_v48 = vadd.f32 %v4415_v38, %v4414_v26  ;;  %v4220_v42 = vadd.f32 %v4219_v24, %v4218_v22  ;;  %v4315_v39 = vmul.f32 %v12263_v58, %v12263_v58  ;;  %v4223_v22 = vsel %vm96_vm0, %v12263_v58, 0.0 }
 0x570   :  { %16647 = vst [vmem:[#allocation68_spill] sm:$0xff] %v12269_v49  ;;  %v4221_v21 = vsel %vm96_vm0, %v12269_v49, 0.0  ;;  %v4314_v23 = vmul.f32 %v12269_v49, %v12269_v49  ;;  %v9628_v15 = vpop.f32.mrb[44].mxu0 }
 0x571   :  { %v4222_v9 = vadd.f32 %v4221_v21, %v4220_v42  ;;  %v4418_v10 = vadd.f32 %v4417_v32, %v4416_v48  ;;  %v12279_v44 = vadd.f32 %v9628_v15, %v11926_v51  ;;  %v4039_v29 = vpop.f32.mrb[45].mxu0  ;;  %v4421_v38 = vsel %vm96_vm0, %v4315_v39, 0.0 }
 0x572   :  { %v4419_v14 = vsel %vm96_vm0, %v4314_v23, 0.0  ;;  %v12285_v26 = vadd.f32 %v11926_v51, %v4039_v29 }
 0x573   :  { %16648 = vst [vmem:[#allocation69_spill] sm:$0xff] %v12279_v44  ;;  %v4420_v57 = vadd.f32 %v4419_v14, %v4418_v10  ;;  %v4224_v24 = vadd.f32 %v4223_v22, %v4222_v9  ;;  %v4317_v42 = vmul.f32 %v12279_v44, %v12279_v44  ;;  %v4227_v9 = vsel %vm96_vm0, %v12279_v44, 0.0 }
 0x574   :  { %16649 = vst [vmem:[#allocation74_spill] sm:$0xff] %v12285_v26  ;;  %v4225_v48 = vsel %vm96_vm0, %v12285_v26, 0.0  ;;  %v4316_v32 = vmul.f32 %v12285_v26, %v12285_v26  ;;  %v9631_v21 = vpop.f32.mrb[46].mxu0 }
 0x575   :  { %v4226_v15 = vadd.f32 %v4225_v48, %v4224_v24  ;;  %v4422_v47 = vadd.f32 %v4421_v38, %v4420_v57  ;;  %v12295_v23 = vadd.f32 %v9631_v21, %v11926_v51  ;;  %v4049_v29 = vpop.f32.mrb[47].mxu0  ;;  %v4425_v6 = vsel %vm96_vm0, %v4317_v42, 0.0 }
 0x576   :  { %v4423_v39 = vsel %vm96_vm0, %v4316_v32, 0.0  ;;  %v12301_v10 = vadd.f32 %v11926_v51, %v4049_v29 }
 0x577   :  { %16650 = vst [vmem:[#allocation75_spill] sm:$0xff] %v12295_v23  ;;  %v4424_v22 = vadd.f32 %v4423_v39, %v4422_v47  ;;  %v4228_v14 = vadd.f32 %v4227_v9, %v4226_v15  ;;  %v4319_v24 = vmul.f32 %v12295_v23, %v12295_v23  ;;  %v4231_v47 = vsel %vm96_vm0, %v12295_v23, 0.0 }
 0x578   :  { %16651 = vst [vmem:[#allocation76_spill] sm:$0xff] %v12301_v10  ;;  %v4229_v57 = vsel %vm96_vm0, %v12301_v10, 0.0  ;;  %v4318_v38 = vmul.f32 %v12301_v10, %v12301_v10  ;;  %v9634_v48 = vpop.f32.mrb[48].mxu0 }
 0x579   :  { %v4230_v21 = vadd.f32 %v4229_v57, %v4228_v14  ;;  %v4426_v44 = vadd.f32 %v4425_v6, %v4424_v22  ;;  %v12311_v32 = vadd.f32 %v9634_v48, %v11926_v51  ;;  %v4059_v29 = vpop.f32.mrb[49].mxu0  ;;  %v4429_v26 = vsel %vm96_vm0, %v4319_v24, 0.0 }
 0x57a   :  { %v4427_v42 = vsel %vm96_vm0, %v4318_v38, 0.0  ;;  %v12317_v15 = vadd.f32 %v11926_v51, %v4059_v29 }
 0x57b   :  { %16652 = vst [vmem:[#allocation77_spill] sm:$0xff] %v12311_v32  ;;  %v4428_v9 = vadd.f32 %v4427_v42, %v4426_v44  ;;  %v4232_v39 = vadd.f32 %v4231_v47, %v4230_v21  ;;  %v4321_v14 = vmul.f32 %v12311_v32, %v12311_v32  ;;  %v4235_v44 = vsel %vm96_vm0, %v12311_v32, 0.0 }
 0x57c   :  { %16653 = vst [vmem:[#allocation78_spill] sm:$0xff] %v12317_v15  ;;  %v4233_v6 = vsel %vm96_vm0, %v12317_v15, 0.0  ;;  %v4320_v22 = vmul.f32 %v12317_v15, %v12317_v15  ;;  %v9637_v57 = vpop.f32.mrb[50].mxu0 }
 0x57d   :  { %v4234_v48 = vadd.f32 %v4233_v6, %v4232_v39  ;;  %v4430_v23 = vadd.f32 %v4429_v26, %v4428_v9  ;;  %v12327_v38 = vadd.f32 %v9637_v57, %v11926_v51  ;;  %v4069_v29 = vpop.f32.mrb[51].mxu0  ;;  %v4433_v10 = vsel %vm96_vm0, %v4321_v14, 0.0 }
 0x57e   :  { %v4431_v24 = vsel %vm96_vm0, %v4320_v22, 0.0  ;;  %v12333_v21 = vadd.f32 %v11926_v51, %v4069_v29 }
 0x57f   :  { %16654 = vst [vmem:[#allocation79_spill] sm:$0xff] %v12327_v38  ;;  %v4432_v47 = vadd.f32 %v4431_v24, %v4430_v23  ;;  %v4236_v42 = vadd.f32 %v4235_v44, %v4234_v48  ;;  %v4323_v39 = vmul.f32 %v12327_v38, %v12327_v38  ;;  %v4239_v23 = vsel %vm96_vm0, %v12327_v38, 0.0 }
 0x580   :  { %16655 = vst [vmem:[#allocation80_spill] sm:$0xff] %v12333_v21  ;;  %v4237_v26 = vsel %vm96_vm0, %v12333_v21, 0.0  ;;  %v4322_v9 = vmul.f32 %v12333_v21, %v12333_v21  ;;  %v9640_v6 = vpop.f32.mrb[52].mxu0 }
 0x581   :  { %v4238_v57 = vadd.f32 %v4237_v26, %v4236_v42  ;;  %v4434_v32 = vadd.f32 %v4433_v10, %v4432_v47  ;;  %v12343_v22 = vadd.f32 %v9640_v6, %v11926_v51  ;;  %v4079_v29 = vpop.f32.mrb[53].mxu0  ;;  %v4437_v15 = vsel %vm96_vm0, %v4323_v39, 0.0 }
 0x582   :  { %v4435_v14 = vsel %vm96_vm0, %v4322_v9, 0.0  ;;  %v12349_v48 = vadd.f32 %v11926_v51, %v4079_v29 }
 0x583   :  { %16656 = vst [vmem:[#allocation81_spill] sm:$0xff] %v12343_v22  ;;  %v4436_v44 = vadd.f32 %v4435_v14, %v4434_v32  ;;  %v4240_v24 = vadd.f32 %v4239_v23, %v4238_v57  ;;  %v4325_v42 = vmul.f32 %v12343_v22, %v12343_v22  ;;  %v4243_v32 = vsel %vm96_vm0, %v12343_v22, 0.0 }
 0x584   :  { %16657 = vst [vmem:[#allocation82_spill] sm:$0xff] %v12349_v48  ;;  %v4241_v10 = vsel %vm96_vm0, %v12349_v48, 0.0  ;;  %v4324_v47 = vmul.f32 %v12349_v48, %v12349_v48  ;;  %v9643_v26 = vpop.f32.mrb[54].mxu0 }
 0x585   :  { %v4242_v6 = vadd.f32 %v4241_v10, %v4240_v24  ;;  %v4438_v38 = vadd.f32 %v4437_v15, %v4436_v44  ;;  %v12359_v9 = vadd.f32 %v9643_v26, %v11926_v51  ;;  %v4089_v29 = vpop.f32.mrb[55].mxu0  ;;  %v4441_v21 = vsel %vm96_vm0, %v4325_v42, 0.0 }
 0x586   :  { %v4439_v39 = vsel %vm96_vm0, %v4324_v47, 0.0  ;;  %v12365_v57 = vadd.f32 %v11926_v51, %v4089_v29 }
 0x587   :  { %16658 = vst [vmem:[#allocation83_spill] sm:$0xff] %v12359_v9  ;;  %v4440_v23 = vadd.f32 %v4439_v39, %v4438_v38  ;;  %v4244_v14 = vadd.f32 %v4243_v32, %v4242_v6  ;;  %v4327_v24 = vmul.f32 %v12359_v9, %v12359_v9  ;;  %v4247_v38 = vsel %vm96_vm0, %v12359_v9, 0.0 }
 0x588   :  { %16659 = vst [vmem:[#allocation84_spill] sm:$0xff] %v12365_v57  ;;  %v4245_v15 = vsel %vm96_vm0, %v12365_v57, 0.0  ;;  %v4326_v44 = vmul.f32 %v12365_v57, %v12365_v57  ;;  %v9646_v10 = vpop.f32.mrb[56].mxu0 }
 0x589   :  { %v4246_v26 = vadd.f32 %v4245_v15, %v4244_v14  ;;  %v4442_v22 = vadd.f32 %v4441_v21, %v4440_v23  ;;  %v12375_v47 = vadd.f32 %v9646_v10, %v11926_v51  ;;  %v4099_v29 = vpop.f32.mrb[57].mxu0  ;;  %v4445_v48 = vsel %vm96_vm0, %v4327_v24, 0.0 }
 0x58a   :  { %v4443_v42 = vsel %vm96_vm0, %v4326_v44, 0.0  ;;  %v12381_v6 = vadd.f32 %v11926_v51, %v4099_v29 }
 0x58b   :  { %16660 = vst [vmem:[#allocation85_spill] sm:$0xff] %v12375_v47  ;;  %v4444_v32 = vadd.f32 %v4443_v42, %v4442_v22  ;;  %v4248_v39 = vadd.f32 %v4247_v38, %v4246_v26  ;;  %v4329_v14 = vmul.f32 %v12375_v47, %v12375_v47  ;;  %v4251_v22 = vsel %vm96_vm0, %v12375_v47, 0.0 }
 0x58c   :  { %16661 = vst [vmem:[#allocation86_spill] sm:$0xff] %v12381_v6  ;;  %v4249_v21 = vsel %vm96_vm0, %v12381_v6, 0.0  ;;  %v4328_v23 = vmul.f32 %v12381_v6, %v12381_v6  ;;  %v9649_v15 = vpop.f32.mrb[58].mxu0 }
 0x58d   :  { %v4250_v10 = vadd.f32 %v4249_v21, %v4248_v39  ;;  %v4446_v9 = vadd.f32 %v4445_v48, %v4444_v32  ;;  %v12391_v44 = vadd.f32 %v9649_v15, %v11926_v51  ;;  %v4109_v29 = vpop.f32.mrb[59].mxu0  ;;  %v4449_v57 = vsel %vm96_vm0, %v4329_v14, 0.0 }
 0x58e   :  { %v4447_v24 = vsel %vm96_vm0, %v4328_v23, 0.0  ;;  %v12397_v26 = vadd.f32 %v11926_v51, %v4109_v29 }
 0x58f   :  { %16662 = vst [vmem:[#allocation87_spill] sm:$0xff] %v12391_v44  ;;  %v4448_v38 = vadd.f32 %v4447_v24, %v4446_v9  ;;  %v4252_v42 = vadd.f32 %v4251_v22, %v4250_v10  ;;  %v4331_v39 = vmul.f32 %v12391_v44, %v12391_v44  ;;  %v4255_v9 = vsel %vm96_vm0, %v12391_v44, 0.0 }
 0x590   :  { %16663 = vst [vmem:[#allocation88_spill] sm:$0xff] %v12397_v26  ;;  %v4253_v48 = vsel %vm96_vm0, %v12397_v26, 0.0  ;;  %v4330_v32 = vmul.f32 %v12397_v26, %v12397_v26  ;;  %v9652_v21 = vpop.f32.mrb[60].mxu0 }
 0x591   :  { %v4254_v15 = vadd.f32 %v4253_v48, %v4252_v42  ;;  %v4450_v47 = vadd.f32 %v4449_v57, %v4448_v38  ;;  %v12407_v23 = vadd.f32 %v9652_v21, %v11926_v51  ;;  %v4119_v29 = vpop.f32.mrb[61].mxu0  ;;  %v4453_v6 = vsel %vm96_vm0, %v4331_v39, 0.0 }
 0x592   :  { %v4451_v14 = vsel %vm96_vm0, %v4330_v32, 0.0  ;;  %v12413_v10 = vadd.f32 %v11926_v51, %v4119_v29 }
 0x593   :  { %16664 = vst [vmem:[#allocation89_spill] sm:$0xff] %v12407_v23  ;;  %v4452_v22 = vadd.f32 %v4451_v14, %v4450_v47  ;;  %v4256_v24 = vadd.f32 %v4255_v9, %v4254_v15  ;;  %v4333_v42 = vmul.f32 %v12407_v23, %v12407_v23  ;;  %v4259_v47 = vsel %vm96_vm0, %v12407_v23, 0.0 }
 0x594   :  { %16665 = vst [vmem:[#allocation90_spill] sm:$0xff] %v12413_v10  ;;  %v4257_v57 = vsel %vm96_vm0, %v12413_v10, 0.0  ;;  %v4332_v38 = vmul.f32 %v12413_v10, %v12413_v10  ;;  %v9655_v48 = vpop.f32.mrb[62].mxu0 }
 0x595   :  { %v4258_v21 = vadd.f32 %v4257_v57, %v4256_v24  ;;  %v4454_v44 = vadd.f32 %v4453_v6, %v4452_v22  ;;  %v12423_v32 = vadd.f32 %v9655_v48, %v11926_v51  ;;  %v4129_v29 = vpop.f32.mrb[63].mxu0  ;;  %v4457_v26 = vsel %vm96_vm0, %v4333_v42, 0.0 }
 0x596   :  { %v4455_v39 = vsel %vm96_vm0, %v4332_v38, 0.0  ;;  %v4130_v15 = vadd.f32 %v11926_v51, %v4129_v29 }
 0x597   :  { %16666 = vst [vmem:[#allocation91_spill] sm:$0xff] %v12423_v32  ;;  %v4456_v9 = vadd.f32 %v4455_v39, %v4454_v44  ;;  %v4260_v14 = vadd.f32 %v4259_v47, %v4258_v21  ;;  %v4335_v10 = vmul.f32 %v12423_v32, %v12423_v32  ;;  %v4263_v48 = vsel %vm96_vm0, %v12423_v32, 0.0 }
 0x598   :  { %v4261_v6 = vsel %vm96_vm0, %v4130_v15, 0.0  ;;  %v4334_v22 = vmul.f32 %v4130_v15, %v4130_v15 }
 0x599   :  { %v4262_v24 = vadd.f32 %v4261_v6, %v4260_v14  ;;  %v4458_v57 = vadd.f32 %v4457_v26, %v4456_v9  ;;  %v4461_v51 = vsel %vm96_vm0, %v4335_v10, 0.0  ;;  %v4480_v10 = vlaneseq }
 0x59a   :  { %v4459_v23 = vsel %vm96_vm0, %v4334_v22, 0.0 }
 0x59b   :  { %v4264_v38 = vadd.f32 %v4263_v48, %v4262_v24  ;;  %v4460_v58 = vadd.f32 %v4459_v23, %v4458_v57  ;;  %v4481_v57 = vshrl.u32 %v4480_v10, 7 }
 0x59d   :  { %v4265_v44 = vrot.slane %v4264_v38, 4  ;;  %v4462_v21 = vadd.f32 %v4461_v51, %v4460_v58  ;;  %v4472_v58 = vld [vmem:[%s16434_s3] sm:$0x1]  ;;  %v12440_v48 = vsub.s32 0, %v4481_v57  ;;  %v16674_v57 = vld [vmem:[#allocation69_spill] sm:$0xff] }
 0x59f   :  { %v4266_v42 = vadd.f32 %v4265_v44, %v4264_v38  ;;  %v4463_v29 = vrot.slane %v4462_v21, 4  ;;  %16667 = vst [vmem:[#allocation92_spill] sm:$0xff] %v12440_v48 }
 0x5a1   :  { %v4267_v47 = vrot.slane %v4266_v42, 2  ;;  %v4464_v39 = vadd.f32 %v4463_v29, %v4462_v21 }
 0x5a3   :  { %v4268_v49 = vadd.f32 %v4267_v47, %v4266_v42  ;;  %v4465_v34 = vrot.slane %v4464_v39, 2 }
 0x5a5   :  { %v4269_v17 = vrot.slane %v4268_v49, 1  ;;  %v4466_v14 = vadd.f32 %v4465_v34, %v4464_v39  ;;  %v4476_v34 = vld [vmem:[%s16435_s4] sm:$0x1] }
 0x5a7   :  { %v4270_v26 = vadd.f32 %v4269_v17, %v4268_v49  ;;  %v4467_v9 = vrot.slane %v4466_v14, 1 }
 0x5a9   :  { %v4271_v6 = vmul.f32 0.001953125, %v4270_v26  ;;  %v4468_v32 = vadd.f32 %v4467_v9, %v4466_v14  ;;  %v16668_v26 = vld [vmem:[#allocation64_spill] sm:$0xff]  ;;  %v16669_v9 = vld [vmem:[#allocation66_spill] sm:$0xff] }
 0x5ab   :  { %v4469_v2 = vmul.f32 0.001953125, %v4468_v32  ;;  %v4470_v22 = vmul.f32 %v4271_v6, %v4271_v6 }
 0x5ad   :  { %v4471_v24 = vsub.f32 %v4469_v2, %v4470_v22  ;;  %v16671_v22 = vld [vmem:[#allocation68_spill] sm:$0xff] }
 0x5af   :  { %v4473_v23 = vadd.f32 1e-05, %v4471_v24  ;;  %v16672_v24 = vld [vmem:[#allocation67_spill] sm:$0xff] }
 0x5b1   :  { %9787 = vrsqrt.f32 %v4473_v23  ;;  %v16673_v23 = vld [vmem:[#allocation74_spill] sm:$0xff] }
 0x5bb   :  { %v9788_v38 = vpop.eup %9787 }
 0x5bc   :  { %v4475_v51 = vmul.f32 %v9788_v38, %v4472_v58  ;;  %v16675_v38 = vld [vmem:[#allocation76_spill] sm:$0xff] }
 0x5be   :  { %v4477_v17 = vmul.f32 %v4475_v51, %v4271_v6  ;;  %v12446_v49 = vrot.slane %v4475_v51, %v12440_v48  ;;  %v16670_v6 = vld [vmem:[#allocation65_spill] sm:$0xff] }
 0x5c0   :  { %v4478_v2 = vsub.f32 %v4476_v34, %v4477_v17  ;;  %v4547_v32 = vmul.f32 %v12446_v49, %v4130_v15  ;;  %v12451_v44 = vmul.f32 %v12446_v49, %v11932_v35  ;;  %v12455_v21 = vmul.f32 %v12446_v49, %v11929_v8  ;;  %v16676_v34 = vld [vmem:[#allocation75_spill] sm:$0xff] }
 0x5c1   :  { %v12459_v42 = vmul.f32 %v12446_v49, %v11948_v31  ;;  %v12463_v29 = vmul.f32 %v12446_v49, %v11943_v45  ;;  %v12467_v47 = vmul.f32 %v12446_v49, %v11963_v12  ;;  %v12471_v35 = vmul.f32 %v12446_v49, %v11957_v16 }
 0x5c2   :  { %v12474_v15 = vrot.slane %v4478_v2, %v12440_v48  ;;  %v12478_v8 = vmul.f32 %v12446_v49, %v11979_v56  ;;  %v12482_v31 = vmul.f32 %v12446_v49, %v11973_v61  ;;  %v12486_v45 = vmul.f32 %v12446_v49, %v11995_v62  ;;  %v16677_v2 = vld [vmem:[#allocation78_spill] sm:$0xff] }
 0x5c3   :  { %v12490_v12 = vmul.f32 %v12446_v49, %v11989_v54  ;;  %v12494_v16 = vmul.f32 %v12446_v49, %v12011_v30  ;;  %v12498_v56 = vmul.f32 %v12446_v49, %v12005_v41  ;;  %v12502_v61 = vmul.f32 %v12446_v49, %v12027_v7  ;;  %v16690_v48 = vld [vmem:[#allocation86_spill] sm:$0xff] }
 0x5c4   :  { %v4617_v39 = vadd.f32 %v12474_v15, %v4547_v32  ;;  %v12507_v62 = vmul.f32 %v12446_v49, %v12021_v11  ;;  %v12511_v54 = vmul.f32 %v12446_v49, %v12043_v63  ;;  %v12515_v30 = vmul.f32 %v12446_v49, %v12037_v59 }
 0x5c5   :  { %v12519_v41 = vmul.f32 %v12446_v49, %v12059_v43  ;;  %v12523_v7 = vmul.f32 %v12446_v49, %v12053_v46  ;;  %v12527_v11 = vmul.f32 %v12446_v49, %v12075_v20  ;;  %v12531_v63 = vmul.f32 %v12446_v49, %v12069_v19 }
 0x5c6   :  { %v4681_v14 = vmax.f32 %v4617_v39, 0.0  ;;  %v12535_v59 = vmul.f32 %v12446_v49, %v12091_v25  ;;  %v12539_v43 = vmul.f32 %v12446_v49, %v12085_v60  ;;  %v12543_v46 = vmul.f32 %v12446_v49, %v12107_v4  ;;  %v16678_v39 = vld [vmem:[#allocation77_spill] sm:$0xff] }
 0x5c7   :  { %v12547_v20 = vmul.f32 %v12446_v49, %v12101_v50  ;;  %v12551_v19 = vmul.f32 %v12446_v49, %v12123_v13  ;;  %v12555_v25 = vmul.f32 %v12446_v49, %v12117_v33  ;;  %v12559_v60 = vmul.f32 %v12446_v49, %v12139_v27 }
 0x5c8   :  { %v12563_v4 = vmul.f32 %v12446_v49, %v12133_v55  ;;  %v12567_v50 = vmul.f32 %v12446_v49, %v12156_v37  ;;  %v12571_v13 = vmul.f32 %v12446_v49, %v12149_v5  ;;  %v12575_v33 = vmul.f32 %v12446_v49, %v12172_v40  ;;  %4745 = vst.msk [vmem:[#allocation2 + $0x331] sm:$0xff] %vm96_vm0, %v4681_v14 }
 0x5c9   :  { %v12580_v27 = vmul.f32 %v12446_v49, %v12166_v3  ;;  %v12584_v55 = vmul.f32 %v12446_v49, %v12188_v53  ;;  %v12588_v37 = vmul.f32 %v12446_v49, %v12182_v52  ;;  %v12592_v5 = vmul.f32 %v12446_v49, %v12204_v36 }
 0x5ca   :  { %v12596_v40 = vmul.f32 %v12446_v49, %v12198_v18  ;;  %v12600_v3 = vmul.f32 %v12446_v49, %v12221_v1  ;;  %v12604_v53 = vmul.f32 %v12446_v49, %v12214_v0  ;;  %v12608_v52 = vmul.f32 %v12446_v49, %v12237_v28 }
 0x5cb   :  { %v12612_v36 = vmul.f32 %v12446_v49, %v16668_v26  ;;  %v12616_v18 = vmul.f32 %v12446_v49, %v16669_v9  ;;  %v12620_v1 = vmul.f32 %v12446_v49, %v16670_v6  ;;  %v12624_v0 = vmul.f32 %v12446_v49, %v16671_v22  ;;  %v16679_v26 = vld [vmem:[#allocation80_spill] sm:$0xff]  ;;  %v16680_v6 = vld [vmem:[#allocation79_spill] sm:$0xff] }
 0x5cc   :  { %v12628_v28 = vmul.f32 %v12446_v49, %v16672_v24  ;;  %v12632_v10 = vmul.f32 %v12446_v49, %v16673_v23  ;;  %v12636_v58 = vmul.f32 %v12446_v49, %v16674_v57  ;;  %v12640_v51 = vmul.f32 %v12446_v49, %v16675_v38  ;;  %v16682_v24 = vld [vmem:[#allocation82_spill] sm:$0xff]  ;;  %v16684_v57 = vld [vmem:[#allocation81_spill] sm:$0xff] }
 0x5cd   :  { %v12644_v17 = vmul.f32 %v12446_v49, %v16676_v34  ;;  %v12648_v32 = vmul.f32 %v12446_v49, %v16677_v2  ;;  %v12652_v14 = vmul.f32 %v12446_v49, %v16678_v39  ;;  %v12656_v9 = vmul.f32 %v12446_v49, %v16679_v26  ;;  %v16686_v34 = vld [vmem:[#allocation84_spill] sm:$0xff]  ;;  %v16688_v39 = vld [vmem:[#allocation83_spill] sm:$0xff] }
 0x5ce   :  { %v12660_v22 = vmul.f32 %v12446_v49, %v16680_v6  ;;  %v12664_v23 = vmul.f32 %v12446_v49, %v16682_v24  ;;  %v12668_v38 = vmul.f32 %v12446_v49, %v16684_v57  ;;  %v12672_v2 = vmul.f32 %v12446_v49, %v16686_v34 }
 0x5cf   :  { %v12676_v26 = vmul.f32 %v12446_v49, %v16688_v39  ;;  %v12680_v6 = vmul.f32 %v12446_v49, %v16690_v48 }
 0x5d0   :  { %16681 = vst [vmem:[#allocation64_spill] sm:$0xff] %v12660_v22  ;;  %16683 = vst [vmem:[#allocation66_spill] sm:$0xff] %v12664_v23  ;;  %v16692_v22 = vld [vmem:[#allocation85_spill] sm:$0xff]  ;;  %v16693_v23 = vld [vmem:[#allocation88_spill] sm:$0xff] }
 0x5d1   :  { %16685 = vst [vmem:[#allocation65_spill] sm:$0xff] %v12668_v38  ;;  %16687 = vst [vmem:[#allocation68_spill] sm:$0xff] %v12672_v2  ;;  %v12684_v24 = vmul.f32 %v12446_v49, %v16692_v22  ;;  %v12688_v57 = vmul.f32 %v12446_v49, %v16693_v23  ;;  %v16694_v38 = vld [vmem:[#allocation87_spill] sm:$0xff]  ;;  %v16695_v2 = vld [vmem:[#allocation90_spill] sm:$0xff]  ;;  %v12708_v23 = vadd.f32 %v12474_v15, %v12451_v44 }
 0x5d2   :  { %16689 = vst [vmem:[#allocation67_spill] sm:$0xff] %v12676_v26  ;;  %16691 = vst [vmem:[#allocation74_spill] sm:$0xff] %v12680_v6  ;;  %v12692_v34 = vmul.f32 %v12446_v49, %v16694_v38  ;;  %v12696_v39 = vmul.f32 %v12446_v49, %v16695_v2  ;;  %v16696_v26 = vld [vmem:[#allocation89_spill] sm:$0xff]  ;;  %v16697_v6 = vld [vmem:[#allocation91_spill] sm:$0xff]  ;;  %v12712_v38 = vadd.f32 %v12474_v15, %v12455_v21 }
 0x5d3   :  { %v12700_v48 = vmul.f32 %v12446_v49, %v16696_v26  ;;  %v12704_v22 = vmul.f32 %v12446_v49, %v16697_v6  ;;  %v12716_v2 = vadd.f32 %v12474_v15, %v12459_v42  ;;  %v12720_v26 = vadd.f32 %v12474_v15, %v12463_v29  ;;  %v4747_v6 = vld [vmem:[#allocation2] sm:$0xff] }
 0x5d4   :  { %v12724_v49 = vadd.f32 %v12474_v15, %v12467_v47  ;;  %v12728_v44 = vadd.f32 %v12474_v15, %v12471_v35  ;;  %v12732_v21 = vadd.f32 %v12474_v15, %v12478_v8  ;;  %v12736_v42 = vadd.f32 %v12474_v15, %v12482_v31  ;;  %4811 = vst.msk [vmem:[#allocation3] sm:$0xff] %vm96_vm0, %v4747_v6 }
 0x5d5   :  { %v12740_v29 = vadd.f32 %v12474_v15, %v12486_v45  ;;  %v12744_v47 = vadd.f32 %v12474_v15, %v12490_v12  ;;  %v12748_v35 = vadd.f32 %v12474_v15, %v12494_v16  ;;  %v12752_v8 = vadd.f32 %v12474_v15, %v12498_v56 }
 0x5d6   :  { %v12756_v31 = vadd.f32 %v12474_v15, %v12502_v61  ;;  %v12760_v45 = vadd.f32 %v12474_v15, %v12507_v62  ;;  %v12764_v12 = vadd.f32 %v12474_v15, %v12511_v54  ;;  %v12768_v16 = vadd.f32 %v12474_v15, %v12515_v30 }
 0x5d7   :  { %v12772_v56 = vadd.f32 %v12474_v15, %v12519_v41  ;;  %v12776_v61 = vadd.f32 %v12474_v15, %v12523_v7  ;;  %v12780_v62 = vadd.f32 %v12474_v15, %v12527_v11  ;;  %v12784_v54 = vadd.f32 %v12474_v15, %v12531_v63  ;;  %v16704_v6 = vld [vmem:[#allocation66_spill] sm:$0xff] }
 0x5d8   :  { %v12788_v30 = vadd.f32 %v12474_v15, %v12535_v59  ;;  %v12792_v41 = vadd.f32 %v12474_v15, %v12539_v43  ;;  %v12796_v7 = vadd.f32 %v12474_v15, %v12543_v46  ;;  %v12800_v11 = vadd.f32 %v12474_v15, %v12547_v20  ;;  %v4748_v20 = vld [vmem:[#allocation2 + $0x8] sm:$0xff] }
 0x5d9   :  { %v12804_v63 = vadd.f32 %v12474_v15, %v12551_v19  ;;  %v12808_v59 = vadd.f32 %v12474_v15, %v12555_v25  ;;  %v12812_v43 = vadd.f32 %v12474_v15, %v12559_v60  ;;  %v12816_v46 = vadd.f32 %v12474_v15, %v12563_v4  ;;  %4812 = vst.msk [vmem:[#allocation3 + $0x8] sm:$0xff] %vm96_vm0, %v4748_v20  ;;  %v16705_v20 = vld [vmem:[#allocation65_spill] sm:$0xff] }
 0x5da   :  { %16698 = vst [vmem:[#allocation69_spill] sm:$0xff] %v12796_v7  ;;  %16699 = vst [vmem:[#allocation76_spill] sm:$0xff] %v12800_v11  ;;  %v5004_v7 = vpop.permute.xlu0 %5003  ;;  %v5006_v11 = vpop.permute.xlu1 %5005  ;;  %v12820_v19 = vadd.f32 %v12474_v15, %v12567_v50  ;;  %v12824_v25 = vadd.f32 %v12474_v15, %v12571_v13  ;;  %v12828_v60 = vadd.f32 %v12474_v15, %v12575_v33 }
 0x5db   :  { %v12832_v4 = vadd.f32 %v12474_v15, %v12580_v27  ;;  %v12838_v50 = vadd.f32 %v12474_v15, %v12584_v55  ;;  %v12842_v13 = vadd.f32 %v12474_v15, %v12588_v37  ;;  %v12846_v33 = vadd.f32 %v12474_v15, %v12592_v5  ;;  %5195 = vst.msk [vmem:[#allocation3] sm:$0xff] %vm719_vm2, %v5004_v7 }
 0x5dc   :  { %v12850_v27 = vadd.f32 %v12474_v15, %v12596_v40  ;;  %5196 = vst.msk [vmem:[#allocation3 + $0x8] sm:$0xff] %vm719_vm2, %v5006_v11  ;;  %v12856_v55 = vadd.f32 %v12474_v15, %v12600_v3  ;;  %v12860_v37 = vadd.f32 %v12474_v15, %v12604_v53  ;;  %v12864_v5 = vadd.f32 %v12474_v15, %v12608_v52  ;;  %v16703_v11 = vld [vmem:[#allocation64_spill] sm:$0xff] }
 0x5dd   :  { %v12868_v40 = vadd.f32 %v12474_v15, %v12612_v36  ;;  %v12872_v7 = vadd.f32 %v12474_v15, %v12616_v18  ;;  %v12876_v3 = vadd.f32 %v12474_v15, %v12620_v1  ;;  %v12880_v53 = vadd.f32 %v12474_v15, %v12624_v0 }
 0x5de   :  { %v12884_v52 = vadd.f32 %v12474_v15, %v12628_v28  ;;  %v12888_v36 = vadd.f32 %v12474_v15, %v12632_v10  ;;  %v12892_v18 = vadd.f32 %v12474_v15, %v12636_v58  ;;  %v12896_v1 = vadd.f32 %v12474_v15, %v12640_v51 }
 0x5df   :  { %v12900_v0 = vadd.f32 %v12474_v15, %v12644_v17  ;;  %v12904_v28 = vadd.f32 %v12474_v15, %v12648_v32  ;;  %v12908_v10 = vadd.f32 %v12474_v15, %v12652_v14  ;;  %v12912_v58 = vadd.f32 %v12474_v15, %v12656_v9 }
 0x5e0   :  { %v12916_v51 = vadd.f32 %v12474_v15, %v16703_v11  ;;  %v12920_v17 = vadd.f32 %v12474_v15, %v16704_v6  ;;  %v12924_v32 = vadd.f32 %v12474_v15, %v16705_v20  ;;  %v12940_v6 = vadd.f32 %v12474_v15, %v12684_v24 }
 0x5e1   :  { %16700 = vst [vmem:[#allocation75_spill] sm:$0xff] %v12904_v28  ;;  %16701 = vst [vmem:[#allocation78_spill] sm:$0xff] %v12908_v10  ;;  %v16706_v28 = vld [vmem:[#allocation68_spill] sm:$0xff]  ;;  %v16707_v10 = vld [vmem:[#allocation67_spill] sm:$0xff]  ;;  %v12944_v20 = vadd.f32 %v12474_v15, %v12688_v57  ;;  %v12960_v24 = vadd.f32 %v12474_v15, %v12704_v22  ;;  %v4620_v57 = vmax.f32 %v12712_v38, 0.0  ;;  %v4629_v22 = vmax.f32 %v12748_v35, 0.0 }
 0x5e2   :  { %16702 = vst [vmem:[#allocation77_spill] sm:$0xff] %v12912_v58  ;;  %v12928_v14 = vadd.f32 %v12474_v15, %v16706_v28  ;;  %v12932_v9 = vadd.f32 %v12474_v15, %v16707_v10  ;;  %v16708_v58 = vld [vmem:[#allocation74_spill] sm:$0xff]  ;;  %16709 = vst [vmem:[#allocation80_spill] sm:$0xff] %v12940_v6  ;;  %v12948_v28 = vadd.f32 %v12474_v15, %v12692_v34  ;;  %v4619_v6 = vmax.f32 %v12708_v23, 0.0 }
 0x5e3   :  { %v12936_v11 = vadd.f32 %v12474_v15, %v16708_v58  ;;  %16710 = vst [vmem:[#allocation79_spill] sm:$0xff] %v12944_v20  ;;  %v12952_v10 = vadd.f32 %v12474_v15, %v12696_v39  ;;  %v12956_v58 = vadd.f32 %v12474_v15, %v12700_v48  ;;  %v4621_v20 = vmax.f32 %v12716_v2, 0.0  ;;  %4684 = vst.msk [vmem:[#allocation2 + $0x21] sm:$0xff] %vm96_vm0, %v4620_v57 }
 0x5e4   :  { %16711 = vst [vmem:[#allocation82_spill] sm:$0xff] %v12948_v28  ;;  %v4622_v34 = vmax.f32 %v12720_v26, 0.0  ;;  %v4623_v28 = vmax.f32 %v12724_v49, 0.0  ;;  %v4624_v39 = vmax.f32 %v12728_v44, 0.0  ;;  %v4626_v48 = vmax.f32 %v12736_v42, 0.0  ;;  %4683 = vst.msk [vmem:[#allocation2 + $0x19] sm:$0xff] %vm96_vm0, %v4619_v6 }
 0x5e5   :  { %16712 = vst [vmem:[#allocation81_spill] sm:$0xff] %v12952_v10  ;;  %16713 = vst [vmem:[#allocation84_spill] sm:$0xff] %v12956_v58  ;;  %v4625_v10 = vmax.f32 %v12732_v21, 0.0  ;;  %v4627_v58 = vmax.f32 %v12740_v29, 0.0  ;;  %v4628_v15 = vmax.f32 %v12744_v47, 0.0  ;;  %v4630_v23 = vmax.f32 %v12752_v8, 0.0 }
 0x5e6   :  { %v4631_v38 = vmax.f32 %v12756_v31, 0.0  ;;  %4685 = vst.msk [vmem:[#allocation2 + $0x31] sm:$0xff] %vm96_vm0, %v4621_v20  ;;  %4686 = vst.msk [vmem:[#allocation2 + $0x39] sm:$0xff] %vm96_vm0, %v4622_v34  ;;  %v4632_v2 = vmax.f32 %v12760_v45, 0.0  ;;  %v4633_v26 = vmax.f32 %v12764_v12, 0.0  ;;  %v4634_v49 = vmax.f32 %v12768_v16, 0.0 }
 0x5e7   :  { %4687 = vst.msk [vmem:[#allocation2 + $0x49] sm:$0xff] %vm96_vm0, %v4623_v28  ;;  %v4635_v44 = vmax.f32 %v12772_v56, 0.0  ;;  %4688 = vst.msk [vmem:[#allocation2 + $0x51] sm:$0xff] %vm96_vm0, %v4624_v39  ;;  %v4636_v21 = vmax.f32 %v12776_v61, 0.0  ;;  %v4637_v42 = vmax.f32 %v12780_v62, 0.0  ;;  %v4638_v29 = vmax.f32 %v12784_v54, 0.0 }
 0x5e8   :  { %4689 = vst.msk [vmem:[#allocation2 + $0x61] sm:$0xff] %vm96_vm0, %v4625_v10  ;;  %4690 = vst.msk [vmem:[#allocation2 + $0x69] sm:$0xff] %vm96_vm0, %v4626_v48  ;;  %v4639_v47 = vmax.f32 %v12788_v30, 0.0  ;;  %v4640_v35 = vmax.f32 %v12792_v41, 0.0  ;;  %v16714_v8 = vld [vmem:[#allocation69_spill] sm:$0xff]  ;;  %v16715_v45 = vld [vmem:[#allocation76_spill] sm:$0xff] }
 0x5e9   :  { %4691 = vst.msk [vmem:[#allocation2 + $0x79] sm:$0xff] %vm96_vm0, %v4627_v58  ;;  %4692 = vst.msk [vmem:[#allocation2 + $0x81] sm:$0xff] %vm96_vm0, %v4628_v15  ;;  %v4641_v31 = vmax.f32 %v16714_v8, 0.0  ;;  %v4642_v12 = vmax.f32 %v16715_v45, 0.0  ;;  %v4643_v16 = vmax.f32 %v12804_v63, 0.0  ;;  %v4644_v56 = vmax.f32 %v12808_v59, 0.0 }
 0x5ea   :  { %4693 = vst.msk [vmem:[#allocation2 + $0x91] sm:$0xff] %vm96_vm0, %v4629_v22  ;;  %4694 = vst.msk [vmem:[#allocation2 + $0x99] sm:$0xff] %vm96_vm0, %v4630_v23  ;;  %v4645_v61 = vmax.f32 %v12812_v43, 0.0  ;;  %v4646_v62 = vmax.f32 %v12816_v46, 0.0  ;;  %v4647_v54 = vmax.f32 %v12820_v19, 0.0  ;;  %v4648_v30 = vmax.f32 %v12824_v25, 0.0 }
 0x5eb   :  { %4695 = vst.msk [vmem:[#allocation2 + $0xa9] sm:$0xff] %vm96_vm0, %v4631_v38  ;;  %4696 = vst.msk [vmem:[#allocation2 + $0xb1] sm:$0xff] %vm96_vm0, %v4632_v2  ;;  %v4649_v41 = vmax.f32 %v12828_v60, 0.0  ;;  %v4650_v63 = vmax.f32 %v12832_v4, 0.0  ;;  %v4651_v59 = vmax.f32 %v12838_v50, 0.0  ;;  %v4652_v43 = vmax.f32 %v12842_v13, 0.0 }
 0x5ec   :  { %4697 = vst.msk [vmem:[#allocation2 + $0xc1] sm:$0xff] %vm96_vm0, %v4633_v26  ;;  %4698 = vst.msk [vmem:[#allocation2 + $0xc9] sm:$0xff] %vm96_vm0, %v4634_v49  ;;  %v4653_v46 = vmax.f32 %v12846_v33, 0.0  ;;  %v4654_v19 = vmax.f32 %v12850_v27, 0.0  ;;  %v4655_v25 = vmax.f32 %v12856_v55, 0.0  ;;  %v4877_v60 = vld [vmem:[#allocation2 + $0x19] sm:$0xff] }
 0x5ed   :  { %4699 = vst.msk [vmem:[#allocation2 + $0xd9] sm:$0xff] %vm96_vm0, %v4635_v44  ;;  %4700 = vst.msk [vmem:[#allocation2 + $0xe1] sm:$0xff] %vm96_vm0, %v4636_v21  ;;  %v13028_v4 = vld [vmem:[#allocation2 + $0x18] sm:$0xff]  ;;  %v4656_v50 = vmax.f32 %v12860_v37, 0.0  ;;  %v4657_v13 = vmax.f32 %v12864_v5, 0.0  ;;  %v4658_v33 = vmax.f32 %v12868_v40, 0.0  ;;  %5007 = vrot.lane.b32.xlu0 %v4877_v60, %s9792_s11 }
 0x5ee   :  { %4701 = vst.msk [vmem:[#allocation2 + $0xf1] sm:$0xff] %vm96_vm0, %v4637_v42  ;;  %4702 = vst.msk [vmem:[#allocation2 + $0xf9] sm:$0xff] %vm96_vm0, %v4638_v29  ;;  %v4659_v27 = vmax.f32 %v12872_v7, 0.0  ;;  %v4878_v55 = vld [vmem:[#allocation2 + $0x21] sm:$0xff]  ;;  %v4660_v37 = vmax.f32 %v12876_v3, 0.0  ;;  %v4661_v5 = vmax.f32 %v12880_v53, 0.0 }
 0x5ef   :  { %4703 = vst.msk [vmem:[#allocation2 + $0x109] sm:$0xff] %vm96_vm0, %v4639_v47  ;;  %4704 = vst.msk [vmem:[#allocation2 + $0x111] sm:$0xff] %vm96_vm0, %v4640_v35  ;;  %v4662_v40 = vmax.f32 %v12884_v52, 0.0  ;;  %v4663_v7 = vmax.f32 %v12888_v36, 0.0  ;;  %5009 = vrot.lane.b32.xlu1 %v4878_v55, %s9792_s11  ;;  %v4664_v6 = vmax.f32 %v12892_v18, 0.0  ;;  %v4665_v3 = vmax.f32 %v12896_v1, 0.0 }
 0x5f0   :  { %4705 = vst.msk [vmem:[#allocation2 + $0x121] sm:$0xff] %vm96_vm0, %v4641_v31  ;;  %4706 = vst.msk [vmem:[#allocation2 + $0x129] sm:$0xff] %vm96_vm0, %v4642_v12  ;;  %v4666_v53 = vmax.f32 %v12900_v0, 0.0  ;;  %v16716_v20 = vld [vmem:[#allocation75_spill] sm:$0xff]  ;;  %v16717_v36 = vld [vmem:[#allocation78_spill] sm:$0xff]  ;;  %v4670_v18 = vmax.f32 %v12916_v51, 0.0 }
 0x5f1   :  { %4707 = vst.msk [vmem:[#allocation2 + $0x139] sm:$0xff] %vm96_vm0, %v4643_v16  ;;  %4708 = vst.msk [vmem:[#allocation2 + $0x141] sm:$0xff] %vm96_vm0, %v4644_v56  ;;  %v4667_v52 = vmax.f32 %v16716_v20, 0.0  ;;  %v4668_v28 = vmax.f32 %v16717_v36, 0.0  ;;  %v16718_v10 = vld [vmem:[#allocation77_spill] sm:$0xff]  ;;  %v4671_v1 = vmax.f32 %v12920_v17, 0.0 }
 0x5f2   :  { %4709 = vst.msk [vmem:[#allocation2 + $0x151] sm:$0xff] %vm96_vm0, %v4645_v61  ;;  %4710 = vst.msk [vmem:[#allocation2 + $0x159] sm:$0xff] %vm96_vm0, %v4646_v62  ;;  %v4669_v58 = vmax.f32 %v16718_v10, 0.0  ;;  %v4879_v0 = vld [vmem:[#allocation2 + $0x31] sm:$0xff]  ;;  %v4672_v57 = vmax.f32 %v12924_v32, 0.0  ;;  %v4673_v34 = vmax.f32 %v12928_v14, 0.0 }
 0x5f3   :  { %4711 = vst.msk [vmem:[#allocation2 + $0x169] sm:$0xff] %vm96_vm0, %v4647_v54  ;;  %4712 = vst.msk [vmem:[#allocation2 + $0x171] sm:$0xff] %vm96_vm0, %v4648_v30  ;;  %v4674_v39 = vmax.f32 %v12932_v9, 0.0  ;;  %v4675_v48 = vmax.f32 %v12936_v11, 0.0  ;;  %v4880_v51 = vld [vmem:[#allocation2 + $0x39] sm:$0xff]  ;;  %5011 = vrot.lane.b32.xlu0 %v4879_v0, %s9792_s11  ;;  %v16721_v14 = vld [vmem:[#allocation82_spill] sm:$0xff] }
 0x5f4   :  { %4713 = vst.msk [vmem:[#allocation2 + $0x181] sm:$0xff] %vm96_vm0, %v4649_v41  ;;  %4714 = vst.msk [vmem:[#allocation2 + $0x189] sm:$0xff] %vm96_vm0, %v4650_v63  ;;  %v16719_v17 = vld [vmem:[#allocation80_spill] sm:$0xff]  ;;  %v16720_v32 = vld [vmem:[#allocation79_spill] sm:$0xff]  ;;  %v4678_v23 = vmax.f32 %v16721_v14, 0.0  ;;  %5013 = vrot.lane.b32.xlu1 %v4880_v51, %s9792_s11  ;;  %v4682_v26 = vmax.f32 %v12960_v24, 0.0 }
 0x5f5   :  { %4715 = vst.msk [vmem:[#allocation2 + $0x1c9] sm:$0xff] %vm96_vm0, %v4651_v59  ;;  %4813 = vst.msk [vmem:[#allocation3 + $0x10] sm:$0xff] %vm96_vm0, %v13028_v4  ;;  %v4676_v15 = vmax.f32 %v16719_v17, 0.0  ;;  %v4677_v22 = vmax.f32 %v16720_v32, 0.0  ;;  %v16722_v9 = vld [vmem:[#allocation81_spill] sm:$0xff]  ;;  %v16723_v11 = vld [vmem:[#allocation84_spill] sm:$0xff] }
 0x5f6   :  { %4716 = vst.msk [vmem:[#allocation2 + $0x1d1] sm:$0xff] %vm96_vm0, %v4652_v43  ;;  %4717 = vst.msk [vmem:[#allocation2 + $0x1e1] sm:$0xff] %vm96_vm0, %v4653_v46  ;;  %v4679_v38 = vmax.f32 %v16722_v9, 0.0  ;;  %v4680_v2 = vmax.f32 %v16723_v11, 0.0  ;;  %v4881_v49 = vld [vmem:[#allocation2 + $0x49] sm:$0xff]  ;;  %v4882_v24 = vld [vmem:[#allocation2 + $0x51] sm:$0xff] }
 0x5f7   :  { %4718 = vst.msk [vmem:[#allocation2 + $0x1e9] sm:$0xff] %vm96_vm0, %v4654_v19  ;;  %4719 = vst.msk [vmem:[#allocation2 + $0x1f9] sm:$0xff] %vm96_vm0, %v4655_v25  ;;  %5015 = vrot.lane.b32.xlu0 %v4881_v49, %s9792_s11  ;;  %v4883_v44 = vld [vmem:[#allocation2 + $0x61] sm:$0xff]  ;;  %v4884_v21 = vld [vmem:[#allocation2 + $0x69] sm:$0xff] }
 0x5f8   :  { %4720 = vst.msk [vmem:[#allocation2 + $0x201] sm:$0xff] %vm96_vm0, %v4656_v50  ;;  %4721 = vst.msk [vmem:[#allocation2 + $0x211] sm:$0xff] %vm96_vm0, %v4657_v13  ;;  %5017 = vrot.lane.b32.xlu1 %v4882_v24, %s9792_s11  ;;  %v4885_v42 = vld [vmem:[#allocation2 + $0x79] sm:$0xff]  ;;  %v4886_v29 = vld [vmem:[#allocation2 + $0x81] sm:$0xff] }
 0x5f9   :  { %4722 = vst.msk [vmem:[#allocation2 + $0x219] sm:$0xff] %vm96_vm0, %v4658_v33  ;;  %4723 = vst.msk [vmem:[#allocation2 + $0x229] sm:$0xff] %vm96_vm0, %v4659_v27  ;;  %v4887_v47 = vld [vmem:[#allocation2 + $0x91] sm:$0xff]  ;;  %v4888_v35 = vld [vmem:[#allocation2 + $0x99] sm:$0xff] }
 0x5fa   :  { %4724 = vst.msk [vmem:[#allocation2 + $0x231] sm:$0xff] %vm96_vm0, %v4660_v37  ;;  %4725 = vst.msk [vmem:[#allocation2 + $0x241] sm:$0xff] %vm96_vm0, %v4661_v5  ;;  %v13103_v8 = vld [vmem:[#allocation2 + $0x20] sm:$0xff]  ;;  %v13108_v31 = vld [vmem:[#allocation2 + $0x38] sm:$0xff] }
 0x5fb   :  { %4726 = vst.msk [vmem:[#allocation2 + $0x249] sm:$0xff] %vm96_vm0, %v4662_v40  ;;  %4727 = vst.msk [vmem:[#allocation2 + $0x259] sm:$0xff] %vm96_vm0, %v4663_v7  ;;  %5019 = vrot.lane.b32.xlu0 %v4883_v44, %s9792_s11  ;;  %v13110_v45 = vld [vmem:[#allocation2 + $0x30] sm:$0xff]  ;;  %v13120_v56 = vld [vmem:[#allocation2 + $0x48] sm:$0xff] }
 0x5fc   :  { %4728 = vst.msk [vmem:[#allocation2 + $0x261] sm:$0xff] %vm96_vm0, %v4664_v6  ;;  %4729 = vst.msk [vmem:[#allocation2 + $0x271] sm:$0xff] %vm96_vm0, %v4665_v3  ;;  %5021 = vrot.lane.b32.xlu1 %v4884_v21, %s9792_s11  ;;  %v4889_v12 = vld [vmem:[#allocation2 + $0xa9] sm:$0xff]  ;;  %v13124_v62 = vld [vmem:[#allocation2 + $0x60] sm:$0xff] }
 0x5fd   :  { %4730 = vst.msk [vmem:[#allocation2 + $0x279] sm:$0xff] %vm96_vm0, %v4666_v53  ;;  %4731 = vst.msk [vmem:[#allocation2 + $0x289] sm:$0xff] %vm96_vm0, %v4667_v52  ;;  %v13116_v16 = vld [vmem:[#allocation2 + $0x50] sm:$0xff]  ;;  %v13122_v61 = vld [vmem:[#allocation2 + $0x68] sm:$0xff] }
 0x5fe   :  { %4732 = vst.msk [vmem:[#allocation2 + $0x291] sm:$0xff] %vm96_vm0, %v4668_v28  ;;  %4733 = vst.msk [vmem:[#allocation2 + $0x2a1] sm:$0xff] %vm96_vm0, %v4669_v58  ;;  %v4890_v54 = vld [vmem:[#allocation2 + $0xb1] sm:$0xff]  ;;  %v13133_v30 = vld [vmem:[#allocation2 + $0x80] sm:$0xff] }
 0x5ff   :  { %4734 = vst.msk [vmem:[#allocation2 + $0x2a9] sm:$0xff] %vm96_vm0, %v4670_v18  ;;  %4735 = vst.msk [vmem:[#allocation2 + $0x2b9] sm:$0xff] %vm96_vm0, %v4671_v1  ;;  %5023 = vrot.lane.b32.xlu0 %v4885_v42, %s9792_s11  ;;  %v13138_v41 = vld [vmem:[#allocation2 + $0x78] sm:$0xff]  ;;  %v13144_v59 = vld [vmem:[#allocation2 + $0x90] sm:$0xff] }
 0x600   :  { %4736 = vst.msk [vmem:[#allocation2 + $0x2c1] sm:$0xff] %vm96_vm0, %v4672_v57  ;;  %4737 = vst.msk [vmem:[#allocation2 + $0x2d1] sm:$0xff] %vm96_vm0, %v4673_v34  ;;  %5025 = vrot.lane.b32.xlu1 %v4886_v29, %s9792_s11  ;;  %v13142_v63 = vld [vmem:[#allocation2 + $0x98] sm:$0xff]  ;;  %v4891_v43 = vld [vmem:[#allocation2 + $0xc1] sm:$0xff] }
 0x601   :  { %4738 = vst.msk [vmem:[#allocation2 + $0x2d9] sm:$0xff] %vm96_vm0, %v4674_v39  ;;  %4739 = vst.msk [vmem:[#allocation2 + $0x2e9] sm:$0xff] %vm96_vm0, %v4675_v48  ;;  %v13150_v46 = vld [vmem:[#allocation2 + $0xb0] sm:$0xff]  ;;  %v13152_v19 = vld [vmem:[#allocation2 + $0xa8] sm:$0xff] }
 0x602   :  { %4740 = vst.msk [vmem:[#allocation2 + $0x2f1] sm:$0xff] %vm96_vm0, %v4676_v15  ;;  %4741 = vst.msk [vmem:[#allocation2 + $0x301] sm:$0xff] %vm96_vm0, %v4677_v22  ;;  %v4892_v25 = vld [vmem:[#allocation2 + $0xc9] sm:$0xff]  ;;  %v13164_v50 = vld [vmem:[#allocation2 + $0xc0] sm:$0xff] }
 0x603   :  { %4742 = vst.msk [vmem:[#allocation2 + $0x309] sm:$0xff] %vm96_vm0, %v4678_v23  ;;  %4743 = vst.msk [vmem:[#allocation2 + $0x319] sm:$0xff] %vm96_vm0, %v4679_v38  ;;  %5027 = vrot.lane.b32.xlu0 %v4887_v47, %s9792_s11  ;;  %v13159_v60 = vld [vmem:[#allocation2 + $0xc8] sm:$0xff]  ;;  %v13168_v13 = vld [vmem:[#allocation2 + $0xe0] sm:$0xff] }
 0x604   :  { %4744 = vst.msk [vmem:[#allocation2 + $0x321] sm:$0xff] %vm96_vm0, %v4680_v2  ;;  %4746 = vst.msk [vmem:[#allocation2 + $0x339] sm:$0xff] %vm96_vm0, %v4682_v26  ;;  %5029 = vrot.lane.b32.xlu1 %v4888_v35, %s9792_s11  ;;  %v13170_v33 = vld [vmem:[#allocation2 + $0xd8] sm:$0xff]  ;;  %v13178_v37 = vld [vmem:[#allocation2 + $0xf0] sm:$0xff] }
 0x605   :  { %4814 = vst.msk [vmem:[#allocation3 + $0x18] sm:$0xff] %vm96_vm0, %v13103_v8  ;;  %4816 = vst.msk [vmem:[#allocation3 + $0x28] sm:$0xff] %vm96_vm0, %v13108_v31  ;;  %v4893_v27 = vld [vmem:[#allocation2 + $0xd9] sm:$0xff]  ;;  %v4894_v5 = vld [vmem:[#allocation2 + $0xe1] sm:$0xff] }
 0x606   :  { %4815 = vst.msk [vmem:[#allocation3 + $0x20] sm:$0xff] %vm96_vm0, %v13110_v45  ;;  %4818 = vst.msk [vmem:[#allocation3 + $0x38] sm:$0xff] %vm96_vm0, %v13116_v16  ;;  %v13176_v55 = vld [vmem:[#allocation2 + $0xf8] sm:$0xff]  ;;  %v13185_v40 = vld [vmem:[#allocation2 + $0x110] sm:$0xff] }
 0x607   :  { %5031 = vrot.lane.b32.xlu0 %v4889_v12, %s9792_s11  ;;  %4817 = vst.msk [vmem:[#allocation3 + $0x30] sm:$0xff] %vm96_vm0, %v13120_v56  ;;  %4820 = vst.msk [vmem:[#allocation3 + $0x48] sm:$0xff] %vm96_vm0, %v13122_v61  ;;  %v13190_v7 = vld [vmem:[#allocation2 + $0x108] sm:$0xff]  ;;  %v13196_v3 = vld [vmem:[#allocation2 + $0x120] sm:$0xff] }
 0x608   :  { %4819 = vst.msk [vmem:[#allocation3 + $0x40] sm:$0xff] %vm96_vm0, %v13124_v62  ;;  %5033 = vrot.lane.b32.xlu1 %v4890_v54, %s9792_s11  ;;  %4822 = vst.msk [vmem:[#allocation3 + $0x58] sm:$0xff] %vm96_vm0, %v13133_v30  ;;  %v13194_v6 = vld [vmem:[#allocation2 + $0x128] sm:$0xff]  ;;  %v4895_v53 = vld [vmem:[#allocation2 + $0xf1] sm:$0xff] }
 0x609   :  { %4821 = vst.msk [vmem:[#allocation3 + $0x50] sm:$0xff] %vm96_vm0, %v13138_v41  ;;  %4824 = vst.msk [vmem:[#allocation3 + $0x68] sm:$0xff] %vm96_vm0, %v13142_v63  ;;  %v13202_v20 = vld [vmem:[#allocation2 + $0x140] sm:$0xff]  ;;  %v13204_v52 = vld [vmem:[#allocation2 + $0x138] sm:$0xff] }
 0x60a   :  { %4823 = vst.msk [vmem:[#allocation3 + $0x60] sm:$0xff] %vm96_vm0, %v13144_v59  ;;  %4826 = vst.msk [vmem:[#allocation3 + $0x78] sm:$0xff] %vm96_vm0, %v13150_v46  ;;  %v4896_v36 = vld [vmem:[#allocation2 + $0xf9] sm:$0xff]  ;;  %v13216_v10 = vld [vmem:[#allocation2 + $0x150] sm:$0xff] }
 0x60b   :  { %5035 = vrot.lane.b32.xlu0 %v4891_v43, %s9792_s11  ;;  %4825 = vst.msk [vmem:[#allocation3 + $0x70] sm:$0xff] %vm96_vm0, %v13152_v19  ;;  %4828 = vst.msk [vmem:[#allocation3 + $0x88] sm:$0xff] %vm96_vm0, %v13159_v60  ;;  %v13211_v28 = vld [vmem:[#allocation2 + $0x158] sm:$0xff]  ;;  %v13220_v58 = vld [vmem:[#allocation2 + $0x170] sm:$0xff] }
 0x60c   :  { %5037 = vrot.lane.b32.xlu1 %v4892_v25, %s9792_s11  ;;  %4827 = vst.msk [vmem:[#allocation3 + $0x80] sm:$0xff] %vm96_vm0, %v13164_v50  ;;  %4830 = vst.msk [vmem:[#allocation3 + $0x98] sm:$0xff] %vm96_vm0, %v13168_v13  ;;  %v13222_v18 = vld [vmem:[#allocation2 + $0x168] sm:$0xff]  ;;  %v4898_v0 = vld [vmem:[#allocation2 + $0x111] sm:$0xff] }
 0x60d   :  { %4829 = vst.msk [vmem:[#allocation3 + $0x90] sm:$0xff] %vm96_vm0, %v13170_v33  ;;  %4832 = vst.msk [vmem:[#allocation3 + $0xa8] sm:$0xff] %vm96_vm0, %v13176_v55  ;;  %v4897_v1 = vld [vmem:[#allocation2 + $0x109] sm:$0xff]  ;;  %v13240_v48 = vld [vmem:[#allocation2 + $0x1e0] sm:$0xff] }
 0x60e   :  { %4831 = vst.msk [vmem:[#allocation3 + $0xa0] sm:$0xff] %vm96_vm0, %v13178_v37  ;;  %4834 = vst.msk [vmem:[#allocation3 + $0xb8] sm:$0xff] %vm96_vm0, %v13185_v40  ;;  %v13229_v57 = vld [vmem:[#allocation2 + $0x1d0] sm:$0xff]  ;;  %v13231_v34 = vld [vmem:[#allocation2 + $0x1c8] sm:$0xff] }
 0x60f   :  { %5039 = vrot.lane.b32.xlu0 %v4893_v27, %s9792_s11  ;;  %4833 = vst.msk [vmem:[#allocation3 + $0xb0] sm:$0xff] %vm96_vm0, %v13190_v7  ;;  %4836 = vst.msk [vmem:[#allocation3 + $0xc8] sm:$0xff] %vm96_vm0, %v13194_v6  ;;  %v13238_v39 = vld [vmem:[#allocation2 + $0x1e8] sm:$0xff]  ;;  %v13246_v17 = vld [vmem:[#allocation2 + $0x200] sm:$0xff] }
 0x610   :  { %5041 = vrot.lane.b32.xlu1 %v4894_v5, %s9792_s11  ;;  %4835 = vst.msk [vmem:[#allocation3 + $0xc0] sm:$0xff] %vm96_vm0, %v13196_v3  ;;  %4838 = vst.msk [vmem:[#allocation3 + $0xd8] sm:$0xff] %vm96_vm0, %v13202_v20  ;;  %v4899_v51 = vld [vmem:[#allocation2 + $0x121] sm:$0xff]  ;;  %v13250_v15 = vld [vmem:[#allocation2 + $0x1f8] sm:$0xff] }
 0x611   :  { %4837 = vst.msk [vmem:[#allocation3 + $0xd0] sm:$0xff] %vm96_vm0, %v13204_v52  ;;  %4840 = vst.msk [vmem:[#allocation3 + $0xe8] sm:$0xff] %vm96_vm0, %v13211_v28  ;;  %v13252_v32 = vld [vmem:[#allocation2 + $0x218] sm:$0xff]  ;;  %v13254_v22 = vld [vmem:[#allocation2 + $0x210] sm:$0xff] }
 0x612   :  { %4839 = vst.msk [vmem:[#allocation3 + $0xe0] sm:$0xff] %vm96_vm0, %v13216_v10  ;;  %4842 = vst.msk [vmem:[#allocation3 + $0xf8] sm:$0xff] %vm96_vm0, %v13220_v58  ;;  %v4900_v14 = vld [vmem:[#allocation2 + $0x129] sm:$0xff]  ;;  %v4780_v9 = vld [vmem:[#allocation2 + $0x1b8] sm:$0xff] }
 0x613   :  { %5043 = vrot.lane.b32.xlu0 %v4895_v53, %s9792_s11  ;;  %4841 = vst.msk [vmem:[#allocation3 + $0xf0] sm:$0xff] %vm96_vm0, %v13222_v18  ;;  %4846 = vst.msk [vmem:[#allocation3 + $0x118] sm:$0xff] %vm96_vm0, %v13229_v57  ;;  %v13263_v23 = vld [vmem:[#allocation2 + $0x230] sm:$0xff]  ;;  %v13268_v38 = vld [vmem:[#allocation2 + $0x228] sm:$0xff] }
 0x614   :  { %5045 = vrot.lane.b32.xlu1 %v4896_v36, %s9792_s11  ;;  %4845 = vst.msk [vmem:[#allocation3 + $0x110] sm:$0xff] %vm96_vm0, %v13231_v34  ;;  %4848 = vst.msk [vmem:[#allocation3 + $0x128] sm:$0xff] %vm96_vm0, %v13238_v39  ;;  %v13273_v11 = vld [vmem:[#allocation2 + $0x248] sm:$0xff]  ;;  %v13275_v2 = vld [vmem:[#allocation2 + $0x240] sm:$0xff] }
 0x615   :  { %4847 = vst.msk [vmem:[#allocation3 + $0x120] sm:$0xff] %vm96_vm0, %v13240_v48  ;;  %4850 = vst.msk [vmem:[#allocation3 + $0x138] sm:$0xff] %vm96_vm0, %v13246_v17  ;;  %v4901_v26 = vld [vmem:[#allocation2 + $0x139] sm:$0xff]  ;;  %v4902_v24 = vld [vmem:[#allocation2 + $0x141] sm:$0xff] }
 0x616   :  { %4849 = vst.msk [vmem:[#allocation3 + $0x130] sm:$0xff] %vm96_vm0, %v13250_v15  ;;  %4852 = vst.msk [vmem:[#allocation3 + $0x148] sm:$0xff] %vm96_vm0, %v13252_v32  ;;  %v13281_v49 = vld [vmem:[#allocation2 + $0x260] sm:$0xff]  ;;  %v4779_v44 = vld [vmem:[#allocation2 + $0x1b0] sm:$0xff] }
 0x617   :  { %5047 = vrot.lane.b32.xlu0 %v4897_v1, %s9792_s11  ;;  %4851 = vst.msk [vmem:[#allocation3 + $0x140] sm:$0xff] %vm96_vm0, %v13254_v22  ;;  %4854 = vst.msk [vmem:[#allocation3 + $0x158] sm:$0xff] %vm96_vm0, %v13263_v23  ;;  %v13286_v21 = vld [vmem:[#allocation2 + $0x258] sm:$0xff]  ;;  %v13294_v29 = vld [vmem:[#allocation2 + $0x270] sm:$0xff] }
 0x618   :  { %5049 = vrot.lane.b32.xlu1 %v4898_v0, %s9792_s11  ;;  %4844 = vst.msk [vmem:[#allocation3 + $0x108] sm:$0xff] %vm96_vm0, %v4780_v9  ;;  %4853 = vst.msk [vmem:[#allocation3 + $0x150] sm:$0xff] %vm96_vm0, %v13268_v38  ;;  %v13292_v42 = vld [vmem:[#allocation2 + $0x278] sm:$0xff]  ;;  %v13300_v47 = vld [vmem:[#allocation2 + $0x290] sm:$0xff] }
 0x619   :  { %4856 = vst.msk [vmem:[#allocation3 + $0x168] sm:$0xff] %vm96_vm0, %v13273_v11  ;;  %4855 = vst.msk [vmem:[#allocation3 + $0x160] sm:$0xff] %vm96_vm0, %v13275_v2  ;;  %v4903_v35 = vld [vmem:[#allocation2 + $0x151] sm:$0xff]  ;;  %v13304_v12 = vld [vmem:[#allocation2 + $0x288] sm:$0xff] }
 0x61a   :  { %4858 = vst.msk [vmem:[#allocation3 + $0x178] sm:$0xff] %vm96_vm0, %v13281_v49  ;;  %4843 = vst.msk [vmem:[#allocation3 + $0x100] sm:$0xff] %vm96_vm0, %v4779_v44  ;;  %v4904_v54 = vld [vmem:[#allocation2 + $0x159] sm:$0xff]  ;;  %v13309_v43 = vld [vmem:[#allocation2 + $0x2a8] sm:$0xff] }
 0x61b   :  { %5051 = vrot.lane.b32.xlu0 %v4899_v51, %s9792_s11  ;;  %4857 = vst.msk [vmem:[#allocation3 + $0x170] sm:$0xff] %vm96_vm0, %v13286_v21  ;;  %4860 = vst.msk [vmem:[#allocation3 + $0x188] sm:$0xff] %vm96_vm0, %v13292_v42  ;;  %v13311_v25 = vld [vmem:[#allocation2 + $0x2a0] sm:$0xff]  ;;  %v13320_v5 = vld [vmem:[#allocation2 + $0x2b8] sm:$0xff] }
 0x61c   :  { %5053 = vrot.lane.b32.xlu1 %v4900_v14, %s9792_s11  ;;  %4859 = vst.msk [vmem:[#allocation3 + $0x180] sm:$0xff] %vm96_vm0, %v13294_v29  ;;  %4862 = vst.msk [vmem:[#allocation3 + $0x198] sm:$0xff] %vm96_vm0, %v13300_v47  ;;  %v13318_v27 = vld [vmem:[#allocation2 + $0x2c0] sm:$0xff]  ;;  %v13326_v53 = vld [vmem:[#allocation2 + $0x2d8] sm:$0xff] }
 0x61d   :  { %4861 = vst.msk [vmem:[#allocation3 + $0x190] sm:$0xff] %vm96_vm0, %v13304_v12  ;;  %4864 = vst.msk [vmem:[#allocation3 + $0x1a8] sm:$0xff] %vm96_vm0, %v13309_v43  ;;  %v4905_v36 = vld [vmem:[#allocation2 + $0x169] sm:$0xff]  ;;  %v4906_v0 = vld [vmem:[#allocation2 + $0x171] sm:$0xff] }
 0x61e   :  { %4863 = vst.msk [vmem:[#allocation3 + $0x1a0] sm:$0xff] %vm96_vm0, %v13311_v25  ;;  %4866 = vst.msk [vmem:[#allocation3 + $0x1b8] sm:$0xff] %vm96_vm0, %v13318_v27  ;;  %v13330_v1 = vld [vmem:[#allocation2 + $0x2d0] sm:$0xff]  ;;  %v13337_v14 = vld [vmem:[#allocation2 + $0x2e8] sm:$0xff] }
 0x61f   :  { %5055 = vrot.lane.b32.xlu0 %v4901_v26, %s9792_s11  ;;  %4865 = vst.msk [vmem:[#allocation3 + $0x1b0] sm:$0xff] %vm96_vm0, %v13320_v5  ;;  %4868 = vst.msk [vmem:[#allocation3 + $0x1c8] sm:$0xff] %vm96_vm0, %v13326_v53  ;;  %v13335_v51 = vld [vmem:[#allocation2 + $0x2f0] sm:$0xff]  ;;  %v13344_v26 = vld [vmem:[#allocation2 + $0x308] sm:$0xff] }
 0x620   :  { %5057 = vrot.lane.b32.xlu1 %v4902_v24, %s9792_s11  ;;  %4867 = vst.msk [vmem:[#allocation3 + $0x1c0] sm:$0xff] %vm96_vm0, %v13330_v1  ;;  %16724 = vst [vmem:[#allocation83_spill] sm:$0xff] %v13335_v51  ;;  %v4907_v9 = vld [vmem:[#allocation2 + $0x1b1] sm:$0xff]  ;;  %v13346_v24 = vld [vmem:[#allocation2 + $0x300] sm:$0xff] }
 0x621   :  { %16725 = vst [vmem:[#allocation86_spill] sm:$0xff] %v13337_v14  ;;  %4870 = vst.msk [vmem:[#allocation3 + $0x1d8] sm:$0xff] %vm96_vm0, %v13335_v51  ;;  %v4908_v44 = vld [vmem:[#allocation2 + $0x1b9] sm:$0xff]  ;;  %v4914_v51 = vld [vmem:[#allocation2 + $0x201] sm:$0xff] }
 0x622   :  { %4869 = vst.msk [vmem:[#allocation3 + $0x1d0] sm:$0xff] %vm96_vm0, %v13337_v14  ;;  %16726 = vst [vmem:[#allocation85_spill] sm:$0xff] %v13344_v26 }
 0x623   :  { %5059 = vrot.lane.b32.xlu0 %v4903_v35, %s9792_s11  ;;  %16727 = vst [vmem:[#allocation88_spill] sm:$0xff] %v13346_v24  ;;  %4872 = vst.msk [vmem:[#allocation3 + $0x1e8] sm:$0xff] %vm96_vm0, %v13344_v26  ;;  %v13352_v35 = vld [vmem:[#allocation2 + $0x320] sm:$0xff] }
 0x624   :  { %5061 = vrot.lane.b32.xlu1 %v4904_v54, %s9792_s11  ;;  %4871 = vst.msk [vmem:[#allocation3 + $0x1e0] sm:$0xff] %vm96_vm0, %v13346_v24  ;;  %16728 = vst [vmem:[#allocation87_spill] sm:$0xff] %v13352_v35  ;;  %v13356_v54 = vld [vmem:[#allocation2 + $0x318] sm:$0xff]  ;;  %v4911_v26 = vld [vmem:[#allocation2 + $0x1e1] sm:$0xff] }
 0x625   :  { %4874 = vst.msk [vmem:[#allocation3 + $0x1f8] sm:$0xff] %vm96_vm0, %v13352_v35  ;;  %16729 = vst [vmem:[#allocation90_spill] sm:$0xff] %v13356_v54  ;;  %v4912_v24 = vld [vmem:[#allocation2 + $0x1e9] sm:$0xff]  ;;  %v4913_v35 = vld [vmem:[#allocation2 + $0x1f9] sm:$0xff] }
 0x626   :  { %4873 = vst.msk [vmem:[#allocation3 + $0x1f0] sm:$0xff] %vm96_vm0, %v13356_v54  ;;  %v4935_v54 = vld [vmem:[#allocation2 + $0x301] sm:$0xff] }
 0x627   :  { %5063 = vrot.lane.b32.xlu0 %v4905_v36, %s9792_s11  ;;  %v4909_v36 = vld [vmem:[#allocation2 + $0x1c9] sm:$0xff] }
 0x628   :  { %5065 = vrot.lane.b32.xlu1 %v4906_v0, %s9792_s11  ;;  %v4910_v0 = vld [vmem:[#allocation2 + $0x1d1] sm:$0xff] }
 0x62b   :  { %5067 = vrot.lane.b32.xlu0 %v4907_v9, %s9792_s11  ;;  %v4915_v9 = vld [vmem:[#allocation2 + $0x211] sm:$0xff] }
 0x62c   :  { %5069 = vrot.lane.b32.xlu1 %v4908_v44, %s9792_s11  ;;  %v4916_v44 = vld [vmem:[#allocation2 + $0x219] sm:$0xff] }
 0x62f   :  { %5071 = vrot.lane.b32.xlu0 %v4909_v36, %s9792_s11  ;;  %v4917_v36 = vld [vmem:[#allocation2 + $0x229] sm:$0xff] }
 0x630   :  { %5073 = vrot.lane.b32.xlu1 %v4910_v0, %s9792_s11  ;;  %v4918_v0 = vld [vmem:[#allocation2 + $0x231] sm:$0xff] }
 0x633   :  { %5075 = vrot.lane.b32.xlu0 %v4911_v26, %s9792_s11  ;;  %v4919_v26 = vld [vmem:[#allocation2 + $0x241] sm:$0xff] }
 0x634   :  { %5077 = vrot.lane.b32.xlu1 %v4912_v24, %s9792_s11  ;;  %v4920_v24 = vld [vmem:[#allocation2 + $0x249] sm:$0xff] }
 0x637   :  { %5079 = vrot.lane.b32.xlu0 %v4913_v35, %s9792_s11  ;;  %v4921_v35 = vld [vmem:[#allocation2 + $0x259] sm:$0xff] }
 0x638   :  { %5081 = vrot.lane.b32.xlu1 %v4914_v51, %s9792_s11  ;;  %v4922_v51 = vld [vmem:[#allocation2 + $0x261] sm:$0xff] }
 0x63b   :  { %5083 = vrot.lane.b32.xlu0 %v4915_v9, %s9792_s11  ;;  %v4923_v9 = vld [vmem:[#allocation2 + $0x271] sm:$0xff] }
 0x63c   :  { %5085 = vrot.lane.b32.xlu1 %v4916_v44, %s9792_s11  ;;  %v4924_v44 = vld [vmem:[#allocation2 + $0x279] sm:$0xff] }
 0x63f   :  { %5087 = vrot.lane.b32.xlu0 %v4917_v36, %s9792_s11  ;;  %v4925_v36 = vld [vmem:[#allocation2 + $0x289] sm:$0xff] }
 0x640   :  { %5089 = vrot.lane.b32.xlu1 %v4918_v0, %s9792_s11  ;;  %v4926_v0 = vld [vmem:[#allocation2 + $0x291] sm:$0xff] }
 0x643   :  { %5091 = vrot.lane.b32.xlu0 %v4919_v26, %s9792_s11  ;;  %v4927_v26 = vld [vmem:[#allocation2 + $0x2a1] sm:$0xff] }
 0x644   :  { %5093 = vrot.lane.b32.xlu1 %v4920_v24, %s9792_s11  ;;  %v4928_v24 = vld [vmem:[#allocation2 + $0x2a9] sm:$0xff] }
 0x647   :  { %5095 = vrot.lane.b32.xlu0 %v4921_v35, %s9792_s11  ;;  %v4929_v35 = vld [vmem:[#allocation2 + $0x2b9] sm:$0xff] }
 0x648   :  { %5097 = vrot.lane.b32.xlu1 %v4922_v51, %s9792_s11  ;;  %v4930_v51 = vld [vmem:[#allocation2 + $0x2c1] sm:$0xff] }
 0x64b   :  { %5099 = vrot.lane.b32.xlu0 %v4923_v9, %s9792_s11  ;;  %v4931_v9 = vld [vmem:[#allocation2 + $0x2d1] sm:$0xff] }
 0x64c   :  { %5101 = vrot.lane.b32.xlu1 %v4924_v44, %s9792_s11  ;;  %v4932_v44 = vld [vmem:[#allocation2 + $0x2d9] sm:$0xff] }
 0x64f   :  { %5103 = vrot.lane.b32.xlu0 %v4925_v36, %s9792_s11  ;;  %v4933_v36 = vld [vmem:[#allocation2 + $0x2e9] sm:$0xff] }
 0x650   :  { %5105 = vrot.lane.b32.xlu1 %v4926_v0, %s9792_s11  ;;  %v4934_v0 = vld [vmem:[#allocation2 + $0x2f1] sm:$0xff] }
 0x653   :  { %5107 = vrot.lane.b32.xlu0 %v4927_v26, %s9792_s11 }
 0x654   :  { %5109 = vrot.lane.b32.xlu1 %v4928_v24, %s9792_s11 }
 0x657   :  { %5111 = vrot.lane.b32.xlu0 %v4929_v35, %s9792_s11  ;;  %v4936_v35 = vld [vmem:[#allocation2 + $0x309] sm:$0xff] }
 0x658   :  { %5113 = vrot.lane.b32.xlu1 %v4930_v51, %s9792_s11 }
 0x65b   :  { %5115 = vrot.lane.b32.xlu0 %v4931_v9, %s9792_s11 }
 0x65c   :  { %5117 = vrot.lane.b32.xlu1 %v4932_v44, %s9792_s11  ;;  %v4937_v44 = vld [vmem:[#allocation2 + $0x319] sm:$0xff] }
 0x65f   :  { %5119 = vrot.lane.b32.xlu0 %v4933_v36, %s9792_s11  ;;  %v5008_v26 = vpop.permute.xlu0 %5007  ;;  %v4938_v36 = vld [vmem:[#allocation2 + $0x321] sm:$0xff] }
 0x660   :  { %5121 = vrot.lane.b32.xlu1 %v4934_v0, %s9792_s11  ;;  %5197 = vst.msk [vmem:[#allocation3 + $0x10] sm:$0xff] %vm719_vm2, %v5008_v26  ;;  %v5259_v0 = vld [vmem:[#allocation2 + $0x2] sm:$0xff] }
 0x661   :  { %v5010_v24 = vpop.permute.xlu1 %5009 }
 0x662   :  { %5198 = vst.msk [vmem:[#allocation3 + $0x18] sm:$0xff] %vm719_vm2, %v5010_v24  ;;  %v5260_v24 = vld [vmem:[#allocation2 + $0xa] sm:$0xff] }
 0x663   :  { %5123 = vrot.lane.b32.xlu0 %v4935_v54, %s9792_s11 }
 0x664   :  { %5125 = vrot.lane.b32.xlu1 %v4936_v35, %s9792_s11 }
 0x665   :  { %v5012_v51 = vpop.permute.xlu0 %5011 }
 0x666   :  { %v5014_v9 = vpop.permute.xlu1 %5013  ;;  %5199 = vst.msk [vmem:[#allocation3 + $0x20] sm:$0xff] %vm719_vm2, %v5012_v51  ;;  %v5261_v51 = vld [vmem:[#allocation2 + $0x1a] sm:$0xff] }
 0x667   :  { %5200 = vst.msk [vmem:[#allocation3 + $0x28] sm:$0xff] %vm719_vm2, %v5014_v9  ;;  %5127 = vrot.lane.b32.xlu0 %v4937_v44, %s9792_s11  ;;  %v5262_v9 = vld [vmem:[#allocation2 + $0x22] sm:$0xff] }
 0x668   :  { %5129 = vrot.lane.b32.xlu1 %v4938_v36, %s9792_s11 }
 0x669   :  { %v5016_v26 = vpop.permute.xlu0 %5015 }
 0x66a   :  { %v5018_v14 = vpop.permute.xlu1 %5017  ;;  %5201 = vst.msk [vmem:[#allocation3 + $0x30] sm:$0xff] %vm719_vm2, %v5016_v26 }
 0x66b   :  { %5202 = vst.msk [vmem:[#allocation3 + $0x38] sm:$0xff] %vm719_vm2, %v5018_v14  ;;  %5387 = vrot.lane.b32.xlu0 %v5259_v0, %s9793_s28  ;;  %v5263_v14 = vld [vmem:[#allocation2 + $0x32] sm:$0xff]  ;;  %v5264_v0 = vld [vmem:[#allocation2 + $0x3a] sm:$0xff] }
 0x66c   :  { %5389 = vrot.lane.b32.xlu1 %v5260_v24, %s9793_s28 }
 0x66d   :  { %v5020_v54 = vpop.permute.xlu0 %5019 }
 0x66e   :  { %v5022_v35 = vpop.permute.xlu1 %5021  ;;  %5203 = vst.msk [vmem:[#allocation3 + $0x40] sm:$0xff] %vm719_vm2, %v5020_v54  ;;  %v5265_v54 = vld [vmem:[#allocation2 + $0x4a] sm:$0xff] }
 0x66f   :  { %5204 = vst.msk [vmem:[#allocation3 + $0x48] sm:$0xff] %vm719_vm2, %v5022_v35  ;;  %5391 = vrot.lane.b32.xlu0 %v5261_v51, %s9793_s28  ;;  %v5266_v35 = vld [vmem:[#allocation2 + $0x52] sm:$0xff] }
 0x670   :  { %5393 = vrot.lane.b32.xlu1 %v5262_v9, %s9793_s28 }
 0x671   :  { %v5024_v44 = vpop.permute.xlu0 %5023 }
 0x672   :  { %v5026_v36 = vpop.permute.xlu1 %5025  ;;  %5205 = vst.msk [vmem:[#allocation3 + $0x50] sm:$0xff] %vm719_vm2, %v5024_v44  ;;  %v5267_v44 = vld [vmem:[#allocation2 + $0x62] sm:$0xff] }
 0x673   :  { %5206 = vst.msk [vmem:[#allocation3 + $0x58] sm:$0xff] %vm719_vm2, %v5026_v36  ;;  %5395 = vrot.lane.b32.xlu0 %v5263_v14, %s9793_s28  ;;  %v5268_v36 = vld [vmem:[#allocation2 + $0x6a] sm:$0xff] }
 0x674   :  { %5397 = vrot.lane.b32.xlu1 %v5264_v0, %s9793_s28 }
 0x675   :  { %v5028_v26 = vpop.permute.xlu0 %5027 }
 0x676   :  { %v5030_v24 = vpop.permute.xlu1 %5029  ;;  %5207 = vst.msk [vmem:[#allocation3 + $0x60] sm:$0xff] %vm719_vm2, %v5028_v26  ;;  %v5269_v26 = vld [vmem:[#allocation2 + $0x7a] sm:$0xff] }
 0x677   :  { %5208 = vst.msk [vmem:[#allocation3 + $0x68] sm:$0xff] %vm719_vm2, %v5030_v24  ;;  %5399 = vrot.lane.b32.xlu0 %v5265_v54, %s9793_s28  ;;  %v5270_v24 = vld [vmem:[#allocation2 + $0x82] sm:$0xff] }
 0x678   :  { %5401 = vrot.lane.b32.xlu1 %v5266_v35, %s9793_s28 }
 0x679   :  { %v5032_v51 = vpop.permute.xlu0 %5031 }
 0x67a   :  { %v5034_v9 = vpop.permute.xlu1 %5033  ;;  %5209 = vst.msk [vmem:[#allocation3 + $0x70] sm:$0xff] %vm719_vm2, %v5032_v51  ;;  %v5271_v51 = vld [vmem:[#allocation2 + $0x92] sm:$0xff] }
 0x67b   :  { %5210 = vst.msk [vmem:[#allocation3 + $0x78] sm:$0xff] %vm719_vm2, %v5034_v9  ;;  %5403 = vrot.lane.b32.xlu0 %v5267_v44, %s9793_s28  ;;  %v5272_v9 = vld [vmem:[#allocation2 + $0x9a] sm:$0xff] }
 0x67c   :  { %5405 = vrot.lane.b32.xlu1 %v5268_v36, %s9793_s28 }
 0x67d   :  { %v5036_v14 = vpop.permute.xlu0 %5035 }
 0x67e   :  { %v5038_v0 = vpop.permute.xlu1 %5037  ;;  %5211 = vst.msk [vmem:[#allocation3 + $0x80] sm:$0xff] %vm719_vm2, %v5036_v14  ;;  %v5273_v14 = vld [vmem:[#allocation2 + $0xaa] sm:$0xff] }
 0x67f   :  { %5212 = vst.msk [vmem:[#allocation3 + $0x88] sm:$0xff] %vm719_vm2, %v5038_v0  ;;  %5407 = vrot.lane.b32.xlu0 %v5269_v26, %s9793_s28  ;;  %v5274_v0 = vld [vmem:[#allocation2 + $0xb2] sm:$0xff] }
 0x680   :  { %5409 = vrot.lane.b32.xlu1 %v5270_v24, %s9793_s28 }
 0x681   :  { %v5040_v54 = vpop.permute.xlu0 %5039 }
 0x682   :  { %v5042_v35 = vpop.permute.xlu1 %5041  ;;  %5213 = vst.msk [vmem:[#allocation3 + $0x90] sm:$0xff] %vm719_vm2, %v5040_v54  ;;  %v5275_v54 = vld [vmem:[#allocation2 + $0xc2] sm:$0xff] }
 0x683   :  { %5214 = vst.msk [vmem:[#allocation3 + $0x98] sm:$0xff] %vm719_vm2, %v5042_v35  ;;  %5411 = vrot.lane.b32.xlu0 %v5271_v51, %s9793_s28  ;;  %v5276_v35 = vld [vmem:[#allocation2 + $0xca] sm:$0xff] }
 0x684   :  { %5413 = vrot.lane.b32.xlu1 %v5272_v9, %s9793_s28 }
 0x685   :  { %v5044_v44 = vpop.permute.xlu0 %5043 }
 0x686   :  { %v5046_v36 = vpop.permute.xlu1 %5045  ;;  %5215 = vst.msk [vmem:[#allocation3 + $0xa0] sm:$0xff] %vm719_vm2, %v5044_v44  ;;  %v5277_v44 = vld [vmem:[#allocation2 + $0xda] sm:$0xff] }
 0x687   :  { %5216 = vst.msk [vmem:[#allocation3 + $0xa8] sm:$0xff] %vm719_vm2, %v5046_v36  ;;  %5415 = vrot.lane.b32.xlu0 %v5273_v14, %s9793_s28  ;;  %v5278_v36 = vld [vmem:[#allocation2 + $0xe2] sm:$0xff] }
 0x688   :  { %5417 = vrot.lane.b32.xlu1 %v5274_v0, %s9793_s28 }
 0x689   :  { %v5048_v26 = vpop.permute.xlu0 %5047 }
 0x68a   :  { %v5050_v24 = vpop.permute.xlu1 %5049  ;;  %5217 = vst.msk [vmem:[#allocation3 + $0xb0] sm:$0xff] %vm719_vm2, %v5048_v26  ;;  %v5279_v26 = vld [vmem:[#allocation2 + $0xf2] sm:$0xff] }
 0x68b   :  { %5218 = vst.msk [vmem:[#allocation3 + $0xb8] sm:$0xff] %vm719_vm2, %v5050_v24  ;;  %5419 = vrot.lane.b32.xlu0 %v5275_v54, %s9793_s28  ;;  %v5280_v24 = vld [vmem:[#allocation2 + $0xfa] sm:$0xff] }
 0x68c   :  { %5421 = vrot.lane.b32.xlu1 %v5276_v35, %s9793_s28 }
 0x68d   :  { %v5052_v51 = vpop.permute.xlu0 %5051 }
 0x68e   :  { %v5054_v9 = vpop.permute.xlu1 %5053  ;;  %5219 = vst.msk [vmem:[#allocation3 + $0xc0] sm:$0xff] %vm719_vm2, %v5052_v51  ;;  %v5281_v51 = vld [vmem:[#allocation2 + $0x10a] sm:$0xff] }
 0x68f   :  { %5220 = vst.msk [vmem:[#allocation3 + $0xc8] sm:$0xff] %vm719_vm2, %v5054_v9  ;;  %5423 = vrot.lane.b32.xlu0 %v5277_v44, %s9793_s28  ;;  %v5282_v9 = vld [vmem:[#allocation2 + $0x112] sm:$0xff] }
 0x690   :  { %5425 = vrot.lane.b32.xlu1 %v5278_v36, %s9793_s28 }
 0x691   :  { %v5056_v14 = vpop.permute.xlu0 %5055 }
 0x692   :  { %v5058_v0 = vpop.permute.xlu1 %5057  ;;  %5221 = vst.msk [vmem:[#allocation3 + $0xd0] sm:$0xff] %vm719_vm2, %v5056_v14  ;;  %v5283_v14 = vld [vmem:[#allocation2 + $0x122] sm:$0xff] }
 0x693   :  { %5222 = vst.msk [vmem:[#allocation3 + $0xd8] sm:$0xff] %vm719_vm2, %v5058_v0  ;;  %5427 = vrot.lane.b32.xlu0 %v5279_v26, %s9793_s28  ;;  %v5284_v0 = vld [vmem:[#allocation2 + $0x12a] sm:$0xff] }
 0x694   :  { %5429 = vrot.lane.b32.xlu1 %v5280_v24, %s9793_s28 }
 0x695   :  { %v5060_v54 = vpop.permute.xlu0 %5059 }
 0x696   :  { %v5062_v35 = vpop.permute.xlu1 %5061  ;;  %5223 = vst.msk [vmem:[#allocation3 + $0xe0] sm:$0xff] %vm719_vm2, %v5060_v54  ;;  %v5285_v54 = vld [vmem:[#allocation2 + $0x13a] sm:$0xff] }
 0x697   :  { %5224 = vst.msk [vmem:[#allocation3 + $0xe8] sm:$0xff] %vm719_vm2, %v5062_v35  ;;  %5431 = vrot.lane.b32.xlu0 %v5281_v51, %s9793_s28  ;;  %v5286_v35 = vld [vmem:[#allocation2 + $0x142] sm:$0xff] }
 0x698   :  { %5433 = vrot.lane.b32.xlu1 %v5282_v9, %s9793_s28 }
 0x699   :  { %v5064_v44 = vpop.permute.xlu0 %5063 }
 0x69a   :  { %v5066_v36 = vpop.permute.xlu1 %5065  ;;  %5225 = vst.msk [vmem:[#allocation3 + $0xf0] sm:$0xff] %vm719_vm2, %v5064_v44  ;;  %v5287_v44 = vld [vmem:[#allocation2 + $0x152] sm:$0xff] }
 0x69b   :  { %5226 = vst.msk [vmem:[#allocation3 + $0xf8] sm:$0xff] %vm719_vm2, %v5066_v36  ;;  %5435 = vrot.lane.b32.xlu0 %v5283_v14, %s9793_s28  ;;  %v5288_v36 = vld [vmem:[#allocation2 + $0x15a] sm:$0xff] }
 0x69c   :  { %5437 = vrot.lane.b32.xlu1 %v5284_v0, %s9793_s28 }
 0x69d   :  { %v5068_v26 = vpop.permute.xlu0 %5067 }
 0x69e   :  { %v5070_v24 = vpop.permute.xlu1 %5069  ;;  %5227 = vst.msk [vmem:[#allocation3 + $0x100] sm:$0xff] %vm719_vm2, %v5068_v26  ;;  %v5289_v26 = vld [vmem:[#allocation2 + $0x16a] sm:$0xff] }
 0x69f   :  { %5228 = vst.msk [vmem:[#allocation3 + $0x108] sm:$0xff] %vm719_vm2, %v5070_v24  ;;  %5439 = vrot.lane.b32.xlu0 %v5285_v54, %s9793_s28  ;;  %v5290_v24 = vld [vmem:[#allocation2 + $0x172] sm:$0xff] }
 0x6a0   :  { %5441 = vrot.lane.b32.xlu1 %v5286_v35, %s9793_s28  ;;  %v5291_v54 = vld [vmem:[#allocation2 + $0x1b2] sm:$0xff] }
 0x6a1   :  { %v5072_v51 = vpop.permute.xlu0 %5071 }
 0x6a2   :  { %v5074_v9 = vpop.permute.xlu1 %5073  ;;  %5229 = vst.msk [vmem:[#allocation3 + $0x110] sm:$0xff] %vm719_vm2, %v5072_v51  ;;  %v5292_v51 = vld [vmem:[#allocation2 + $0x1ba] sm:$0xff] }
 0x6a3   :  { %5230 = vst.msk [vmem:[#allocation3 + $0x118] sm:$0xff] %vm719_vm2, %v5074_v9  ;;  %5443 = vrot.lane.b32.xlu0 %v5287_v44, %s9793_s28 }
 0x6a4   :  { %5445 = vrot.lane.b32.xlu1 %v5288_v36, %s9793_s28 }
 0x6a5   :  { %v5076_v14 = vpop.permute.xlu0 %5075 }
 0x6a6   :  { %v5078_v0 = vpop.permute.xlu1 %5077  ;;  %5231 = vst.msk [vmem:[#allocation3 + $0x120] sm:$0xff] %vm719_vm2, %v5076_v14  ;;  %v5293_v14 = vld [vmem:[#allocation2 + $0x1ca] sm:$0xff] }
 0x6a7   :  { %5232 = vst.msk [vmem:[#allocation3 + $0x128] sm:$0xff] %vm719_vm2, %v5078_v0  ;;  %5447 = vrot.lane.b32.xlu0 %v5289_v26, %s9793_s28  ;;  %v5294_v0 = vld [vmem:[#allocation2 + $0x1d2] sm:$0xff] }
 0x6a8   :  { %5449 = vrot.lane.b32.xlu1 %v5290_v24, %s9793_s28 }
 0x6a9   :  { %v5080_v35 = vpop.permute.xlu0 %5079 }
 0x6aa   :  { %v5082_v9 = vpop.permute.xlu1 %5081  ;;  %5233 = vst.msk [vmem:[#allocation3 + $0x130] sm:$0xff] %vm719_vm2, %v5080_v35  ;;  %v5295_v35 = vld [vmem:[#allocation2 + $0x1e2] sm:$0xff] }
 0x6ab   :  { %5234 = vst.msk [vmem:[#allocation3 + $0x138] sm:$0xff] %vm719_vm2, %v5082_v9  ;;  %5451 = vrot.lane.b32.xlu0 %v5291_v54, %s9793_s28  ;;  %v5296_v54 = vld [vmem:[#allocation2 + $0x1ea] sm:$0xff] }
 0x6ac   :  { %5453 = vrot.lane.b32.xlu1 %v5292_v51, %s9793_s28 }
 0x6ad   :  { %v5084_v44 = vpop.permute.xlu0 %5083 }
 0x6ae   :  { %v5086_v36 = vpop.permute.xlu1 %5085  ;;  %5235 = vst.msk [vmem:[#allocation3 + $0x140] sm:$0xff] %vm719_vm2, %v5084_v44  ;;  %v5297_v44 = vld [vmem:[#allocation2 + $0x1fa] sm:$0xff] }
 0x6af   :  { %5236 = vst.msk [vmem:[#allocation3 + $0x148] sm:$0xff] %vm719_vm2, %v5086_v36  ;;  %5455 = vrot.lane.b32.xlu0 %v5293_v14, %s9793_s28  ;;  %v5298_v36 = vld [vmem:[#allocation2 + $0x202] sm:$0xff] }
 0x6b0   :  { %5457 = vrot.lane.b32.xlu1 %v5294_v0, %s9793_s28 }
 0x6b1   :  { %v5088_v26 = vpop.permute.xlu0 %5087 }
 0x6b2   :  { %v5090_v24 = vpop.permute.xlu1 %5089  ;;  %5237 = vst.msk [vmem:[#allocation3 + $0x150] sm:$0xff] %vm719_vm2, %v5088_v26  ;;  %v5299_v26 = vld [vmem:[#allocation2 + $0x212] sm:$0xff] }
 0x6b3   :  { %5238 = vst.msk [vmem:[#allocation3 + $0x158] sm:$0xff] %vm719_vm2, %v5090_v24  ;;  %5459 = vrot.lane.b32.xlu0 %v5295_v35, %s9793_s28  ;;  %v5300_v24 = vld [vmem:[#allocation2 + $0x21a] sm:$0xff] }
 0x6b4   :  { %5461 = vrot.lane.b32.xlu1 %v5296_v54, %s9793_s28 }
 0x6b5   :  { %v5092_v51 = vpop.permute.xlu0 %5091 }
 0x6b6   :  { %v5094_v9 = vpop.permute.xlu1 %5093  ;;  %5239 = vst.msk [vmem:[#allocation3 + $0x160] sm:$0xff] %vm719_vm2, %v5092_v51  ;;  %v5301_v51 = vld [vmem:[#allocation2 + $0x22a] sm:$0xff] }
 0x6b7   :  { %5240 = vst.msk [vmem:[#allocation3 + $0x168] sm:$0xff] %vm719_vm2, %v5094_v9  ;;  %5463 = vrot.lane.b32.xlu0 %v5297_v44, %s9793_s28  ;;  %v5302_v9 = vld [vmem:[#allocation2 + $0x232] sm:$0xff] }
 0x6b8   :  { %5465 = vrot.lane.b32.xlu1 %v5298_v36, %s9793_s28 }
 0x6b9   :  { %v5096_v14 = vpop.permute.xlu0 %5095 }
 0x6ba   :  { %v5098_v0 = vpop.permute.xlu1 %5097  ;;  %5241 = vst.msk [vmem:[#allocation3 + $0x170] sm:$0xff] %vm719_vm2, %v5096_v14  ;;  %v5303_v14 = vld [vmem:[#allocation2 + $0x242] sm:$0xff] }
 0x6bb   :  { %5242 = vst.msk [vmem:[#allocation3 + $0x178] sm:$0xff] %vm719_vm2, %v5098_v0  ;;  %5467 = vrot.lane.b32.xlu0 %v5299_v26, %s9793_s28  ;;  %v5304_v0 = vld [vmem:[#allocation2 + $0x24a] sm:$0xff] }
 0x6bc   :  { %5469 = vrot.lane.b32.xlu1 %v5300_v24, %s9793_s28 }
 0x6bd   :  { %v5100_v35 = vpop.permute.xlu0 %5099 }
 0x6be   :  { %v5102_v54 = vpop.permute.xlu1 %5101  ;;  %5243 = vst.msk [vmem:[#allocation3 + $0x180] sm:$0xff] %vm719_vm2, %v5100_v35  ;;  %v5305_v35 = vld [vmem:[#allocation2 + $0x25a] sm:$0xff] }
 0x6bf   :  { %5244 = vst.msk [vmem:[#allocation3 + $0x188] sm:$0xff] %vm719_vm2, %v5102_v54  ;;  %5471 = vrot.lane.b32.xlu0 %v5301_v51, %s9793_s28  ;;  %v5306_v54 = vld [vmem:[#allocation2 + $0x262] sm:$0xff] }
 0x6c0   :  { %5473 = vrot.lane.b32.xlu1 %v5302_v9, %s9793_s28 }
 0x6c1   :  { %v5104_v44 = vpop.permute.xlu0 %5103 }
 0x6c2   :  { %v5106_v36 = vpop.permute.xlu1 %5105  ;;  %5245 = vst.msk [vmem:[#allocation3 + $0x190] sm:$0xff] %vm719_vm2, %v5104_v44  ;;  %v5307_v44 = vld [vmem:[#allocation2 + $0x272] sm:$0xff] }
 0x6c3   :  { %5246 = vst.msk [vmem:[#allocation3 + $0x198] sm:$0xff] %vm719_vm2, %v5106_v36  ;;  %5475 = vrot.lane.b32.xlu0 %v5303_v14, %s9793_s28  ;;  %v5308_v36 = vld [vmem:[#allocation2 + $0x27a] sm:$0xff] }
 0x6c4   :  { %5477 = vrot.lane.b32.xlu1 %v5304_v0, %s9793_s28 }
 0x6c5   :  { %v5108_v26 = vpop.permute.xlu0 %5107 }
 0x6c6   :  { %v5110_v24 = vpop.permute.xlu1 %5109  ;;  %5247 = vst.msk [vmem:[#allocation3 + $0x1a0] sm:$0xff] %vm719_vm2, %v5108_v26  ;;  %v5309_v26 = vld [vmem:[#allocation2 + $0x28a] sm:$0xff] }
 0x6c7   :  { %5248 = vst.msk [vmem:[#allocation3 + $0x1a8] sm:$0xff] %vm719_vm2, %v5110_v24  ;;  %5479 = vrot.lane.b32.xlu0 %v5305_v35, %s9793_s28  ;;  %v5310_v24 = vld [vmem:[#allocation2 + $0x292] sm:$0xff] }
 0x6c8   :  { %5481 = vrot.lane.b32.xlu1 %v5306_v54, %s9793_s28 }
 0x6c9   :  { %v5112_v51 = vpop.permute.xlu0 %5111 }
 0x6ca   :  { %v5114_v9 = vpop.permute.xlu1 %5113  ;;  %5249 = vst.msk [vmem:[#allocation3 + $0x1b0] sm:$0xff] %vm719_vm2, %v5112_v51  ;;  %v5311_v51 = vld [vmem:[#allocation2 + $0x2a2] sm:$0xff] }
 0x6cb   :  { %5250 = vst.msk [vmem:[#allocation3 + $0x1b8] sm:$0xff] %vm719_vm2, %v5114_v9  ;;  %5483 = vrot.lane.b32.xlu0 %v5307_v44, %s9793_s28  ;;  %v5312_v9 = vld [vmem:[#allocation2 + $0x2aa] sm:$0xff] }
 0x6cc   :  { %5485 = vrot.lane.b32.xlu1 %v5308_v36, %s9793_s28 }
 0x6cd   :  { %v5116_v14 = vpop.permute.xlu0 %5115 }
 0x6ce   :  { %v5118_v0 = vpop.permute.xlu1 %5117  ;;  %5251 = vst.msk [vmem:[#allocation3 + $0x1c0] sm:$0xff] %vm719_vm2, %v5116_v14  ;;  %v5313_v14 = vld [vmem:[#allocation2 + $0x2ba] sm:$0xff] }
 0x6cf   :  { %5252 = vst.msk [vmem:[#allocation3 + $0x1c8] sm:$0xff] %vm719_vm2, %v5118_v0  ;;  %5487 = vrot.lane.b32.xlu0 %v5309_v26, %s9793_s28  ;;  %v5314_v0 = vld [vmem:[#allocation2 + $0x2c2] sm:$0xff] }
 0x6d0   :  { %5489 = vrot.lane.b32.xlu1 %v5310_v24, %s9793_s28 }
 0x6d1   :  { %v5120_v35 = vpop.permute.xlu0 %5119 }
 0x6d2   :  { %v5122_v54 = vpop.permute.xlu1 %5121  ;;  %5253 = vst.msk [vmem:[#allocation3 + $0x1d0] sm:$0xff] %vm719_vm2, %v5120_v35  ;;  %v5315_v35 = vld [vmem:[#allocation2 + $0x2d2] sm:$0xff] }
 0x6d3   :  { %5254 = vst.msk [vmem:[#allocation3 + $0x1d8] sm:$0xff] %vm719_vm2, %v5122_v54  ;;  %5491 = vrot.lane.b32.xlu0 %v5311_v51, %s9793_s28  ;;  %v5316_v54 = vld [vmem:[#allocation2 + $0x2da] sm:$0xff] }
 0x6d4   :  { %5493 = vrot.lane.b32.xlu1 %v5312_v9, %s9793_s28 }
 0x6d5   :  { %v5124_v44 = vpop.permute.xlu0 %5123 }
 0x6d6   :  { %v5126_v36 = vpop.permute.xlu1 %5125  ;;  %5255 = vst.msk [vmem:[#allocation3 + $0x1e0] sm:$0xff] %vm719_vm2, %v5124_v44  ;;  %v5317_v44 = vld [vmem:[#allocation2 + $0x2ea] sm:$0xff] }
 0x6d7   :  { %5256 = vst.msk [vmem:[#allocation3 + $0x1e8] sm:$0xff] %vm719_vm2, %v5126_v36  ;;  %5495 = vrot.lane.b32.xlu0 %v5313_v14, %s9793_s28  ;;  %v5318_v36 = vld [vmem:[#allocation2 + $0x2f2] sm:$0xff] }
 0x6d8   :  { %5497 = vrot.lane.b32.xlu1 %v5314_v0, %s9793_s28 }
 0x6d9   :  { %v5128_v26 = vpop.permute.xlu0 %5127 }
 0x6da   :  { %v5130_v24 = vpop.permute.xlu1 %5129  ;;  %5257 = vst.msk [vmem:[#allocation3 + $0x1f0] sm:$0xff] %vm719_vm2, %v5128_v26  ;;  %v5319_v26 = vld [vmem:[#allocation2 + $0x302] sm:$0xff] }
 0x6db   :  { %5258 = vst.msk [vmem:[#allocation3 + $0x1f8] sm:$0xff] %vm719_vm2, %v5130_v24  ;;  %5499 = vrot.lane.b32.xlu0 %v5315_v35, %s9793_s28  ;;  %v5320_v24 = vld [vmem:[#allocation2 + $0x30a] sm:$0xff] }
 0x6dc   :  { %5501 = vrot.lane.b32.xlu1 %v5316_v54, %s9793_s28 }
 0x6dd   :  { %v5388_v51 = vpop.permute.xlu0 %5387 }
 0x6de   :  { %v5390_v9 = vpop.permute.xlu1 %5389  ;;  %5579 = vst.msk [vmem:[#allocation3] sm:$0xff] %vm1104_vm3, %v5388_v51  ;;  %v5321_v51 = vld [vmem:[#allocation2 + $0x31a] sm:$0xff] }
 0x6df   :  { %5580 = vst.msk [vmem:[#allocation3 + $0x8] sm:$0xff] %vm1104_vm3, %v5390_v9  ;;  %5503 = vrot.lane.b32.xlu0 %v5317_v44, %s9793_s28  ;;  %v5322_v9 = vld [vmem:[#allocation2 + $0x322] sm:$0xff] }
 0x6e0   :  { %5505 = vrot.lane.b32.xlu1 %v5318_v36, %s9793_s28 }
 0x6e1   :  { %v5392_v14 = vpop.permute.xlu0 %5391 }
 0x6e2   :  { %v5394_v0 = vpop.permute.xlu1 %5393  ;;  %5581 = vst.msk [vmem:[#allocation3 + $0x10] sm:$0xff] %vm1104_vm3, %v5392_v14 }
 0x6e3   :  { %5582 = vst.msk [vmem:[#allocation3 + $0x18] sm:$0xff] %vm1104_vm3, %v5394_v0  ;;  %5507 = vrot.lane.b32.xlu0 %v5319_v26, %s9793_s28 }
 0x6e4   :  { %5509 = vrot.lane.b32.xlu1 %v5320_v24, %s9793_s28 }
 0x6e5   :  { %v5396_v35 = vpop.permute.xlu0 %5395 }
 0x6e6   :  { %v5398_v54 = vpop.permute.xlu1 %5397  ;;  %5583 = vst.msk [vmem:[#allocation3 + $0x20] sm:$0xff] %vm1104_vm3, %v5396_v35 }
 0x6e7   :  { %5584 = vst.msk [vmem:[#allocation3 + $0x28] sm:$0xff] %vm1104_vm3, %v5398_v54  ;;  %5511 = vrot.lane.b32.xlu0 %v5321_v51, %s9793_s28 }
 0x6e8   :  { %5513 = vrot.lane.b32.xlu1 %v5322_v9, %s9793_s28 }
 0x6e9   :  { %v5400_v44 = vpop.permute.xlu0 %5399 }
 0x6ea   :  { %v5402_v36 = vpop.permute.xlu1 %5401  ;;  %5585 = vst.msk [vmem:[#allocation3 + $0x30] sm:$0xff] %vm1104_vm3, %v5400_v44 }
 0x6eb   :  { %5586 = vst.msk [vmem:[#allocation3 + $0x38] sm:$0xff] %vm1104_vm3, %v5402_v36  ;;  %5771 = vrot.lane.b32.xlu0 %v13028_v4, %s9794_s0 }
 0x6ec   :  { %5773 = vrot.lane.b32.xlu1 %v13103_v8, %s9794_s0 }
 0x6ed   :  { %v5404_v14 = vpop.permute.xlu0 %5403 }
 0x6ee   :  { %v5406_v0 = vpop.permute.xlu1 %5405  ;;  %5587 = vst.msk [vmem:[#allocation3 + $0x40] sm:$0xff] %vm1104_vm3, %v5404_v14 }
 0x6ef   :  { %5588 = vst.msk [vmem:[#allocation3 + $0x48] sm:$0xff] %vm1104_vm3, %v5406_v0  ;;  %5775 = vrot.lane.b32.xlu0 %v13110_v45, %s9794_s0 }
 0x6f0   :  { %5777 = vrot.lane.b32.xlu1 %v13108_v31, %s9794_s0 }
 0x6f1   :  { %v5408_v26 = vpop.permute.xlu0 %5407 }
 0x6f2   :  { %v5410_v24 = vpop.permute.xlu1 %5409  ;;  %5589 = vst.msk [vmem:[#allocation3 + $0x50] sm:$0xff] %vm1104_vm3, %v5408_v26  ;;  %v16734_v26 = vld [vmem:[#allocation90_spill] sm:$0xff] }
 0x6f3   :  { %5590 = vst.msk [vmem:[#allocation3 + $0x58] sm:$0xff] %vm1104_vm3, %v5410_v24  ;;  %5779 = vrot.lane.b32.xlu0 %v13120_v56, %s9794_s0  ;;  %v16735_v24 = vld [vmem:[#allocation87_spill] sm:$0xff] }
 0x6f4   :  { %5781 = vrot.lane.b32.xlu1 %v13116_v16, %s9794_s0 }
 0x6f5   :  { %v5412_v4 = vpop.permute.xlu0 %5411 }
 0x6f6   :  { %v5414_v8 = vpop.permute.xlu1 %5413  ;;  %5591 = vst.msk [vmem:[#allocation3 + $0x60] sm:$0xff] %vm1104_vm3, %v5412_v4 }
 0x6f7   :  { %5592 = vst.msk [vmem:[#allocation3 + $0x68] sm:$0xff] %vm1104_vm3, %v5414_v8  ;;  %5783 = vrot.lane.b32.xlu0 %v13124_v62, %s9794_s0 }
 0x6f8   :  { %5785 = vrot.lane.b32.xlu1 %v13122_v61, %s9794_s0 }
 0x6f9   :  { %v5416_v31 = vpop.permute.xlu0 %5415 }
 0x6fa   :  { %v5418_v45 = vpop.permute.xlu1 %5417  ;;  %5593 = vst.msk [vmem:[#allocation3 + $0x70] sm:$0xff] %vm1104_vm3, %v5416_v31  ;;  %v5705_v31 = vld [vmem:[#allocation2 + $0x330] sm:$0xff] }
 0x6fb   :  { %5594 = vst.msk [vmem:[#allocation3 + $0x78] sm:$0xff] %vm1104_vm3, %v5418_v45  ;;  %5787 = vrot.lane.b32.xlu0 %v13138_v41, %s9794_s0  ;;  %v5706_v45 = vld [vmem:[#allocation2 + $0x338] sm:$0xff] }
 0x6fc   :  { %5789 = vrot.lane.b32.xlu1 %v13133_v30, %s9794_s0 }
 0x6fd   :  { %v5420_v16 = vpop.permute.xlu0 %5419 }
 0x6fe   :  { %v5422_v56 = vpop.permute.xlu1 %5421  ;;  %5595 = vst.msk [vmem:[#allocation3 + $0x80] sm:$0xff] %vm1104_vm3, %v5420_v16 }
 0x6ff   :  { %5596 = vst.msk [vmem:[#allocation3 + $0x88] sm:$0xff] %vm1104_vm3, %v5422_v56  ;;  %5791 = vrot.lane.b32.xlu0 %v13144_v59, %s9794_s0 }
 0x700   :  { %5793 = vrot.lane.b32.xlu1 %v13142_v63, %s9794_s0 }
 0x701   :  { %v5424_v61 = vpop.permute.xlu0 %5423 }
 0x702   :  { %v5426_v62 = vpop.permute.xlu1 %5425  ;;  %5597 = vst.msk [vmem:[#allocation3 + $0x90] sm:$0xff] %vm1104_vm3, %v5424_v61  ;;  %v6027_v61 = vld [vmem:[#allocation2 + $0x19] sm:$0xff] }
 0x703   :  { %5598 = vst.msk [vmem:[#allocation3 + $0x98] sm:$0xff] %vm1104_vm3, %v5426_v62  ;;  %5795 = vrot.lane.b32.xlu0 %v13152_v19, %s9794_s0  ;;  %v6028_v62 = vld [vmem:[#allocation2 + $0x21] sm:$0xff] }
 0x704   :  { %5797 = vrot.lane.b32.xlu1 %v13150_v46, %s9794_s0 }
 0x705   :  { %v5428_v30 = vpop.permute.xlu0 %5427 }
 0x706   :  { %v5430_v41 = vpop.permute.xlu1 %5429  ;;  %5599 = vst.msk [vmem:[#allocation3 + $0xa0] sm:$0xff] %vm1104_vm3, %v5428_v30 }
 0x707   :  { %5600 = vst.msk [vmem:[#allocation3 + $0xa8] sm:$0xff] %vm1104_vm3, %v5430_v41  ;;  %5799 = vrot.lane.b32.xlu0 %v13164_v50, %s9794_s0 }
 0x708   :  { %5801 = vrot.lane.b32.xlu1 %v13159_v60, %s9794_s0 }
 0x709   :  { %v5432_v63 = vpop.permute.xlu0 %5431 }
 0x70a   :  { %v5434_v59 = vpop.permute.xlu1 %5433  ;;  %5601 = vst.msk [vmem:[#allocation3 + $0xb0] sm:$0xff] %vm1104_vm3, %v5432_v63  ;;  %v13717_v63 = vld [vmem:[#allocation2 + $0x31] sm:$0xff] }
 0x70b   :  { %5602 = vst.msk [vmem:[#allocation3 + $0xb8] sm:$0xff] %vm1104_vm3, %v5434_v59  ;;  %5803 = vrot.lane.b32.xlu0 %v13170_v33, %s9794_s0  ;;  %v13720_v59 = vld [vmem:[#allocation2 + $0x39] sm:$0xff] }
 0x70c   :  { %5805 = vrot.lane.b32.xlu1 %v13168_v13, %s9794_s0 }
 0x70d   :  { %v5436_v46 = vpop.permute.xlu0 %5435 }
 0x70e   :  { %v5438_v19 = vpop.permute.xlu1 %5437  ;;  %5603 = vst.msk [vmem:[#allocation3 + $0xc0] sm:$0xff] %vm1104_vm3, %v5436_v46 }
 0x70f   :  { %5604 = vst.msk [vmem:[#allocation3 + $0xc8] sm:$0xff] %vm1104_vm3, %v5438_v19  ;;  %5807 = vrot.lane.b32.xlu0 %v13178_v37, %s9794_s0 }
 0x710   :  { %5809 = vrot.lane.b32.xlu1 %v13176_v55, %s9794_s0 }
 0x711   :  { %v5440_v60 = vpop.permute.xlu0 %5439 }
 0x712   :  { %v5442_v50 = vpop.permute.xlu1 %5441  ;;  %5605 = vst.msk [vmem:[#allocation3 + $0xd0] sm:$0xff] %vm1104_vm3, %v5440_v60  ;;  %v13727_v60 = vld [vmem:[#allocation2 + $0x49] sm:$0xff] }
 0x713   :  { %5606 = vst.msk [vmem:[#allocation3 + $0xd8] sm:$0xff] %vm1104_vm3, %v5442_v50  ;;  %5811 = vrot.lane.b32.xlu0 %v13190_v7, %s9794_s0  ;;  %v13730_v50 = vld [vmem:[#allocation2 + $0x51] sm:$0xff] }
 0x714   :  { %5813 = vrot.lane.b32.xlu1 %v13185_v40, %s9794_s0 }
 0x715   :  { %v5444_v13 = vpop.permute.xlu0 %5443 }
 0x716   :  { %v5446_v33 = vpop.permute.xlu1 %5445  ;;  %5607 = vst.msk [vmem:[#allocation3 + $0xe0] sm:$0xff] %vm1104_vm3, %v5444_v13 }
 0x717   :  { %5608 = vst.msk [vmem:[#allocation3 + $0xe8] sm:$0xff] %vm1104_vm3, %v5446_v33  ;;  %5815 = vrot.lane.b32.xlu0 %v13196_v3, %s9794_s0 }
 0x718   :  { %5817 = vrot.lane.b32.xlu1 %v13194_v6, %s9794_s0 }
 0x719   :  { %v5448_v55 = vpop.permute.xlu0 %5447 }
 0x71a   :  { %v5450_v37 = vpop.permute.xlu1 %5449  ;;  %5609 = vst.msk [vmem:[#allocation3 + $0xf0] sm:$0xff] %vm1104_vm3, %v5448_v55  ;;  %v13737_v55 = vld [vmem:[#allocation2 + $0x61] sm:$0xff] }
 0x71b   :  { %5610 = vst.msk [vmem:[#allocation3 + $0xf8] sm:$0xff] %vm1104_vm3, %v5450_v37  ;;  %5819 = vrot.lane.b32.xlu0 %v13204_v52, %s9794_s0  ;;  %v13740_v37 = vld [vmem:[#allocation2 + $0x69] sm:$0xff] }
 0x71c   :  { %5821 = vrot.lane.b32.xlu1 %v13202_v20, %s9794_s0 }
 0x71d   :  { %v5452_v40 = vpop.permute.xlu0 %5451 }
 0x71e   :  { %v5454_v7 = vpop.permute.xlu1 %5453  ;;  %5611 = vst.msk [vmem:[#allocation3 + $0x100] sm:$0xff] %vm1104_vm3, %v5452_v40 }
 0x71f   :  { %5612 = vst.msk [vmem:[#allocation3 + $0x108] sm:$0xff] %vm1104_vm3, %v5454_v7  ;;  %5823 = vrot.lane.b32.xlu0 %v13216_v10, %s9794_s0  ;;  %v5673_v10 = vld [vmem:[#allocation2 + $0x180] sm:$0xff] }
 0x720   :  { %5825 = vrot.lane.b32.xlu1 %v13211_v28, %s9794_s0  ;;  %v5674_v28 = vld [vmem:[#allocation2 + $0x188] sm:$0xff] }
 0x721   :  { %v5456_v6 = vpop.permute.xlu0 %5455 }
 0x722   :  { %v5458_v3 = vpop.permute.xlu1 %5457  ;;  %5613 = vst.msk [vmem:[#allocation3 + $0x110] sm:$0xff] %vm1104_vm3, %v5456_v6  ;;  %v13747_v6 = vld [vmem:[#allocation2 + $0x79] sm:$0xff] }
 0x723   :  { %5614 = vst.msk [vmem:[#allocation3 + $0x118] sm:$0xff] %vm1104_vm3, %v5458_v3  ;;  %5827 = vrot.lane.b32.xlu0 %v13222_v18, %s9794_s0  ;;  %v13750_v3 = vld [vmem:[#allocation2 + $0x81] sm:$0xff] }
 0x724   :  { %5829 = vrot.lane.b32.xlu1 %v13220_v58, %s9794_s0 }
 0x725   :  { %v5460_v20 = vpop.permute.xlu0 %5459 }
 0x726   :  { %v5462_v52 = vpop.permute.xlu1 %5461  ;;  %5615 = vst.msk [vmem:[#allocation3 + $0x120] sm:$0xff] %vm1104_vm3, %v5460_v20 }
 0x727   :  { %5616 = vst.msk [vmem:[#allocation3 + $0x128] sm:$0xff] %vm1104_vm3, %v5462_v52  ;;  %5831 = vrot.lane.b32.xlu0 %v5673_v10, %s9794_s0  ;;  %v13757_v10 = vld [vmem:[#allocation2 + $0x91] sm:$0xff] }
 0x728   :  { %5833 = vrot.lane.b32.xlu1 %v5674_v28, %s9794_s0  ;;  %v13760_v28 = vld [vmem:[#allocation2 + $0x99] sm:$0xff] }
 0x729   :  { %v5464_v35 = vpop.permute.xlu0 %5463 }
 0x72a   :  { %v5466_v54 = vpop.permute.xlu1 %5465  ;;  %5617 = vst.msk [vmem:[#allocation3 + $0x130] sm:$0xff] %vm1104_vm3, %v5464_v35 }
 0x72b   :  { %5618 = vst.msk [vmem:[#allocation3 + $0x138] sm:$0xff] %vm1104_vm3, %v5466_v54  ;;  %5835 = vrot.lane.b32.xlu0 %v13231_v34, %s9794_s0 }
 0x72c   :  { %5837 = vrot.lane.b32.xlu1 %v13229_v57, %s9794_s0 }
 0x72d   :  { %v5468_v58 = vpop.permute.xlu0 %5467 }
 0x72e   :  { %v5470_v18 = vpop.permute.xlu1 %5469  ;;  %5619 = vst.msk [vmem:[#allocation3 + $0x140] sm:$0xff] %vm1104_vm3, %v5468_v58  ;;  %v13767_v58 = vld [vmem:[#allocation2 + $0xa9] sm:$0xff] }
 0x72f   :  { %5620 = vst.msk [vmem:[#allocation3 + $0x148] sm:$0xff] %vm1104_vm3, %v5470_v18  ;;  %5839 = vrot.lane.b32.xlu0 %v13240_v48, %s9794_s0  ;;  %v13770_v18 = vld [vmem:[#allocation2 + $0xb1] sm:$0xff] }
 0x730   :  { %5841 = vrot.lane.b32.xlu1 %v13238_v39, %s9794_s0 }
 0x731   :  { %v5472_v51 = vpop.permute.xlu0 %5471 }
 0x732   :  { %v5474_v9 = vpop.permute.xlu1 %5473  ;;  %5621 = vst.msk [vmem:[#allocation3 + $0x150] sm:$0xff] %vm1104_vm3, %v5472_v51 }
 0x733   :  { %5622 = vst.msk [vmem:[#allocation3 + $0x158] sm:$0xff] %vm1104_vm3, %v5474_v9  ;;  %5843 = vrot.lane.b32.xlu0 %v13250_v15, %s9794_s0 }
 0x734   :  { %5845 = vrot.lane.b32.xlu1 %v13246_v17, %s9794_s0 }
 0x735   :  { %v5476_v57 = vpop.permute.xlu0 %5475 }
 0x736   :  { %v5478_v34 = vpop.permute.xlu1 %5477  ;;  %5623 = vst.msk [vmem:[#allocation3 + $0x160] sm:$0xff] %vm1104_vm3, %v5476_v57  ;;  %v13777_v57 = vld [vmem:[#allocation2 + $0xc1] sm:$0xff] }
 0x737   :  { %5624 = vst.msk [vmem:[#allocation3 + $0x168] sm:$0xff] %vm1104_vm3, %v5478_v34  ;;  %5847 = vrot.lane.b32.xlu0 %v13254_v22, %s9794_s0  ;;  %v13780_v34 = vld [vmem:[#allocation2 + $0xc9] sm:$0xff] }
 0x738   :  { %5849 = vrot.lane.b32.xlu1 %v13252_v32, %s9794_s0 }
 0x739   :  { %v5480_v39 = vpop.permute.xlu0 %5479 }
 0x73a   :  { %v5482_v48 = vpop.permute.xlu1 %5481  ;;  %5625 = vst.msk [vmem:[#allocation3 + $0x170] sm:$0xff] %vm1104_vm3, %v5480_v39 }
 0x73b   :  { %5626 = vst.msk [vmem:[#allocation3 + $0x178] sm:$0xff] %vm1104_vm3, %v5482_v48  ;;  %5851 = vrot.lane.b32.xlu0 %v13268_v38, %s9794_s0 }
 0x73c   :  { %5853 = vrot.lane.b32.xlu1 %v13263_v23, %s9794_s0 }
 0x73d   :  { %v5484_v17 = vpop.permute.xlu0 %5483 }
 0x73e   :  { %v5486_v15 = vpop.permute.xlu1 %5485  ;;  %5627 = vst.msk [vmem:[#allocation3 + $0x180] sm:$0xff] %vm1104_vm3, %v5484_v17  ;;  %v13787_v17 = vld [vmem:[#allocation2 + $0xd9] sm:$0xff] }
 0x73f   :  { %5628 = vst.msk [vmem:[#allocation3 + $0x188] sm:$0xff] %vm1104_vm3, %v5486_v15  ;;  %5855 = vrot.lane.b32.xlu0 %v13275_v2, %s9794_s0  ;;  %v13790_v15 = vld [vmem:[#allocation2 + $0xe1] sm:$0xff] }
 0x740   :  { %5857 = vrot.lane.b32.xlu1 %v13273_v11, %s9794_s0 }
 0x741   :  { %v5488_v32 = vpop.permute.xlu0 %5487 }
 0x742   :  { %v5490_v22 = vpop.permute.xlu1 %5489  ;;  %5629 = vst.msk [vmem:[#allocation3 + $0x190] sm:$0xff] %vm1104_vm3, %v5488_v32 }
 0x743   :  { %5630 = vst.msk [vmem:[#allocation3 + $0x198] sm:$0xff] %vm1104_vm3, %v5490_v22  ;;  %5859 = vrot.lane.b32.xlu0 %v13286_v21, %s9794_s0 }
 0x744   :  { %5861 = vrot.lane.b32.xlu1 %v13281_v49, %s9794_s0 }
 0x745   :  { %v5492_v23 = vpop.permute.xlu0 %5491 }
 0x746   :  { %v5494_v38 = vpop.permute.xlu1 %5493  ;;  %5631 = vst.msk [vmem:[#allocation3 + $0x1a0] sm:$0xff] %vm1104_vm3, %v5492_v23  ;;  %v13797_v23 = vld [vmem:[#allocation2 + $0xf1] sm:$0xff] }
 0x747   :  { %5632 = vst.msk [vmem:[#allocation3 + $0x1a8] sm:$0xff] %vm1104_vm3, %v5494_v38  ;;  %5863 = vrot.lane.b32.xlu0 %v13294_v29, %s9794_s0  ;;  %v13800_v38 = vld [vmem:[#allocation2 + $0xf9] sm:$0xff] }
 0x748   :  { %5865 = vrot.lane.b32.xlu1 %v13292_v42, %s9794_s0 }
 0x749   :  { %v5496_v11 = vpop.permute.xlu0 %5495 }
 0x74a   :  { %v5498_v2 = vpop.permute.xlu1 %5497  ;;  %5633 = vst.msk [vmem:[#allocation3 + $0x1b0] sm:$0xff] %vm1104_vm3, %v5496_v11 }
 0x74b   :  { %5634 = vst.msk [vmem:[#allocation3 + $0x1b8] sm:$0xff] %vm1104_vm3, %v5498_v2  ;;  %5867 = vrot.lane.b32.xlu0 %v13304_v12, %s9794_s0 }
 0x74c   :  { %5869 = vrot.lane.b32.xlu1 %v13300_v47, %s9794_s0 }
 0x74d   :  { %v5500_v49 = vpop.permute.xlu0 %5499 }
 0x74e   :  { %v5502_v21 = vpop.permute.xlu1 %5501  ;;  %5635 = vst.msk [vmem:[#allocation3 + $0x1c0] sm:$0xff] %vm1104_vm3, %v5500_v49  ;;  %v13807_v49 = vld [vmem:[#allocation2 + $0x109] sm:$0xff] }
 0x74f   :  { %5636 = vst.msk [vmem:[#allocation3 + $0x1c8] sm:$0xff] %vm1104_vm3, %v5502_v21  ;;  %5871 = vrot.lane.b32.xlu0 %v13311_v25, %s9794_s0  ;;  %v6048_v21 = vld [vmem:[#allocation2 + $0x111] sm:$0xff] }
 0x750   :  { %5873 = vrot.lane.b32.xlu1 %v13309_v43, %s9794_s0 }
 0x751   :  { %v5504_v42 = vpop.permute.xlu0 %5503 }
 0x752   :  { %v5506_v29 = vpop.permute.xlu1 %5505  ;;  %5637 = vst.msk [vmem:[#allocation3 + $0x1d0] sm:$0xff] %vm1104_vm3, %v5504_v42 }
 0x753   :  { %5638 = vst.msk [vmem:[#allocation3 + $0x1d8] sm:$0xff] %vm1104_vm3, %v5506_v29  ;;  %5875 = vrot.lane.b32.xlu0 %v13320_v5, %s9794_s0  ;;  %v16731_v5 = vld [vmem:[#allocation83_spill] sm:$0xff] }
 0x754   :  { %5877 = vrot.lane.b32.xlu1 %v13318_v27, %s9794_s0  ;;  %v16730_v27 = vld [vmem:[#allocation86_spill] sm:$0xff] }
 0x755   :  { %v5508_v47 = vpop.permute.xlu0 %5507 }
 0x756   :  { %v5510_v12 = vpop.permute.xlu1 %5509  ;;  %5639 = vst.msk [vmem:[#allocation3 + $0x1e0] sm:$0xff] %vm1104_vm3, %v5508_v47  ;;  %v6049_v47 = vld [vmem:[#allocation2 + $0x121] sm:$0xff] }
 0x757   :  { %5640 = vst.msk [vmem:[#allocation3 + $0x1e8] sm:$0xff] %vm1104_vm3, %v5510_v12  ;;  %5879 = vrot.lane.b32.xlu0 %v13330_v1, %s9794_s0  ;;  %v16733_v1 = vld [vmem:[#allocation85_spill] sm:$0xff] }
 0x758   :  { %5881 = vrot.lane.b32.xlu1 %v13326_v53, %s9794_s0  ;;  %v16732_v53 = vld [vmem:[#allocation88_spill] sm:$0xff]  ;;  %v6050_v12 = vld [vmem:[#allocation2 + $0x129] sm:$0xff] }
 0x759   :  { %v5512_v43 = vpop.permute.xlu0 %5511 }
 0x75a   :  { %v5514_v25 = vpop.permute.xlu1 %5513  ;;  %5641 = vst.msk [vmem:[#allocation3 + $0x1f0] sm:$0xff] %vm1104_vm3, %v5512_v43 }
 0x75b   :  { %5642 = vst.msk [vmem:[#allocation3 + $0x1f8] sm:$0xff] %vm1104_vm3, %v5514_v25  ;;  %5883 = vrot.lane.b32.xlu0 %v16730_v27, %s9794_s0  ;;  %v6051_v27 = vld [vmem:[#allocation2 + $0x139] sm:$0xff] }
 0x75c   :  { %5885 = vrot.lane.b32.xlu1 %v16731_v5, %s9794_s0  ;;  %v6052_v5 = vld [vmem:[#allocation2 + $0x141] sm:$0xff] }
 0x75d   :  { %v5772_v44 = vpop.permute.xlu0 %5771 }
 0x75e   :  { %v5774_v36 = vpop.permute.xlu1 %5773  ;;  %5963 = vst.msk [vmem:[#allocation3] sm:$0xff] %vm1489_vm4, %v5772_v44 }
 0x75f   :  { %5964 = vst.msk [vmem:[#allocation3 + $0x8] sm:$0xff] %vm1489_vm4, %v5774_v36  ;;  %5887 = vrot.lane.b32.xlu0 %v16732_v53, %s9794_s0  ;;  %v6053_v53 = vld [vmem:[#allocation2 + $0x151] sm:$0xff] }
 0x760   :  { %5889 = vrot.lane.b32.xlu1 %v16733_v1, %s9794_s0  ;;  %v6054_v1 = vld [vmem:[#allocation2 + $0x159] sm:$0xff] }
 0x761   :  { %v5776_v14 = vpop.permute.xlu0 %5775 }
 0x762   :  { %v5778_v0 = vpop.permute.xlu1 %5777  ;;  %5965 = vst.msk [vmem:[#allocation3 + $0x10] sm:$0xff] %vm1489_vm4, %v5776_v14 }
 0x763   :  { %5966 = vst.msk [vmem:[#allocation3 + $0x18] sm:$0xff] %vm1489_vm4, %v5778_v0  ;;  %5891 = vrot.lane.b32.xlu0 %v16734_v26, %s9794_s0  ;;  %v6055_v26 = vld [vmem:[#allocation2 + $0x169] sm:$0xff] }
 0x764   :  { %5893 = vrot.lane.b32.xlu1 %v16735_v24, %s9794_s0  ;;  %v6056_v24 = vld [vmem:[#allocation2 + $0x171] sm:$0xff] }
 0x765   :  { %v5780_v4 = vpop.permute.xlu0 %5779 }
 0x766   :  { %v5782_v8 = vpop.permute.xlu1 %5781  ;;  %5967 = vst.msk [vmem:[#allocation3 + $0x20] sm:$0xff] %vm1489_vm4, %v5780_v4 }
 0x767   :  { %5968 = vst.msk [vmem:[#allocation3 + $0x28] sm:$0xff] %vm1489_vm4, %v5782_v8  ;;  %5895 = vrot.lane.b32.xlu0 %v5705_v31, %s9794_s0  ;;  %v6057_v31 = vld [vmem:[#allocation2 + $0x181] sm:$0xff] }
 0x768   :  { %5897 = vrot.lane.b32.xlu1 %v5706_v45, %s9794_s0  ;;  %v6058_v45 = vld [vmem:[#allocation2 + $0x189] sm:$0xff] }
 0x769   :  { %v5784_v16 = vpop.permute.xlu0 %5783 }
 0x76a   :  { %v5786_v56 = vpop.permute.xlu1 %5785  ;;  %5969 = vst.msk [vmem:[#allocation3 + $0x30] sm:$0xff] %vm1489_vm4, %v5784_v16 }
 0x76b   :  { %5970 = vst.msk [vmem:[#allocation3 + $0x38] sm:$0xff] %vm1489_vm4, %v5786_v56  ;;  %6155 = vrot.lane.b32.xlu0 %v6027_v61, %s9795_s17  ;;  %v6059_v61 = vld [vmem:[#allocation2 + $0x1c9] sm:$0xff] }
 0x76c   :  { %6157 = vrot.lane.b32.xlu1 %v6028_v62, %s9795_s17  ;;  %v6060_v62 = vld [vmem:[#allocation2 + $0x1d1] sm:$0xff] }
 0x76d   :  { %v5788_v30 = vpop.permute.xlu0 %5787 }
 0x76e   :  { %v5790_v41 = vpop.permute.xlu1 %5789  ;;  %5971 = vst.msk [vmem:[#allocation3 + $0x40] sm:$0xff] %vm1489_vm4, %v5788_v30 }
 0x76f   :  { %5972 = vst.msk [vmem:[#allocation3 + $0x48] sm:$0xff] %vm1489_vm4, %v5790_v41  ;;  %6159 = vrot.lane.b32.xlu0 %v13717_v63, %s9795_s17 }
 0x770   :  { %6161 = vrot.lane.b32.xlu1 %v13720_v59, %s9795_s17 }
 0x771   :  { %v5792_v46 = vpop.permute.xlu0 %5791 }
 0x772   :  { %v5794_v19 = vpop.permute.xlu1 %5793  ;;  %5973 = vst.msk [vmem:[#allocation3 + $0x50] sm:$0xff] %vm1489_vm4, %v5792_v46  ;;  %v6061_v46 = vld [vmem:[#allocation2 + $0x1e1] sm:$0xff] }
 0x773   :  { %5974 = vst.msk [vmem:[#allocation3 + $0x58] sm:$0xff] %vm1489_vm4, %v5794_v19  ;;  %6163 = vrot.lane.b32.xlu0 %v13727_v60, %s9795_s17  ;;  %v6062_v19 = vld [vmem:[#allocation2 + $0x1e9] sm:$0xff] }
 0x774   :  { %6165 = vrot.lane.b32.xlu1 %v13730_v50, %s9795_s17 }
 0x775   :  { %v5796_v13 = vpop.permute.xlu0 %5795 }
 0x776   :  { %v5798_v33 = vpop.permute.xlu1 %5797  ;;  %5975 = vst.msk [vmem:[#allocation3 + $0x60] sm:$0xff] %vm1489_vm4, %v5796_v13 }
 0x777   :  { %5976 = vst.msk [vmem:[#allocation3 + $0x68] sm:$0xff] %vm1489_vm4, %v5798_v33  ;;  %6167 = vrot.lane.b32.xlu0 %v13737_v55, %s9795_s17 }
 0x778   :  { %6169 = vrot.lane.b32.xlu1 %v13740_v37, %s9795_s17 }
 0x779   :  { %v5800_v40 = vpop.permute.xlu0 %5799 }
 0x77a   :  { %v5802_v7 = vpop.permute.xlu1 %5801  ;;  %5977 = vst.msk [vmem:[#allocation3 + $0x70] sm:$0xff] %vm1489_vm4, %v5800_v40  ;;  %v6063_v40 = vld [vmem:[#allocation2 + $0x1f9] sm:$0xff] }
 0x77b   :  { %5978 = vst.msk [vmem:[#allocation3 + $0x78] sm:$0xff] %vm1489_vm4, %v5802_v7  ;;  %6171 = vrot.lane.b32.xlu0 %v13747_v6, %s9795_s17  ;;  %v6064_v7 = vld [vmem:[#allocation2 + $0x201] sm:$0xff] }
 0x77c   :  { %6173 = vrot.lane.b32.xlu1 %v13750_v3, %s9795_s17 }
 0x77d   :  { %v5804_v20 = vpop.permute.xlu0 %5803 }
 0x77e   :  { %v5806_v52 = vpop.permute.xlu1 %5805  ;;  %5979 = vst.msk [vmem:[#allocation3 + $0x80] sm:$0xff] %vm1489_vm4, %v5804_v20 }
 0x77f   :  { %5980 = vst.msk [vmem:[#allocation3 + $0x88] sm:$0xff] %vm1489_vm4, %v5806_v52  ;;  %6175 = vrot.lane.b32.xlu0 %v13757_v10, %s9795_s17 }
 0x780   :  { %6177 = vrot.lane.b32.xlu1 %v13760_v28, %s9795_s17 }
 0x781   :  { %v5808_v35 = vpop.permute.xlu0 %5807 }
 0x782   :  { %v5810_v54 = vpop.permute.xlu1 %5809  ;;  %5981 = vst.msk [vmem:[#allocation3 + $0x90] sm:$0xff] %vm1489_vm4, %v5808_v35  ;;  %v6065_v35 = vld [vmem:[#allocation2 + $0x211] sm:$0xff] }
 0x783   :  { %5982 = vst.msk [vmem:[#allocation3 + $0x98] sm:$0xff] %vm1489_vm4, %v5810_v54  ;;  %6179 = vrot.lane.b32.xlu0 %v13767_v58, %s9795_s17  ;;  %v6066_v54 = vld [vmem:[#allocation2 + $0x219] sm:$0xff] }
 0x784   :  { %6181 = vrot.lane.b32.xlu1 %v13770_v18, %s9795_s17 }
 0x785   :  { %v5812_v51 = vpop.permute.xlu0 %5811 }
 0x786   :  { %v5814_v9 = vpop.permute.xlu1 %5813  ;;  %5983 = vst.msk [vmem:[#allocation3 + $0xa0] sm:$0xff] %vm1489_vm4, %v5812_v51 }
 0x787   :  { %5984 = vst.msk [vmem:[#allocation3 + $0xa8] sm:$0xff] %vm1489_vm4, %v5814_v9  ;;  %6183 = vrot.lane.b32.xlu0 %v13777_v57, %s9795_s17 }
 0x788   :  { %6185 = vrot.lane.b32.xlu1 %v13780_v34, %s9795_s17 }
 0x789   :  { %v5816_v39 = vpop.permute.xlu0 %5815 }
 0x78a   :  { %v5818_v48 = vpop.permute.xlu1 %5817  ;;  %5985 = vst.msk [vmem:[#allocation3 + $0xb0] sm:$0xff] %vm1489_vm4, %v5816_v39  ;;  %v6067_v39 = vld [vmem:[#allocation2 + $0x229] sm:$0xff] }
 0x78b   :  { %5986 = vst.msk [vmem:[#allocation3 + $0xb8] sm:$0xff] %vm1489_vm4, %v5818_v48  ;;  %6187 = vrot.lane.b32.xlu0 %v13787_v17, %s9795_s17  ;;  %v6068_v48 = vld [vmem:[#allocation2 + $0x231] sm:$0xff] }
 0x78c   :  { %6189 = vrot.lane.b32.xlu1 %v13790_v15, %s9795_s17 }
 0x78d   :  { %v5820_v32 = vpop.permute.xlu0 %5819 }
 0x78e   :  { %v5822_v22 = vpop.permute.xlu1 %5821  ;;  %5987 = vst.msk [vmem:[#allocation3 + $0xc0] sm:$0xff] %vm1489_vm4, %v5820_v32 }
 0x78f   :  { %5988 = vst.msk [vmem:[#allocation3 + $0xc8] sm:$0xff] %vm1489_vm4, %v5822_v22  ;;  %6191 = vrot.lane.b32.xlu0 %v13797_v23, %s9795_s17 }
 0x790   :  { %6193 = vrot.lane.b32.xlu1 %v13800_v38, %s9795_s17 }
 0x791   :  { %v5824_v11 = vpop.permute.xlu0 %5823 }
 0x792   :  { %v5826_v2 = vpop.permute.xlu1 %5825  ;;  %5989 = vst.msk [vmem:[#allocation3 + $0xd0] sm:$0xff] %vm1489_vm4, %v5824_v11  ;;  %v6069_v11 = vld [vmem:[#allocation2 + $0x241] sm:$0xff] }
 0x793   :  { %5990 = vst.msk [vmem:[#allocation3 + $0xd8] sm:$0xff] %vm1489_vm4, %v5826_v2  ;;  %6195 = vrot.lane.b32.xlu0 %v13807_v49, %s9795_s17  ;;  %v6070_v2 = vld [vmem:[#allocation2 + $0x249] sm:$0xff] }
 0x794   :  { %6197 = vrot.lane.b32.xlu1 %v6048_v21, %s9795_s17 }
 0x795   :  { %v5828_v42 = vpop.permute.xlu0 %5827 }
 0x796   :  { %v5830_v29 = vpop.permute.xlu1 %5829  ;;  %5991 = vst.msk [vmem:[#allocation3 + $0xe0] sm:$0xff] %vm1489_vm4, %v5828_v42 }
 0x797   :  { %5992 = vst.msk [vmem:[#allocation3 + $0xe8] sm:$0xff] %vm1489_vm4, %v5830_v29  ;;  %6199 = vrot.lane.b32.xlu0 %v6049_v47, %s9795_s17  ;;  %v6071_v29 = vld [vmem:[#allocation2 + $0x259] sm:$0xff]  ;;  %v6072_v47 = vld [vmem:[#allocation2 + $0x261] sm:$0xff] }
 0x798   :  { %6201 = vrot.lane.b32.xlu1 %v6050_v12, %s9795_s17 }
 0x799   :  { %v5832_v43 = vpop.permute.xlu0 %5831 }
 0x79a   :  { %v5834_v25 = vpop.permute.xlu1 %5833  ;;  %5993 = vst.msk [vmem:[#allocation3 + $0xf0] sm:$0xff] %vm1489_vm4, %v5832_v43 }
 0x79b   :  { %5994 = vst.msk [vmem:[#allocation3 + $0xf8] sm:$0xff] %vm1489_vm4, %v5834_v25  ;;  %6203 = vrot.lane.b32.xlu0 %v6051_v27, %s9795_s17  ;;  %v6073_v25 = vld [vmem:[#allocation2 + $0x271] sm:$0xff]  ;;  %v6074_v27 = vld [vmem:[#allocation2 + $0x279] sm:$0xff] }
 0x79c   :  { %6205 = vrot.lane.b32.xlu1 %v6052_v5, %s9795_s17 }
 0x79d   :  { %v5836_v44 = vpop.permute.xlu0 %5835 }
 0x79e   :  { %v5838_v36 = vpop.permute.xlu1 %5837  ;;  %5995 = vst.msk [vmem:[#allocation3 + $0x100] sm:$0xff] %vm1489_vm4, %v5836_v44 }
 0x79f   :  { %5996 = vst.msk [vmem:[#allocation3 + $0x108] sm:$0xff] %vm1489_vm4, %v5838_v36  ;;  %6207 = vrot.lane.b32.xlu0 %v6053_v53, %s9795_s17  ;;  %v6075_v36 = vld [vmem:[#allocation2 + $0x289] sm:$0xff]  ;;  %v6076_v53 = vld [vmem:[#allocation2 + $0x291] sm:$0xff] }
 0x7a0   :  { %6209 = vrot.lane.b32.xlu1 %v6054_v1, %s9795_s17 }
 0x7a1   :  { %v5840_v14 = vpop.permute.xlu0 %5839 }
 0x7a2   :  { %v5842_v0 = vpop.permute.xlu1 %5841  ;;  %5997 = vst.msk [vmem:[#allocation3 + $0x110] sm:$0xff] %vm1489_vm4, %v5840_v14 }
 0x7a3   :  { %5998 = vst.msk [vmem:[#allocation3 + $0x118] sm:$0xff] %vm1489_vm4, %v5842_v0  ;;  %6211 = vrot.lane.b32.xlu0 %v6055_v26, %s9795_s17  ;;  %v6077_v0 = vld [vmem:[#allocation2 + $0x2a1] sm:$0xff]  ;;  %v6078_v26 = vld [vmem:[#allocation2 + $0x2a9] sm:$0xff] }
 0x7a4   :  { %6213 = vrot.lane.b32.xlu1 %v6056_v24, %s9795_s17 }
 0x7a5   :  { %v5844_v4 = vpop.permute.xlu0 %5843 }
 0x7a6   :  { %v5846_v8 = vpop.permute.xlu1 %5845  ;;  %5999 = vst.msk [vmem:[#allocation3 + $0x120] sm:$0xff] %vm1489_vm4, %v5844_v4 }
 0x7a7   :  { %6000 = vst.msk [vmem:[#allocation3 + $0x128] sm:$0xff] %vm1489_vm4, %v5846_v8  ;;  %6215 = vrot.lane.b32.xlu0 %v6057_v31, %s9795_s17  ;;  %v6079_v8 = vld [vmem:[#allocation2 + $0x2b9] sm:$0xff]  ;;  %v6080_v31 = vld [vmem:[#allocation2 + $0x2c1] sm:$0xff] }
 0x7a8   :  { %6217 = vrot.lane.b32.xlu1 %v6058_v45, %s9795_s17 }
 0x7a9   :  { %v5848_v16 = vpop.permute.xlu0 %5847 }
 0x7aa   :  { %v5850_v56 = vpop.permute.xlu1 %5849  ;;  %6001 = vst.msk [vmem:[#allocation3 + $0x130] sm:$0xff] %vm1489_vm4, %v5848_v16 }
 0x7ab   :  { %6002 = vst.msk [vmem:[#allocation3 + $0x138] sm:$0xff] %vm1489_vm4, %v5850_v56  ;;  %6219 = vrot.lane.b32.xlu0 %v6059_v61, %s9795_s17  ;;  %v6081_v56 = vld [vmem:[#allocation2 + $0x2d1] sm:$0xff]  ;;  %v6082_v61 = vld [vmem:[#allocation2 + $0x2d9] sm:$0xff] }
 0x7ac   :  { %6221 = vrot.lane.b32.xlu1 %v6060_v62, %s9795_s17 }
 0x7ad   :  { %v5852_v30 = vpop.permute.xlu0 %5851 }
 0x7ae   :  { %v5854_v41 = vpop.permute.xlu1 %5853  ;;  %6003 = vst.msk [vmem:[#allocation3 + $0x140] sm:$0xff] %vm1489_vm4, %v5852_v30 }
 0x7af   :  { %6004 = vst.msk [vmem:[#allocation3 + $0x148] sm:$0xff] %vm1489_vm4, %v5854_v41  ;;  %6223 = vrot.lane.b32.xlu0 %v6061_v46, %s9795_s17  ;;  %v6083_v41 = vld [vmem:[#allocation2 + $0x2e9] sm:$0xff]  ;;  %v6084_v46 = vld [vmem:[#allocation2 + $0x2f1] sm:$0xff] }
 0x7b0   :  { %6225 = vrot.lane.b32.xlu1 %v6062_v19, %s9795_s17 }
 0x7b1   :  { %v5856_v13 = vpop.permute.xlu0 %5855 }
 0x7b2   :  { %v5858_v33 = vpop.permute.xlu1 %5857  ;;  %6005 = vst.msk [vmem:[#allocation3 + $0x150] sm:$0xff] %vm1489_vm4, %v5856_v13 }
 0x7b3   :  { %6006 = vst.msk [vmem:[#allocation3 + $0x158] sm:$0xff] %vm1489_vm4, %v5858_v33  ;;  %6227 = vrot.lane.b32.xlu0 %v6063_v40, %s9795_s17  ;;  %v6085_v33 = vld [vmem:[#allocation2 + $0x301] sm:$0xff]  ;;  %v6086_v40 = vld [vmem:[#allocation2 + $0x309] sm:$0xff] }
 0x7b4   :  { %6229 = vrot.lane.b32.xlu1 %v6064_v7, %s9795_s17 }
 0x7b5   :  { %v5860_v20 = vpop.permute.xlu0 %5859 }
 0x7b6   :  { %v5862_v52 = vpop.permute.xlu1 %5861  ;;  %6007 = vst.msk [vmem:[#allocation3 + $0x160] sm:$0xff] %vm1489_vm4, %v5860_v20 }
 0x7b7   :  { %6008 = vst.msk [vmem:[#allocation3 + $0x168] sm:$0xff] %vm1489_vm4, %v5862_v52  ;;  %6231 = vrot.lane.b32.xlu0 %v6065_v35, %s9795_s17  ;;  %v6087_v52 = vld [vmem:[#allocation2 + $0x319] sm:$0xff]  ;;  %v6088_v35 = vld [vmem:[#allocation2 + $0x321] sm:$0xff] }
 0x7b8   :  { %6233 = vrot.lane.b32.xlu1 %v6066_v54, %s9795_s17 }
 0x7b9   :  { %v5864_v51 = vpop.permute.xlu0 %5863 }
 0x7ba   :  { %v5866_v9 = vpop.permute.xlu1 %5865  ;;  %6009 = vst.msk [vmem:[#allocation3 + $0x170] sm:$0xff] %vm1489_vm4, %v5864_v51 }
 0x7bb   :  { %6010 = vst.msk [vmem:[#allocation3 + $0x178] sm:$0xff] %vm1489_vm4, %v5866_v9  ;;  %6235 = vrot.lane.b32.xlu0 %v6067_v39, %s9795_s17  ;;  %v6089_v9 = vld [vmem:[#allocation2 + $0x331] sm:$0xff]  ;;  %v6090_v39 = vld [vmem:[#allocation2 + $0x339] sm:$0xff] }
 0x7bc   :  { %6237 = vrot.lane.b32.xlu1 %v6068_v48, %s9795_s17 }
 0x7bd   :  { %v5868_v32 = vpop.permute.xlu0 %5867 }
 0x7be   :  { %v5870_v22 = vpop.permute.xlu1 %5869  ;;  %6011 = vst.msk [vmem:[#allocation3 + $0x180] sm:$0xff] %vm1489_vm4, %v5868_v32 }
 0x7bf   :  { %6012 = vst.msk [vmem:[#allocation3 + $0x188] sm:$0xff] %vm1489_vm4, %v5870_v22  ;;  %6239 = vrot.lane.b32.xlu0 %v6069_v11, %s9795_s17  ;;  %v6411_v22 = vld [vmem:[#allocation2 + $0x1a] sm:$0xff]  ;;  %v6412_v11 = vld [vmem:[#allocation2 + $0x22] sm:$0xff] }
 0x7c0   :  { %6241 = vrot.lane.b32.xlu1 %v6070_v2, %s9795_s17 }
 0x7c1   :  { %v5872_v21 = vpop.permute.xlu0 %5871 }
 0x7c2   :  { %v5874_v42 = vpop.permute.xlu1 %5873  ;;  %6013 = vst.msk [vmem:[#allocation3 + $0x190] sm:$0xff] %vm1489_vm4, %v5872_v21 }
 0x7c3   :  { %6014 = vst.msk [vmem:[#allocation3 + $0x198] sm:$0xff] %vm1489_vm4, %v5874_v42  ;;  %6243 = vrot.lane.b32.xlu0 %v6071_v29, %s9795_s17  ;;  %v13902_v42 = vld [vmem:[#allocation2 + $0x32] sm:$0xff]  ;;  %v13905_v29 = vld [vmem:[#allocation2 + $0x3a] sm:$0xff] }
 0x7c4   :  { %6245 = vrot.lane.b32.xlu1 %v6072_v47, %s9795_s17 }
 0x7c5   :  { %v5876_v12 = vpop.permute.xlu0 %5875 }
 0x7c6   :  { %v5878_v43 = vpop.permute.xlu1 %5877  ;;  %6015 = vst.msk [vmem:[#allocation3 + $0x1a0] sm:$0xff] %vm1489_vm4, %v5876_v12 }
 0x7c7   :  { %6016 = vst.msk [vmem:[#allocation3 + $0x1a8] sm:$0xff] %vm1489_vm4, %v5878_v43  ;;  %6247 = vrot.lane.b32.xlu0 %v6073_v25, %s9795_s17  ;;  %v13912_v43 = vld [vmem:[#allocation2 + $0x4a] sm:$0xff]  ;;  %v13915_v25 = vld [vmem:[#allocation2 + $0x52] sm:$0xff] }
 0x7c8   :  { %6249 = vrot.lane.b32.xlu1 %v6074_v27, %s9795_s17 }
 0x7c9   :  { %v5880_v5 = vpop.permute.xlu0 %5879 }
 0x7ca   :  { %v5882_v44 = vpop.permute.xlu1 %5881  ;;  %6017 = vst.msk [vmem:[#allocation3 + $0x1b0] sm:$0xff] %vm1489_vm4, %v5880_v5 }
 0x7cb   :  { %6018 = vst.msk [vmem:[#allocation3 + $0x1b8] sm:$0xff] %vm1489_vm4, %v5882_v44  ;;  %6251 = vrot.lane.b32.xlu0 %v6075_v36, %s9795_s17  ;;  %v13922_v44 = vld [vmem:[#allocation2 + $0x62] sm:$0xff]  ;;  %v13925_v36 = vld [vmem:[#allocation2 + $0x6a] sm:$0xff] }
 0x7cc   :  { %6253 = vrot.lane.b32.xlu1 %v6076_v53, %s9795_s17 }
 0x7cd   :  { %v5884_v1 = vpop.permute.xlu0 %5883 }
 0x7ce   :  { %v5886_v14 = vpop.permute.xlu1 %5885  ;;  %6019 = vst.msk [vmem:[#allocation3 + $0x1c0] sm:$0xff] %vm1489_vm4, %v5884_v1 }
 0x7cf   :  { %6020 = vst.msk [vmem:[#allocation3 + $0x1c8] sm:$0xff] %vm1489_vm4, %v5886_v14  ;;  %6255 = vrot.lane.b32.xlu0 %v6077_v0, %s9795_s17  ;;  %v13932_v14 = vld [vmem:[#allocation2 + $0x7a] sm:$0xff]  ;;  %v13935_v0 = vld [vmem:[#allocation2 + $0x82] sm:$0xff] }
 0x7d0   :  { %6257 = vrot.lane.b32.xlu1 %v6078_v26, %s9795_s17 }
 0x7d1   :  { %v5888_v24 = vpop.permute.xlu0 %5887 }
 0x7d2   :  { %v5890_v4 = vpop.permute.xlu1 %5889  ;;  %6021 = vst.msk [vmem:[#allocation3 + $0x1d0] sm:$0xff] %vm1489_vm4, %v5888_v24 }
 0x7d3   :  { %6022 = vst.msk [vmem:[#allocation3 + $0x1d8] sm:$0xff] %vm1489_vm4, %v5890_v4  ;;  %6259 = vrot.lane.b32.xlu0 %v6079_v8, %s9795_s17  ;;  %v13942_v4 = vld [vmem:[#allocation2 + $0x92] sm:$0xff]  ;;  %v13945_v8 = vld [vmem:[#allocation2 + $0x9a] sm:$0xff] }
 0x7d4   :  { %6261 = vrot.lane.b32.xlu1 %v6080_v31, %s9795_s17 }
 0x7d5   :  { %v5892_v45 = vpop.permute.xlu0 %5891 }
 0x7d6   :  { %v5894_v16 = vpop.permute.xlu1 %5893  ;;  %6023 = vst.msk [vmem:[#allocation3 + $0x1e0] sm:$0xff] %vm1489_vm4, %v5892_v45 }
 0x7d7   :  { %6024 = vst.msk [vmem:[#allocation3 + $0x1e8] sm:$0xff] %vm1489_vm4, %v5894_v16  ;;  %6263 = vrot.lane.b32.xlu0 %v6081_v56, %s9795_s17  ;;  %v13952_v16 = vld [vmem:[#allocation2 + $0xaa] sm:$0xff]  ;;  %v13955_v56 = vld [vmem:[#allocation2 + $0xb2] sm:$0xff] }
 0x7d8   :  { %6265 = vrot.lane.b32.xlu1 %v6082_v61, %s9795_s17 }
 0x7d9   :  { %v5896_v62 = vpop.permute.xlu0 %5895 }
 0x7da   :  { %v5898_v30 = vpop.permute.xlu1 %5897  ;;  %6025 = vst.msk [vmem:[#allocation3 + $0x1f0] sm:$0xff] %vm1489_vm4, %v5896_v62 }
 0x7db   :  { %6026 = vst.msk [vmem:[#allocation3 + $0x1f8] sm:$0xff] %vm1489_vm4, %v5898_v30  ;;  %6267 = vrot.lane.b32.xlu0 %v6083_v41, %s9795_s17  ;;  %v13962_v30 = vld [vmem:[#allocation2 + $0xc2] sm:$0xff]  ;;  %v13965_v41 = vld [vmem:[#allocation2 + $0xca] sm:$0xff] }
 0x7dc   :  { %6269 = vrot.lane.b32.xlu1 %v6084_v46, %s9795_s17 }
 0x7dd   :  { %v6156_v19 = vpop.permute.xlu0 %6155 }
 0x7de   :  { %v6158_v13 = vpop.permute.xlu1 %6157  ;;  %6347 = vst.msk [vmem:[#allocation3] sm:$0xff] %vm1874_vm5, %v6156_v19 }
 0x7df   :  { %6348 = vst.msk [vmem:[#allocation3 + $0x8] sm:$0xff] %vm1874_vm5, %v6158_v13  ;;  %6271 = vrot.lane.b32.xlu0 %v6085_v33, %s9795_s17  ;;  %v13972_v13 = vld [vmem:[#allocation2 + $0xda] sm:$0xff]  ;;  %v13975_v33 = vld [vmem:[#allocation2 + $0xe2] sm:$0xff] }
 0x7e0   :  { %6273 = vrot.lane.b32.xlu1 %v6086_v40, %s9795_s17 }
 0x7e1   :  { %v6160_v7 = vpop.permute.xlu0 %6159 }
 0x7e2   :  { %v6162_v20 = vpop.permute.xlu1 %6161  ;;  %6349 = vst.msk [vmem:[#allocation3 + $0x10] sm:$0xff] %vm1874_vm5, %v6160_v7 }
 0x7e3   :  { %6350 = vst.msk [vmem:[#allocation3 + $0x18] sm:$0xff] %vm1874_vm5, %v6162_v20  ;;  %6275 = vrot.lane.b32.xlu0 %v6087_v52, %s9795_s17  ;;  %v13982_v20 = vld [vmem:[#allocation2 + $0xf2] sm:$0xff]  ;;  %v13985_v52 = vld [vmem:[#allocation2 + $0xfa] sm:$0xff] }
 0x7e4   :  { %6277 = vrot.lane.b32.xlu1 %v6088_v35, %s9795_s17 }
 0x7e5   :  { %v6164_v54 = vpop.permute.xlu0 %6163 }
 0x7e6   :  { %v6166_v51 = vpop.permute.xlu1 %6165  ;;  %6351 = vst.msk [vmem:[#allocation3 + $0x20] sm:$0xff] %vm1874_vm5, %v6164_v54 }
 0x7e7   :  { %6352 = vst.msk [vmem:[#allocation3 + $0x28] sm:$0xff] %vm1874_vm5, %v6166_v51  ;;  %6279 = vrot.lane.b32.xlu0 %v6089_v9, %s9795_s17  ;;  %v13992_v51 = vld [vmem:[#allocation2 + $0x10a] sm:$0xff]  ;;  %v13995_v9 = vld [vmem:[#allocation2 + $0x112] sm:$0xff] }
 0x7e8   :  { %6281 = vrot.lane.b32.xlu1 %v6090_v39, %s9795_s17 }
 0x7e9   :  { %v6168_v48 = vpop.permute.xlu0 %6167 }
 0x7ea   :  { %v6170_v32 = vpop.permute.xlu1 %6169  ;;  %6353 = vst.msk [vmem:[#allocation3 + $0x30] sm:$0xff] %vm1874_vm5, %v6168_v48 }
 0x7eb   :  { %6354 = vst.msk [vmem:[#allocation3 + $0x38] sm:$0xff] %vm1874_vm5, %v6170_v32  ;;  %6539 = vrot.lane.b32.xlu0 %v6411_v22, %s9796_s18  ;;  %v14002_v32 = vld [vmem:[#allocation2 + $0x122] sm:$0xff]  ;;  %v14005_v22 = vld [vmem:[#allocation2 + $0x12a] sm:$0xff] }
 0x7ec   :  { %6541 = vrot.lane.b32.xlu1 %v6412_v11, %s9796_s18 }
 0x7ed   :  { %v6172_v2 = vpop.permute.xlu0 %6171 }
 0x7ee   :  { %v6174_v21 = vpop.permute.xlu1 %6173  ;;  %6355 = vst.msk [vmem:[#allocation3 + $0x40] sm:$0xff] %vm1874_vm5, %v6172_v2 }
 0x7ef   :  { %6356 = vst.msk [vmem:[#allocation3 + $0x48] sm:$0xff] %vm1874_vm5, %v6174_v21  ;;  %6543 = vrot.lane.b32.xlu0 %v13902_v42, %s9796_s18  ;;  %v14012_v21 = vld [vmem:[#allocation2 + $0x13a] sm:$0xff] }
 0x7f0   :  { %6545 = vrot.lane.b32.xlu1 %v13905_v29, %s9796_s18 }
 0x7f1   :  { %v6176_v47 = vpop.permute.xlu0 %6175 }
 0x7f2   :  { %v6178_v12 = vpop.permute.xlu1 %6177  ;;  %6357 = vst.msk [vmem:[#allocation3 + $0x50] sm:$0xff] %vm1874_vm5, %v6176_v47  ;;  %v14015_v47 = vld [vmem:[#allocation2 + $0x142] sm:$0xff] }
 0x7f3   :  { %6358 = vst.msk [vmem:[#allocation3 + $0x58] sm:$0xff] %vm1874_vm5, %v6178_v12  ;;  %6547 = vrot.lane.b32.xlu0 %v13912_v43, %s9796_s18 }
 0x7f4   :  { %6549 = vrot.lane.b32.xlu1 %v13915_v25, %s9796_s18 }
 0x7f5   :  { %v6180_v27 = vpop.permute.xlu0 %6179 }
 0x7f6   :  { %v6182_v5 = vpop.permute.xlu1 %6181  ;;  %6359 = vst.msk [vmem:[#allocation3 + $0x60] sm:$0xff] %vm1874_vm5, %v6180_v27  ;;  %v8011_v27 = vld [vmem:[%s16436_s5] sm:$0xff] }
 0x7f7   :  { %6360 = vst.msk [vmem:[#allocation3 + $0x68] sm:$0xff] %vm1874_vm5, %v6182_v5  ;;  %6551 = vrot.lane.b32.xlu0 %v13922_v44, %s9796_s18  ;;  %v8012_v5 = vld [vmem:[%s16436_s5 + $0x8] sm:$0xff] }
 0x7f8   :  { %6553 = vrot.lane.b32.xlu1 %v13925_v36, %s9796_s18 }
 0x7f9   :  { %v6184_v53 = vpop.permute.xlu0 %6183 }
 0x7fa   :  { %v6186_v1 = vpop.permute.xlu1 %6185  ;;  %6361 = vst.msk [vmem:[#allocation3 + $0x70] sm:$0xff] %vm1874_vm5, %v6184_v53 }
 0x7fb   :  { %6362 = vst.msk [vmem:[#allocation3 + $0x78] sm:$0xff] %vm1874_vm5, %v6186_v1  ;;  %6555 = vrot.lane.b32.xlu0 %v13932_v14, %s9796_s18  ;;  %v14028_v1 = vld [vmem:[#allocation2 + $0x152] sm:$0xff] }
 0x7fc   :  { %6557 = vrot.lane.b32.xlu1 %v13935_v0, %s9796_s18 }
 0x7fd   :  { %v6188_v26 = vpop.permute.xlu0 %6187 }
 0x7fe   :  { %v6190_v24 = vpop.permute.xlu1 %6189  ;;  %6363 = vst.msk [vmem:[#allocation3 + $0x80] sm:$0xff] %vm1874_vm5, %v6188_v26  ;;  %v9770_v26 = vpack.c.bf16 %v8012_v5, %v8011_v27  ;;  %v6799_v27 = vld [vmem:[#allocation2 + $0x60] sm:$0xff] }
 0x7ff   :  { %6364 = vst.msk [vmem:[#allocation3 + $0x88] sm:$0xff] %vm1874_vm5, %v6190_v24  ;;  %6559 = vrot.lane.b32.xlu0 %v13942_v4, %s9796_s18  ;;  %v6795_v24 = vld [vmem:[#allocation2 + $0x30] sm:$0xff] }
 0x800   :  { %6561 = vrot.lane.b32.xlu1 %v13945_v8, %s9796_s18  ;;  %9771 = vmatprep.subr.bf16.mxu1 %v9770_v26 }
 0x801   :  { %v6192_v31 = vpop.permute.xlu0 %6191  ;;  %9773 = vmatpush3.bf16.msra.mxu1 %v9770_v26 }
 0x802   :  { %v6194_v45 = vpop.permute.xlu1 %6193  ;;  %6365 = vst.msk [vmem:[#allocation3 + $0x90] sm:$0xff] %vm1874_vm5, %v6192_v31  ;;  %v8013_v31 = vld [vmem:[%s16436_s5 + $0x10] sm:$0xff] }
 0x803   :  { %6366 = vst.msk [vmem:[#allocation3 + $0x98] sm:$0xff] %vm1874_vm5, %v6194_v45  ;;  %6563 = vrot.lane.b32.xlu0 %v13952_v16, %s9796_s18  ;;  %v8014_v45 = vld [vmem:[%s16436_s5 + $0x18] sm:$0xff] }
 0x804   :  { %6565 = vrot.lane.b32.xlu1 %v13955_v56, %s9796_s18 }
 0x805   :  { %v6196_v61 = vpop.permute.xlu0 %6195 }
 0x806   :  { %v6198_v62 = vpop.permute.xlu1 %6197  ;;  %6367 = vst.msk [vmem:[#allocation3 + $0xa0] sm:$0xff] %vm1874_vm5, %v6196_v61 }
 0x807   :  { %6368 = vst.msk [vmem:[#allocation3 + $0xa8] sm:$0xff] %vm1874_vm5, %v6198_v62  ;;  %6567 = vrot.lane.b32.xlu0 %v13962_v30, %s9796_s18  ;;  %v9774_v62 = vpack.c.bf16 %v8014_v45, %v8013_v31 }
 0x808   :  { %6569 = vrot.lane.b32.xlu1 %v13965_v41, %s9796_s18 }
 0x809   :  { %v6200_v46 = vpop.permute.xlu0 %6199  ;;  %9775 = vmatprep.subr.bf16.mxu1 %v9774_v62 }
 0x80a   :  { %v6202_v19 = vpop.permute.xlu1 %6201  ;;  %6369 = vst.msk [vmem:[#allocation3 + $0xb0] sm:$0xff] %vm1874_vm5, %v6200_v46  ;;  %9777 = vmatpush3.bf16.msra.mxu1 %v9774_v62  ;;  %v6803_v62 = vld [vmem:[#allocation2 + $0x90] sm:$0xff] }
 0x80b   :  { %6370 = vst.msk [vmem:[#allocation3 + $0xb8] sm:$0xff] %vm1874_vm5, %v6202_v19  ;;  %6571 = vrot.lane.b32.xlu0 %v13972_v13, %s9796_s18  ;;  %v6796_v19 = vld [vmem:[#allocation2 + $0x38] sm:$0xff] }
 0x80c   :  { %6573 = vrot.lane.b32.xlu1 %v13975_v33, %s9796_s18 }
 0x80d   :  { %v6204_v40 = vpop.permute.xlu0 %6203 }
 0x80e   :  { %v6206_v7 = vpop.permute.xlu1 %6205  ;;  %6371 = vst.msk [vmem:[#allocation3 + $0xc0] sm:$0xff] %vm1874_vm5, %v6204_v40  ;;  %v8015_v40 = vld [vmem:[%s16436_s5 + $0x20] sm:$0xf] }
 0x80f   :  { %6372 = vst.msk [vmem:[#allocation3 + $0xc8] sm:$0xff] %vm1874_vm5, %v6206_v7  ;;  %6575 = vrot.lane.b32.xlu0 %v13982_v20, %s9796_s18  ;;  %9664 = vmatprep.subr.msk.mxu1 %vm3749_vm9, %v8015_v40 }
 0x810   :  { %6577 = vrot.lane.b32.xlu1 %v13985_v52, %s9796_s18  ;;  %9665 = vmatpush3.msk.msra.mxu1 %vm3749_vm9, %v8015_v40 }
 0x811   :  { %v6208_v35 = vpop.permute.xlu0 %6207 }
 0x812   :  { %v6210_v54 = vpop.permute.xlu1 %6209  ;;  %6373 = vst.msk [vmem:[#allocation3 + $0xd0] sm:$0xff] %vm1874_vm5, %v6208_v35 }
 0x813   :  { %6374 = vst.msk [vmem:[#allocation3 + $0xd8] sm:$0xff] %vm1874_vm5, %v6210_v54  ;;  %6579 = vrot.lane.b32.xlu0 %v13992_v51, %s9796_s18 }
 0x814   :  { %6581 = vrot.lane.b32.xlu1 %v13995_v9, %s9796_s18 }
 0x815   :  { %v6212_v39 = vpop.permute.xlu0 %6211 }
 0x816   :  { %v6214_v48 = vpop.permute.xlu1 %6213  ;;  %6375 = vst.msk [vmem:[#allocation3 + $0xe0] sm:$0xff] %vm1874_vm5, %v6212_v39  ;;  %v6797_v39 = vld [vmem:[#allocation2 + $0x48] sm:$0xff] }
 0x817   :  { %6376 = vst.msk [vmem:[#allocation3 + $0xe8] sm:$0xff] %vm1874_vm5, %v6214_v48  ;;  %6583 = vrot.lane.b32.xlu0 %v14002_v32, %s9796_s18 }
 0x818   :  { %6585 = vrot.lane.b32.xlu1 %v14005_v22, %s9796_s18 }
 0x819   :  { %v6216_v11 = vpop.permute.xlu0 %6215 }
 0x81a   :  { %v6218_v2 = vpop.permute.xlu1 %6217  ;;  %6377 = vst.msk [vmem:[#allocation3 + $0xf0] sm:$0xff] %vm1874_vm5, %v6216_v11 }
 0x81b   :  { %6378 = vst.msk [vmem:[#allocation3 + $0xf8] sm:$0xff] %vm1874_vm5, %v6218_v2  ;;  %6587 = vrot.lane.b32.xlu0 %v14012_v21, %s9796_s18 }
 0x81c   :  { %6589 = vrot.lane.b32.xlu1 %v14015_v47, %s9796_s18 }
 0x81d   :  { %v6220_v12 = vpop.permute.xlu0 %6219 }
 0x81e   :  { %v6222_v53 = vpop.permute.xlu1 %6221  ;;  %6379 = vst.msk [vmem:[#allocation3 + $0x100] sm:$0xff] %vm1874_vm5, %v6220_v12 }
 0x81f   :  { %6380 = vst.msk [vmem:[#allocation3 + $0x108] sm:$0xff] %vm1874_vm5, %v6222_v53  ;;  %6591 = vrot.lane.b32.xlu0 %v14028_v1, %s9796_s18 }
 0x820   :  { %6923 = vrot.lane.b32.xlu1 %v6795_v24, %s9797_s19  ;;  %v6801_v24 = vld [vmem:[#allocation2 + $0x78] sm:$0xff] }
 0x821   :  { %v6224_v61 = vpop.permute.xlu0 %6223 }
 0x822   :  { %v6226_v46 = vpop.permute.xlu1 %6225  ;;  %6381 = vst.msk [vmem:[#allocation3 + $0x110] sm:$0xff] %vm1874_vm5, %v6224_v61 }
 0x823   :  { %6382 = vst.msk [vmem:[#allocation3 + $0x118] sm:$0xff] %vm1874_vm5, %v6226_v46  ;;  %6925 = vrot.lane.b32.xlu0 %v6796_v19, %s9797_s19 }
 0x824   :  { %7307 = vrot.lane.b32.xlu1 %v13717_v63, %s9798_s20 }
 0x825   :  { %v6228_v7 = vpop.permute.xlu0 %6227 }
 0x826   :  { %v6230_v35 = vpop.permute.xlu1 %6229  ;;  %6383 = vst.msk [vmem:[#allocation3 + $0x120] sm:$0xff] %vm1874_vm5, %v6228_v7  ;;  %v6805_v7 = vld [vmem:[#allocation2 + $0xa8] sm:$0xff] }
 0x827   :  { %6384 = vst.msk [vmem:[#allocation3 + $0x128] sm:$0xff] %vm1874_vm5, %v6230_v35  ;;  %7309 = vrot.lane.b32.xlu0 %v13720_v59, %s9798_s20  ;;  %v6798_v59 = vld [vmem:[#allocation2 + $0x50] sm:$0xff] }
 0x828   :  { %7691 = vrot.lane.b32.xlu1 %v13902_v42, %s9799_s1 }
 0x829   :  { %v6232_v63 = vpop.permute.xlu0 %6231 }
 0x82a   :  { %v6234_v54 = vpop.permute.xlu1 %6233  ;;  %6385 = vst.msk [vmem:[#allocation3 + $0x130] sm:$0xff] %vm1874_vm5, %v6232_v63 }
 0x82b   :  { %6386 = vst.msk [vmem:[#allocation3 + $0x138] sm:$0xff] %vm1874_vm5, %v6234_v54  ;;  %7693 = vrot.lane.b32.xlu0 %v13905_v29, %s9799_s1 }
 0x82c   :  { %6927 = vrot.lane.b32.xlu1 %v6797_v39, %s9797_s19  ;;  %v6807_v39 = vld [vmem:[#allocation2 + $0xc0] sm:$0xff] }
 0x82d   :  { %v6236_v48 = vpop.permute.xlu0 %6235 }
 0x82e   :  { %v6238_v11 = vpop.permute.xlu1 %6237  ;;  %6387 = vst.msk [vmem:[#allocation3 + $0x140] sm:$0xff] %vm1874_vm5, %v6236_v48 }
 0x82f   :  { %6388 = vst.msk [vmem:[#allocation3 + $0x148] sm:$0xff] %vm1874_vm5, %v6238_v11  ;;  %6929 = vrot.lane.b32.xlu0 %v6798_v59, %s9797_s19 }
 0x830   :  { %7311 = vrot.lane.b32.xlu1 %v13727_v60, %s9798_s20 }
 0x831   :  { %v6240_v42 = vpop.permute.xlu0 %6239 }
 0x832   :  { %v6242_v2 = vpop.permute.xlu1 %6241  ;;  %6389 = vst.msk [vmem:[#allocation3 + $0x150] sm:$0xff] %vm1874_vm5, %v6240_v42  ;;  %v6809_v42 = vld [vmem:[#allocation2 + $0xd8] sm:$0xff] }
 0x833   :  { %6390 = vst.msk [vmem:[#allocation3 + $0x158] sm:$0xff] %vm1874_vm5, %v6242_v2  ;;  %7313 = vrot.lane.b32.xlu0 %v13730_v50, %s9798_s20  ;;  %v6800_v50 = vld [vmem:[#allocation2 + $0x68] sm:$0xff] }
 0x834   :  { %7695 = vrot.lane.b32.xlu1 %v13912_v43, %s9799_s1 }
 0x835   :  { %v6244_v29 = vpop.permute.xlu0 %6243 }
 0x836   :  { %v6246_v12 = vpop.permute.xlu1 %6245  ;;  %6391 = vst.msk [vmem:[#allocation3 + $0x160] sm:$0xff] %vm1874_vm5, %v6244_v29 }
 0x837   :  { %6392 = vst.msk [vmem:[#allocation3 + $0x168] sm:$0xff] %vm1874_vm5, %v6246_v12  ;;  %7697 = vrot.lane.b32.xlu0 %v13915_v25, %s9799_s1 }
 0x838   :  { %6931 = vrot.lane.b32.xlu1 %v6799_v27, %s9797_s19  ;;  %v6811_v27 = vld [vmem:[#allocation2 + $0xf0] sm:$0xff] }
 0x839   :  { %v6248_v60 = vpop.permute.xlu0 %6247 }
 0x83a   :  { %v6250_v5 = vpop.permute.xlu1 %6249  ;;  %6393 = vst.msk [vmem:[#allocation3 + $0x170] sm:$0xff] %vm1874_vm5, %v6248_v60 }
 0x83b   :  { %6394 = vst.msk [vmem:[#allocation3 + $0x178] sm:$0xff] %vm1874_vm5, %v6250_v5  ;;  %6933 = vrot.lane.b32.xlu0 %v6800_v50, %s9797_s19 }
 0x83c   :  { %7315 = vrot.lane.b32.xlu1 %v13737_v55, %s9798_s20 }
 0x83d   :  { %v6252_v43 = vpop.permute.xlu0 %6251 }
 0x83e   :  { %v6254_v53 = vpop.permute.xlu1 %6253  ;;  %6395 = vst.msk [vmem:[#allocation3 + $0x180] sm:$0xff] %vm1874_vm5, %v6252_v43  ;;  %v6813_v43 = vld [vmem:[#allocation2 + $0x108] sm:$0xff] }
 0x83f   :  { %6396 = vst.msk [vmem:[#allocation3 + $0x188] sm:$0xff] %vm1874_vm5, %v6254_v53  ;;  %7317 = vrot.lane.b32.xlu0 %v13740_v37, %s9798_s20  ;;  %v6802_v37 = vld [vmem:[#allocation2 + $0x80] sm:$0xff] }
 0x840   :  { %7699 = vrot.lane.b32.xlu1 %v13922_v44, %s9799_s1 }
 0x841   :  { %v6256_v25 = vpop.permute.xlu0 %6255 }
 0x842   :  { %v6258_v26 = vpop.permute.xlu1 %6257  ;;  %6397 = vst.msk [vmem:[#allocation3 + $0x190] sm:$0xff] %vm1874_vm5, %v6256_v25 }
 0x843   :  { %6398 = vst.msk [vmem:[#allocation3 + $0x198] sm:$0xff] %vm1874_vm5, %v6258_v26  ;;  %7701 = vrot.lane.b32.xlu0 %v13925_v36, %s9799_s1  ;;  %v7198_v26 = vld [vmem:[#allocation2 + $0x111] sm:$0xff] }
 0x844   :  { %6935 = vrot.lane.b32.xlu1 %v6801_v24, %s9797_s19 }
 0x845   :  { %v6260_v55 = vpop.permute.xlu0 %6259 }
 0x846   :  { %v6262_v31 = vpop.permute.xlu1 %6261  ;;  %6399 = vst.msk [vmem:[#allocation3 + $0x1a0] sm:$0xff] %vm1874_vm5, %v6260_v55  ;;  %v6815_v55 = vld [vmem:[#allocation2 + $0x120] sm:$0xff] }
 0x847   :  { %6400 = vst.msk [vmem:[#allocation3 + $0x1a8] sm:$0xff] %vm1874_vm5, %v6262_v31  ;;  %6937 = vrot.lane.b32.xlu0 %v6802_v37, %s9797_s19  ;;  %v6816_v37 = vld [vmem:[#allocation2 + $0x128] sm:$0xff] }
 0x848   :  { %7319 = vrot.lane.b32.xlu1 %v13747_v6, %s9798_s20 }
 0x849   :  { %v6264_v44 = vpop.permute.xlu0 %6263 }
 0x84a   :  { %v6266_v45 = vpop.permute.xlu1 %6265  ;;  %6401 = vst.msk [vmem:[#allocation3 + $0x1b0] sm:$0xff] %vm1874_vm5, %v6264_v44 }
 0x84b   :  { %6402 = vst.msk [vmem:[#allocation3 + $0x1b8] sm:$0xff] %vm1874_vm5, %v6266_v45  ;;  %7321 = vrot.lane.b32.xlu0 %v13750_v3, %s9798_s20  ;;  %v6804_v3 = vld [vmem:[#allocation2 + $0x98] sm:$0xff] }
 0x84c   :  { %7703 = vrot.lane.b32.xlu1 %v13932_v14, %s9799_s1 }
 0x84d   :  { %v6268_v36 = vpop.permute.xlu0 %6267 }
 0x84e   :  { %v6270_v61 = vpop.permute.xlu1 %6269  ;;  %6403 = vst.msk [vmem:[#allocation3 + $0x1c0] sm:$0xff] %vm1874_vm5, %v6268_v36  ;;  %v7200_v36 = vld [vmem:[#allocation2 + $0x129] sm:$0xff] }
 0x84f   :  { %6404 = vst.msk [vmem:[#allocation3 + $0x1c8] sm:$0xff] %vm1874_vm5, %v6270_v61  ;;  %7705 = vrot.lane.b32.xlu0 %v13935_v0, %s9799_s1 }
 0x850   :  { %6939 = vrot.lane.b32.xlu1 %v6803_v62, %s9797_s19 }
 0x851   :  { %v6272_v6 = vpop.permute.xlu0 %6271 }
 0x852   :  { %v6274_v46 = vpop.permute.xlu1 %6273  ;;  %6405 = vst.msk [vmem:[#allocation3 + $0x1d0] sm:$0xff] %vm1874_vm5, %v6272_v6  ;;  %v6817_v6 = vld [vmem:[#allocation2 + $0x138] sm:$0xff] }
 0x853   :  { %6406 = vst.msk [vmem:[#allocation3 + $0x1d8] sm:$0xff] %vm1874_vm5, %v6274_v46  ;;  %6941 = vrot.lane.b32.xlu0 %v6804_v3, %s9797_s19 }
 0x854   :  { %7323 = vrot.lane.b32.xlu1 %v13757_v10, %s9798_s20 }
 0x855   :  { %v6276_v14 = vpop.permute.xlu0 %6275 }
 0x856   :  { %v6278_v19 = vpop.permute.xlu1 %6277  ;;  %6407 = vst.msk [vmem:[#allocation3 + $0x1e0] sm:$0xff] %vm1874_vm5, %v6276_v14 }
 0x857   :  { %6408 = vst.msk [vmem:[#allocation3 + $0x1e8] sm:$0xff] %vm1874_vm5, %v6278_v19  ;;  %7325 = vrot.lane.b32.xlu0 %v13760_v28, %s9798_s20  ;;  %v6806_v28 = vld [vmem:[#allocation2 + $0xb0] sm:$0xff]  ;;  %v7201_v19 = vld [vmem:[#allocation2 + $0x139] sm:$0xff] }
 0x858   :  { %7707 = vrot.lane.b32.xlu1 %v13942_v4, %s9799_s1 }
 0x859   :  { %v6280_v0 = vpop.permute.xlu0 %6279 }
 0x85a   :  { %v6282_v40 = vpop.permute.xlu1 %6281  ;;  %6409 = vst.msk [vmem:[#allocation3 + $0x1f0] sm:$0xff] %vm1874_vm5, %v6280_v0 }
 0x85b   :  { %6410 = vst.msk [vmem:[#allocation3 + $0x1f8] sm:$0xff] %vm1874_vm5, %v6282_v40  ;;  %7709 = vrot.lane.b32.xlu0 %v13945_v8, %s9799_s1 }
 0x85c   :  { %6943 = vrot.lane.b32.xlu1 %v6805_v7, %s9797_s19 }
 0x85d   :  { %v6540_v10 = vpop.permute.xlu0 %6539 }
 0x85e   :  { %v6542_v35 = vpop.permute.xlu1 %6541  ;;  %6731 = vst.msk [vmem:[#allocation3] sm:$0xff] %vm2259_vm6, %v6540_v10 }
 0x85f   :  { %6732 = vst.msk [vmem:[#allocation3 + $0x8] sm:$0xff] %vm2259_vm6, %v6542_v35  ;;  %6945 = vrot.lane.b32.xlu0 %v6806_v28, %s9797_s19  ;;  %v6819_v28 = vld [vmem:[#allocation2 + $0x150] sm:$0xff] }
 0x860   :  { %7327 = vrot.lane.b32.xlu1 %v13767_v58, %s9798_s20 }
 0x861   :  { %v6544_v4 = vpop.permute.xlu0 %6543 }
 0x862   :  { %v6546_v63 = vpop.permute.xlu1 %6545  ;;  %6733 = vst.msk [vmem:[#allocation3 + $0x10] sm:$0xff] %vm2259_vm6, %v6544_v4 }
 0x863   :  { %6734 = vst.msk [vmem:[#allocation3 + $0x18] sm:$0xff] %vm2259_vm6, %v6546_v63  ;;  %7329 = vrot.lane.b32.xlu0 %v13770_v18, %s9798_s20  ;;  %v6808_v18 = vld [vmem:[#allocation2 + $0xc8] sm:$0xff] }
 0x864   :  { %7711 = vrot.lane.b32.xlu1 %v13952_v16, %s9799_s1 }
 0x865   :  { %v6548_v8 = vpop.permute.xlu0 %6547 }
 0x866   :  { %v6550_v54 = vpop.permute.xlu1 %6549  ;;  %6735 = vst.msk [vmem:[#allocation3 + $0x20] sm:$0xff] %vm2259_vm6, %v6548_v8 }
 0x867   :  { %6736 = vst.msk [vmem:[#allocation3 + $0x28] sm:$0xff] %vm2259_vm6, %v6550_v54  ;;  %7713 = vrot.lane.b32.xlu0 %v13955_v56, %s9799_s1  ;;  %v7203_v54 = vld [vmem:[#allocation2 + $0x151] sm:$0xff] }
 0x868   :  { %6947 = vrot.lane.b32.xlu1 %v6807_v39, %s9797_s19 }
 0x869   :  { %v6552_v58 = vpop.permute.xlu0 %6551 }
 0x86a   :  { %v6554_v48 = vpop.permute.xlu1 %6553  ;;  %6737 = vst.msk [vmem:[#allocation3 + $0x30] sm:$0xff] %vm2259_vm6, %v6552_v58 }
 0x86b   :  { %6738 = vst.msk [vmem:[#allocation3 + $0x38] sm:$0xff] %vm2259_vm6, %v6554_v48  ;;  %6949 = vrot.lane.b32.xlu0 %v6808_v18, %s9797_s19 }
 0x86c   :  { %7331 = vrot.lane.b32.xlu1 %v13777_v57, %s9798_s20 }
 0x86d   :  { %v6556_v16 = vpop.permute.xlu0 %6555 }
 0x86e   :  { %v6558_v11 = vpop.permute.xlu1 %6557  ;;  %6739 = vst.msk [vmem:[#allocation3 + $0x40] sm:$0xff] %vm2259_vm6, %v6556_v16 }
 0x86f   :  { %6740 = vst.msk [vmem:[#allocation3 + $0x48] sm:$0xff] %vm2259_vm6, %v6558_v11  ;;  %7333 = vrot.lane.b32.xlu0 %v13780_v34, %s9798_s20  ;;  %v6810_v34 = vld [vmem:[#allocation2 + $0xe0] sm:$0xff] }
 0x870   :  { %7715 = vrot.lane.b32.xlu1 %v13962_v30, %s9799_s1  ;;  %v6438_v11 = vld [vmem:[#allocation2 + $0x15a] sm:$0xff] }
 0x871   :  { %v6560_v56 = vpop.permute.xlu0 %6559 }
 0x872   :  { %v6562_v59 = vpop.permute.xlu1 %6561  ;;  %6741 = vst.msk [vmem:[#allocation3 + $0x50] sm:$0xff] %vm2259_vm6, %v6560_v56 }
 0x873   :  { %6742 = vst.msk [vmem:[#allocation3 + $0x58] sm:$0xff] %vm2259_vm6, %v6562_v59  ;;  %7717 = vrot.lane.b32.xlu0 %v13965_v41, %s9799_s1 }
 0x874   :  { %6951 = vrot.lane.b32.xlu1 %v6809_v42, %s9797_s19 }
 0x875   :  { %v6564_v57 = vpop.permute.xlu0 %6563 }
 0x876   :  { %v6566_v2 = vpop.permute.xlu1 %6565  ;;  %6743 = vst.msk [vmem:[#allocation3 + $0x60] sm:$0xff] %vm2259_vm6, %v6564_v57  ;;  %v6822_v57 = vld [vmem:[#allocation2 + $0x170] sm:$0xff] }
 0x877   :  { %6744 = vst.msk [vmem:[#allocation3 + $0x68] sm:$0xff] %vm2259_vm6, %v6566_v2  ;;  %6953 = vrot.lane.b32.xlu0 %v6810_v34, %s9797_s19 }
 0x878   :  { %7335 = vrot.lane.b32.xlu1 %v13787_v17, %s9798_s20 }
 0x879   :  { %v6568_v30 = vpop.permute.xlu0 %6567 }
 0x87a   :  { %v6570_v29 = vpop.permute.xlu1 %6569  ;;  %6745 = vst.msk [vmem:[#allocation3 + $0x70] sm:$0xff] %vm2259_vm6, %v6568_v30  ;;  %v7205_v30 = vld [vmem:[#allocation2 + $0x169] sm:$0xff] }
 0x87b   :  { %6746 = vst.msk [vmem:[#allocation3 + $0x78] sm:$0xff] %vm2259_vm6, %v6570_v29  ;;  %7337 = vrot.lane.b32.xlu0 %v13790_v15, %s9798_s20  ;;  %v6812_v15 = vld [vmem:[#allocation2 + $0xf8] sm:$0xff] }
 0x87c   :  { %7719 = vrot.lane.b32.xlu1 %v13972_v13, %s9799_s1  ;;  %v7206_v29 = vld [vmem:[#allocation2 + $0x171] sm:$0xff] }
 0x87d   :  { %v6572_v41 = vpop.permute.xlu0 %6571 }
 0x87e   :  { %v6574_v12 = vpop.permute.xlu1 %6573  ;;  %6747 = vst.msk [vmem:[#allocation3 + $0x80] sm:$0xff] %vm2259_vm6, %v6572_v41 }
 0x87f   :  { %6748 = vst.msk [vmem:[#allocation3 + $0x88] sm:$0xff] %vm2259_vm6, %v6574_v12  ;;  %7721 = vrot.lane.b32.xlu0 %v13975_v33, %s9799_s1 }
 0x880   :  { %6955 = vrot.lane.b32.xlu1 %v6811_v27, %s9797_s19 }
 0x881   :  { %v6576_v17 = vpop.permute.xlu0 %6575 }
 0x882   :  { %v6578_v60 = vpop.permute.xlu1 %6577  ;;  %6749 = vst.msk [vmem:[#allocation3 + $0x90] sm:$0xff] %vm2259_vm6, %v6576_v17  ;;  %v6439_v17 = vld [vmem:[#allocation2 + $0x16a] sm:$0xff] }
 0x883   :  { %6750 = vst.msk [vmem:[#allocation3 + $0x98] sm:$0xff] %vm2259_vm6, %v6578_v60  ;;  %6957 = vrot.lane.b32.xlu0 %v6812_v15, %s9797_s19 }
 0x884   :  { %7339 = vrot.lane.b32.xlu1 %v13797_v23, %s9798_s20 }
 0x885   :  { %v6580_v13 = vpop.permute.xlu0 %6579 }
 0x886   :  { %v6582_v5 = vpop.permute.xlu1 %6581  ;;  %6751 = vst.msk [vmem:[#allocation3 + $0xa0] sm:$0xff] %vm2259_vm6, %v6580_v13 }
 0x887   :  { %6752 = vst.msk [vmem:[#allocation3 + $0xa8] sm:$0xff] %vm2259_vm6, %v6582_v5  ;;  %7341 = vrot.lane.b32.xlu0 %v13800_v38, %s9798_s20  ;;  %v6814_v38 = vld [vmem:[#allocation2 + $0x110] sm:$0xff] }
 0x888   :  { %7723 = vrot.lane.b32.xlu1 %v13982_v20, %s9799_s1  ;;  %v6440_v5 = vld [vmem:[#allocation2 + $0x172] sm:$0xff] }
 0x889   :  { %v6584_v33 = vpop.permute.xlu0 %6583 }
 0x88a   :  { %v6586_v50 = vpop.permute.xlu1 %6585  ;;  %6753 = vst.msk [vmem:[#allocation3 + $0xb0] sm:$0xff] %vm2259_vm6, %v6584_v33 }
 0x88b   :  { %6754 = vst.msk [vmem:[#allocation3 + $0xb8] sm:$0xff] %vm2259_vm6, %v6586_v50  ;;  %7725 = vrot.lane.b32.xlu0 %v13985_v52, %s9799_s1 }
 0x88c   :  { %6959 = vrot.lane.b32.xlu1 %v6813_v43, %s9797_s19  ;;  %v6823_v43 = vld [vmem:[#allocation2 + $0x180] sm:$0xff] }
 0x88d   :  { %v6588_v23 = vpop.permute.xlu0 %6587 }
 0x88e   :  { %v6590_v53 = vpop.permute.xlu1 %6589  ;;  %6755 = vst.msk [vmem:[#allocation3 + $0xc0] sm:$0xff] %vm2259_vm6, %v6588_v23  ;;  %v6824_v23 = vld [vmem:[#allocation2 + $0x188] sm:$0xff] }
 0x88f   :  { %6756 = vst.msk [vmem:[#allocation3 + $0xc8] sm:$0xff] %vm2259_vm6, %v6590_v53  ;;  %6961 = vrot.lane.b32.xlu0 %v6814_v38, %s9797_s19 }
 0x890   :  { %7343 = vrot.lane.b32.xlu1 %v13807_v49, %s9798_s20 }
 0x891   :  { %v6592_v20 = vpop.permute.xlu0 %6591 }
 0x892   :  { %v6924_v25 = vpop.permute.xlu1 %6923  ;;  %6757 = vst.msk [vmem:[#allocation3 + $0xd0] sm:$0xff] %vm2259_vm6, %v6592_v20 }
 0x893   :  { %7115 = vst.msk [vmem:[#allocation3] sm:$0xff] %vm2645_vm7, %v6924_v25  ;;  %7345 = vrot.lane.b32.xlu0 %v7198_v26, %s9798_s20  ;;  %v7207_v25 = vld [vmem:[#allocation2 + $0x181] sm:$0xff]  ;;  %v7208_v26 = vld [vmem:[#allocation2 + $0x189] sm:$0xff] }
 0x894   :  { %7727 = vrot.lane.b32.xlu1 %v13992_v51, %s9799_s1  ;;  %v7199_v51 = vld [vmem:[#allocation2 + $0x121] sm:$0xff] }
 0x895   :  { %v6926_v52 = vpop.permute.xlu0 %6925 }
 0x896   :  { %v7308_v24 = vpop.permute.xlu1 %7307  ;;  %7116 = vst.msk [vmem:[#allocation3 + $0x8] sm:$0xff] %vm2645_vm7, %v6926_v52 }
 0x897   :  { %7499 = vst.msk [vmem:[#allocation3] sm:$0xff] %vm3030_vm8, %v7308_v24  ;;  %7729 = vrot.lane.b32.xlu0 %v13995_v9, %s9799_s1 }
 0x898   :  { %6963 = vrot.lane.b32.xlu1 %v6815_v55, %s9797_s19 }
 0x899   :  { %v7310_v49 = vpop.permute.xlu0 %7309 }
 0x89a   :  { %v7692_v31 = vpop.permute.xlu1 %7691  ;;  %7500 = vst.msk [vmem:[#allocation3 + $0x8] sm:$0xff] %vm3030_vm8, %v7310_v49  ;;  %v6441_v49 = vld [vmem:[#allocation2 + $0x182] sm:$0xff] }
 0x89b   :  { %7883 = vst.msk [vmem:[#allocation3] sm:$0xff] %vm3415_vm10, %v7692_v31  ;;  %6965 = vrot.lane.b32.xlu0 %v6816_v37, %s9797_s19 }
 0x89c   :  { %7347 = vrot.lane.b32.xlu1 %v7199_v51, %s9798_s20  ;;  %v6442_v51 = vld [vmem:[#allocation2 + $0x18a] sm:$0xff] }
 0x89d   :  { %v7694_v44 = vpop.permute.xlu0 %7693 }
 0x89e   :  { %v6928_v45 = vpop.permute.xlu1 %6927  ;;  %7884 = vst.msk [vmem:[#allocation3 + $0x8] sm:$0xff] %vm3415_vm10, %v7694_v44  ;;  %v6825_v44 = vld [vmem:[#allocation2 + $0x198] sm:$0xff] }
 0x89f   :  { %7117 = vst.msk [vmem:[#allocation3 + $0x10] sm:$0xff] %vm2645_vm7, %v6928_v45  ;;  %7349 = vrot.lane.b32.xlu0 %v7200_v36, %s9798_s20  ;;  %v6826_v36 = vld [vmem:[#allocation2 + $0x1a0] sm:$0xff] }
 0x8a0   :  { %7731 = vrot.lane.b32.xlu1 %v14002_v32, %s9799_s1  ;;  %v6818_v32 = vld [vmem:[#allocation2 + $0x140] sm:$0xff] }
 0x8a1   :  { %v6930_v9 = vpop.permute.xlu0 %6929 }
 0x8a2   :  { %v7312_v61 = vpop.permute.xlu1 %7311  ;;  %7118 = vst.msk [vmem:[#allocation3 + $0x18] sm:$0xff] %vm2645_vm7, %v6930_v9  ;;  %v7947_v62 = vld [vmem:[#allocation3] sm:$0xff] }
 0x8a3   :  { %7501 = vst.msk [vmem:[#allocation3 + $0x10] sm:$0xff] %vm3030_vm8, %v7312_v61  ;;  %9666 = vmatprep.mubr.msk.f32.mxu1 %vm3556_vm11, %v7947_v62  ;;  %7733 = vrot.lane.b32.xlu0 %v14005_v22, %s9799_s1  ;;  %v7202_v22 = vld [vmem:[#allocation2 + $0x141] sm:$0xff]  ;;  %v7209_v62 = vld [vmem:[#allocation2 + $0x199] sm:$0xff] }
 0x8a4   :  { %6967 = vrot.lane.b32.xlu1 %v6817_v6, %s9797_s19 }
 0x8a5   :  { %v7314_v46 = vpop.permute.xlu0 %7313  ;;  %v7948_v3 = vld [vmem:[#allocation3 + $0x8] sm:$0xff] }
 0x8a6   :  { %v7696_v14 = vpop.permute.xlu1 %7695  ;;  %7502 = vst.msk [vmem:[#allocation3 + $0x18] sm:$0xff] %vm3030_vm8, %v7314_v46  ;;  %9667 = vmatmul.mubr.msk.f32.vlgmr.msra.gmra.mrb[0].mxu1 %vm3556_vm11, %v7948_v3  ;;  %v7210_v3 = vld [vmem:[#allocation2 + $0x1a1] sm:$0xff] }
 0x8a7   :  { %7885 = vst.msk [vmem:[#allocation3 + $0x10] sm:$0xff] %vm3415_vm10, %v7696_v14  ;;  %6969 = vrot.lane.b32.xlu0 %v6818_v32, %s9797_s19  ;;  %v7593_v32 = vld [vmem:[#allocation2 + $0x19a] sm:$0xff] }
 0x8a8   :  { %7351 = vrot.lane.b32.xlu1 %v7201_v19, %s9798_s20 }
 0x8a9   :  { %v7698_v0 = vpop.permute.xlu0 %7697 }
 0x8aa   :  { %v6932_v40 = vpop.permute.xlu1 %6931  ;;  %7886 = vst.msk [vmem:[#allocation3 + $0x18] sm:$0xff] %vm3415_vm10, %v7698_v0 }
 0x8ab   :  { %7119 = vst.msk [vmem:[#allocation3 + $0x20] sm:$0xff] %vm2645_vm7, %v6932_v40  ;;  %7353 = vrot.lane.b32.xlu0 %v7202_v22, %s9798_s20  ;;  %v6443_v40 = vld [vmem:[#allocation2 + $0x1ca] sm:$0xff]  ;;  %v7594_v22 = vld [vmem:[#allocation2 + $0x1a2] sm:$0xff] }
 0x8ac   :  { %7735 = vrot.lane.b32.xlu1 %v14012_v21, %s9799_s1  ;;  %v6820_v21 = vld [vmem:[#allocation2 + $0x158] sm:$0xff] }
 0x8ad   :  { %v6934_v7 = vpop.permute.xlu0 %6933 }
 0x8ae   :  { %v7316_v10 = vpop.permute.xlu1 %7315  ;;  %7120 = vst.msk [vmem:[#allocation3 + $0x28] sm:$0xff] %vm2645_vm7, %v6934_v7  ;;  %v7949_v35 = vld [vmem:[#allocation3 + $0x10] sm:$0xff] }
 0x8af   :  { %7503 = vst.msk [vmem:[#allocation3 + $0x20] sm:$0xff] %vm3030_vm8, %v7316_v10  ;;  %9669 = vmatprep.mubr.msk.f32.mxu1 %vm3556_vm11, %v7949_v35  ;;  %7737 = vrot.lane.b32.xlu0 %v14015_v47, %s9799_s1  ;;  %v7204_v47 = vld [vmem:[#allocation2 + $0x159] sm:$0xff] }
 0x8b0   :  { %6971 = vrot.lane.b32.xlu1 %v6819_v28, %s9797_s19  ;;  %v6444_v28 = vld [vmem:[#allocation2 + $0x1d2] sm:$0xff] }
 0x8b1   :  { %v7318_v4 = vpop.permute.xlu0 %7317  ;;  %v7950_v63 = vld [vmem:[#allocation3 + $0x18] sm:$0xff] }
 0x8b2   :  { %v7700_v8 = vpop.permute.xlu1 %7699  ;;  %7504 = vst.msk [vmem:[#allocation3 + $0x28] sm:$0xff] %vm3030_vm8, %v7318_v4  ;;  %9670 = vmatmul.mubr.msk.f32.gmra.mrb[2].mxu1 %vm3556_vm11, %v7950_v63 }
 0x8b3   :  { %7887 = vst.msk [vmem:[#allocation3 + $0x20] sm:$0xff] %vm3415_vm10, %v7700_v8  ;;  %6973 = vrot.lane.b32.xlu0 %v6820_v21, %s9797_s19  ;;  %v6827_v21 = vld [vmem:[#allocation2 + $0x1e0] sm:$0xff] }
 0x8b4   :  { %7355 = vrot.lane.b32.xlu1 %v7203_v54, %s9798_s20  ;;  %v6828_v54 = vld [vmem:[#allocation2 + $0x1e8] sm:$0xff] }
 0x8b5   :  { %v7702_v39 = vpop.permute.xlu0 %7701 }
 0x8b6   :  { %v6936_v58 = vpop.permute.xlu1 %6935  ;;  %7888 = vst.msk [vmem:[#allocation3 + $0x28] sm:$0xff] %vm3415_vm10, %v7702_v39 }
 0x8b7   :  { %7121 = vst.msk [vmem:[#allocation3 + $0x30] sm:$0xff] %vm2645_vm7, %v6936_v58  ;;  %7357 = vrot.lane.b32.xlu0 %v7204_v47, %s9798_s20  ;;  %v7211_v47 = vld [vmem:[#allocation2 + $0x1e1] sm:$0xff] }
 0x8b8   :  { %7739 = vrot.lane.b32.xlu1 %v14028_v1, %s9799_s1  ;;  %v6821_v1 = vld [vmem:[#allocation2 + $0x168] sm:$0xff] }
 0x8b9   :  { %v6938_v48 = vpop.permute.xlu0 %6937 }
 0x8ba   :  { %v7320_v18 = vpop.permute.xlu1 %7319  ;;  %7122 = vst.msk [vmem:[#allocation3 + $0x38] sm:$0xff] %vm2645_vm7, %v6938_v48  ;;  %v7951_v16 = vld [vmem:[#allocation3 + $0x20] sm:$0xff]  ;;  %v7212_v48 = vld [vmem:[#allocation2 + $0x1e9] sm:$0xff] }
 0x8bb   :  { %7505 = vst.msk [vmem:[#allocation3 + $0x30] sm:$0xff] %vm3030_vm8, %v7320_v18  ;;  %9672 = vmatprep.mubr.msk.f32.mxu1 %vm3556_vm11, %v7951_v16  ;;  %7741 = vrot.lane.b32.xlu0 %v6438_v11, %s9799_s1 }
 0x8bc   :  { %6593 = vrot.lane.b32.xlu1 %v6438_v11, %s9796_s18 }
 0x8bd   :  { %v7322_v56 = vpop.permute.xlu0 %7321  ;;  %v7952_v59 = vld [vmem:[#allocation3 + $0x28] sm:$0xff] }
 0x8be   :  { %v7704_v42 = vpop.permute.xlu1 %7703  ;;  %7506 = vst.msk [vmem:[#allocation3 + $0x38] sm:$0xff] %vm3030_vm8, %v7322_v56  ;;  %9673 = vmatmul.mubr.msk.f32.gmra.mrb[4].mxu1 %vm3556_vm11, %v7952_v59  ;;  %v6445_v56 = vld [vmem:[#allocation2 + $0x1e2] sm:$0xff] }
 0x8bf   :  { %7889 = vst.msk [vmem:[#allocation3 + $0x30] sm:$0xff] %vm3415_vm10, %v7704_v42  ;;  %6975 = vrot.lane.b32.xlu0 %v6821_v1, %s9797_s19 }
 0x8c0   :  { %6977 = vrot.lane.b32.xlu1 %v6822_v57, %s9797_s19  ;;  %v6446_v57 = vld [vmem:[#allocation2 + $0x1ea] sm:$0xff] }
 0x8c1   :  { %v7706_v2 = vpop.permute.xlu0 %7705 }
 0x8c2   :  { %v6940_v34 = vpop.permute.xlu1 %6939  ;;  %7890 = vst.msk [vmem:[#allocation3 + $0x38] sm:$0xff] %vm3415_vm10, %v7706_v2 }
 0x8c3   :  { %7123 = vst.msk [vmem:[#allocation3 + $0x40] sm:$0xff] %vm2645_vm7, %v6940_v34  ;;  %7359 = vrot.lane.b32.xlu0 %v7205_v30, %s9798_s20  ;;  %v6829_v30 = vld [vmem:[#allocation2 + $0x1f8] sm:$0xff] }
 0x8c4   :  { %7361 = vrot.lane.b32.xlu1 %v7206_v29, %s9798_s20  ;;  %v6830_v29 = vld [vmem:[#allocation2 + $0x200] sm:$0xff] }
 0x8c5   :  { %v6942_v41 = vpop.permute.xlu0 %6941 }
 0x8c6   :  { %v7324_v12 = vpop.permute.xlu1 %7323  ;;  %7124 = vst.msk [vmem:[#allocation3 + $0x48] sm:$0xff] %vm2645_vm7, %v6942_v41  ;;  %v7953_v27 = vld [vmem:[#allocation3 + $0x30] sm:$0xff] }
 0x8c7   :  { %7507 = vst.msk [vmem:[#allocation3 + $0x40] sm:$0xff] %vm3030_vm8, %v7324_v12  ;;  %9675 = vmatprep.mubr.msk.f32.mxu1 %vm3556_vm11, %v7953_v27  ;;  %7743 = vrot.lane.b32.xlu0 %v6439_v17, %s9799_s1 }
 0x8c8   :  { %6595 = vrot.lane.b32.xlu1 %v6439_v17, %s9796_s18  ;;  %v7213_v17 = vld [vmem:[#allocation2 + $0x1f9] sm:$0xff] }
 0x8c9   :  { %v7326_v60 = vpop.permute.xlu0 %7325  ;;  %v7954_v15 = vld [vmem:[#allocation3 + $0x38] sm:$0xff] }
 0x8ca   :  { %v7708_v13 = vpop.permute.xlu1 %7707  ;;  %7508 = vst.msk [vmem:[#allocation3 + $0x48] sm:$0xff] %vm3030_vm8, %v7326_v60  ;;  %9676 = vmatmul.mubr.msk.f32.gmra.mrb[6].mxu1 %vm3556_vm11, %v7954_v15  ;;  %v7214_v60 = vld [vmem:[#allocation2 + $0x201] sm:$0xff] }
 0x8cb   :  { %7891 = vst.msk [vmem:[#allocation3 + $0x40] sm:$0xff] %vm3415_vm10, %v7708_v13  ;;  %7745 = vrot.lane.b32.xlu0 %v6440_v5, %s9799_s1 }
 0x8cc   :  { %6597 = vrot.lane.b32.xlu1 %v6440_v5, %s9796_s18 }
 0x8cd   :  { %v7710_v33 = vpop.permute.xlu0 %7709 }
 0x8ce   :  { %v6944_v50 = vpop.permute.xlu1 %6943  ;;  %7892 = vst.msk [vmem:[#allocation3 + $0x48] sm:$0xff] %vm3415_vm10, %v7710_v33  ;;  %v6447_v33 = vld [vmem:[#allocation2 + $0x1fa] sm:$0xff] }
 0x8cf   :  { %7125 = vst.msk [vmem:[#allocation3 + $0x50] sm:$0xff] %vm2645_vm7, %v6944_v50  ;;  %6979 = vrot.lane.b32.xlu0 %v6823_v43, %s9797_s19 }
 0x8d0   :  { %6981 = vrot.lane.b32.xlu1 %v6824_v23, %s9797_s19  ;;  %v6448_v23 = vld [vmem:[#allocation2 + $0x202] sm:$0xff] }
 0x8d1   :  { %v6946_v53 = vpop.permute.xlu0 %6945 }
 0x8d2   :  { %v7328_v38 = vpop.permute.xlu1 %7327  ;;  %7126 = vst.msk [vmem:[#allocation3 + $0x58] sm:$0xff] %vm2645_vm7, %v6946_v53  ;;  %v7955_v20 = vld [vmem:[#allocation3 + $0x40] sm:$0xff] }
 0x8d3   :  { %7509 = vst.msk [vmem:[#allocation3 + $0x50] sm:$0xff] %vm3030_vm8, %v7328_v38  ;;  %9678 = vmatprep.mubr.msk.f32.mxu1 %vm3556_vm11, %v7955_v20  ;;  %7363 = vrot.lane.b32.xlu0 %v7207_v25, %s9798_s20  ;;  %v6831_v25 = vld [vmem:[#allocation2 + $0x210] sm:$0xff] }
 0x8d4   :  { %7365 = vrot.lane.b32.xlu1 %v7208_v26, %s9798_s20  ;;  %v6832_v26 = vld [vmem:[#allocation2 + $0x218] sm:$0xff] }
 0x8d5   :  { %v7330_v52 = vpop.permute.xlu0 %7329  ;;  %v7956_v24 = vld [vmem:[#allocation3 + $0x48] sm:$0xff] }
 0x8d6   :  { %v7712_v55 = vpop.permute.xlu1 %7711  ;;  %7510 = vst.msk [vmem:[#allocation3 + $0x58] sm:$0xff] %vm3030_vm8, %v7330_v52  ;;  %9679 = vmatmul.mubr.msk.f32.gmra.mrb[8].mxu1 %vm3556_vm11, %v7956_v24 }
 0x8d7   :  { %7893 = vst.msk [vmem:[#allocation3 + $0x50] sm:$0xff] %vm3415_vm10, %v7712_v55  ;;  %7747 = vrot.lane.b32.xlu0 %v6441_v49, %s9799_s1 }
 0x8d8   :  { %6599 = vrot.lane.b32.xlu1 %v6441_v49, %s9796_s18  ;;  %v7215_v49 = vld [vmem:[#allocation2 + $0x211] sm:$0xff] }
 0x8d9   :  { %v7714_v31 = vpop.permute.xlu0 %7713 }
 0x8da   :  { %v6948_v37 = vpop.permute.xlu1 %6947  ;;  %7894 = vst.msk [vmem:[#allocation3 + $0x58] sm:$0xff] %vm3415_vm10, %v7714_v31  ;;  %v7216_v31 = vld [vmem:[#allocation2 + $0x219] sm:$0xff] }
 0x8db   :  { %7127 = vst.msk [vmem:[#allocation3 + $0x60] sm:$0xff] %vm2645_vm7, %v6948_v37  ;;  %7749 = vrot.lane.b32.xlu0 %v6442_v51, %s9799_s1 }
 0x8dc   :  { %6601 = vrot.lane.b32.xlu1 %v6442_v51, %s9796_s18 }
 0x8dd   :  { %v6950_v45 = vpop.permute.xlu0 %6949 }
 0x8de   :  { %v7332_v9 = vpop.permute.xlu1 %7331  ;;  %7128 = vst.msk [vmem:[#allocation3 + $0x68] sm:$0xff] %vm2645_vm7, %v6950_v45  ;;  %v7957_v61 = vld [vmem:[#allocation3 + $0x50] sm:$0xff] }
 0x8df   :  { %7511 = vst.msk [vmem:[#allocation3 + $0x60] sm:$0xff] %vm3030_vm8, %v7332_v9  ;;  %9681 = vmatprep.mubr.msk.f32.mxu1 %vm3556_vm11, %v7957_v61  ;;  %6983 = vrot.lane.b32.xlu0 %v6825_v44, %s9797_s19  ;;  %v6449_v44 = vld [vmem:[#allocation2 + $0x212] sm:$0xff]  ;;  %v6450_v61 = vld [vmem:[#allocation2 + $0x21a] sm:$0xff] }
 0x8e0   :  { %6985 = vrot.lane.b32.xlu1 %v6826_v36, %s9797_s19 }
 0x8e1   :  { %v7334_v6 = vpop.permute.xlu0 %7333  ;;  %v7958_v46 = vld [vmem:[#allocation3 + $0x58] sm:$0xff] }
 0x8e2   :  { %v7716_v14 = vpop.permute.xlu1 %7715  ;;  %7512 = vst.msk [vmem:[#allocation3 + $0x68] sm:$0xff] %vm3030_vm8, %v7334_v6  ;;  %9682 = vmatmul.mubr.msk.f32.gmra.mrb[10].mxu1 %vm3556_vm11, %v7958_v46 }
 0x8e3   :  { %7895 = vst.msk [vmem:[#allocation3 + $0x60] sm:$0xff] %vm3415_vm10, %v7716_v14  ;;  %7367 = vrot.lane.b32.xlu0 %v7209_v62, %s9798_s20  ;;  %v6834_v14 = vld [vmem:[#allocation2 + $0x230] sm:$0xff] }
 0x8e4   :  { %7369 = vrot.lane.b32.xlu1 %v7210_v3, %s9798_s20  ;;  %v6833_v3 = vld [vmem:[#allocation2 + $0x228] sm:$0xff] }
 0x8e5   :  { %v7718_v19 = vpop.permute.xlu0 %7717 }
 0x8e6   :  { %v6952_v0 = vpop.permute.xlu1 %6951  ;;  %7896 = vst.msk [vmem:[#allocation3 + $0x68] sm:$0xff] %vm3415_vm10, %v7718_v19 }
 0x8e7   :  { %7129 = vst.msk [vmem:[#allocation3 + $0x70] sm:$0xff] %vm2645_vm7, %v6952_v0  ;;  %7751 = vrot.lane.b32.xlu0 %v7593_v32, %s9799_s1  ;;  %v7217_v0 = vld [vmem:[#allocation2 + $0x229] sm:$0xff] }
 0x8e8   :  { %6603 = vrot.lane.b32.xlu1 %v6443_v40, %s9796_s18  ;;  %v7218_v40 = vld [vmem:[#allocation2 + $0x231] sm:$0xff] }
 0x8e9   :  { %v6954_v7 = vpop.permute.xlu0 %6953 }
 0x8ea   :  { %v7336_v10 = vpop.permute.xlu1 %7335  ;;  %7130 = vst.msk [vmem:[#allocation3 + $0x78] sm:$0xff] %vm2645_vm7, %v6954_v7  ;;  %v7959_v35 = vld [vmem:[#allocation3 + $0x60] sm:$0xff] }
 0x8eb   :  { %7513 = vst.msk [vmem:[#allocation3 + $0x70] sm:$0xff] %vm3030_vm8, %v7336_v10  ;;  %9684 = vmatprep.mubr.msk.f32.mxu1 %vm3556_vm11, %v7959_v35  ;;  %7753 = vrot.lane.b32.xlu0 %v7594_v22, %s9799_s1  ;;  %v6451_v35 = vld [vmem:[#allocation2 + $0x22a] sm:$0xff] }
 0x8ec   :  { %6605 = vrot.lane.b32.xlu1 %v6444_v28, %s9796_s18 }
 0x8ed   :  { %v7338_v4 = vpop.permute.xlu0 %7337  ;;  %v7960_v63 = vld [vmem:[#allocation3 + $0x68] sm:$0xff] }
 0x8ee   :  { %v7720_v8 = vpop.permute.xlu1 %7719  ;;  %7514 = vst.msk [vmem:[#allocation3 + $0x78] sm:$0xff] %vm3030_vm8, %v7338_v4  ;;  %9685 = vmatmul.mubr.msk.f32.gmra.mrb[12].mxu1 %vm3556_vm11, %v7960_v63 }
 0x8ef   :  { %7897 = vst.msk [vmem:[#allocation3 + $0x70] sm:$0xff] %vm3415_vm10, %v7720_v8  ;;  %6987 = vrot.lane.b32.xlu0 %v6827_v21, %s9797_s19  ;;  %v6452_v8 = vld [vmem:[#allocation2 + $0x232] sm:$0xff] }
 0x8f0   :  { %6989 = vrot.lane.b32.xlu1 %v6828_v54, %s9797_s19 }
 0x8f1   :  { %v7722_v39 = vpop.permute.xlu0 %7721 }
 0x8f2   :  { %v6956_v58 = vpop.permute.xlu1 %6955  ;;  %7898 = vst.msk [vmem:[#allocation3 + $0x78] sm:$0xff] %vm3415_vm10, %v7722_v39  ;;  %v6835_v39 = vld [vmem:[#allocation2 + $0x240] sm:$0xff] }
 0x8f3   :  { %7131 = vst.msk [vmem:[#allocation3 + $0x80] sm:$0xff] %vm2645_vm7, %v6956_v58  ;;  %7371 = vrot.lane.b32.xlu0 %v7211_v47, %s9798_s20  ;;  %v6836_v58 = vld [vmem:[#allocation2 + $0x248] sm:$0xff] }
 0x8f4   :  { %7373 = vrot.lane.b32.xlu1 %v7212_v48, %s9798_s20 }
 0x8f5   :  { %v6958_v18 = vpop.permute.xlu0 %6957 }
 0x8f6   :  { %v7340_v16 = vpop.permute.xlu1 %7339  ;;  %7132 = vst.msk [vmem:[#allocation3 + $0x88] sm:$0xff] %vm2645_vm7, %v6958_v18  ;;  %v7961_v11 = vld [vmem:[#allocation3 + $0x70] sm:$0xff] }
 0x8f7   :  { %7515 = vst.msk [vmem:[#allocation3 + $0x80] sm:$0xff] %vm3030_vm8, %v7340_v16  ;;  %9687 = vmatprep.mubr.msk.f32.mxu1 %vm3556_vm11, %v7961_v11  ;;  %7755 = vrot.lane.b32.xlu0 %v6445_v56, %s9799_s1  ;;  %v7219_v16 = vld [vmem:[#allocation2 + $0x241] sm:$0xff]  ;;  %v7220_v11 = vld [vmem:[#allocation2 + $0x249] sm:$0xff] }
 0x8f8   :  { %6607 = vrot.lane.b32.xlu1 %v6445_v56, %s9796_s18 }
 0x8f9   :  { %v7342_v59 = vpop.permute.xlu0 %7341  ;;  %v7962_v42 = vld [vmem:[#allocation3 + $0x78] sm:$0xff] }
 0x8fa   :  { %v7724_v1 = vpop.permute.xlu1 %7723  ;;  %7516 = vst.msk [vmem:[#allocation3 + $0x88] sm:$0xff] %vm3030_vm8, %v7342_v59  ;;  %9688 = vmatmul.mubr.msk.f32.gmra.mrb[14].mxu1 %vm3556_vm11, %v7962_v42 }
 0x8fb   :  { %7899 = vst.msk [vmem:[#allocation3 + $0x80] sm:$0xff] %vm3415_vm10, %v7724_v1  ;;  %7757 = vrot.lane.b32.xlu0 %v6446_v57, %s9799_s1  ;;  %v6453_v1 = vld [vmem:[#allocation2 + $0x242] sm:$0xff] }
 0x8fc   :  { %6609 = vrot.lane.b32.xlu1 %v6446_v57, %s9796_s18 }
 0x8fd   :  { %v7726_v2 = vpop.permute.xlu0 %7725 }
 0x8fe   :  { %v6960_v34 = vpop.permute.xlu1 %6959  ;;  %7900 = vst.msk [vmem:[#allocation3 + $0x88] sm:$0xff] %vm3415_vm10, %v7726_v2 }
 0x8ff   :  { %7133 = vst.msk [vmem:[#allocation3 + $0x90] sm:$0xff] %vm2645_vm7, %v6960_v34  ;;  %6991 = vrot.lane.b32.xlu0 %v6829_v30, %s9797_s19  ;;  %v6454_v34 = vld [vmem:[#allocation2 + $0x24a] sm:$0xff] }
 0x900   :  { %6993 = vrot.lane.b32.xlu1 %v6830_v29, %s9797_s19 }
 0x901   :  { %v6962_v41 = vpop.permute.xlu0 %6961 }
 0x902   :  { %v7344_v12 = vpop.permute.xlu1 %7343  ;;  %7134 = vst.msk [vmem:[#allocation3 + $0x98] sm:$0xff] %vm2645_vm7, %v6962_v41  ;;  %v7963_v27 = vld [vmem:[#allocation3 + $0x80] sm:$0xff]  ;;  %v6837_v41 = vld [vmem:[#allocation2 + $0x258] sm:$0xff] }
 0x903   :  { %7517 = vst.msk [vmem:[#allocation3 + $0x90] sm:$0xff] %vm3030_vm8, %v7344_v12  ;;  %9690 = vmatprep.mubr.msk.f32.mxu1 %vm3556_vm11, %v7963_v27  ;;  %7375 = vrot.lane.b32.xlu0 %v7213_v17, %s9798_s20  ;;  %v6838_v12 = vld [vmem:[#allocation2 + $0x260] sm:$0xff] }
 0x904   :  { %7377 = vrot.lane.b32.xlu1 %v7214_v60, %s9798_s20 }
 0x905   :  { %v7346_v15 = vpop.permute.xlu0 %7345  ;;  %v7964_v13 = vld [vmem:[#allocation3 + $0x88] sm:$0xff] }
 0x906   :  { %v7728_v5 = vpop.permute.xlu1 %7727  ;;  %7518 = vst.msk [vmem:[#allocation3 + $0x98] sm:$0xff] %vm3030_vm8, %v7346_v15  ;;  %9691 = vmatmul.mubr.msk.f32.gmra.mrb[16].mxu1 %vm3556_vm11, %v7964_v13  ;;  %v7221_v15 = vld [vmem:[#allocation2 + $0x259] sm:$0xff]  ;;  %v7222_v13 = vld [vmem:[#allocation2 + $0x261] sm:$0xff] }
 0x907   :  { %7901 = vst.msk [vmem:[#allocation3 + $0x90] sm:$0xff] %vm3415_vm10, %v7728_v5  ;;  %7759 = vrot.lane.b32.xlu0 %v6447_v33, %s9799_s1 }
 0x908   :  { %6611 = vrot.lane.b32.xlu1 %v6447_v33, %s9796_s18 }
 0x909   :  { %v7730_v50 = vpop.permute.xlu0 %7729 }
 0x90a   :  { %v6964_v43 = vpop.permute.xlu1 %6963  ;;  %7902 = vst.msk [vmem:[#allocation3 + $0x98] sm:$0xff] %vm3415_vm10, %v7730_v50 }
 0x90b   :  { %7135 = vst.msk [vmem:[#allocation3 + $0xa0] sm:$0xff] %vm2645_vm7, %v6964_v43  ;;  %7761 = vrot.lane.b32.xlu0 %v6448_v23, %s9799_s1  ;;  %v6455_v43 = vld [vmem:[#allocation2 + $0x25a] sm:$0xff] }
 0x90c   :  { %6613 = vrot.lane.b32.xlu1 %v6448_v23, %s9796_s18 }
 0x90d   :  { %v6966_v53 = vpop.permute.xlu0 %6965 }
 0x90e   :  { %v7348_v38 = vpop.permute.xlu1 %7347  ;;  %7136 = vst.msk [vmem:[#allocation3 + $0xa8] sm:$0xff] %vm2645_vm7, %v6966_v53  ;;  %v7965_v20 = vld [vmem:[#allocation3 + $0x90] sm:$0xff] }
 0x90f   :  { %7519 = vst.msk [vmem:[#allocation3 + $0xa0] sm:$0xff] %vm3030_vm8, %v7348_v38  ;;  %9693 = vmatprep.mubr.msk.f32.mxu1 %vm3556_vm11, %v7965_v20  ;;  %6995 = vrot.lane.b32.xlu0 %v6831_v25, %s9797_s19  ;;  %v6456_v38 = vld [vmem:[#allocation2 + $0x262] sm:$0xff] }
 0x910   :  { %6997 = vrot.lane.b32.xlu1 %v6832_v26, %s9797_s19  ;;  %v6839_v26 = vld [vmem:[#allocation2 + $0x270] sm:$0xff] }
 0x911   :  { %v7350_v52 = vpop.permute.xlu0 %7349  ;;  %v7966_v24 = vld [vmem:[#allocation3 + $0x98] sm:$0xff] }
 0x912   :  { %v7732_v55 = vpop.permute.xlu1 %7731  ;;  %7520 = vst.msk [vmem:[#allocation3 + $0xa8] sm:$0xff] %vm3030_vm8, %v7350_v52  ;;  %9694 = vmatmul.mubr.msk.f32.gmra.mrb[18].mxu1 %vm3556_vm11, %v7966_v24  ;;  %v6840_v52 = vld [vmem:[#allocation2 + $0x278] sm:$0xff] }
 0x913   :  { %7903 = vst.msk [vmem:[#allocation3 + $0xa0] sm:$0xff] %vm3415_vm10, %v7732_v55  ;;  %7379 = vrot.lane.b32.xlu0 %v7215_v49, %s9798_s20 }
 0x914   :  { %7381 = vrot.lane.b32.xlu1 %v7216_v31, %s9798_s20  ;;  %v7223_v31 = vld [vmem:[#allocation2 + $0x271] sm:$0xff] }
 0x915   :  { %v7734_v37 = vpop.permute.xlu0 %7733 }
 0x916   :  { %v6968_v51 = vpop.permute.xlu1 %6967  ;;  %7904 = vst.msk [vmem:[#allocation3 + $0xa8] sm:$0xff] %vm3415_vm10, %v7734_v37  ;;  %v7224_v37 = vld [vmem:[#allocation2 + $0x279] sm:$0xff] }
 0x917   :  { %7137 = vst.msk [vmem:[#allocation3 + $0xb0] sm:$0xff] %vm2645_vm7, %v6968_v51  ;;  %7763 = vrot.lane.b32.xlu0 %v6449_v44, %s9799_s1 }
 0x918   :  { %6615 = vrot.lane.b32.xlu1 %v6449_v44, %s9796_s18 }
 0x919   :  { %v6970_v45 = vpop.permute.xlu0 %6969 }
 0x91a   :  { %v7352_v36 = vpop.permute.xlu1 %7351  ;;  %7138 = vst.msk [vmem:[#allocation3 + $0xb8] sm:$0xff] %vm2645_vm7, %v6970_v45  ;;  %v7967_v9 = vld [vmem:[#allocation3 + $0xa0] sm:$0xff] }
 0x91b   :  { %7521 = vst.msk [vmem:[#allocation3 + $0xb0] sm:$0xff] %vm3030_vm8, %v7352_v36  ;;  %9696 = vmatprep.mubr.msk.f32.mxu1 %vm3556_vm11, %v7967_v9  ;;  %7765 = vrot.lane.b32.xlu0 %v6450_v61, %s9799_s1  ;;  %v6457_v36 = vld [vmem:[#allocation2 + $0x272] sm:$0xff] }
 0x91c   :  { %6617 = vrot.lane.b32.xlu1 %v6450_v61, %s9796_s18 }
 0x91d   :  { %v7354_v62 = vpop.permute.xlu0 %7353  ;;  %v7968_v6 = vld [vmem:[#allocation3 + $0xa8] sm:$0xff] }
 0x91e   :  { %v7736_v46 = vpop.permute.xlu1 %7735  ;;  %7522 = vst.msk [vmem:[#allocation3 + $0xb8] sm:$0xff] %vm3030_vm8, %v7354_v62  ;;  %9697 = vmatmul.mubr.msk.f32.gmra.mrb[20].mxu1 %vm3556_vm11, %v7968_v6  ;;  %v6458_v62 = vld [vmem:[#allocation2 + $0x27a] sm:$0xff] }
 0x91f   :  { %7905 = vst.msk [vmem:[#allocation3 + $0xb0] sm:$0xff] %vm3415_vm10, %v7736_v46  ;;  %6999 = vrot.lane.b32.xlu0 %v6833_v3, %s9797_s19  ;;  %v6841_v3 = vld [vmem:[#allocation2 + $0x288] sm:$0xff] }
 0x920   :  { %7001 = vrot.lane.b32.xlu1 %v6834_v14, %s9797_s19  ;;  %v6842_v14 = vld [vmem:[#allocation2 + $0x290] sm:$0xff] }
 0x921   :  { %v7738_v32 = vpop.permute.xlu0 %7737 }
 0x922   :  { %v6972_v19 = vpop.permute.xlu1 %6971  ;;  %7906 = vst.msk [vmem:[#allocation3 + $0xb8] sm:$0xff] %vm3415_vm10, %v7738_v32 }
 0x923   :  { %7139 = vst.msk [vmem:[#allocation3 + $0xc0] sm:$0xff] %vm2645_vm7, %v6972_v19  ;;  %7383 = vrot.lane.b32.xlu0 %v7217_v0, %s9798_s20 }
 0x924   :  { %7385 = vrot.lane.b32.xlu1 %v7218_v40, %s9798_s20  ;;  %v7225_v40 = vld [vmem:[#allocation2 + $0x289] sm:$0xff] }
 0x925   :  { %v6974_v22 = vpop.permute.xlu0 %6973 }
 0x926   :  { %v7356_v7 = vpop.permute.xlu1 %7355  ;;  %7140 = vst.msk [vmem:[#allocation3 + $0xc8] sm:$0xff] %vm2645_vm7, %v6974_v22  ;;  %v7969_v10 = vld [vmem:[#allocation3 + $0xb0] sm:$0xff] }
 0x927   :  { %7523 = vst.msk [vmem:[#allocation3 + $0xc0] sm:$0xff] %vm3030_vm8, %v7356_v7  ;;  %9699 = vmatprep.mubr.msk.f32.mxu1 %vm3556_vm11, %v7969_v10  ;;  %7767 = vrot.lane.b32.xlu0 %v6451_v35, %s9799_s1  ;;  %v7226_v22 = vld [vmem:[#allocation2 + $0x291] sm:$0xff] }
 0x928   :  { %6619 = vrot.lane.b32.xlu1 %v6451_v35, %s9796_s18 }
 0x929   :  { %v7358_v28 = vpop.permute.xlu0 %7357  ;;  %v7970_v4 = vld [vmem:[#allocation3 + $0xb8] sm:$0xff] }
 0x92a   :  { %v7740_v63 = vpop.permute.xlu1 %7739  ;;  %7524 = vst.msk [vmem:[#allocation3 + $0xc8] sm:$0xff] %vm3030_vm8, %v7358_v28  ;;  %9700 = vmatmul.mubr.msk.f32.gmra.mrb[22].mxu1 %vm3556_vm11, %v7970_v4  ;;  %v6459_v28 = vld [vmem:[#allocation2 + $0x28a] sm:$0xff] }
 0x92b   :  { %7907 = vst.msk [vmem:[#allocation3 + $0xc0] sm:$0xff] %vm3415_vm10, %v7740_v63  ;;  %7769 = vrot.lane.b32.xlu0 %v6452_v8, %s9799_s1 }
 0x92c   :  { %6621 = vrot.lane.b32.xlu1 %v6452_v8, %s9796_s18  ;;  %v6460_v8 = vld [vmem:[#allocation2 + $0x292] sm:$0xff] }
 0x92d   :  { %v7742_v21 = vpop.permute.xlu0 %7741 }
 0x92e   :  { %v6594_v54 = vpop.permute.xlu1 %6593  ;;  %7908 = vst.msk [vmem:[#allocation3 + $0xc8] sm:$0xff] %vm3415_vm10, %v7742_v21 }
 0x92f   :  { %6758 = vst.msk [vmem:[#allocation3 + $0xd8] sm:$0xff] %vm2259_vm6, %v6594_v54  ;;  %7003 = vrot.lane.b32.xlu0 %v6835_v39, %s9797_s19  ;;  %v6843_v39 = vld [vmem:[#allocation2 + $0x2a0] sm:$0xff] }
 0x930   :  { %7005 = vrot.lane.b32.xlu1 %v6836_v58, %s9797_s19  ;;  %v6844_v58 = vld [vmem:[#allocation2 + $0x2a8] sm:$0xff] }
 0x931   :  { %v6976_v47 = vpop.permute.xlu0 %6975 }
 0x932   :  { %v6978_v48 = vpop.permute.xlu1 %6977  ;;  %7141 = vst.msk [vmem:[#allocation3 + $0xd0] sm:$0xff] %vm2645_vm7, %v6976_v47  ;;  %v7971_v18 = vld [vmem:[#allocation3 + $0xc0] sm:$0xff] }
 0x933   :  { %7142 = vst.msk [vmem:[#allocation3 + $0xd8] sm:$0xff] %vm2645_vm7, %v6978_v48  ;;  %9702 = vmatprep.mubr.msk.f32.mxu1 %vm3556_vm11, %v7971_v18  ;;  %7387 = vrot.lane.b32.xlu0 %v7219_v16, %s9798_s20  ;;  %v7227_v16 = vld [vmem:[#allocation2 + $0x2a1] sm:$0xff] }
 0x934   :  { %7389 = vrot.lane.b32.xlu1 %v7220_v11, %s9798_s20  ;;  %v7228_v11 = vld [vmem:[#allocation2 + $0x2a9] sm:$0xff] }
 0x935   :  { %v7360_v56 = vpop.permute.xlu0 %7359  ;;  %v7972_v59 = vld [vmem:[#allocation3 + $0xc8] sm:$0xff] }
 0x936   :  { %v7362_v42 = vpop.permute.xlu1 %7361  ;;  %7525 = vst.msk [vmem:[#allocation3 + $0xd0] sm:$0xff] %vm3030_vm8, %v7360_v56  ;;  %9703 = vmatmul.mubr.msk.f32.gmra.mrb[24].mxu1 %vm3556_vm11, %v7972_v59 }
 0x937   :  { %7526 = vst.msk [vmem:[#allocation3 + $0xd8] sm:$0xff] %vm3030_vm8, %v7362_v42  ;;  %7771 = vrot.lane.b32.xlu0 %v6453_v1, %s9799_s1 }
 0x938   :  { %6623 = vrot.lane.b32.xlu1 %v6453_v1, %s9796_s18  ;;  %v6461_v1 = vld [vmem:[#allocation2 + $0x2a2] sm:$0xff] }
 0x939   :  { %v7744_v57 = vpop.permute.xlu0 %7743 }
 0x93a   :  { %v6596_v2 = vpop.permute.xlu1 %6595  ;;  %7909 = vst.msk [vmem:[#allocation3 + $0xd0] sm:$0xff] %vm3415_vm10, %v7744_v57 }
 0x93b   :  { %6759 = vst.msk [vmem:[#allocation3 + $0xe0] sm:$0xff] %vm2259_vm6, %v6596_v2  ;;  %7773 = vrot.lane.b32.xlu0 %v6454_v34, %s9799_s1 }
 0x93c   :  { %6625 = vrot.lane.b32.xlu1 %v6454_v34, %s9796_s18 }
 0x93d   :  { %v7746_v30 = vpop.permute.xlu0 %7745 }
 0x93e   :  { %v6598_v29 = vpop.permute.xlu1 %6597  ;;  %7910 = vst.msk [vmem:[#allocation3 + $0xd8] sm:$0xff] %vm3415_vm10, %v7746_v30 }
 0x93f   :  { %6760 = vst.msk [vmem:[#allocation3 + $0xe8] sm:$0xff] %vm2259_vm6, %v6598_v29  ;;  %7007 = vrot.lane.b32.xlu0 %v6837_v41, %s9797_s19  ;;  %v6462_v29 = vld [vmem:[#allocation2 + $0x2aa] sm:$0xff] }
 0x940   :  { %7009 = vrot.lane.b32.xlu1 %v6838_v12, %s9797_s19 }
 0x941   :  { %v6980_v27 = vpop.permute.xlu0 %6979  ;;  %v7973_v17 = vld [vmem:[#allocation3 + $0xd0] sm:$0xff] }
 0x942   :  { %v6982_v60 = vpop.permute.xlu1 %6981  ;;  %7143 = vst.msk [vmem:[#allocation3 + $0xe0] sm:$0xff] %vm2645_vm7, %v6980_v27  ;;  %9705 = vmatprep.mubr.msk.f32.mxu1 %vm3556_vm11, %v7973_v17  ;;  %v6845_v27 = vld [vmem:[#allocation2 + $0x2b8] sm:$0xff]  ;;  %v6846_v17 = vld [vmem:[#allocation2 + $0x2c0] sm:$0xff] }
 0x943   :  { %7144 = vst.msk [vmem:[#allocation3 + $0xe8] sm:$0xff] %vm2645_vm7, %v6982_v60  ;;  %7391 = vrot.lane.b32.xlu0 %v7221_v15, %s9798_s20 }
 0x944   :  { %7393 = vrot.lane.b32.xlu1 %v7222_v13, %s9798_s20 }
 0x945   :  { %v7364_v5 = vpop.permute.xlu0 %7363  ;;  %v7974_v33 = vld [vmem:[#allocation3 + $0xd8] sm:$0xff] }
 0x946   :  { %v7366_v50 = vpop.permute.xlu1 %7365  ;;  %7527 = vst.msk [vmem:[#allocation3 + $0xe0] sm:$0xff] %vm3030_vm8, %v7364_v5  ;;  %9706 = vmatmul.mubr.msk.f32.gmra.mrb[26].mxu1 %vm3556_vm11, %v7974_v33  ;;  %v7229_v5 = vld [vmem:[#allocation2 + $0x2b9] sm:$0xff]  ;;  %v7230_v33 = vld [vmem:[#allocation2 + $0x2c1] sm:$0xff] }
 0x947   :  { %7528 = vst.msk [vmem:[#allocation3 + $0xe8] sm:$0xff] %vm3030_vm8, %v7366_v50  ;;  %7775 = vrot.lane.b32.xlu0 %v6455_v43, %s9799_s1 }
 0x948   :  { %6627 = vrot.lane.b32.xlu1 %v6455_v43, %s9796_s18 }
 0x949   :  { %v7748_v23 = vpop.permute.xlu0 %7747 }
 0x94a   :  { %v6600_v53 = vpop.permute.xlu1 %6599  ;;  %7911 = vst.msk [vmem:[#allocation3 + $0xe0] sm:$0xff] %vm3415_vm10, %v7748_v23 }
 0x94b   :  { %6761 = vst.msk [vmem:[#allocation3 + $0xf0] sm:$0xff] %vm2259_vm6, %v6600_v53  ;;  %7777 = vrot.lane.b32.xlu0 %v6456_v38, %s9799_s1 }
 0x94c   :  { %6629 = vrot.lane.b32.xlu1 %v6456_v38, %s9796_s18 }
 0x94d   :  { %v7750_v20 = vpop.permute.xlu0 %7749 }
 0x94e   :  { %v6602_v25 = vpop.permute.xlu1 %6601  ;;  %7912 = vst.msk [vmem:[#allocation3 + $0xe8] sm:$0xff] %vm3415_vm10, %v7750_v20  ;;  %v6463_v20 = vld [vmem:[#allocation2 + $0x2ba] sm:$0xff] }
 0x94f   :  { %6762 = vst.msk [vmem:[#allocation3 + $0xf8] sm:$0xff] %vm2259_vm6, %v6602_v25  ;;  %7011 = vrot.lane.b32.xlu0 %v6839_v26, %s9797_s19 }
 0x950   :  { %7013 = vrot.lane.b32.xlu1 %v6840_v52, %s9797_s19  ;;  %v6464_v52 = vld [vmem:[#allocation2 + $0x2c2] sm:$0xff] }
 0x951   :  { %v6984_v24 = vpop.permute.xlu0 %6983  ;;  %v7975_v55 = vld [vmem:[#allocation3 + $0xe0] sm:$0xff] }
 0x952   :  { %v6986_v49 = vpop.permute.xlu1 %6985  ;;  %7145 = vst.msk [vmem:[#allocation3 + $0xf0] sm:$0xff] %vm2645_vm7, %v6984_v24  ;;  %9708 = vmatprep.mubr.msk.f32.mxu1 %vm3556_vm11, %v7975_v55 }
 0x953   :  { %7146 = vst.msk [vmem:[#allocation3 + $0xf8] sm:$0xff] %vm2645_vm7, %v6986_v49  ;;  %7395 = vrot.lane.b32.xlu0 %v7223_v31, %s9798_s20  ;;  %v6847_v49 = vld [vmem:[#allocation2 + $0x2d0] sm:$0xff]  ;;  %v6848_v31 = vld [vmem:[#allocation2 + $0x2d8] sm:$0xff] }
 0x954   :  { %7397 = vrot.lane.b32.xlu1 %v7224_v37, %s9798_s20 }
 0x955   :  { %v7368_v51 = vpop.permute.xlu0 %7367  ;;  %v7976_v44 = vld [vmem:[#allocation3 + $0xe8] sm:$0xff] }
 0x956   :  { %v7370_v45 = vpop.permute.xlu1 %7369  ;;  %7529 = vst.msk [vmem:[#allocation3 + $0xf0] sm:$0xff] %vm3030_vm8, %v7368_v51  ;;  %9709 = vmatmul.mubr.msk.f32.gmra.mrb[28].mxu1 %vm3556_vm11, %v7976_v44 }
 0x957   :  { %7530 = vst.msk [vmem:[#allocation3 + $0xf8] sm:$0xff] %vm3030_vm8, %v7370_v45  ;;  %7779 = vrot.lane.b32.xlu0 %v6457_v36, %s9799_s1 }
 0x958   :  { %6631 = vrot.lane.b32.xlu1 %v6457_v36, %s9796_s18 }
 0x959   :  { %v7752_v9 = vpop.permute.xlu0 %7751 }
 0x95a   :  { %v6604_v61 = vpop.permute.xlu1 %6603  ;;  %7913 = vst.msk [vmem:[#allocation3 + $0xf0] sm:$0xff] %vm3415_vm10, %v7752_v9  ;;  %v7231_v9 = vld [vmem:[#allocation2 + $0x2d1] sm:$0xff] }
 0x95b   :  { %6763 = vst.msk [vmem:[#allocation3 + $0x100] sm:$0xff] %vm2259_vm6, %v6604_v61  ;;  %7781 = vrot.lane.b32.xlu0 %v6458_v62, %s9799_s1  ;;  %v7232_v61 = vld [vmem:[#allocation2 + $0x2d9] sm:$0xff] }
 0x95c   :  { %6633 = vrot.lane.b32.xlu1 %v6458_v62, %s9796_s18 }
 0x95d   :  { %v7754_v6 = vpop.permute.xlu0 %7753 }
 0x95e   :  { %v6606_v46 = vpop.permute.xlu1 %6605  ;;  %7914 = vst.msk [vmem:[#allocation3 + $0xf8] sm:$0xff] %vm3415_vm10, %v7754_v6 }
 0x95f   :  { %6764 = vst.msk [vmem:[#allocation3 + $0x108] sm:$0xff] %vm2259_vm6, %v6606_v46  ;;  %7015 = vrot.lane.b32.xlu0 %v6841_v3, %s9797_s19  ;;  %v6465_v3 = vld [vmem:[#allocation2 + $0x2d2] sm:$0xff] }
 0x960   :  { %7017 = vrot.lane.b32.xlu1 %v6842_v14, %s9797_s19 }
 0x961   :  { %v6988_v32 = vpop.permute.xlu0 %6987  ;;  %v7977_v19 = vld [vmem:[#allocation3 + $0xf0] sm:$0xff] }
 0x962   :  { %v6990_v0 = vpop.permute.xlu1 %6989  ;;  %7147 = vst.msk [vmem:[#allocation3 + $0x100] sm:$0xff] %vm2645_vm7, %v6988_v32  ;;  %9711 = vmatprep.mubr.msk.f32.mxu1 %vm3556_vm11, %v7977_v19  ;;  %v6466_v19 = vld [vmem:[#allocation2 + $0x2da] sm:$0xff] }
 0x963   :  { %7148 = vst.msk [vmem:[#allocation3 + $0x108] sm:$0xff] %vm2645_vm7, %v6990_v0  ;;  %7399 = vrot.lane.b32.xlu0 %v7225_v40, %s9798_s20 }
 0x964   :  { %7401 = vrot.lane.b32.xlu1 %v7226_v22, %s9798_s20 }
 0x965   :  { %v7372_v7 = vpop.permute.xlu0 %7371  ;;  %v7978_v10 = vld [vmem:[#allocation3 + $0xf8] sm:$0xff] }
 0x966   :  { %v7374_v35 = vpop.permute.xlu1 %7373  ;;  %7531 = vst.msk [vmem:[#allocation3 + $0x100] sm:$0xff] %vm3030_vm8, %v7372_v7  ;;  %9712 = vmatmul.mubr.msk.f32.gmra.mrb[30].mxu1 %vm3556_vm11, %v7978_v10  ;;  %v6849_v10 = vld [vmem:[#allocation2 + $0x2e8] sm:$0xff] }
 0x967   :  { %7532 = vst.msk [vmem:[#allocation3 + $0x108] sm:$0xff] %vm3030_vm8, %v7374_v35  ;;  %7783 = vrot.lane.b32.xlu0 %v6459_v28, %s9799_s1  ;;  %v6850_v35 = vld [vmem:[#allocation2 + $0x2f0] sm:$0xff] }
 0x968   :  { %6635 = vrot.lane.b32.xlu1 %v6459_v28, %s9796_s18 }
 0x969   :  { %v7756_v4 = vpop.permute.xlu0 %7755 }
 0x96a   :  { %v6608_v63 = vpop.permute.xlu1 %6607  ;;  %7915 = vst.msk [vmem:[#allocation3 + $0x100] sm:$0xff] %vm3415_vm10, %v7756_v4 }
 0x96b   :  { %6765 = vst.msk [vmem:[#allocation3 + $0x110] sm:$0xff] %vm2259_vm6, %v6608_v63  ;;  %7785 = vrot.lane.b32.xlu0 %v6460_v8, %s9799_s1 }
 0x96c   :  { %6637 = vrot.lane.b32.xlu1 %v6460_v8, %s9796_s18  ;;  %v7233_v8 = vld [vmem:[#allocation2 + $0x2e9] sm:$0xff] }
 0x96d   :  { %v7758_v21 = vpop.permute.xlu0 %7757 }
 0x96e   :  { %v6610_v54 = vpop.permute.xlu1 %6609  ;;  %7916 = vst.msk [vmem:[#allocation3 + $0x108] sm:$0xff] %vm3415_vm10, %v7758_v21  ;;  %v7234_v21 = vld [vmem:[#allocation2 + $0x2f1] sm:$0xff] }
 0x96f   :  { %6766 = vst.msk [vmem:[#allocation3 + $0x118] sm:$0xff] %vm2259_vm6, %v6610_v54  ;;  %7019 = vrot.lane.b32.xlu0 %v6843_v39, %s9797_s19 }
 0x970   :  { %7021 = vrot.lane.b32.xlu1 %v6844_v58, %s9797_s19 }
 0x971   :  { %v6992_v47 = vpop.permute.xlu0 %6991  ;;  %v7979_v48 = vld [vmem:[#allocation3 + $0x100] sm:$0xff] }
 0x972   :  { %v6994_v18 = vpop.permute.xlu1 %6993  ;;  %7149 = vst.msk [vmem:[#allocation3 + $0x110] sm:$0xff] %vm2645_vm7, %v6992_v47  ;;  %9714 = vmatprep.mubr.msk.f32.mxu1 %vm3556_vm11, %v7979_v48  ;;  %v6467_v47 = vld [vmem:[#allocation2 + $0x2ea] sm:$0xff] }
 0x973   :  { %7150 = vst.msk [vmem:[#allocation3 + $0x118] sm:$0xff] %vm2645_vm7, %v6994_v18  ;;  %7403 = vrot.lane.b32.xlu0 %v7227_v16, %s9798_s20 }
 0x974   :  { %7405 = vrot.lane.b32.xlu1 %v7228_v11, %s9798_s20 }
 0x975   :  { %v7376_v56 = vpop.permute.xlu0 %7375  ;;  %v7980_v59 = vld [vmem:[#allocation3 + $0x108] sm:$0xff] }
 0x976   :  { %v7378_v42 = vpop.permute.xlu1 %7377  ;;  %7533 = vst.msk [vmem:[#allocation3 + $0x110] sm:$0xff] %vm3030_vm8, %v7376_v56  ;;  %9715 = vmatmul.mubr.msk.f32.gmra.mrb[32].mxu1 %vm3556_vm11, %v7980_v59  ;;  %v6468_v56 = vld [vmem:[#allocation2 + $0x2f2] sm:$0xff] }
 0x977   :  { %7534 = vst.msk [vmem:[#allocation3 + $0x118] sm:$0xff] %vm3030_vm8, %v7378_v42  ;;  %7787 = vrot.lane.b32.xlu0 %v6461_v1, %s9799_s1 }
 0x978   :  { %6639 = vrot.lane.b32.xlu1 %v6461_v1, %s9796_s18  ;;  %v6851_v1 = vld [vmem:[#allocation2 + $0x300] sm:$0xff] }
 0x979   :  { %v14467_v57 = vpop.f32.mrb[0].mxu1  ;;  %v7760_v2 = vpop.permute.xlu0 %7759 }
 0x97a   :  { %v6612_v34 = vpop.permute.xlu1 %6611  ;;  %7917 = vst.msk [vmem:[#allocation3 + $0x110] sm:$0xff] %vm3415_vm10, %v7760_v2  ;;  %v14470_v30 = vpop.f32.mrb[1].mxu1  ;;  %v6852_v2 = vld [vmem:[#allocation2 + $0x308] sm:$0xff] }
 0x97b   :  { %6767 = vst.msk [vmem:[#allocation3 + $0x120] sm:$0xff] %vm2259_vm6, %v6612_v34  ;;  %7789 = vrot.lane.b32.xlu0 %v6462_v29, %s9799_s1 }
 0x97c   :  { %6641 = vrot.lane.b32.xlu1 %v6462_v29, %s9796_s18 }
 0x97d   :  { %v7762_v41 = vpop.permute.xlu0 %7761 }
 0x97e   :  { %v6614_v12 = vpop.permute.xlu1 %6613  ;;  %7918 = vst.msk [vmem:[#allocation3 + $0x118] sm:$0xff] %vm3415_vm10, %v7762_v41 }
 0x97f   :  { %6768 = vst.msk [vmem:[#allocation3 + $0x128] sm:$0xff] %vm2259_vm6, %v6614_v12  ;;  %7023 = vrot.lane.b32.xlu0 %v6845_v27, %s9797_s19  ;;  %v7235_v12 = vld [vmem:[#allocation2 + $0x301] sm:$0xff]  ;;  %v7236_v27 = vld [vmem:[#allocation2 + $0x309] sm:$0xff] }
 0x980   :  { %7025 = vrot.lane.b32.xlu1 %v6846_v17, %s9797_s19 }
 0x981   :  { %v6996_v60 = vpop.permute.xlu0 %6995  ;;  %v7981_v15 = vld [vmem:[#allocation3 + $0x110] sm:$0xff] }
 0x982   :  { %v6998_v13 = vpop.permute.xlu1 %6997  ;;  %7151 = vst.msk [vmem:[#allocation3 + $0x120] sm:$0xff] %vm2645_vm7, %v6996_v60  ;;  %9717 = vmatprep.mubr.msk.f32.mxu1 %vm3556_vm11, %v7981_v15 }
 0x983   :  { %7152 = vst.msk [vmem:[#allocation3 + $0x128] sm:$0xff] %vm2645_vm7, %v6998_v13  ;;  %7407 = vrot.lane.b32.xlu0 %v7229_v5, %s9798_s20 }
 0x984   :  { %7409 = vrot.lane.b32.xlu1 %v7230_v33, %s9798_s20  ;;  %v6469_v33 = vld [vmem:[#allocation2 + $0x302] sm:$0xff] }
 0x985   :  { %v7380_v50 = vpop.permute.xlu0 %7379  ;;  %v14484_v43 = vpop.f32.mrb[2].mxu1  ;;  %v7982_v23 = vld [vmem:[#allocation3 + $0x118] sm:$0xff] }
 0x986   :  { %v7382_v53 = vpop.permute.xlu1 %7381  ;;  %7535 = vst.msk [vmem:[#allocation3 + $0x120] sm:$0xff] %vm3030_vm8, %v7380_v50  ;;  %v14487_v38 = vpop.f32.mrb[3].mxu1  ;;  %9718 = vmatmul.mubr.msk.f32.gmra.mrb[34].mxu1 %vm3556_vm11, %v7982_v23 }
 0x987   :  { %7536 = vst.msk [vmem:[#allocation3 + $0x128] sm:$0xff] %vm3030_vm8, %v7382_v53  ;;  %7791 = vrot.lane.b32.xlu0 %v6463_v20, %s9799_s1  ;;  %v6470_v53 = vld [vmem:[#allocation2 + $0x30a] sm:$0xff] }
 0x988   :  { %6643 = vrot.lane.b32.xlu1 %v6463_v20, %s9796_s18 }
 0x989   :  { %v7764_v25 = vpop.permute.xlu0 %7763 }
 0x98a   :  { %v6616_v26 = vpop.permute.xlu1 %6615  ;;  %7919 = vst.msk [vmem:[#allocation3 + $0x120] sm:$0xff] %vm3415_vm10, %v7764_v25 }
 0x98b   :  { %6769 = vst.msk [vmem:[#allocation3 + $0x130] sm:$0xff] %vm2259_vm6, %v6616_v26  ;;  %7793 = vrot.lane.b32.xlu0 %v6464_v52, %s9799_s1  ;;  %v6853_v26 = vld [vmem:[#allocation2 + $0x318] sm:$0xff] }
 0x98c   :  { %6645 = vrot.lane.b32.xlu1 %v6464_v52, %s9796_s18  ;;  %v6854_v52 = vld [vmem:[#allocation2 + $0x320] sm:$0xff] }
 0x98d   :  { %v7766_v24 = vpop.permute.xlu0 %7765 }
 0x98e   :  { %v6618_v55 = vpop.permute.xlu1 %6617  ;;  %7920 = vst.msk [vmem:[#allocation3 + $0x128] sm:$0xff] %vm3415_vm10, %v7766_v24 }
 0x98f   :  { %6770 = vst.msk [vmem:[#allocation3 + $0x138] sm:$0xff] %vm2259_vm6, %v6618_v55  ;;  %7027 = vrot.lane.b32.xlu0 %v6847_v49, %s9797_s19 }
 0x990   :  { %7029 = vrot.lane.b32.xlu1 %v6848_v31, %s9797_s19 }
 0x991   :  { %v7000_v37 = vpop.permute.xlu0 %6999  ;;  %v14501_v51 = vpop.f32.mrb[4].mxu1  ;;  %v7983_v44 = vld [vmem:[#allocation3 + $0x120] sm:$0xff] }
 0x992   :  { %v7002_v45 = vpop.permute.xlu1 %7001  ;;  %7153 = vst.msk [vmem:[#allocation3 + $0x130] sm:$0xff] %vm2645_vm7, %v7000_v37  ;;  %v14504_v36 = vpop.f32.mrb[5].mxu1  ;;  %9720 = vmatprep.mubr.msk.f32.mxu1 %vm3556_vm11, %v7983_v44  ;;  %v7237_v44 = vld [vmem:[#allocation2 + $0x319] sm:$0xff] }
 0x993   :  { %7154 = vst.msk [vmem:[#allocation3 + $0x138] sm:$0xff] %vm2645_vm7, %v7002_v45  ;;  %7411 = vrot.lane.b32.xlu0 %v7231_v9, %s9798_s20  ;;  %v7238_v45 = vld [vmem:[#allocation2 + $0x321] sm:$0xff] }
 0x994   :  { %7413 = vrot.lane.b32.xlu1 %v7232_v61, %s9798_s20 }
 0x995   :  { %v7384_v62 = vpop.permute.xlu0 %7383  ;;  %v7984_v6 = vld [vmem:[#allocation3 + $0x128] sm:$0xff] }
 0x996   :  { %v7386_v46 = vpop.permute.xlu1 %7385  ;;  %7537 = vst.msk [vmem:[#allocation3 + $0x130] sm:$0xff] %vm3030_vm8, %v7384_v62  ;;  %9721 = vmatmul.mubr.msk.f32.gmra.mrb[36].mxu1 %vm3556_vm11, %v7984_v6  ;;  %v6471_v6 = vld [vmem:[#allocation2 + $0x31a] sm:$0xff] }
 0x997   :  { %7538 = vst.msk [vmem:[#allocation3 + $0x138] sm:$0xff] %vm3030_vm8, %v7386_v46  ;;  %7795 = vrot.lane.b32.xlu0 %v6465_v3, %s9799_s1 }
 0x998   :  { %6647 = vrot.lane.b32.xlu1 %v6465_v3, %s9796_s18 }
 0x999   :  { %v7768_v14 = vpop.permute.xlu0 %7767 }
 0x99a   :  { %v6620_v32 = vpop.permute.xlu1 %6619  ;;  %7921 = vst.msk [vmem:[#allocation3 + $0x130] sm:$0xff] %vm3415_vm10, %v7768_v14  ;;  %v6472_v14 = vld [vmem:[#allocation2 + $0x322] sm:$0xff] }
 0x99b   :  { %6771 = vst.msk [vmem:[#allocation3 + $0x140] sm:$0xff] %vm2259_vm6, %v6620_v32  ;;  %7797 = vrot.lane.b32.xlu0 %v6466_v19, %s9799_s1 }
 0x99c   :  { %6649 = vrot.lane.b32.xlu1 %v6466_v19, %s9796_s18 }
 0x99d   :  { %v7770_v0 = vpop.permute.xlu0 %7769  ;;  %v14519_v40 = vpop.f32.mrb[6].mxu1 }
 0x99e   :  { %v6622_v22 = vpop.permute.xlu1 %6621  ;;  %7922 = vst.msk [vmem:[#allocation3 + $0x138] sm:$0xff] %vm3415_vm10, %v7770_v0  ;;  %v14522_v7 = vpop.f32.mrb[7].mxu1 }
 0x99f   :  { %6772 = vst.msk [vmem:[#allocation3 + $0x148] sm:$0xff] %vm2259_vm6, %v6622_v22  ;;  %7031 = vrot.lane.b32.xlu0 %v6849_v10, %s9797_s19  ;;  %v6855_v10 = vld [vmem:[#allocation2 + $0x330] sm:$0xff] }
 0x9a0   :  { %7033 = vrot.lane.b32.xlu1 %v6850_v35, %s9797_s19  ;;  %v6856_v35 = vld [vmem:[#allocation2 + $0x338] sm:$0xff] }
 0x9a1   :  { %v7004_v28 = vpop.permute.xlu0 %7003  ;;  %v7985_v4 = vld [vmem:[#allocation3 + $0x130] sm:$0xff] }
 0x9a2   :  { %v7006_v63 = vpop.permute.xlu1 %7005  ;;  %7155 = vst.msk [vmem:[#allocation3 + $0x140] sm:$0xff] %vm2645_vm7, %v7004_v28  ;;  %9723 = vmatprep.mubr.msk.f32.mxu1 %vm3556_vm11, %v7985_v4 }
 0x9a3   :  { %7156 = vst.msk [vmem:[#allocation3 + $0x148] sm:$0xff] %vm2645_vm7, %v7006_v63  ;;  %7415 = vrot.lane.b32.xlu0 %v7233_v8, %s9798_s20  ;;  %v7239_v8 = vld [vmem:[#allocation2 + $0x331] sm:$0xff] }
 0x9a4   :  { %7417 = vrot.lane.b32.xlu1 %v7234_v21, %s9798_s20  ;;  %v7240_v21 = vld [vmem:[#allocation2 + $0x339] sm:$0xff] }
 0x9a5   :  { %v7388_v54 = vpop.permute.xlu0 %7387  ;;  %v7986_v39 = vld [vmem:[#allocation3 + $0x138] sm:$0xff] }
 0x9a6   :  { %v7390_v58 = vpop.permute.xlu1 %7389  ;;  %7539 = vst.msk [vmem:[#allocation3 + $0x140] sm:$0xff] %vm3030_vm8, %v7388_v54  ;;  %9724 = vmatmul.mubr.msk.f32.gmra.mrb[38].mxu1 %vm3556_vm11, %v7986_v39 }
 0x9a7   :  { %7540 = vst.msk [vmem:[#allocation3 + $0x148] sm:$0xff] %vm3030_vm8, %v7390_v58  ;;  %7799 = vrot.lane.b32.xlu0 %v6467_v47, %s9799_s1 }
 0x9a8   :  { %6651 = vrot.lane.b32.xlu1 %v6467_v47, %s9796_s18  ;;  %v6473_v47 = vld [vmem:[#allocation2 + $0x332] sm:$0xff] }
 0x9a9   :  { %v7772_v48 = vpop.permute.xlu0 %7771  ;;  %v14537_v18 = vpop.f32.mrb[8].mxu1 }
 0x9aa   :  { %v6624_v16 = vpop.permute.xlu1 %6623  ;;  %7923 = vst.msk [vmem:[#allocation3 + $0x140] sm:$0xff] %vm3415_vm10, %v7772_v48  ;;  %v14540_v11 = vpop.f32.mrb[9].mxu1 }
 0x9ab   :  { %6773 = vst.msk [vmem:[#allocation3 + $0x150] sm:$0xff] %vm2259_vm6, %v6624_v16  ;;  %7801 = vrot.lane.b32.xlu0 %v6468_v56, %s9799_s1 }
 0x9ac   :  { %6653 = vrot.lane.b32.xlu1 %v6468_v56, %s9796_s18 }
 0x9ad   :  { %v7774_v59 = vpop.permute.xlu0 %7773 }
 0x9ae   :  { %v6626_v42 = vpop.permute.xlu1 %6625  ;;  %7924 = vst.msk [vmem:[#allocation3 + $0x148] sm:$0xff] %vm3415_vm10, %v7774_v59 }
 0x9af   :  { %6774 = vst.msk [vmem:[#allocation3 + $0x158] sm:$0xff] %vm2259_vm6, %v6626_v42  ;;  %7035 = vrot.lane.b32.xlu0 %v6851_v1, %s9797_s19  ;;  %v6474_v42 = vld [vmem:[#allocation2 + $0x33a] sm:$0xff]  ;;  %v6857_v1 = vld [vmem:[#allocation2 + $0x348] sm:$0xff] }
 0x9b0   :  { %7037 = vrot.lane.b32.xlu1 %v6852_v2, %s9797_s19 }
 0x9b1   :  { %v7008_v34 = vpop.permute.xlu0 %7007  ;;  %v7987_v29 = vld [vmem:[#allocation3 + $0x140] sm:$0xff] }
 0x9b2   :  { %v7010_v41 = vpop.permute.xlu1 %7009  ;;  %7157 = vst.msk [vmem:[#allocation3 + $0x150] sm:$0xff] %vm2645_vm7, %v7008_v34  ;;  %9726 = vmatprep.mubr.msk.f32.mxu1 %vm3556_vm11, %v7987_v29  ;;  %v6858_v34 = vld [vmem:[#allocation2 + $0x350] sm:$0xff] }
 0x9b3   :  { %7158 = vst.msk [vmem:[#allocation3 + $0x158] sm:$0xff] %vm2645_vm7, %v7010_v41  ;;  %7419 = vrot.lane.b32.xlu0 %v7235_v12, %s9798_s20  ;;  %v7241_v41 = vld [vmem:[#allocation2 + $0x349] sm:$0xff] }
 0x9b4   :  { %7421 = vrot.lane.b32.xlu1 %v7236_v27, %s9798_s20 }
 0x9b5   :  { %v7392_v17 = vpop.permute.xlu0 %7391  ;;  %v14554_v60 = vpop.f32.mrb[10].mxu1  ;;  %v7988_v15 = vld [vmem:[#allocation3 + $0x148] sm:$0xff] }
 0x9b6   :  { %v7394_v13 = vpop.permute.xlu1 %7393  ;;  %7541 = vst.msk [vmem:[#allocation3 + $0x150] sm:$0xff] %vm3030_vm8, %v7392_v17  ;;  %v14557_v5 = vpop.f32.mrb[11].mxu1  ;;  %9727 = vmatmul.mubr.msk.f32.gmra.mrb[40].mxu1 %vm3556_vm11, %v7988_v15  ;;  %v7242_v17 = vld [vmem:[#allocation2 + $0x351] sm:$0xff] }
 0x9b7   :  { %7542 = vst.msk [vmem:[#allocation3 + $0x158] sm:$0xff] %vm3030_vm8, %v7394_v13  ;;  %7803 = vrot.lane.b32.xlu0 %v6469_v33, %s9799_s1  ;;  %v7625_v13 = vld [vmem:[#allocation2 + $0x34a] sm:$0xff] }
 0x9b8   :  { %6655 = vrot.lane.b32.xlu1 %v6469_v33, %s9796_s18 }
 0x9b9   :  { %v7776_v50 = vpop.permute.xlu0 %7775 }
 0x9ba   :  { %v6628_v23 = vpop.permute.xlu1 %6627  ;;  %7925 = vst.msk [vmem:[#allocation3 + $0x150] sm:$0xff] %vm3415_vm10, %v7776_v50 }
 0x9bb   :  { %6775 = vst.msk [vmem:[#allocation3 + $0x160] sm:$0xff] %vm2259_vm6, %v6628_v23  ;;  %7805 = vrot.lane.b32.xlu0 %v6470_v53, %s9799_s1 }
 0x9bc   :  { %6657 = vrot.lane.b32.xlu1 %v6470_v53, %s9796_s18  ;;  %v7626_v53 = vld [vmem:[#allocation2 + $0x352] sm:$0xff] }
 0x9bd   :  { %v7778_v20 = vpop.permute.xlu0 %7777 }
 0x9be   :  { %v6630_v25 = vpop.permute.xlu1 %6629  ;;  %7926 = vst.msk [vmem:[#allocation3 + $0x158] sm:$0xff] %vm3415_vm10, %v7778_v20 }
 0x9bf   :  { %6776 = vst.msk [vmem:[#allocation3 + $0x168] sm:$0xff] %vm2259_vm6, %v6630_v25  ;;  %7039 = vrot.lane.b32.xlu0 %v6853_v26, %s9797_s19 }
 0x9c0   :  { %7041 = vrot.lane.b32.xlu1 %v6854_v52, %s9797_s19 }
 0x9c1   :  { %v7012_v24 = vpop.permute.xlu0 %7011  ;;  %v14571_v55 = vpop.f32.mrb[12].mxu1  ;;  %v7989_v49 = vld [vmem:[#allocation3 + $0x150] sm:$0xff] }
 0x9c2   :  { %v7014_v31 = vpop.permute.xlu1 %7013  ;;  %7159 = vst.msk [vmem:[#allocation3 + $0x160] sm:$0xff] %vm2645_vm7, %v7012_v24  ;;  %v14574_v37 = vpop.f32.mrb[13].mxu1  ;;  %9729 = vmatprep.mubr.msk.f32.mxu1 %vm3556_vm11, %v7989_v49 }
 0x9c3   :  { %7160 = vst.msk [vmem:[#allocation3 + $0x168] sm:$0xff] %vm2645_vm7, %v7014_v31  ;;  %7423 = vrot.lane.b32.xlu0 %v7237_v44, %s9798_s20 }
 0x9c4   :  { %7425 = vrot.lane.b32.xlu1 %v7238_v45, %s9798_s20 }
 0x9c5   :  { %v7396_v9 = vpop.permute.xlu0 %7395  ;;  %v7990_v61 = vld [vmem:[#allocation3 + $0x158] sm:$0xff] }
 0x9c6   :  { %v7398_v62 = vpop.permute.xlu1 %7397  ;;  %7543 = vst.msk [vmem:[#allocation3 + $0x160] sm:$0xff] %vm3030_vm8, %v7396_v9  ;;  %9730 = vmatmul.mubr.msk.f32.gmra.mrb[42].mxu1 %vm3556_vm11, %v7990_v61 }
 0x9c7   :  { %7544 = vst.msk [vmem:[#allocation3 + $0x168] sm:$0xff] %vm3030_vm8, %v7398_v62  ;;  %7807 = vrot.lane.b32.xlu0 %v6471_v6, %s9799_s1 }
 0x9c8   :  { %6659 = vrot.lane.b32.xlu1 %v6471_v6, %s9796_s18 }
 0x9c9   :  { %v7780_v46 = vpop.permute.xlu0 %7779 }
 0x9ca   :  { %v6632_v3 = vpop.permute.xlu1 %6631  ;;  %7927 = vst.msk [vmem:[#allocation3 + $0x160] sm:$0xff] %vm3415_vm10, %v7780_v46 }
 0x9cb   :  { %6777 = vst.msk [vmem:[#allocation3 + $0x170] sm:$0xff] %vm2259_vm6, %v6632_v3  ;;  %7809 = vrot.lane.b32.xlu0 %v6472_v14, %s9799_s1 }
 0x9cc   :  { %6661 = vrot.lane.b32.xlu1 %v6472_v14, %s9796_s18 }
 0x9cd   :  { %v7782_v32 = vpop.permute.xlu0 %7781  ;;  %v14589_v19 = vpop.f32.mrb[14].mxu1 }
 0x9ce   :  { %v6634_v0 = vpop.permute.xlu1 %6633  ;;  %7928 = vst.msk [vmem:[#allocation3 + $0x168] sm:$0xff] %vm3415_vm10, %v7782_v32  ;;  %v14592_v22 = vpop.f32.mrb[15].mxu1 }
 0x9cf   :  { %6778 = vst.msk [vmem:[#allocation3 + $0x178] sm:$0xff] %vm2259_vm6, %v6634_v0  ;;  %7043 = vrot.lane.b32.xlu0 %v6855_v10, %s9797_s19 }
 0x9d0   :  { %7045 = vrot.lane.b32.xlu1 %v6856_v35, %s9797_s19 }
 0x9d1   :  { %v7016_v28 = vpop.permute.xlu0 %7015  ;;  %v7991_v4 = vld [vmem:[#allocation3 + $0x160] sm:$0xff] }
 0x9d2   :  { %v7018_v63 = vpop.permute.xlu1 %7017  ;;  %7161 = vst.msk [vmem:[#allocation3 + $0x170] sm:$0xff] %vm2645_vm7, %v7016_v28  ;;  %9732 = vmatprep.mubr.msk.f32.mxu1 %vm3556_vm11, %v7991_v4 }
 0x9d3   :  { %7162 = vst.msk [vmem:[#allocation3 + $0x178] sm:$0xff] %vm2645_vm7, %v7018_v63  ;;  %7427 = vrot.lane.b32.xlu0 %v7239_v8, %s9798_s20 }
 0x9d4   :  { %7429 = vrot.lane.b32.xlu1 %v7240_v21, %s9798_s20 }
 0x9d5   :  { %v7400_v54 = vpop.permute.xlu0 %7399  ;;  %v7992_v39 = vld [vmem:[#allocation3 + $0x168] sm:$0xff] }
 0x9d6   :  { %v7402_v58 = vpop.permute.xlu1 %7401  ;;  %7545 = vst.msk [vmem:[#allocation3 + $0x170] sm:$0xff] %vm3030_vm8, %v7400_v54  ;;  %9733 = vmatmul.mubr.msk.f32.gmra.mrb[44].mxu1 %vm3556_vm11, %v7992_v39 }
 0x9d7   :  { %7546 = vst.msk [vmem:[#allocation3 + $0x178] sm:$0xff] %vm3030_vm8, %v7402_v58  ;;  %7811 = vrot.lane.b32.xlu0 %v6473_v47, %s9799_s1 }
 0x9d8   :  { %6663 = vrot.lane.b32.xlu1 %v6473_v47, %s9796_s18 }
 0x9d9   :  { %v7784_v48 = vpop.permute.xlu0 %7783  ;;  %v14607_v16 = vpop.f32.mrb[16].mxu1 }
 0x9da   :  { %v6636_v56 = vpop.permute.xlu1 %6635  ;;  %7929 = vst.msk [vmem:[#allocation3 + $0x170] sm:$0xff] %vm3415_vm10, %v7784_v48  ;;  %v14610_v59 = vpop.f32.mrb[17].mxu1 }
 0x9db   :  { %6779 = vst.msk [vmem:[#allocation3 + $0x180] sm:$0xff] %vm2259_vm6, %v6636_v56  ;;  %7813 = vrot.lane.b32.xlu0 %v6474_v42, %s9799_s1 }
 0x9dc   :  { %6665 = vrot.lane.b32.xlu1 %v6474_v42, %s9796_s18 }
 0x9dd   :  { %v7786_v2 = vpop.permute.xlu0 %7785 }
 0x9de   :  { %v6638_v29 = vpop.permute.xlu1 %6637  ;;  %7930 = vst.msk [vmem:[#allocation3 + $0x178] sm:$0xff] %vm3415_vm10, %v7786_v2 }
 0x9df   :  { %6780 = vst.msk [vmem:[#allocation3 + $0x188] sm:$0xff] %vm2259_vm6, %v6638_v29  ;;  %7047 = vrot.lane.b32.xlu0 %v6857_v1, %s9797_s19 }
 0x9e0   :  { %7049 = vrot.lane.b32.xlu1 %v6858_v34, %s9797_s19 }
 0x9e1   :  { %v7020_v12 = vpop.permute.xlu0 %7019  ;;  %v7993_v27 = vld [vmem:[#allocation3 + $0x170] sm:$0xff] }
 0x9e2   :  { %v7022_v15 = vpop.permute.xlu1 %7021  ;;  %7163 = vst.msk [vmem:[#allocation3 + $0x180] sm:$0xff] %vm2645_vm7, %v7020_v12  ;;  %9735 = vmatprep.mubr.msk.f32.mxu1 %vm3556_vm11, %v7993_v27 }
 0x9e3   :  { %7164 = vst.msk [vmem:[#allocation3 + $0x188] sm:$0xff] %vm2645_vm7, %v7022_v15  ;;  %7431 = vrot.lane.b32.xlu0 %v7241_v41, %s9798_s20 }
 0x9e4   :  { %7433 = vrot.lane.b32.xlu1 %v7242_v17, %s9798_s20 }
 0x9e5   :  { %v7404_v33 = vpop.permute.xlu0 %7403  ;;  %v14624_v50 = vpop.f32.mrb[18].mxu1  ;;  %v7994_v23 = vld [vmem:[#allocation3 + $0x178] sm:$0xff] }
 0x9e6   :  { %v7406_v20 = vpop.permute.xlu1 %7405  ;;  %7547 = vst.msk [vmem:[#allocation3 + $0x180] sm:$0xff] %vm3030_vm8, %v7404_v33  ;;  %v14627_v25 = vpop.f32.mrb[19].mxu1  ;;  %9736 = vmatmul.mubr.msk.f32.gmra.mrb[46].mxu1 %vm3556_vm11, %v7994_v23 }
 0x9e7   :  { %7548 = vst.msk [vmem:[#allocation3 + $0x188] sm:$0xff] %vm3030_vm8, %v7406_v20  ;;  %7815 = vrot.lane.b32.xlu0 %v7625_v13, %s9799_s1 }
 0x9e8   :  { %7817 = vrot.lane.b32.xlu1 %v7626_v53, %s9799_s1 }
 0x9e9   :  { %v7788_v26 = vpop.permute.xlu0 %7787 }
 0x9ea   :  { %v6640_v52 = vpop.permute.xlu1 %6639  ;;  %7931 = vst.msk [vmem:[#allocation3 + $0x180] sm:$0xff] %vm3415_vm10, %v7788_v26 }
 0x9eb   :  { %6781 = vst.msk [vmem:[#allocation3 + $0x190] sm:$0xff] %vm2259_vm6, %v6640_v52 }
 0x9ed   :  { %v7790_v24 = vpop.permute.xlu0 %7789 }
 0x9ee   :  { %v6642_v49 = vpop.permute.xlu1 %6641  ;;  %7932 = vst.msk [vmem:[#allocation3 + $0x188] sm:$0xff] %vm3415_vm10, %v7790_v24 }
 0x9ef   :  { %6782 = vst.msk [vmem:[#allocation3 + $0x198] sm:$0xff] %vm2259_vm6, %v6642_v49 }
 0x9f1   :  { %v7024_v31 = vpop.permute.xlu0 %7023  ;;  %v14637_v44 = vpop.f32.mrb[20].mxu1  ;;  %v7995_v45 = vld [vmem:[#allocation3 + $0x180] sm:$0xff] }
 0x9f2   :  { %v7026_v9 = vpop.permute.xlu1 %7025  ;;  %7165 = vst.msk [vmem:[#allocation3 + $0x190] sm:$0xff] %vm2645_vm7, %v7024_v31  ;;  %v14640_v61 = vpop.f32.mrb[21].mxu1  ;;  %9738 = vmatprep.mubr.msk.f32.mxu1 %vm3556_vm11, %v7995_v45 }
 0x9f3   :  { %7166 = vst.msk [vmem:[#allocation3 + $0x198] sm:$0xff] %vm2645_vm7, %v7026_v9 }
 0x9f5   :  { %v7408_v62 = vpop.permute.xlu0 %7407  ;;  %v7996_v6 = vld [vmem:[#allocation3 + $0x188] sm:$0xff] }
 0x9f6   :  { %v7410_v46 = vpop.permute.xlu1 %7409  ;;  %7549 = vst.msk [vmem:[#allocation3 + $0x190] sm:$0xff] %vm3030_vm8, %v7408_v62  ;;  %9739 = vmatmul.mubr.msk.f32.gmra.mrb[48].mxu1 %vm3556_vm11, %v7996_v6 }
 0x9f7   :  { %7550 = vst.msk [vmem:[#allocation3 + $0x198] sm:$0xff] %vm3030_vm8, %v7410_v46 }
 0x9f9   :  { %v7792_v3 = vpop.permute.xlu0 %7791 }
 0x9fa   :  { %v6644_v14 = vpop.permute.xlu1 %6643  ;;  %7933 = vst.msk [vmem:[#allocation3 + $0x190] sm:$0xff] %vm3415_vm10, %v7792_v3 }
 0x9fb   :  { %6783 = vst.msk [vmem:[#allocation3 + $0x1a0] sm:$0xff] %vm2259_vm6, %v6644_v14 }
 0x9fd   :  { %v7794_v32 = vpop.permute.xlu0 %7793  ;;  %v14649_v0 = vpop.f32.mrb[22].mxu1 }
 0x9fe   :  { %v6646_v10 = vpop.permute.xlu1 %6645  ;;  %7934 = vst.msk [vmem:[#allocation3 + $0x198] sm:$0xff] %vm3415_vm10, %v7794_v32  ;;  %v14652_v35 = vpop.f32.mrb[23].mxu1 }
 0x9ff   :  { %6784 = vst.msk [vmem:[#allocation3 + $0x1a8] sm:$0xff] %vm2259_vm6, %v6646_v10 }
 0xa01   :  { %v7028_v28 = vpop.permute.xlu0 %7027  ;;  %v7997_v4 = vld [vmem:[#allocation3 + $0x190] sm:$0xff] }
 0xa02   :  { %v7030_v63 = vpop.permute.xlu1 %7029  ;;  %7167 = vst.msk [vmem:[#allocation3 + $0x1a0] sm:$0xff] %vm2645_vm7, %v7028_v28  ;;  %9741 = vmatprep.mubr.msk.f32.mxu1 %vm3556_vm11, %v7997_v4 }
 0xa03   :  { %7168 = vst.msk [vmem:[#allocation3 + $0x1a8] sm:$0xff] %vm2645_vm7, %v7030_v63 }
 0xa05   :  { %v7412_v8 = vpop.permute.xlu0 %7411  ;;  %v7998_v21 = vld [vmem:[#allocation3 + $0x198] sm:$0xff] }
 0xa06   :  { %v7414_v54 = vpop.permute.xlu1 %7413  ;;  %7551 = vst.msk [vmem:[#allocation3 + $0x1a0] sm:$0xff] %vm3030_vm8, %v7412_v8  ;;  %9742 = vmatmul.mubr.msk.f32.gmra.mrb[50].mxu1 %vm3556_vm11, %v7998_v21 }
 0xa07   :  { %7552 = vst.msk [vmem:[#allocation3 + $0x1a8] sm:$0xff] %vm3030_vm8, %v7414_v54 }
 0xa09   :  { %v7796_v39 = vpop.permute.xlu0 %7795  ;;  %v14661_v58 = vpop.f32.mrb[24].mxu1 }
 0xa0a   :  { %v6648_v47 = vpop.permute.xlu1 %6647  ;;  %7935 = vst.msk [vmem:[#allocation3 + $0x1a0] sm:$0xff] %vm3415_vm10, %v7796_v39  ;;  %v14664_v48 = vpop.f32.mrb[25].mxu1 }
 0xa0b   :  { %6785 = vst.msk [vmem:[#allocation3 + $0x1b0] sm:$0xff] %vm2259_vm6, %v6648_v47 }
 0xa0d   :  { %v7798_v56 = vpop.permute.xlu0 %7797 }
 0xa0e   :  { %v6650_v42 = vpop.permute.xlu1 %6649  ;;  %7936 = vst.msk [vmem:[#allocation3 + $0x1a8] sm:$0xff] %vm3415_vm10, %v7798_v56 }
 0xa0f   :  { %6786 = vst.msk [vmem:[#allocation3 + $0x1b8] sm:$0xff] %vm2259_vm6, %v6650_v42 }
 0xa11   :  { %v7032_v1 = vpop.permute.xlu0 %7031  ;;  %v7999_v2 = vld [vmem:[#allocation3 + $0x1a0] sm:$0xff] }
 0xa12   :  { %v7034_v34 = vpop.permute.xlu1 %7033  ;;  %7169 = vst.msk [vmem:[#allocation3 + $0x1b0] sm:$0xff] %vm2645_vm7, %v7032_v1  ;;  %9744 = vmatprep.mubr.msk.f32.mxu1 %vm3556_vm11, %v7999_v2 }
 0xa13   :  { %7170 = vst.msk [vmem:[#allocation3 + $0x1b8] sm:$0xff] %vm2645_vm7, %v7034_v34 }
 0xa15   :  { %v7416_v29 = vpop.permute.xlu0 %7415  ;;  %v8000_v41 = vld [vmem:[#allocation3 + $0x1a8] sm:$0xff] }
 0xa16   :  { %v7418_v12 = vpop.permute.xlu1 %7417  ;;  %7553 = vst.msk [vmem:[#allocation3 + $0x1b0] sm:$0xff] %vm3030_vm8, %v7416_v29  ;;  %9745 = vmatmul.mubr.msk.f32.gmra.mrb[52].mxu1 %vm3556_vm11, %v8000_v41 }
 0xa17   :  { %7554 = vst.msk [vmem:[#allocation3 + $0x1b8] sm:$0xff] %vm3030_vm8, %v7418_v12 }
 0xa19   :  { %v7800_v27 = vpop.permute.xlu0 %7799  ;;  %v14675_v17 = vpop.f32.mrb[26].mxu1 }
 0xa1a   :  { %v6652_v15 = vpop.permute.xlu1 %6651  ;;  %7937 = vst.msk [vmem:[#allocation3 + $0x1b0] sm:$0xff] %vm3415_vm10, %v7800_v27  ;;  %v14678_v13 = vpop.f32.mrb[27].mxu1 }
 0xa1b   :  { %6787 = vst.msk [vmem:[#allocation3 + $0x1c0] sm:$0xff] %vm2259_vm6, %v6652_v15 }
 0xa1d   :  { %v7802_v33 = vpop.permute.xlu0 %7801 }
 0xa1e   :  { %v6654_v23 = vpop.permute.xlu1 %6653  ;;  %7938 = vst.msk [vmem:[#allocation3 + $0x1b8] sm:$0xff] %vm3415_vm10, %v7802_v33 }
 0xa1f   :  { %6788 = vst.msk [vmem:[#allocation3 + $0x1c8] sm:$0xff] %vm2259_vm6, %v6654_v23 }
 0xa21   :  { %v7036_v53 = vpop.permute.xlu0 %7035  ;;  %v8001_v20 = vld [vmem:[#allocation3 + $0x1b0] sm:$0xff] }
 0xa22   :  { %v7038_v26 = vpop.permute.xlu1 %7037  ;;  %7171 = vst.msk [vmem:[#allocation3 + $0x1c0] sm:$0xff] %vm2645_vm7, %v7036_v53  ;;  %9747 = vmatprep.mubr.msk.f32.mxu1 %vm3556_vm11, %v8001_v20 }
 0xa23   :  { %7172 = vst.msk [vmem:[#allocation3 + $0x1c8] sm:$0xff] %vm2645_vm7, %v7038_v26 }
 0xa25   :  { %v7420_v52 = vpop.permute.xlu0 %7419  ;;  %v8002_v24 = vld [vmem:[#allocation3 + $0x1b8] sm:$0xff] }
 0xa26   :  { %v7422_v49 = vpop.permute.xlu1 %7421  ;;  %7555 = vst.msk [vmem:[#allocation3 + $0x1c0] sm:$0xff] %vm3030_vm8, %v7420_v52  ;;  %9748 = vmatmul.mubr.msk.f32.gmra.mrb[54].mxu1 %vm3556_vm11, %v8002_v24 }
 0xa27   :  { %7556 = vst.msk [vmem:[#allocation3 + $0x1c8] sm:$0xff] %vm3030_vm8, %v7422_v49 }
 0xa29   :  { %v7804_v31 = vpop.permute.xlu0 %7803  ;;  %v14689_v45 = vpop.f32.mrb[28].mxu1 }
 0xa2a   :  { %v6656_v9 = vpop.permute.xlu1 %6655  ;;  %7939 = vst.msk [vmem:[#allocation3 + $0x1c0] sm:$0xff] %vm3415_vm10, %v7804_v31  ;;  %v14692_v62 = vpop.f32.mrb[29].mxu1 }
 0xa2b   :  { %6789 = vst.msk [vmem:[#allocation3 + $0x1d0] sm:$0xff] %vm2259_vm6, %v6656_v9 }
 0xa2d   :  { %v7806_v6 = vpop.permute.xlu0 %7805 }
 0xa2e   :  { %v6658_v46 = vpop.permute.xlu1 %6657  ;;  %7940 = vst.msk [vmem:[#allocation3 + $0x1c8] sm:$0xff] %vm3415_vm10, %v7806_v6 }
 0xa2f   :  { %6790 = vst.msk [vmem:[#allocation3 + $0x1d8] sm:$0xff] %vm2259_vm6, %v6658_v46 }
 0xa31   :  { %v7040_v3 = vpop.permute.xlu0 %7039  ;;  %v8003_v14 = vld [vmem:[#allocation3 + $0x1c0] sm:$0xff] }
 0xa32   :  { %v7042_v32 = vpop.permute.xlu1 %7041  ;;  %7173 = vst.msk [vmem:[#allocation3 + $0x1d0] sm:$0xff] %vm2645_vm7, %v7040_v3  ;;  %9750 = vmatprep.mubr.msk.f32.mxu1 %vm3556_vm11, %v8003_v14 }
 0xa33   :  { %7174 = vst.msk [vmem:[#allocation3 + $0x1d8] sm:$0xff] %vm2645_vm7, %v7042_v32  ;;  %v14742_v32 = vld [vmem:[%s16437_s6] ss:$0 sm:$0xff] }
 0xa35   :  { %v7424_v10 = vpop.permute.xlu0 %7423  ;;  %v8004_v28 = vld [vmem:[#allocation3 + $0x1c8] sm:$0xff] }
 0xa36   :  { %v7426_v4 = vpop.permute.xlu1 %7425  ;;  %7557 = vst.msk [vmem:[#allocation3 + $0x1d0] sm:$0xff] %vm3030_vm8, %v7424_v10  ;;  %9751 = vmatmul.mubr.msk.f32.gmra.mrb[56].mxu1 %vm3556_vm11, %v8004_v28  ;;  %v14748_v28 = vadd.f32 %v14467_v57, %v14742_v32 }
 0xa37   :  { %7558 = vst.msk [vmem:[#allocation3 + $0x1d8] sm:$0xff] %vm3030_vm8, %v7426_v4 }
 0xa38   :  { %v8604_v57 = vsel %vm96_vm0, %v14748_v28, 0.0 }
 0xa39   :  { %v7808_v63 = vpop.permute.xlu0 %7807  ;;  %v14703_v8 = vpop.f32.mrb[30].mxu1 }
 0xa3a   :  { %v6660_v21 = vpop.permute.xlu1 %6659  ;;  %7941 = vst.msk [vmem:[#allocation3 + $0x1d0] sm:$0xff] %vm3415_vm10, %v7808_v63  ;;  %v14706_v54 = vpop.f32.mrb[31].mxu1  ;;  %v14754_v63 = vadd.f32 %v14742_v32, %v14470_v30 }
 0xa3b   :  { %6791 = vst.msk [vmem:[#allocation3 + $0x1e0] sm:$0xff] %vm2259_vm6, %v6660_v21  ;;  %v14758_v21 = vadd.f32 %v14742_v32, %v14487_v38 }
 0xa3d   :  { %v7810_v39 = vpop.permute.xlu0 %7809  ;;  %v8739_v30 = vmul.f32 %v14758_v21, %v14758_v21 }
 0xa3e   :  { %v6662_v47 = vpop.permute.xlu1 %6661  ;;  %7942 = vst.msk [vmem:[#allocation3 + $0x1d8] sm:$0xff] %vm3415_vm10, %v7810_v39  ;;  %v8738_v39 = vmul.f32 %v14748_v28, %v14748_v28 }
 0xa3f   :  { %6792 = vst.msk [vmem:[#allocation3 + $0x1e8] sm:$0xff] %vm2259_vm6, %v6662_v47  ;;  %v8737_v47 = vmul.f32 %v14754_v63, %v14754_v63 }
 0xa41   :  { %v7044_v56 = vpop.permute.xlu0 %7043  ;;  %v8005_v42 = vld [vmem:[#allocation3 + $0x1d0] sm:$0xff]  ;;  %v8801_v38 = vsel %vm96_vm0, %v8737_v47, 0.0 }
 0xa42   :  { %v7046_v1 = vpop.permute.xlu1 %7045  ;;  %7175 = vst.msk [vmem:[#allocation3 + $0x1e0] sm:$0xff] %vm2645_vm7, %v7044_v56  ;;  %9753 = vmatprep.mubr.msk.f32.mxu1 %vm3556_vm11, %v8005_v42  ;;  %v8603_v56 = vsel %vm96_vm0, %v14754_v63, 0.0  ;;  %v8802_v42 = vsel %vm96_vm0, %v8738_v39, 0.0 }
 0xa43   :  { %7176 = vst.msk [vmem:[#allocation3 + $0x1e8] sm:$0xff] %vm2645_vm7, %v7046_v1  ;;  %v14774_v1 = vadd.f32 %v14484_v43, %v14742_v32 }
 0xa45   :  { %v7428_v2 = vpop.permute.xlu0 %7427  ;;  %v8006_v34 = vld [vmem:[#allocation3 + $0x1d8] sm:$0xff] }
 0xa46   :  { %v7430_v29 = vpop.permute.xlu1 %7429  ;;  %7559 = vst.msk [vmem:[#allocation3 + $0x1e0] sm:$0xff] %vm3030_vm8, %v7428_v2  ;;  %9754 = vmatmul.mubr.msk.f32.gmra.mrb[58].mxu1 %vm3556_vm11, %v8006_v34  ;;  %v8606_v2 = vsel %vm96_vm0, %v14758_v21, 0.0  ;;  %v14780_v34 = vadd.f32 %v14742_v32, %v14504_v36 }
 0xa47   :  { %7560 = vst.msk [vmem:[#allocation3 + $0x1e8] sm:$0xff] %vm3030_vm8, %v7430_v29  ;;  %v8605_v29 = vadd.f32 %v8604_v57, %v8603_v56  ;;  %v14813_v56 = vadd.f32 %v14519_v40, %v14742_v32 }
 0xa48   :  { %v8610_v36 = vsel %vm96_vm0, %v14780_v34, 0.0 }
 0xa49   :  { %v7812_v41 = vpop.permute.xlu0 %7811  ;;  %v14717_v12 = vpop.f32.mrb[32].mxu1 }
 0xa4a   :  { %v6664_v27 = vpop.permute.xlu1 %6663  ;;  %7943 = vst.msk [vmem:[#allocation3 + $0x1e0] sm:$0xff] %vm3415_vm10, %v7812_v41  ;;  %v14720_v15 = vpop.f32.mrb[33].mxu1  ;;  %v8804_v41 = vsel %vm96_vm0, %v8739_v30, 0.0 }
 0xa4b   :  { %6793 = vst.msk [vmem:[#allocation3 + $0x1f0] sm:$0xff] %vm2259_vm6, %v6664_v27  ;;  %v8803_v27 = vadd.f32 %v8802_v42, %v8801_v38  ;;  %v14819_v42 = vadd.f32 %v14742_v32, %v14540_v11  ;;  %v14831_v11 = vadd.f32 %v14537_v18, %v14742_v32 }
 0xa4d   :  { %v7814_v33 = vpop.permute.xlu0 %7813  ;;  %v8805_v43 = vadd.f32 %v8804_v41, %v8803_v27  ;;  %v8745_v40 = vmul.f32 %v14819_v42, %v14819_v42 }
 0xa4e   :  { %v6666_v23 = vpop.permute.xlu1 %6665  ;;  %7944 = vst.msk [vmem:[#allocation3 + $0x1e8] sm:$0xff] %vm3415_vm10, %v7814_v33  ;;  %v8607_v33 = vadd.f32 %v8606_v2, %v8605_v29 }
 0xa4f   :  { %6794 = vst.msk [vmem:[#allocation3 + $0x1f8] sm:$0xff] %vm2259_vm6, %v6666_v23  ;;  %v8740_v23 = vmul.f32 %v14774_v1, %v14774_v1 }
 0xa51   :  { %v7048_v53 = vpop.permute.xlu0 %7047  ;;  %v8007_v20 = vld [vmem:[#allocation3 + $0x1e0] sm:$0xff] }
 0xa52   :  { %7177 = vst.msk [vmem:[#allocation3 + $0x1f0] sm:$0xff] %vm2645_vm7, %v7048_v53  ;;  %v7050_v26 = vpop.permute.xlu1 %7049  ;;  %9756 = vmatprep.mubr.msk.f32.mxu1 %vm3556_vm11, %v8007_v20  ;;  %v8741_v53 = vmul.f32 %v14780_v34, %v14780_v34  ;;  %v8608_v20 = vsel %vm96_vm0, %v14774_v1, 0.0 }
 0xa53   :  { %7178 = vst.msk [vmem:[#allocation3 + $0x1f8] sm:$0xff] %vm2645_vm7, %v7050_v26  ;;  %v14791_v26 = vadd.f32 %v14501_v51, %v14742_v32 }
 0xa55   :  { %v7432_v52 = vpop.permute.xlu0 %7431  ;;  %v8008_v24 = vld [vmem:[#allocation3 + $0x1e8] sm:$0xff]  ;;  %v8742_v51 = vmul.f32 %v14791_v26, %v14791_v26 }
 0xa56   :  { %7561 = vst.msk [vmem:[#allocation3 + $0x1f0] sm:$0xff] %vm3030_vm8, %v7432_v52  ;;  %v7434_v49 = vpop.permute.xlu1 %7433  ;;  %9757 = vmatmul.mubr.msk.f32.gmra.mrb[60].mxu1 %vm3556_vm11, %v8008_v24  ;;  %v14797_v52 = vadd.f32 %v14742_v32, %v14522_v7  ;;  %v8612_v7 = vsel %vm96_vm0, %v14791_v26, 0.0 }
 0xa57   :  { %7562 = vst.msk [vmem:[#allocation3 + $0x1f8] sm:$0xff] %vm3030_vm8, %v7434_v49  ;;  %v8609_v49 = vadd.f32 %v8608_v20, %v8607_v33  ;;  %v8810_v2 = vsel %vm96_vm0, %v8742_v51, 0.0  ;;  %v8744_v33 = vmul.f32 %v14813_v56, %v14813_v56  ;;  %v14837_v20 = vadd.f32 %v14742_v32, %v14557_v5 }
 0xa58   :  { %v8743_v47 = vmul.f32 %v14797_v52, %v14797_v52  ;;  %v8614_v30 = vsel %vm96_vm0, %v14797_v52, 0.0  ;;  %v8620_v5 = vsel %vm96_vm0, %v14831_v11, 0.0 }
 0xa59   :  { %v7816_v31 = vpop.permute.xlu0 %7815  ;;  %v14731_v9 = vpop.f32.mrb[34].mxu1  ;;  %v8611_v39 = vadd.f32 %v8610_v36, %v8609_v49  ;;  %v8814_v49 = vsel %vm96_vm0, %v8744_v33, 0.0  ;;  %v8747_v18 = vmul.f32 %v14837_v20, %v14837_v20 }
 0xa5a   :  { %7945 = vst.msk [vmem:[#allocation3 + $0x1f0] sm:$0xff] %vm3415_vm10, %v7816_v31  ;;  %v7818_v6 = vpop.permute.xlu1 %7817  ;;  %v14734_v46 = vpop.f32.mrb[35].mxu1  ;;  %v8812_v29 = vsel %vm96_vm0, %v8743_v47, 0.0 }
 0xa5b   :  { %7946 = vst.msk [vmem:[#allocation3 + $0x1f8] sm:$0xff] %vm3415_vm10, %v7818_v6  ;;  %v8806_v6 = vsel %vm96_vm0, %v8740_v23, 0.0  ;;  %v8613_v38 = vadd.f32 %v8612_v7, %v8611_v39  ;;  %v8746_v39 = vmul.f32 %v14831_v11, %v14831_v11  ;;  %v14853_v7 = vadd.f32 %v14554_v60, %v14742_v32 }
 0xa5d   :  { %v8615_v41 = vadd.f32 %v8614_v30, %v8613_v38  ;;  %v8622_v30 = vsel %vm96_vm0, %v14837_v20, 0.0  ;;  %v14859_v38 = vadd.f32 %v14742_v32, %v14574_v37  ;;  %v14871_v37 = vadd.f32 %v14571_v55, %v14742_v32 }
 0xa5f   :  { %v8749_v60 = vmul.f32 %v14859_v38, %v14859_v38 }
 0xa61   :  { %v8009_v3 = vld [vmem:[#allocation3 + $0x1f0] sm:$0xff] }
 0xa62   :  { %9759 = vmatprep.mubr.msk.f32.mxu1 %vm3556_vm11, %v8009_v3  ;;  %v8010_v14 = vld [vmem:[#allocation3 + $0x1f8] sm:$0xff]  ;;  %v8808_v3 = vsel %vm96_vm0, %v8741_v53, 0.0  ;;  %v8616_v53 = vsel %vm96_vm0, %v14813_v56, 0.0 }
 0xa63   :  { %9760 = vmatmul.mubr.msk.f32.gmra.mrb[62].mxu1 %vm3556_vm11, %v8010_v14  ;;  %v8807_v14 = vadd.f32 %v8806_v6, %v8805_v43  ;;  %v8618_v43 = vsel %vm96_vm0, %v14819_v42, 0.0  ;;  %v8617_v36 = vadd.f32 %v8616_v53, %v8615_v41  ;;  %v8816_v6 = vsel %vm96_vm0, %v8745_v40, 0.0 }
 0xa64   :  { %v8820_v41 = vsel %vm96_vm0, %v8747_v18, 0.0  ;;  %v8748_v40 = vmul.f32 %v14853_v7, %v14853_v7  ;;  %v8624_v53 = vsel %vm96_vm0, %v14853_v7, 0.0  ;;  %v8750_v18 = vmul.f32 %v14871_v37, %v14871_v37 }
 0xa65   :  { %v8809_v57 = vadd.f32 %v8808_v3, %v8807_v14  ;;  %v8619_v3 = vadd.f32 %v8618_v43, %v8617_v36  ;;  %v8626_v43 = vsel %vm96_vm0, %v14859_v38, 0.0  ;;  %v14877_v36 = vadd.f32 %v14742_v32, %v14592_v22 }
 0xa66   :  { %v14889_v22 = vadd.f32 %v14589_v19, %v14742_v32 }
 0xa67   :  { %v8811_v27 = vadd.f32 %v8810_v2, %v8809_v57  ;;  %v8621_v2 = vadd.f32 %v8620_v5, %v8619_v3  ;;  %v8824_v3 = vsel %vm96_vm0, %v8749_v60, 0.0  ;;  %v8751_v55 = vmul.f32 %v14877_v36, %v14877_v36 }
 0xa68   :  { %v8628_v5 = vsel %vm96_vm0, %v14871_v37, 0.0  ;;  %v8752_v19 = vmul.f32 %v14889_v22, %v14889_v22 }
 0xa69   :  { %v14744_v10 = vpop.f32.mrb[36].mxu1  ;;  %v8813_v23 = vadd.f32 %v8812_v29, %v8811_v27  ;;  %v8818_v29 = vsel %vm96_vm0, %v8746_v39, 0.0  ;;  %v8623_v27 = vadd.f32 %v8622_v30, %v8621_v2  ;;  %v8630_v30 = vsel %vm96_vm0, %v14877_v36, 0.0 }
 0xa6a   :  { %v14750_v4 = vpop.f32.mrb[37].mxu1  ;;  %v14895_v2 = vadd.f32 %v14742_v32, %v14610_v59  ;;  %v8632_v59 = vsel %vm96_vm0, %v14889_v22, 0.0 }
 0xa6b   :  { %v8815_v14 = vadd.f32 %v8814_v49, %v8813_v23  ;;  %v8625_v49 = vadd.f32 %v8624_v53, %v8623_v27  ;;  %v8828_v27 = vsel %vm96_vm0, %v8751_v55, 0.0 }
 0xa6c   :  { %v8753_v53 = vmul.f32 %v14895_v2, %v14895_v2 }
 0xa6d   :  { %v8817_v47 = vadd.f32 %v8816_v6, %v8815_v14  ;;  %v8822_v6 = vsel %vm96_vm0, %v8748_v40, 0.0  ;;  %v8627_v14 = vadd.f32 %v8626_v43, %v8625_v49  ;;  %v14911_v49 = vadd.f32 %v14607_v16, %v14742_v32 }
 0xa6f   :  { %v8819_v33 = vadd.f32 %v8818_v29, %v8817_v47  ;;  %v8629_v29 = vadd.f32 %v8628_v5, %v8627_v14  ;;  %v8754_v5 = vmul.f32 %v14911_v49, %v14911_v49 }
 0xa71   :  { %v8821_v23 = vadd.f32 %v8820_v41, %v8819_v33  ;;  %v8826_v41 = vsel %vm96_vm0, %v8750_v18, 0.0  ;;  %v8631_v40 = vadd.f32 %v8630_v30, %v8629_v29  ;;  %v8832_v18 = vsel %vm96_vm0, %v8753_v53, 0.0 }
 0xa72   :  { %v8636_v29 = vsel %vm96_vm0, %v14911_v49, 0.0 }
 0xa73   :  { %v8823_v39 = vadd.f32 %v8822_v6, %v8821_v23  ;;  %v8634_v6 = vsel %vm96_vm0, %v14895_v2, 0.0  ;;  %v8633_v14 = vadd.f32 %v8632_v59, %v8631_v40 }
 0xa75   :  { %v8825_v47 = vadd.f32 %v8824_v3, %v8823_v39  ;;  %v14917_v3 = vadd.f32 %v14742_v32, %v14627_v25  ;;  %v8830_v39 = vsel %vm96_vm0, %v8752_v19, 0.0  ;;  %v8635_v55 = vadd.f32 %v8634_v6, %v8633_v14 }
 0xa76   :  { %v14929_v25 = vadd.f32 %v14624_v50, %v14742_v32 }
 0xa77   :  { %v8827_v60 = vadd.f32 %v8826_v41, %v8825_v47  ;;  %v8755_v16 = vmul.f32 %v14917_v3, %v14917_v3  ;;  %v8638_v41 = vsel %vm96_vm0, %v14917_v3, 0.0  ;;  %v8637_v40 = vadd.f32 %v8636_v29, %v8635_v55 }
 0xa78   :  { %v8756_v59 = vmul.f32 %v14929_v25, %v14929_v25  ;;  %v8640_v14 = vsel %vm96_vm0, %v14929_v25, 0.0 }
 0xa79   :  { %v14799_v24 = vpop.f32.mrb[38].mxu1  ;;  %v8829_v43 = vadd.f32 %v8828_v27, %v8827_v60  ;;  %v14935_v27 = vadd.f32 %v14742_v32, %v14640_v61  ;;  %v8834_v60 = vsel %vm96_vm0, %v8754_v5, 0.0  ;;  %v8836_v19 = vsel %vm96_vm0, %v8755_v16, 0.0 }
 0xa7a   :  { %v14801_v31 = vpop.f32.mrb[39].mxu1  ;;  %v8639_v53 = vadd.f32 %v8638_v41, %v8637_v40  ;;  %v14947_v61 = vadd.f32 %v14637_v44, %v14742_v32  ;;  %v8838_v16 = vsel %vm96_vm0, %v8756_v59, 0.0 }
 0xa7b   :  { %v8831_v47 = vadd.f32 %v8830_v39, %v8829_v43  ;;  %v8757_v50 = vmul.f32 %v14935_v27, %v14935_v27  ;;  %v8642_v39 = vsel %vm96_vm0, %v14935_v27, 0.0 }
 0xa7c   :  { %v8758_v44 = vmul.f32 %v14947_v61, %v14947_v61 }
 0xa7d   :  { %v8833_v30 = vadd.f32 %v8832_v18, %v8831_v47  ;;  %v14953_v18 = vadd.f32 %v14742_v32, %v14652_v35  ;;  %v8641_v47 = vadd.f32 %v8640_v14, %v8639_v53  ;;  %v8644_v35 = vsel %vm96_vm0, %v14947_v61, 0.0 }
 0xa7f   :  { %v8835_v43 = vadd.f32 %v8834_v60, %v8833_v30  ;;  %v8840_v30 = vsel %vm96_vm0, %v8757_v50, 0.0  ;;  %v8643_v29 = vadd.f32 %v8642_v39, %v8641_v47  ;;  %v8759_v40 = vmul.f32 %v14953_v18, %v14953_v18 }
 0xa80   :  { %v8646_v53 = vsel %vm96_vm0, %v14953_v18, 0.0  ;;  %v8842_v50 = vsel %vm96_vm0, %v8758_v44, 0.0 }
 0xa81   :  { %v8837_v6 = vadd.f32 %v8836_v19, %v8835_v43  ;;  %v14969_v19 = vadd.f32 %v14649_v0, %v14742_v32  ;;  %v14975_v43 = vadd.f32 %v14742_v32, %v14664_v48  ;;  %v8645_v59 = vadd.f32 %v8644_v35, %v8643_v29 }
 0xa82   :  { %v14987_v48 = vadd.f32 %v14661_v58, %v14742_v32 }
 0xa83   :  { %v8839_v41 = vadd.f32 %v8838_v16, %v8837_v6  ;;  %v8844_v6 = vsel %vm96_vm0, %v8759_v40, 0.0  ;;  %v8647_v14 = vadd.f32 %v8646_v53, %v8645_v59  ;;  %v8760_v47 = vmul.f32 %v14969_v19, %v14969_v19 }
 0xa84   :  { %v8761_v0 = vmul.f32 %v14975_v43, %v14975_v43  ;;  %v8650_v29 = vsel %vm96_vm0, %v14975_v43, 0.0  ;;  %v8762_v59 = vmul.f32 %v14987_v48, %v14987_v48 }
 0xa85   :  { %v8841_v60 = vadd.f32 %v8840_v30, %v8839_v41  ;;  %v8648_v30 = vsel %vm96_vm0, %v14969_v19, 0.0  ;;  %v14993_v41 = vadd.f32 %v14742_v32, %v14678_v13  ;;  %v8846_v40 = vsel %vm96_vm0, %v8760_v47, 0.0 }
 0xa86   :  { %v8649_v44 = vadd.f32 %v8648_v30, %v8647_v14  ;;  %v8652_v13 = vsel %vm96_vm0, %v14987_v48, 0.0  ;;  %v15009_v14 = vadd.f32 %v14675_v17, %v14742_v32  ;;  %v8850_v30 = vsel %vm96_vm0, %v8762_v59, 0.0 }
 0xa87   :  { %v8843_v39 = vadd.f32 %v8842_v50, %v8841_v60  ;;  %16736 = vst [vmem:[#allocation89_spill] sm:$0xff] %v14993_v41  ;;  %v8848_v60 = vsel %vm96_vm0, %v8761_v0, 0.0  ;;  %v8763_v58 = vmul.f32 %v14993_v41, %v14993_v41  ;;  %v8654_v47 = vsel %vm96_vm0, %v14993_v41, 0.0 }
 0xa88   :  { %v8651_v35 = vadd.f32 %v8650_v29, %v8649_v44  ;;  %v15015_v0 = vadd.f32 %v14742_v32, %v14692_v62  ;;  %v8656_v41 = vsel %vm96_vm0, %v15009_v14, 0.0  ;;  %v15027_v62 = vadd.f32 %v14689_v45, %v14742_v32 }
 0xa89   :  { %v14845_v51 = vpop.f32.mrb[40].mxu1  ;;  %v8845_v16 = vadd.f32 %v8844_v6, %v8843_v39  ;;  %v8852_v29 = vsel %vm96_vm0, %v8763_v58, 0.0  ;;  %v15033_v59 = vadd.f32 %v14742_v32, %v14706_v54  ;;  %v15045_v54 = vadd.f32 %v14703_v8, %v14742_v32 }
 0xa8a   :  { %v14847_v57 = vpop.f32.mrb[41].mxu1  ;;  %v8765_v17 = vmul.f32 %v15015_v0, %v15015_v0 }
 0xa8b   :  { %v8847_v53 = vadd.f32 %v8846_v40, %v8845_v16  ;;  %v8653_v16 = vadd.f32 %v8652_v13, %v8651_v35  ;;  %v8658_v35 = vsel %vm96_vm0, %v15015_v0, 0.0  ;;  %16737 = vst [vmem:[#allocation91_spill] sm:$0xff] %v15033_v59  ;;  %v8767_v45 = vmul.f32 %v15033_v59, %v15033_v59 }
 0xa8c   :  { %v8856_v13 = vsel %vm96_vm0, %v8765_v17, 0.0  ;;  %v8768_v8 = vmul.f32 %v15045_v54, %v15045_v54 }
 0xa8d   :  { %v8849_v6 = vadd.f32 %v8848_v60, %v8847_v53  ;;  %v8655_v44 = vadd.f32 %v8654_v47, %v8653_v16  ;;  %v8764_v60 = vmul.f32 %v15009_v14, %v15009_v14 }
 0xa8f   :  { %v8851_v40 = vadd.f32 %v8850_v30, %v8849_v6  ;;  %v8657_v58 = vadd.f32 %v8656_v41, %v8655_v44  ;;  %v8854_v6 = vsel %vm96_vm0, %v8764_v60, 0.0  ;;  %v8766_v30 = vmul.f32 %v15027_v62, %v15027_v62 }
 0xa90   :  { %v8662_v41 = vsel %vm96_vm0, %v15033_v59, 0.0  ;;  %v15051_v44 = vadd.f32 %v14742_v32, %v14720_v15  ;;  %v8664_v15 = vsel %vm96_vm0, %v15045_v54, 0.0 }
 0xa91   :  { %v8853_v53 = vadd.f32 %v8852_v29, %v8851_v40  ;;  %v8659_v47 = vadd.f32 %v8658_v35, %v8657_v58  ;;  %v8660_v40 = vsel %vm96_vm0, %v15027_v62, 0.0  ;;  %v8858_v17 = vsel %vm96_vm0, %v8766_v30, 0.0 }
 0xa92   :  { %16738 = vst [vmem:[#allocation64_spill] sm:$0xff] %v15051_v44  ;;  %v8666_v30 = vsel %vm96_vm0, %v15051_v44, 0.0 }
 0xa93   :  { %v8855_v16 = vadd.f32 %v8854_v6, %v8853_v53  ;;  %v8661_v60 = vadd.f32 %v8660_v40, %v8659_v47  ;;  %v8860_v53 = vsel %vm96_vm0, %v8767_v45, 0.0  ;;  %v15067_v47 = vadd.f32 %v14717_v12, %v14742_v32 }
 0xa94   :  { %v15073_v45 = vadd.f32 %v14742_v32, %v14734_v46  ;;  %v8862_v40 = vsel %vm96_vm0, %v8768_v8, 0.0  ;;  %v15085_v46 = vadd.f32 %v14731_v9, %v14742_v32 }
 0xa95   :  { %v8857_v29 = vadd.f32 %v8856_v13, %v8855_v16  ;;  %v8663_v58 = vadd.f32 %v8662_v41, %v8661_v60  ;;  %v8769_v16 = vmul.f32 %v15051_v44, %v15051_v44  ;;  %v8668_v44 = vsel %vm96_vm0, %v15067_v47, 0.0 }
 0xa96   :  { %v8771_v12 = vmul.f32 %v15073_v45, %v15073_v45 }
 0xa97   :  { %v8859_v6 = vadd.f32 %v8858_v17, %v8857_v29  ;;  %v8665_v29 = vadd.f32 %v8664_v15, %v8663_v58  ;;  %v8864_v41 = vsel %vm96_vm0, %v8769_v16, 0.0  ;;  %v8670_v58 = vsel %vm96_vm0, %v15073_v45, 0.0 }
 0xa98   :  { %v8868_v15 = vsel %vm96_vm0, %v8771_v12, 0.0 }
 0xa99   :  { %v14899_v33 = vpop.f32.mrb[42].mxu1  ;;  %v8861_v59 = vadd.f32 %v8860_v53, %v8859_v6  ;;  %v8667_v60 = vadd.f32 %v8666_v30, %v8665_v29  ;;  %v8770_v53 = vmul.f32 %v15067_v47, %v15067_v47 }
 0xa9a   :  { %v14901_v23 = vpop.f32.mrb[43].mxu1 }
 0xa9b   :  { %v8863_v17 = vadd.f32 %v8862_v40, %v8861_v59  ;;  %v15091_v59 = vadd.f32 %v14742_v32, %v14750_v4  ;;  %v8669_v8 = vadd.f32 %v8668_v44, %v8667_v60  ;;  %v8866_v16 = vsel %vm96_vm0, %v8770_v53, 0.0 }
 0xa9c   :  { %v8772_v40 = vmul.f32 %v15085_v46, %v15085_v46  ;;  %v15103_v4 = vadd.f32 %v14744_v10, %v14742_v32  ;;  %v15109_v60 = vadd.f32 %v14742_v32, %v14801_v31 }
 0xa9d   :  { %v8865_v6 = vadd.f32 %v8864_v41, %v8863_v17  ;;  %16739 = vst [vmem:[#allocation66_spill] sm:$0xff] %v15091_v59  ;;  %v8671_v30 = vadd.f32 %v8670_v58, %v8669_v8  ;;  %v8773_v9 = vmul.f32 %v15091_v59, %v15091_v59  ;;  %v8672_v17 = vsel %vm96_vm0, %v15085_v46, 0.0 }
 0xa9e   :  { %v8674_v44 = vsel %vm96_vm0, %v15091_v59, 0.0  ;;  %16740 = vst [vmem:[#allocation65_spill] sm:$0xff] %v15109_v60  ;;  %v8870_v58 = vsel %vm96_vm0, %v8772_v40, 0.0  ;;  %v8774_v10 = vmul.f32 %v15103_v4, %v15103_v4  ;;  %v8676_v31 = vsel %vm96_vm0, %v15103_v4, 0.0 }
 0xa9f   :  { %v8867_v29 = vadd.f32 %v8866_v16, %v8865_v6  ;;  %v8673_v12 = vadd.f32 %v8672_v17, %v8671_v30  ;;  %v8872_v8 = vsel %vm96_vm0, %v8773_v9, 0.0  ;;  %v15125_v30 = vadd.f32 %v14799_v24, %v14742_v32 }
 0xaa0   :  { %v8678_v40 = vsel %vm96_vm0, %v15109_v60, 0.0  ;;  %v15131_v9 = vadd.f32 %v14742_v32, %v14847_v57  ;;  %v8874_v17 = vsel %vm96_vm0, %v8774_v10, 0.0  ;;  %v15143_v57 = vadd.f32 %v14845_v51, %v14742_v32 }
 0xaa1   :  { %v8869_v41 = vadd.f32 %v8868_v15, %v8867_v29  ;;  %v8675_v16 = vadd.f32 %v8674_v44, %v8673_v12  ;;  %v8775_v29 = vmul.f32 %v15109_v60, %v15109_v60  ;;  %v8680_v60 = vsel %vm96_vm0, %v15125_v30, 0.0 }
 0xaa2   :  { %16741 = vst [vmem:[#allocation68_spill] sm:$0xff] %v15131_v9  ;;  %v8777_v24 = vmul.f32 %v15131_v9, %v15131_v9 }
 0xaa3   :  { %v8871_v15 = vadd.f32 %v8870_v58, %v8869_v41  ;;  %v8677_v41 = vadd.f32 %v8676_v31, %v8675_v16  ;;  %v8876_v44 = vsel %vm96_vm0, %v8775_v29, 0.0  ;;  %v8682_v16 = vsel %vm96_vm0, %v15131_v9, 0.0 }
 0xaa4   :  { %v8880_v31 = vsel %vm96_vm0, %v8777_v24, 0.0 }
 0xaa5   :  { %v8873_v59 = vadd.f32 %v8872_v8, %v8871_v15  ;;  %v8679_v12 = vadd.f32 %v8678_v40, %v8677_v41  ;;  %v8776_v8 = vmul.f32 %v15125_v30, %v15125_v30 }
 0xaa7   :  { %v8875_v58 = vadd.f32 %v8874_v17, %v8873_v59  ;;  %v15149_v59 = vadd.f32 %v14742_v32, %v14901_v23  ;;  %v8681_v10 = vadd.f32 %v8680_v60, %v8679_v12  ;;  %v8878_v29 = vsel %vm96_vm0, %v8776_v8, 0.0 }
 0xaa8   :  { %v8778_v17 = vmul.f32 %v15143_v57, %v15143_v57  ;;  %v8684_v23 = vsel %vm96_vm0, %v15143_v57, 0.0  ;;  %v15163_v60 = vadd.f32 %v14899_v33, %v14742_v32 }
 0xaa9   :  { %v14955_v55 = vpop.f32.mrb[44].mxu1  ;;  %v8877_v15 = vadd.f32 %v8876_v44, %v8875_v58  ;;  %16742 = vst [vmem:[#allocation67_spill] sm:$0xff] %v15149_v59  ;;  %v8683_v40 = vadd.f32 %v8682_v16, %v8681_v10  ;;  %v8779_v51 = vmul.f32 %v15149_v59, %v15149_v59  ;;  %v8686_v12 = vsel %vm96_vm0, %v15149_v59, 0.0 }
 0xaaa   :  { %v14957_v5 = vpop.f32.mrb[45].mxu1  ;;  %v8688_v59 = vsel %vm96_vm0, %v15163_v60, 0.0 }
 0xaab   :  { %v8879_v41 = vadd.f32 %v8878_v29, %v8877_v15  ;;  %v15169_v8 = vadd.f32 %v14742_v32, %v14957_v5  ;;  %v8685_v24 = vadd.f32 %v8684_v23, %v8683_v40  ;;  %v8882_v15 = vsel %vm96_vm0, %v8778_v17, 0.0 }
 0xaac   :  { %v8884_v16 = vsel %vm96_vm0, %v8779_v51, 0.0  ;;  %v15181_v5 = vadd.f32 %v14955_v55, %v14742_v32 }
 0xaad   :  { %v8881_v58 = vadd.f32 %v8880_v31, %v8879_v41  ;;  %v8687_v10 = vadd.f32 %v8686_v12, %v8685_v24  ;;  %v8780_v31 = vmul.f32 %v15163_v60, %v15163_v60  ;;  %v8781_v33 = vmul.f32 %v15169_v8, %v15169_v8 }
 0xaae   :  { %v8690_v40 = vsel %vm96_vm0, %v15169_v8, 0.0 }
 0xaaf   :  { %v8883_v29 = vadd.f32 %v8882_v15, %v8881_v58  ;;  %v8689_v51 = vadd.f32 %v8688_v59, %v8687_v10  ;;  %v8886_v58 = vsel %vm96_vm0, %v8780_v31, 0.0  ;;  %v8888_v23 = vsel %vm96_vm0, %v8781_v33, 0.0 }
 0xab0   :  { %v8782_v15 = vmul.f32 %v15181_v5, %v15181_v5 }
 0xab1   :  { %v8885_v41 = vadd.f32 %v8884_v16, %v8883_v29  ;;  %v8691_v12 = vadd.f32 %v8690_v40, %v8689_v51  ;;  %v8692_v29 = vsel %vm96_vm0, %v15181_v5, 0.0 }
 0xab2   :  { %v8890_v33 = vsel %vm96_vm0, %v8782_v15, 0.0 }
 0xab3   :  { %v8887_v24 = vadd.f32 %v8886_v58, %v8885_v41  ;;  %v8693_v31 = vadd.f32 %v8692_v29, %v8691_v12 }
 0xab5   :  { %v8889_v16 = vadd.f32 %v8888_v23, %v8887_v24 }
 0xab7   :  { %v8891_v58 = vadd.f32 %v8890_v33, %v8889_v16 }
 0xab9   :  { %v15001_v50 = vpop.f32.mrb[46].mxu1 }
 0xaba   :  { %v15003_v39 = vpop.f32.mrb[47].mxu1 }
 0xabb   :  { %v15187_v17 = vadd.f32 %v14742_v32, %v15003_v39  ;;  %v15199_v39 = vadd.f32 %v15001_v50, %v14742_v32 }
 0xabd   :  { %16743 = vst [vmem:[#allocation74_spill] sm:$0xff] %v15187_v17  ;;  %v8783_v55 = vmul.f32 %v15187_v17, %v15187_v17  ;;  %v8694_v59 = vsel %vm96_vm0, %v15187_v17, 0.0  ;;  %v8784_v50 = vmul.f32 %v15199_v39, %v15199_v39 }
 0xabe   :  { %v8695_v51 = vadd.f32 %v8694_v59, %v8693_v31 }
 0xabf   :  { %v8892_v41 = vsel %vm96_vm0, %v8783_v55, 0.0  ;;  %v8894_v29 = vsel %vm96_vm0, %v8784_v50, 0.0 }
 0xac0   :  { %v8893_v17 = vadd.f32 %v8892_v41, %v8891_v58 }
 0xac2   :  { %v8895_v33 = vadd.f32 %v8894_v29, %v8893_v17 }
 0xac9   :  { %v15055_v35 = vpop.f32.mrb[48].mxu1 }
 0xaca   :  { %v15057_v13 = vpop.f32.mrb[49].mxu1  ;;  %v15217_v12 = vadd.f32 %v15055_v35, %v14742_v32 }
 0xacb   :  { %v15205_v10 = vadd.f32 %v14742_v32, %v15057_v13  ;;  %v8696_v13 = vsel %vm96_vm0, %v15199_v39, 0.0 }
 0xacc   :  { %16745 = vst [vmem:[#allocation76_spill] sm:$0xff] %v15217_v12  ;;  %v8697_v16 = vadd.f32 %v8696_v13, %v8695_v51  ;;  %v8786_v41 = vmul.f32 %v15217_v12, %v15217_v12 }
 0xacd   :  { %16744 = vst [vmem:[#allocation69_spill] sm:$0xff] %v15205_v10  ;;  %v8785_v24 = vmul.f32 %v15205_v10, %v15205_v10  ;;  %v8698_v15 = vsel %vm96_vm0, %v15205_v10, 0.0  ;;  %v8700_v10 = vsel %vm96_vm0, %v15217_v12, 0.0 }
 0xace   :  { %v8699_v31 = vadd.f32 %v8698_v15, %v8697_v16 }
 0xacf   :  { %v8896_v59 = vsel %vm96_vm0, %v8785_v24, 0.0  ;;  %v8898_v24 = vsel %vm96_vm0, %v8786_v41, 0.0 }
 0xad0   :  { %v8897_v58 = vadd.f32 %v8896_v59, %v8895_v33  ;;  %v8701_v17 = vadd.f32 %v8700_v10, %v8699_v31 }
 0xad2   :  { %v8899_v16 = vadd.f32 %v8898_v24, %v8897_v58 }
 0xad9   :  { %v15111_v53 = vpop.f32.mrb[50].mxu1 }
 0xada   :  { %v15113_v6 = vpop.f32.mrb[51].mxu1 }
 0xadb   :  { %v15223_v55 = vadd.f32 %v14742_v32, %v15113_v6  ;;  %v15235_v6 = vadd.f32 %v15111_v53, %v14742_v32 }
 0xadd   :  { %16746 = vst [vmem:[#allocation75_spill] sm:$0xff] %v15223_v55  ;;  %v8787_v35 = vmul.f32 %v15223_v55, %v15223_v55  ;;  %16747 = vst [vmem:[#allocation78_spill] sm:$0xff] %v15235_v6  ;;  %v8702_v51 = vsel %vm96_vm0, %v15223_v55, 0.0  ;;  %v8788_v29 = vmul.f32 %v15235_v6, %v15235_v6  ;;  %v8704_v33 = vsel %vm96_vm0, %v15235_v6, 0.0 }
 0xade   :  { %v8703_v15 = vadd.f32 %v8702_v51, %v8701_v17 }
 0xadf   :  { %v8900_v13 = vsel %vm96_vm0, %v8787_v35, 0.0  ;;  %v8902_v51 = vsel %vm96_vm0, %v8788_v29, 0.0 }
 0xae0   :  { %v8901_v59 = vadd.f32 %v8900_v13, %v8899_v16  ;;  %v8705_v35 = vadd.f32 %v8704_v33, %v8703_v15 }
 0xae2   :  { %v8903_v13 = vadd.f32 %v8902_v51, %v8901_v59 }
 0xae9   :  { %v15157_v44 = vpop.f32.mrb[52].mxu1 }
 0xaea   :  { %v8544_v9 = vpop.f32.mrb[53].mxu1 }
 0xaeb   :  { %v15240_v50 = vadd.f32 %v14742_v32, %v8544_v9  ;;  %v15252_v9 = vadd.f32 %v15157_v44, %v14742_v32 }
 0xaed   :  { %16748 = vst [vmem:[#allocation77_spill] sm:$0xff] %v15240_v50  ;;  %v8789_v53 = vmul.f32 %v15240_v50, %v15240_v50  ;;  %16749 = vst [vmem:[#allocation80_spill] sm:$0xff] %v15252_v9  ;;  %v8706_v10 = vsel %vm96_vm0, %v15240_v50, 0.0  ;;  %v8790_v16 = vmul.f32 %v15252_v9, %v15252_v9 }
 0xaee   :  { %v8707_v24 = vadd.f32 %v8706_v10, %v8705_v35 }
 0xaef   :  { %v8904_v17 = vsel %vm96_vm0, %v8789_v53, 0.0  ;;  %v8906_v59 = vsel %vm96_vm0, %v8790_v16, 0.0 }
 0xaf0   :  { %v8905_v6 = vadd.f32 %v8904_v17, %v8903_v13 }
 0xaf2   :  { %v8907_v35 = vadd.f32 %v8906_v59, %v8905_v6 }
 0xaf9   :  { %v9749_v40 = vpop.f32.mrb[54].mxu1 }
 0xafa   :  { %v8554_v23 = vpop.f32.mrb[55].mxu1  ;;  %v15268_v50 = vadd.f32 %v9749_v40, %v14742_v32 }
 0xafb   :  { %v15257_v31 = vadd.f32 %v14742_v32, %v8554_v23  ;;  %v8708_v23 = vsel %vm96_vm0, %v15252_v9, 0.0 }
 0xafc   :  { %16751 = vst [vmem:[#allocation82_spill] sm:$0xff] %v15268_v50  ;;  %v8709_v53 = vadd.f32 %v8708_v23, %v8707_v24  ;;  %v8792_v51 = vmul.f32 %v15268_v50, %v15268_v50  ;;  %v8712_v13 = vsel %vm96_vm0, %v15268_v50, 0.0 }
 0xafd   :  { %16750 = vst [vmem:[#allocation79_spill] sm:$0xff] %v15257_v31  ;;  %v8791_v44 = vmul.f32 %v15257_v31, %v15257_v31  ;;  %v8710_v15 = vsel %vm96_vm0, %v15257_v31, 0.0 }
 0xafe   :  { %v8711_v10 = vadd.f32 %v8710_v15, %v8709_v53 }
 0xaff   :  { %v8908_v33 = vsel %vm96_vm0, %v8791_v44, 0.0  ;;  %v8910_v44 = vsel %vm96_vm0, %v8792_v51, 0.0 }
 0xb00   :  { %v8909_v17 = vadd.f32 %v8908_v33, %v8907_v35  ;;  %v8713_v16 = vadd.f32 %v8712_v13, %v8711_v10 }
 0xb02   :  { %v8911_v15 = vadd.f32 %v8910_v44, %v8909_v17 }
 0xb09   :  { %v9752_v41 = vpop.f32.mrb[56].mxu1 }
 0xb0a   :  { %v8564_v58 = vpop.f32.mrb[57].mxu1 }
 0xb0b   :  { %v15273_v29 = vadd.f32 %v14742_v32, %v8564_v58  ;;  %v15284_v58 = vadd.f32 %v9752_v41, %v14742_v32 }
 0xb0d   :  { %16752 = vst [vmem:[#allocation81_spill] sm:$0xff] %v15273_v29  ;;  %v8793_v40 = vmul.f32 %v15273_v29, %v15273_v29  ;;  %16753 = vst [vmem:[#allocation84_spill] sm:$0xff] %v15284_v58  ;;  %v8714_v24 = vsel %vm96_vm0, %v15273_v29, 0.0  ;;  %v8794_v53 = vmul.f32 %v15284_v58, %v15284_v58  ;;  %v8716_v50 = vsel %vm96_vm0, %v15284_v58, 0.0 }
 0xb0e   :  { %v8715_v23 = vadd.f32 %v8714_v24, %v8713_v16 }
 0xb0f   :  { %v8912_v6 = vsel %vm96_vm0, %v8793_v40, 0.0  ;;  %v8914_v40 = vsel %vm96_vm0, %v8794_v53, 0.0 }
 0xb10   :  { %v8913_v33 = vadd.f32 %v8912_v6, %v8911_v15  ;;  %v8717_v51 = vadd.f32 %v8716_v50, %v8715_v23 }
 0xb12   :  { %v8915_v44 = vadd.f32 %v8914_v40, %v8913_v33 }
 0xb19   :  { %v9755_v59 = vpop.f32.mrb[58].mxu1 }
 0xb1a   :  { %v15293_v35 = vadd.f32 %v9755_v59, %v14742_v32  ;;  %v8574_v41 = vpop.f32.mrb[59].mxu1 }
 0xb1b   :  { %v15298_v10 = vadd.f32 %v14742_v32, %v8574_v41 }
 0xb1c   :  { %16754 = vst [vmem:[#allocation86_spill] sm:$0xff] %v15293_v35  ;;  %v8796_v17 = vmul.f32 %v15293_v35, %v15293_v35  ;;  %v8720_v6 = vsel %vm96_vm0, %v15293_v35, 0.0 }
 0xb1d   :  { %16755 = vst [vmem:[#allocation83_spill] sm:$0xff] %v15298_v10  ;;  %v8718_v13 = vsel %vm96_vm0, %v15298_v10, 0.0  ;;  %v8795_v24 = vmul.f32 %v15298_v10, %v15298_v10 }
 0xb1e   :  { %v8719_v16 = vadd.f32 %v8718_v13, %v8717_v51  ;;  %v8918_v23 = vsel %vm96_vm0, %v8796_v17, 0.0 }
 0xb1f   :  { %v8916_v15 = vsel %vm96_vm0, %v8795_v24, 0.0 }
 0xb20   :  { %v8917_v59 = vadd.f32 %v8916_v15, %v8915_v44  ;;  %v8721_v50 = vadd.f32 %v8720_v6, %v8719_v16 }
 0xb22   :  { %v8919_v53 = vadd.f32 %v8918_v23, %v8917_v59 }
 0xb29   :  { %v9758_v41 = vpop.f32.mrb[60].mxu1 }
 0xb2a   :  { %v15312_v58 = vadd.f32 %v9758_v41, %v14742_v32  ;;  %v8584_v29 = vpop.f32.mrb[61].mxu1 }
 0xb2b   :  { %v15315_v31 = vadd.f32 %v14742_v32, %v8584_v29 }
 0xb2c   :  { %16756 = vst [vmem:[#allocation88_spill] sm:$0xff] %v15312_v58  ;;  %v8798_v33 = vmul.f32 %v15312_v58, %v15312_v58  ;;  %v8724_v17 = vsel %vm96_vm0, %v15312_v58, 0.0 }
 0xb2d   :  { %16757 = vst [vmem:[#allocation85_spill] sm:$0xff] %v15315_v31  ;;  %v8722_v51 = vsel %vm96_vm0, %v15315_v31, 0.0  ;;  %v8797_v40 = vmul.f32 %v15315_v31, %v15315_v31 }
 0xb2e   :  { %v8723_v13 = vadd.f32 %v8722_v51, %v8721_v50  ;;  %v8922_v29 = vsel %vm96_vm0, %v8798_v33, 0.0 }
 0xb2f   :  { %v8920_v24 = vsel %vm96_vm0, %v8797_v40, 0.0 }
 0xb30   :  { %v8921_v16 = vadd.f32 %v8920_v24, %v8919_v53  ;;  %v8725_v44 = vadd.f32 %v8724_v17, %v8723_v13 }
 0xb32   :  { %v8923_v6 = vadd.f32 %v8922_v29, %v8921_v16 }
 0xb36   :  { %v9761_v15 = vpop.f32.mrb[62].mxu1 }
 0xb37   :  { %v15328_v59 = vadd.f32 %v9761_v15, %v14742_v32  ;;  %v8594_v23 = vpop.f32.mrb[63].mxu1 }
 0xb38   :  { %v15331_v41 = vadd.f32 %v14742_v32, %v8594_v23 }
 0xb39   :  { %16758 = vst [vmem:[#allocation90_spill] sm:$0xff] %v15328_v59  ;;  %v8800_v50 = vmul.f32 %v15328_v59, %v15328_v59  ;;  %v8728_v33 = vsel %vm96_vm0, %v15328_v59, 0.0 }
 0xb3a   :  { %16759 = vst [vmem:[#allocation87_spill] sm:$0xff] %v15331_v41  ;;  %v8726_v51 = vsel %vm96_vm0, %v15331_v41, 0.0  ;;  %v8799_v53 = vmul.f32 %v15331_v41, %v15331_v41 }
 0xb3b   :  { %v8727_v40 = vadd.f32 %v8726_v51, %v8725_v44  ;;  %v8926_v32 = vsel %vm96_vm0, %v8800_v50, 0.0  ;;  %v8937_v50 = vld [vmem:[%s16438_s7] sm:$0x1] }
 0xb3c   :  { %v8924_v13 = vsel %vm96_vm0, %v8799_v53, 0.0 }
 0xb3d   :  { %v8729_v17 = vadd.f32 %v8728_v33, %v8727_v40  ;;  %v8925_v24 = vadd.f32 %v8924_v13, %v8923_v6 }
 0xb3f   :  { %v8730_v16 = vrot.slane %v8729_v17, 4  ;;  %v8927_v29 = vadd.f32 %v8926_v32, %v8925_v24  ;;  %v16761_v24 = vld [vmem:[#allocation89_spill] sm:$0xff]  ;;  %v16762_v32 = vld [vmem:[#allocation91_spill] sm:$0xff] }
 0xb41   :  { %v8731_v15 = vadd.f32 %v8730_v16, %v8729_v17  ;;  %v8928_v23 = vrot.slane %v8927_v29, 4 }
 0xb43   :  { %v8732_v9 = vrot.slane %v8731_v15, 2  ;;  %v8929_v58 = vadd.f32 %v8928_v23, %v8927_v29  ;;  %v16763_v29 = vld [vmem:[#allocation64_spill] sm:$0xff]  ;;  %v16764_v23 = vld [vmem:[#allocation66_spill] sm:$0xff] }
 0xb45   :  { %v8733_v31 = vadd.f32 %v8732_v9, %v8731_v15  ;;  %v8930_v35 = vrot.slane %v8929_v58, 2  ;;  %v15349_v9 = vld [vmem:[%s16439_s8] sm:$0x1] }
 0xb47   :  { %v8734_v10 = vrot.slane %v8733_v31, 1  ;;  %v8931_v41 = vadd.f32 %v8930_v35, %v8929_v58  ;;  %v16760_v58 = vld [vmem:[#allocation92_spill] sm:$0xff] }
 0xb49   :  { %v8735_v44 = vadd.f32 %v8734_v10, %v8733_v31  ;;  %v8932_v51 = vrot.slane %v8931_v41, 1 }
 0xb4b   :  { %v8736_v55 = vmul.f32 0.001953125, %v8735_v44  ;;  %v8933_v59 = vadd.f32 %v8932_v51, %v8931_v41  ;;  %v16765_v51 = vld [vmem:[#allocation65_spill] sm:$0xff] }
 0xb4d   :  { %v8934_v12 = vmul.f32 0.001953125, %v8933_v59  ;;  %v8935_v53 = vmul.f32 %v8736_v55, %v8736_v55 }
 0xb4f   :  { %v8936_v40 = vsub.f32 %v8934_v12, %v8935_v53  ;;  %v16766_v53 = vld [vmem:[#allocation68_spill] sm:$0xff] }
 0xb51   :  { %v8938_v6 = vadd.f32 1e-05, %v8936_v40 }
 0xb53   :  { %9789 = vrsqrt.f32 %v8938_v6  ;;  %v16767_v6 = vld [vmem:[#allocation67_spill] sm:$0xff] }
 0xb5d   :  { %v9790_v33 = vpop.eup %9789 }
 0xb5e   :  { %v8940_v13 = vmul.f32 %v9790_v33, %v8937_v50 }
 0xb60   :  { %v15351_v31 = vmul.f32 %v8940_v13, %v8736_v55  ;;  %v15354_v35 = vrot.slane %v8940_v13, %v16760_v58  ;;  %v16768_v13 = vld [vmem:[#allocation74_spill] sm:$0xff] }
 0xb62   :  { %v8943_v12 = vsub.f32 %v15349_v9, %v15351_v31  ;;  %v15360_v10 = vmul.f32 %v15354_v35, %v14754_v63  ;;  %v15364_v59 = vmul.f32 %v15354_v35, %v14748_v28  ;;  %v15368_v41 = vmul.f32 %v15354_v35, %v14758_v21  ;;  %v16770_v31 = vld [vmem:[#allocation69_spill] sm:$0xff] }
 0xb63   :  { %v15372_v55 = vmul.f32 %v15354_v35, %v14774_v1  ;;  %v15376_v17 = vmul.f32 %v15354_v35, %v14780_v34  ;;  %v15380_v63 = vmul.f32 %v15354_v35, %v14791_v26  ;;  %v15384_v28 = vmul.f32 %v15354_v35, %v14797_v52 }
 0xb64   :  { %v15388_v21 = vmul.f32 %v15354_v35, %v14813_v56  ;;  %v15392_v1 = vmul.f32 %v15354_v35, %v14819_v42  ;;  %v15396_v34 = vmul.f32 %v15354_v35, %v14831_v11  ;;  %v15400_v26 = vmul.f32 %v15354_v35, %v14837_v20 }
 0xb65   :  { %v15404_v52 = vmul.f32 %v15354_v35, %v14853_v7  ;;  %v15408_v56 = vmul.f32 %v15354_v35, %v14859_v38  ;;  %v15412_v42 = vmul.f32 %v15354_v35, %v14871_v37  ;;  %v15416_v11 = vmul.f32 %v15354_v35, %v14877_v36 }
 0xb66   :  { %v15420_v20 = vmul.f32 %v15354_v35, %v14889_v22  ;;  %v15424_v7 = vmul.f32 %v15354_v35, %v14895_v2  ;;  %v15428_v38 = vmul.f32 %v15354_v35, %v14911_v49  ;;  %v15432_v37 = vmul.f32 %v15354_v35, %v14917_v3 }
 0xb67   :  { %v15436_v36 = vmul.f32 %v15354_v35, %v14929_v25  ;;  %v15440_v22 = vmul.f32 %v15354_v35, %v14935_v27  ;;  %v15444_v2 = vmul.f32 %v15354_v35, %v14947_v61  ;;  %v15448_v49 = vmul.f32 %v15354_v35, %v14953_v18 }
 0xb68   :  { %v15452_v3 = vmul.f32 %v15354_v35, %v14969_v19  ;;  %v15456_v25 = vmul.f32 %v15354_v35, %v14975_v43  ;;  %v15460_v27 = vmul.f32 %v15354_v35, %v14987_v48  ;;  %v15464_v61 = vmul.f32 %v15354_v35, %v16761_v24  ;;  %v16772_v24 = vld [vmem:[#allocation76_spill] sm:$0xff] }
 0xb69   :  { %v15468_v18 = vmul.f32 %v15354_v35, %v15009_v14  ;;  %v15472_v19 = vmul.f32 %v15354_v35, %v15015_v0  ;;  %v15476_v43 = vmul.f32 %v15354_v35, %v15027_v62  ;;  %v15480_v48 = vmul.f32 %v15354_v35, %v16762_v32  ;;  %v16774_v32 = vld [vmem:[#allocation75_spill] sm:$0xff] }
 0xb6a   :  { %v15484_v16 = vmul.f32 %v15354_v35, %v15045_v54  ;;  %v15488_v14 = vmul.f32 %v15354_v35, %v16763_v29  ;;  %v15492_v0 = vmul.f32 %v15354_v35, %v15067_v47  ;;  %v15496_v62 = vmul.f32 %v15354_v35, %v15073_v45  ;;  %v16776_v29 = vld [vmem:[#allocation78_spill] sm:$0xff] }
 0xb6b   :  { %v15500_v15 = vmul.f32 %v15354_v35, %v15085_v46  ;;  %v15504_v54 = vmul.f32 %v15354_v35, %v16764_v23  ;;  %v15508_v44 = vmul.f32 %v15354_v35, %v15103_v4  ;;  %v15512_v47 = vmul.f32 %v15354_v35, %v16765_v51  ;;  %v16778_v51 = vld [vmem:[#allocation83_spill] sm:$0xff] }
 0xb6c   :  { %v15516_v45 = vmul.f32 %v15354_v35, %v15125_v30  ;;  %v15520_v46 = vmul.f32 %v15354_v35, %v16766_v53  ;;  %v15524_v40 = vmul.f32 %v15354_v35, %v15143_v57  ;;  %v15528_v4 = vmul.f32 %v15354_v35, %v16767_v6  ;;  %v16780_v53 = vld [vmem:[#allocation86_spill] sm:$0xff] }
 0xb6d   :  { %v15532_v50 = vmul.f32 %v15354_v35, %v15163_v60  ;;  %v15536_v30 = vmul.f32 %v15354_v35, %v15169_v8  ;;  %v15540_v33 = vmul.f32 %v15354_v35, %v15181_v5  ;;  %v15544_v57 = vmul.f32 %v15354_v35, %v16768_v13  ;;  %v16782_v13 = vld [vmem:[#allocation85_spill] sm:$0xff] }
 0xb6e   :  { %v15548_v9 = vmul.f32 %v15354_v35, %v15199_v39  ;;  %v15552_v60 = vmul.f32 %v15354_v35, %v16770_v31  ;;  %v15556_v8 = vmul.f32 %v15354_v35, %v16772_v24  ;;  %v15560_v5 = vmul.f32 %v15354_v35, %v16774_v32  ;;  %v16784_v24 = vld [vmem:[#allocation88_spill] sm:$0xff] }
 0xb6f   :  { %v15564_v23 = vmul.f32 %v15354_v35, %v16776_v29  ;;  %v15568_v39 = vmul.f32 %v15354_v35, %v16778_v51  ;;  %v15572_v6 = vmul.f32 %v15354_v35, %v16780_v53  ;;  %v15576_v31 = vmul.f32 %v15354_v35, %v16782_v13  ;;  %v16790_v53 = vld [vmem:[#allocation90_spill] sm:$0xff] }
 0xb70   :  { %16769 = vst [vmem:[#allocation92_spill] sm:$0xff] %v15548_v9  ;;  %16771 = vst [vmem:[#allocation89_spill] sm:$0xff] %v15552_v60  ;;  %v15580_v32 = vmul.f32 %v15354_v35, %v16784_v24  ;;  %v15595_v13 = vrot.slane %v8943_v12, %v16760_v58 }
 0xb71   :  { %16773 = vst [vmem:[#allocation91_spill] sm:$0xff] %v15556_v8  ;;  %16775 = vst [vmem:[#allocation64_spill] sm:$0xff] %v15560_v5  ;;  %v16786_v5 = vld [vmem:[#allocation87_spill] sm:$0xff] }
 0xb72   :  { %16777 = vst [vmem:[#allocation66_spill] sm:$0xff] %v15564_v23  ;;  %16779 = vst [vmem:[#allocation65_spill] sm:$0xff] %v15568_v39  ;;  %v15584_v29 = vmul.f32 %v15354_v35, %v16786_v5  ;;  %v16788_v23 = vld [vmem:[#allocation77_spill] sm:$0xff]  ;;  %v16789_v39 = vld [vmem:[#allocation80_spill] sm:$0xff]  ;;  %v15611_v58 = vadd.f32 %v15595_v13, %v15364_v59  ;;  %v15615_v12 = vadd.f32 %v15595_v13, %v15368_v41 }
 0xb73   :  { %16781 = vst [vmem:[#allocation68_spill] sm:$0xff] %v15572_v6  ;;  %16783 = vst [vmem:[#allocation67_spill] sm:$0xff] %v15576_v31  ;;  %v9002_v51 = vmul.f32 %v15354_v35, %v16788_v23  ;;  %v9003_v8 = vmul.f32 %v15354_v35, %v16789_v39  ;;  %v15592_v6 = vmul.f32 %v15354_v35, %v16790_v53  ;;  %v16791_v31 = vld [vmem:[#allocation79_spill] sm:$0xff]  ;;  %v16794_v23 = vld [vmem:[#allocation84_spill] sm:$0xff] }
 0xb74   :  { %16785 = vst [vmem:[#allocation74_spill] sm:$0xff] %v15580_v32  ;;  %16787 = vst [vmem:[#allocation69_spill] sm:$0xff] %v15584_v29  ;;  %v9004_v24 = vmul.f32 %v15354_v35, %v16791_v31  ;;  %v16792_v32 = vld [vmem:[#allocation82_spill] sm:$0xff]  ;;  %v16793_v29 = vld [vmem:[#allocation81_spill] sm:$0xff]  ;;  %v9007_v9 = vmul.f32 %v15354_v35, %v16794_v23  ;;  %v15607_v39 = vadd.f32 %v15595_v13, %v15360_v10 }
 0xb75   :  { %v9005_v5 = vmul.f32 %v15354_v35, %v16792_v32  ;;  %v9006_v60 = vmul.f32 %v15354_v35, %v16793_v29  ;;  %v15619_v31 = vadd.f32 %v15595_v13, %v15372_v55  ;;  %v15623_v32 = vadd.f32 %v15595_v13, %v15376_v17 }
 0xb76   :  { %v15627_v35 = vadd.f32 %v15595_v13, %v15380_v63  ;;  %v15631_v10 = vadd.f32 %v15595_v13, %v15384_v28  ;;  %v15635_v59 = vadd.f32 %v15595_v13, %v15388_v21  ;;  %v15639_v41 = vadd.f32 %v15595_v13, %v15392_v1 }
 0xb77   :  { %v15643_v55 = vadd.f32 %v15595_v13, %v15396_v34  ;;  %v15647_v17 = vadd.f32 %v15595_v13, %v15400_v26  ;;  %v15651_v63 = vadd.f32 %v15595_v13, %v15404_v52  ;;  %v15655_v28 = vadd.f32 %v15595_v13, %v15408_v56  ;;  %v16798_v29 = vld [vmem:[#allocation89_spill] sm:$0xff] }
 0xb78   :  { %v15659_v21 = vadd.f32 %v15595_v13, %v15412_v42  ;;  %v15663_v1 = vadd.f32 %v15595_v13, %v15416_v11  ;;  %v15667_v34 = vadd.f32 %v15595_v13, %v15420_v20  ;;  %v15671_v26 = vadd.f32 %v15595_v13, %v15424_v7  ;;  %v16799_v53 = vld [vmem:[#allocation91_spill] sm:$0xff]  ;;  %v16801_v23 = vld [vmem:[#allocation64_spill] sm:$0xff] }
 0xb79   :  { %v15675_v52 = vadd.f32 %v15595_v13, %v15428_v38  ;;  %v15679_v56 = vadd.f32 %v15595_v13, %v15432_v37  ;;  %v15683_v42 = vadd.f32 %v15595_v13, %v15436_v36  ;;  %v15687_v11 = vadd.f32 %v15595_v13, %v15440_v22 }
 0xb7a   :  { %v15691_v20 = vadd.f32 %v15595_v13, %v15444_v2  ;;  %v15695_v7 = vadd.f32 %v15595_v13, %v15448_v49  ;;  %v15699_v38 = vadd.f32 %v15595_v13, %v15452_v3  ;;  %v15703_v37 = vadd.f32 %v15595_v13, %v15456_v25 }
 0xb7b   :  { %v15707_v36 = vadd.f32 %v15595_v13, %v15460_v27  ;;  %v15711_v22 = vadd.f32 %v15595_v13, %v15464_v61  ;;  %v15715_v2 = vadd.f32 %v15595_v13, %v15468_v18  ;;  %v15719_v49 = vadd.f32 %v15595_v13, %v15472_v19 }
 0xb7c   :  { %v15723_v3 = vadd.f32 %v15595_v13, %v15476_v43  ;;  %v15727_v25 = vadd.f32 %v15595_v13, %v15480_v48  ;;  %v15731_v27 = vadd.f32 %v15595_v13, %v15484_v16  ;;  %v15735_v61 = vadd.f32 %v15595_v13, %v15488_v14 }
 0xb7d   :  { %v15739_v18 = vadd.f32 %v15595_v13, %v15492_v0  ;;  %v15743_v19 = vadd.f32 %v15595_v13, %v15496_v62  ;;  %v15747_v43 = vadd.f32 %v15595_v13, %v15500_v15  ;;  %v15751_v48 = vadd.f32 %v15595_v13, %v15504_v54 }
 0xb7e   :  { %v15755_v16 = vadd.f32 %v15595_v13, %v15508_v44  ;;  %v15759_v14 = vadd.f32 %v15595_v13, %v15512_v47  ;;  %v15763_v0 = vadd.f32 %v15595_v13, %v15516_v45  ;;  %v15767_v62 = vadd.f32 %v15595_v13, %v15520_v46 }
 0xb7f   :  { %v15771_v15 = vadd.f32 %v15595_v13, %v15524_v40  ;;  %v15775_v54 = vadd.f32 %v15595_v13, %v15528_v4  ;;  %v15779_v44 = vadd.f32 %v15595_v13, %v15532_v50  ;;  %v15783_v47 = vadd.f32 %v15595_v13, %v15536_v30  ;;  %v16797_v40 = vld [vmem:[#allocation92_spill] sm:$0xff] }
 0xb80   :  { %v15787_v45 = vadd.f32 %v15595_v13, %v15540_v33  ;;  %v15791_v46 = vadd.f32 %v15595_v13, %v15544_v57  ;;  %v15795_v4 = vadd.f32 %v15595_v13, %v16797_v40  ;;  %v15799_v50 = vadd.f32 %v15595_v13, %v16798_v29 }
 0xb81   :  { %v15803_v30 = vadd.f32 %v15595_v13, %v16799_v53  ;;  %v15807_v33 = vadd.f32 %v15595_v13, %v16801_v23  ;;  %v15817_v40 = vadd.f32 %v15595_v13, %v9003_v8  ;;  %v15820_v29 = vadd.f32 %v15595_v13, %v9004_v24 }
 0xb82   :  { %16795 = vst [vmem:[#allocation76_spill] sm:$0xff] %v15787_v45  ;;  %16796 = vst [vmem:[#allocation75_spill] sm:$0xff] %v15791_v46  ;;  %v16802_v45 = vld [vmem:[#allocation66_spill] sm:$0xff]  ;;  %v15814_v46 = vadd.f32 %v15595_v13, %v9002_v51  ;;  %v15823_v53 = vadd.f32 %v15595_v13, %v9005_v5  ;;  %v15829_v23 = vadd.f32 %v15595_v13, %v9007_v9  ;;  %v16808_v51 = vld [vmem:[#allocation68_spill] sm:$0xff] }
 0xb83   :  { %16800 = vst [vmem:[#allocation78_spill] sm:$0xff] %v15803_v30  ;;  %v15811_v57 = vadd.f32 %v15595_v13, %v16802_v45  ;;  %16804 = vst [vmem:[#allocation86_spill] sm:$0xff] %v15817_v40  ;;  %v15826_v30 = vadd.f32 %v15595_v13, %v9006_v60  ;;  %v16806_v45 = vld [vmem:[#allocation65_spill] sm:$0xff]  ;;  %v15837_v8 = vadd.f32 %v15595_v13, %v16808_v51  ;;  %v16810_v40 = vld [vmem:[#allocation67_spill] sm:$0xff] }
 0xb84   :  { %16805 = vst [vmem:[#allocation85_spill] sm:$0xff] %v15823_v53  ;;  %v15841_v24 = vadd.f32 %v15595_v13, %v16810_v40  ;;  %v16812_v5 = vld [vmem:[#allocation74_spill] sm:$0xff]  ;;  %v16814_v60 = vld [vmem:[#allocation69_spill] sm:$0xff] }
 0xb85   :  { %16803 = vst [vmem:[#allocation83_spill] sm:$0xff] %v15811_v57  ;;  %v15833_v57 = vadd.f32 %v15595_v13, %v16806_v45  ;;  %16809 = vst [vmem:[#allocation87_spill] sm:$0xff] %v15837_v8  ;;  %v15845_v53 = vadd.f32 %v15595_v13, %v16812_v5  ;;  %v15849_v9 = vadd.f32 %v15595_v13, %v16814_v60  ;;  %v16817_v8 = vld [vmem:[#allocation5_spill] sm:$0xff] }
 0xb86   :  { %16811 = vst [vmem:[#allocation77_spill] sm:$0xff] %v15841_v24  ;;  %v15853_v45 = vadd.f32 %v15595_v13, %v15592_v6  ;;  %v15861_v40 = vadd.f32 %v15611_v58, %v16817_v8  ;;  %v16818_v24 = vld [vmem:[#allocation6_spill] sm:$0xff]  ;;  %v16821_v13 = vld [vmem:[#allocation9_spill] sm:$0xff]  ;;  %v16823_v8 = vld [vmem:[#allocation11_spill] sm:$0xff] }
 0xb87   :  { %16807 = vst [vmem:[#allocation88_spill] sm:$0xff] %v15833_v57  ;;  %16813 = vst [vmem:[#allocation80_spill] sm:$0xff] %v15845_v53  ;;  %v16816_v57 = vld [vmem:[#allocation4_spill] sm:$0xff]  ;;  %v15865_v5 = vadd.f32 %v15615_v12, %v16818_v24  ;;  %v16819_v53 = vld [vmem:[#allocation7_spill] sm:$0xff]  ;;  %v15885_v12 = vadd.f32 %v15635_v59, %v16823_v8 }
 0xb88   :  { %16815 = vst [vmem:[#allocation90_spill] sm:$0xff] %v15849_v9  ;;  %v15857_v51 = vadd.f32 %v15607_v39, %v16816_v57  ;;  %v15869_v60 = vadd.f32 %v15619_v31, %v16819_v53  ;;  %v16820_v9 = vld [vmem:[#allocation8_spill] sm:$0xff]  ;;  %v15877_v39 = vadd.f32 %v15627_v35, %v16821_v13  ;;  %v16822_v57 = vld [vmem:[#allocation10_spill] sm:$0xff]  ;;  %v16825_v53 = vld [vmem:[#allocation13_spill] sm:$0xff] }
 0xb89   :  { %v15873_v6 = vadd.f32 %v15623_v32, %v16820_v9  ;;  %v15881_v58 = vadd.f32 %v15631_v10, %v16822_v57  ;;  %v16824_v24 = vld [vmem:[#allocation12_spill] sm:$0xff]  ;;  %v15893_v32 = vadd.f32 %v15643_v55, %v16825_v53  ;;  %v16826_v9 = vld [vmem:[#allocation14_spill] sm:$0xff]  ;;  %v16827_v13 = vld [vmem:[#allocation15_spill] sm:$0xff] }
 0xb8a   :  { %v15889_v31 = vadd.f32 %v15639_v41, %v16824_v24  ;;  %v15897_v35 = vadd.f32 %v15647_v17, %v16826_v9  ;;  %v15901_v10 = vadd.f32 %v15651_v63, %v16827_v13  ;;  %v16828_v57 = vld [vmem:[#allocation16_spill] sm:$0xff]  ;;  %v16829_v8 = vld [vmem:[#allocation17_spill] sm:$0xff]  ;;  %v16830_v24 = vld [vmem:[#allocation18_spill] sm:$0xff] }
 0xb8b   :  { %v15905_v59 = vadd.f32 %v15655_v28, %v16828_v57  ;;  %v15909_v41 = vadd.f32 %v15659_v21, %v16829_v8  ;;  %v15913_v55 = vadd.f32 %v15663_v1, %v16830_v24  ;;  %v16831_v53 = vld [vmem:[#allocation19_spill] sm:$0xff]  ;;  %v16832_v9 = vld [vmem:[#allocation20_spill] sm:$0xff]  ;;  %v16833_v13 = vld [vmem:[#allocation21_spill] sm:$0xff] }
 0xb8c   :  { %v15917_v17 = vadd.f32 %v15667_v34, %v16831_v53  ;;  %v15921_v63 = vadd.f32 %v15671_v26, %v16832_v9  ;;  %v15925_v28 = vadd.f32 %v15675_v52, %v16833_v13  ;;  %v16834_v57 = vld [vmem:[#allocation22_spill] sm:$0xff]  ;;  %v16835_v8 = vld [vmem:[#allocation23_spill] sm:$0xff]  ;;  %v16836_v24 = vld [vmem:[#allocation24_spill] sm:$0xff] }
 0xb8d   :  { %v15929_v21 = vadd.f32 %v15679_v56, %v16834_v57  ;;  %v15933_v1 = vadd.f32 %v15683_v42, %v16835_v8  ;;  %v15937_v34 = vadd.f32 %v15687_v11, %v16836_v24  ;;  %v16837_v53 = vld [vmem:[#allocation25_spill] sm:$0xff]  ;;  %v16838_v9 = vld [vmem:[#allocation26_spill] sm:$0xff]  ;;  %v16839_v13 = vld [vmem:[#allocation27_spill] sm:$0xff] }
 0xb8e   :  { %v15941_v26 = vadd.f32 %v15691_v20, %v16837_v53  ;;  %v15945_v52 = vadd.f32 %v15695_v7, %v16838_v9  ;;  %v15949_v56 = vadd.f32 %v15699_v38, %v16839_v13  ;;  %v16840_v57 = vld [vmem:[#allocation28_spill] sm:$0xff]  ;;  %v16841_v8 = vld [vmem:[#allocation29_spill] sm:$0xff]  ;;  %v16842_v24 = vld [vmem:[#allocation30_spill] sm:$0xff] }
 0xb8f   :  { %v15953_v42 = vadd.f32 %v15703_v37, %v16840_v57  ;;  %v15957_v11 = vadd.f32 %v15707_v36, %v16841_v8  ;;  %v15961_v20 = vadd.f32 %v15711_v22, %v16842_v24  ;;  %v16843_v53 = vld [vmem:[#allocation31_spill] sm:$0xff]  ;;  %v16844_v9 = vld [vmem:[#allocation32_spill] sm:$0xff]  ;;  %v16845_v13 = vld [vmem:[#allocation33_spill] sm:$0xff] }
 0xb90   :  { %v15965_v7 = vadd.f32 %v15715_v2, %v16843_v53  ;;  %v15969_v38 = vadd.f32 %v15719_v49, %v16844_v9  ;;  %v15973_v37 = vadd.f32 %v15723_v3, %v16845_v13  ;;  %v16846_v57 = vld [vmem:[#allocation70_spill] sm:$0xff]  ;;  %v16847_v8 = vld [vmem:[#allocation71_spill] sm:$0xff]  ;;  %v16850_v9 = vld [vmem:[#allocation36_spill] sm:$0xff] }
 0xb91   :  { %v15977_v36 = vadd.f32 %v15727_v25, %v16846_v57  ;;  %v15981_v22 = vadd.f32 %v15731_v27, %v16847_v8  ;;  %v16848_v24 = vld [vmem:[#allocation34_spill] sm:$0xff]  ;;  %v16849_v53 = vld [vmem:[#allocation35_spill] sm:$0xff]  ;;  %v15993_v3 = vadd.f32 %v15743_v19, %v16850_v9  ;;  %v16851_v13 = vld [vmem:[#allocation37_spill] sm:$0xff] }
 0xb92   :  { %v15985_v2 = vadd.f32 %v15735_v61, %v16848_v24  ;;  %v15989_v49 = vadd.f32 %v15739_v18, %v16849_v53  ;;  %v15997_v25 = vadd.f32 %v15747_v43, %v16851_v13  ;;  %v16852_v57 = vld [vmem:[#allocation38_spill] sm:$0xff]  ;;  %v16853_v8 = vld [vmem:[#allocation39_spill] sm:$0xff]  ;;  %v16854_v24 = vld [vmem:[#allocation40_spill] sm:$0xff] }
 0xb93   :  { %v16001_v27 = vadd.f32 %v15751_v48, %v16852_v57  ;;  %v16005_v61 = vadd.f32 %v15755_v16, %v16853_v8  ;;  %v16009_v18 = vadd.f32 %v15759_v14, %v16854_v24  ;;  %v16855_v53 = vld [vmem:[#allocation41_spill] sm:$0xff]  ;;  %v16857_v9 = vld [vmem:[#allocation42_spill] sm:$0xff]  ;;  %v16859_v13 = vld [vmem:[#allocation43_spill] sm:$0xff] }
 0xb94   :  { %v16013_v19 = vadd.f32 %v15763_v0, %v16855_v53  ;;  %v16017_v43 = vadd.f32 %v15767_v62, %v16857_v9  ;;  %v16021_v48 = vadd.f32 %v15771_v15, %v16859_v13  ;;  %v16860_v57 = vld [vmem:[#allocation44_spill] sm:$0xff]  ;;  %v16861_v8 = vld [vmem:[#allocation45_spill] sm:$0xff]  ;;  %v16863_v24 = vld [vmem:[#allocation46_spill] sm:$0xff] }
 0xb95   :  { %v16025_v16 = vadd.f32 %v15775_v54, %v16860_v57  ;;  %v16029_v14 = vadd.f32 %v15779_v44, %v16861_v8  ;;  %v16033_v0 = vadd.f32 %v15783_v47, %v16863_v24  ;;  %v16864_v53 = vld [vmem:[#allocation47_spill] sm:$0xff]  ;;  %v16867_v9 = vld [vmem:[#allocation48_spill] sm:$0xff]  ;;  %v16869_v13 = vld [vmem:[#allocation49_spill] sm:$0xff] }
 0xb96   :  { %16856 = vst [vmem:[#allocation79_spill] sm:$0xff] %v16013_v19  ;;  %16858 = vst [vmem:[#allocation82_spill] sm:$0xff] %v16017_v43  ;;  %v16865_v19 = vld [vmem:[#allocation76_spill] sm:$0xff]  ;;  %v16868_v43 = vld [vmem:[#allocation75_spill] sm:$0xff]  ;;  %v16045_v54 = vadd.f32 %v15795_v4, %v16869_v13 }
 0xb97   :  { %16862 = vst [vmem:[#allocation81_spill] sm:$0xff] %v16029_v14  ;;  %v16037_v62 = vadd.f32 %v16865_v19, %v16864_v53  ;;  %v16041_v15 = vadd.f32 %v16868_v43, %v16867_v9  ;;  %v16871_v57 = vld [vmem:[#allocation50_spill] sm:$0xff]  ;;  %v16872_v8 = vld [vmem:[#allocation51_spill] sm:$0xff]  ;;  %v16875_v24 = vld [vmem:[#allocation52_spill] sm:$0xff] }
 0xb98   :  { %16870 = vst [vmem:[#allocation92_spill] sm:$0xff] %v16045_v54  ;;  %v16049_v44 = vadd.f32 %v15799_v50, %v16871_v57  ;;  %v16873_v14 = vld [vmem:[#allocation78_spill] sm:$0xff]  ;;  %v16057_v19 = vadd.f32 %v15807_v33, %v16875_v24  ;;  %v16876_v53 = vld [vmem:[#allocation53_spill] sm:$0xff]  ;;  %v16880_v13 = vld [vmem:[#allocation55_spill] sm:$0xff] }
 0xb99   :  { %16866 = vst [vmem:[#allocation84_spill] sm:$0xff] %v16037_v62  ;;  %v16053_v47 = vadd.f32 %v16873_v14, %v16872_v8  ;;  %v16877_v62 = vld [vmem:[#allocation83_spill] sm:$0xff]  ;;  %v16878_v9 = vld [vmem:[#allocation54_spill] sm:$0xff]  ;;  %v16883_v57 = vld [vmem:[#allocation56_spill] sm:$0xff] }
 0xb9a   :  { %v16061_v43 = vadd.f32 %v16877_v62, %v16876_v53  ;;  %v16065_v4 = vadd.f32 %v15814_v46, %v16878_v9  ;;  %v16881_v54 = vld [vmem:[#allocation86_spill] sm:$0xff]  ;;  %v16073_v14 = vadd.f32 %v15820_v29, %v16883_v57  ;;  %v16885_v8 = vld [vmem:[#allocation57_spill] sm:$0xff]  ;;  %v16890_v53 = vld [vmem:[#allocation59_spill] sm:$0xff] }
 0xb9b   :  { %16874 = vst [vmem:[#allocation89_spill] sm:$0xff] %v16053_v47  ;;  %v16069_v50 = vadd.f32 %v16881_v54, %v16880_v13  ;;  %v16886_v47 = vld [vmem:[#allocation85_spill] sm:$0xff]  ;;  %v16888_v24 = vld [vmem:[#allocation58_spill] sm:$0xff]  ;;  %v16085_v46 = vadd.f32 %v15829_v23, %v16890_v53  ;;  %v16891_v9 = vld [vmem:[#allocation60_spill] sm:$0xff] }
 0xb9c   :  { %16879 = vst [vmem:[#allocation91_spill] sm:$0xff] %v16065_v4  ;;  %16884 = vst [vmem:[#allocation66_spill] sm:$0xff] %v16073_v14  ;;  %v16077_v33 = vadd.f32 %v16886_v47, %v16885_v8  ;;  %v16081_v62 = vadd.f32 %v15826_v30, %v16888_v24  ;;  %v16892_v4 = vld [vmem:[#allocation88_spill] sm:$0xff]  ;;  %v16893_v13 = vld [vmem:[#allocation61_spill] sm:$0xff] }
 0xb9d   :  { %16882 = vst [vmem:[#allocation64_spill] sm:$0xff] %v16069_v50  ;;  %v16089_v54 = vadd.f32 %v16892_v4, %v16891_v9  ;;  %v16894_v50 = vld [vmem:[#allocation87_spill] sm:$0xff]  ;;  %v16895_v57 = vld [vmem:[#allocation62_spill] sm:$0xff]  ;;  %v16896_v14 = vld [vmem:[#allocation77_spill] sm:$0xff]  ;;  %v9148_v9 = vmax.f32 %v15857_v51, 0.0  ;;  %v9158_v51 = vmax.f32 %v15897_v35, 0.0 }
 0xb9e   :  { %16887 = vst [vmem:[#allocation65_spill] sm:$0xff] %v16077_v33  ;;  %16889 = vst [vmem:[#allocation68_spill] sm:$0xff] %v16081_v62  ;;  %v16093_v29 = vadd.f32 %v16894_v50, %v16893_v13  ;;  %v16097_v47 = vadd.f32 %v16896_v14, %v16895_v57  ;;  %v16897_v8 = vld [vmem:[#allocation63_spill] sm:$0xff]  ;;  %v16898_v33 = vld [vmem:[#allocation80_spill] sm:$0xff]  ;;  %v9149_v50 = vmax.f32 %v15861_v40, 0.0  ;;  %v9150_v13 = vmax.f32 %v15865_v5, 0.0 }
 0xb9f   :  { %v16101_v30 = vadd.f32 %v16898_v33, %v16897_v8  ;;  %v16899_v24 = vld [vmem:[#allocation72_spill] sm:$0xff]  ;;  %v16900_v62 = vld [vmem:[#allocation90_spill] sm:$0xff]  ;;  %v16901_v53 = vld [vmem:[#allocation73_spill] sm:$0xff]  ;;  %v9151_v14 = vmax.f32 %v15869_v60, 0.0  ;;  %v9152_v57 = vmax.f32 %v15873_v6, 0.0  ;;  %v9153_v33 = vmax.f32 %v15877_v39, 0.0 }
 0xba0   :  { %v16105_v23 = vadd.f32 %v16900_v62, %v16899_v24  ;;  %v16109_v4 = vadd.f32 %v15853_v45, %v16901_v53  ;;  %v9154_v8 = vmax.f32 %v15881_v58, 0.0  ;;  %v9155_v62 = vmax.f32 %v15885_v12, 0.0  ;;  %9212 = vst.msk [vmem:[%s16440_s9] sm:$0xff] %vm96_vm0, %v9148_v9  ;;  %9213 = vst.msk [vmem:[%s16440_s9 + $0x8] sm:$0xff] %vm96_vm0, %v9149_v50  ;;  %v16906_v53 = vld [vmem:[#allocation92_spill] sm:$0xff] }
 0xba1   :  { %v9156_v24 = vmax.f32 %v15889_v31, 0.0  ;;  %v9157_v45 = vmax.f32 %v15893_v32, 0.0  ;;  %v9159_v40 = vmax.f32 %v15901_v10, 0.0  ;;  %9214 = vst.msk [vmem:[%s16440_s9 + $0x10] sm:$0xff] %vm96_vm0, %v9150_v13  ;;  %9215 = vst.msk [vmem:[%s16440_s9 + $0x18] sm:$0xff] %vm96_vm0, %v9151_v14  ;;  %v9160_v5 = vmax.f32 %v15905_v59, 0.0 }
 0xba2   :  { %v9161_v60 = vmax.f32 %v15909_v41, 0.0  ;;  %v9162_v6 = vmax.f32 %v15913_v55, 0.0  ;;  %v9163_v39 = vmax.f32 %v15917_v17, 0.0  ;;  %9216 = vst.msk [vmem:[%s16440_s9 + $0x20] sm:$0xff] %vm96_vm0, %v9152_v57  ;;  %9217 = vst.msk [vmem:[%s16440_s9 + $0x28] sm:$0xff] %vm96_vm0, %v9153_v33  ;;  %v9164_v58 = vmax.f32 %v15921_v63, 0.0 }
 0xba3   :  { %9218 = vst.msk [vmem:[%s16440_s9 + $0x30] sm:$0xff] %vm96_vm0, %v9154_v8  ;;  %9219 = vst.msk [vmem:[%s16440_s9 + $0x38] sm:$0xff] %vm96_vm0, %v9155_v62  ;;  %v9165_v12 = vmax.f32 %v15925_v28, 0.0  ;;  %v9166_v31 = vmax.f32 %v15929_v21, 0.0  ;;  %v9167_v32 = vmax.f32 %v15933_v1, 0.0  ;;  %v9168_v35 = vmax.f32 %v15937_v34, 0.0 }
 0xba4   :  { %9220 = vst.msk [vmem:[%s16440_s9 + $0x40] sm:$0xff] %vm96_vm0, %v9156_v24  ;;  %9221 = vst.msk [vmem:[%s16440_s9 + $0x48] sm:$0xff] %vm96_vm0, %v9157_v45  ;;  %v9169_v10 = vmax.f32 %v15941_v26, 0.0  ;;  %v9170_v59 = vmax.f32 %v15945_v52, 0.0  ;;  %v9171_v41 = vmax.f32 %v15949_v56, 0.0  ;;  %v9172_v55 = vmax.f32 %v15953_v42, 0.0 }
 0xba5   :  { %9222 = vst.msk [vmem:[%s16440_s9 + $0x50] sm:$0xff] %vm96_vm0, %v9158_v51  ;;  %9223 = vst.msk [vmem:[%s16440_s9 + $0x58] sm:$0xff] %vm96_vm0, %v9159_v40  ;;  %v9173_v17 = vmax.f32 %v15957_v11, 0.0  ;;  %v9174_v63 = vmax.f32 %v15961_v20, 0.0  ;;  %v9175_v28 = vmax.f32 %v15965_v7, 0.0  ;;  %v9176_v21 = vmax.f32 %v15969_v38, 0.0 }
 0xba6   :  { %9224 = vst.msk [vmem:[%s16440_s9 + $0x60] sm:$0xff] %vm96_vm0, %v9160_v5  ;;  %9225 = vst.msk [vmem:[%s16440_s9 + $0x68] sm:$0xff] %vm96_vm0, %v9161_v60  ;;  %v9177_v1 = vmax.f32 %v15973_v37, 0.0  ;;  %v9178_v34 = vmax.f32 %v15977_v36, 0.0  ;;  %v9179_v26 = vmax.f32 %v15981_v22, 0.0  ;;  %v9180_v52 = vmax.f32 %v15985_v2, 0.0 }
 0xba7   :  { %9226 = vst.msk [vmem:[%s16440_s9 + $0x70] sm:$0xff] %vm96_vm0, %v9162_v6  ;;  %9227 = vst.msk [vmem:[%s16440_s9 + $0x78] sm:$0xff] %vm96_vm0, %v9163_v39  ;;  %v9181_v56 = vmax.f32 %v15989_v49, 0.0  ;;  %v9182_v42 = vmax.f32 %v15993_v3, 0.0  ;;  %v9183_v11 = vmax.f32 %v15997_v25, 0.0  ;;  %v9184_v20 = vmax.f32 %v16001_v27, 0.0 }
 0xba8   :  { %9228 = vst.msk [vmem:[%s16440_s9 + $0x80] sm:$0xff] %vm96_vm0, %v9164_v58  ;;  %9229 = vst.msk [vmem:[%s16440_s9 + $0x88] sm:$0xff] %vm96_vm0, %v9165_v12  ;;  %v9185_v7 = vmax.f32 %v16005_v61, 0.0  ;;  %v9186_v38 = vmax.f32 %v16009_v18, 0.0  ;;  %v16902_v37 = vld [vmem:[#allocation79_spill] sm:$0xff]  ;;  %v16903_v22 = vld [vmem:[#allocation82_spill] sm:$0xff] }
 0xba9   :  { %9230 = vst.msk [vmem:[%s16440_s9 + $0x90] sm:$0xff] %vm96_vm0, %v9166_v31  ;;  %9231 = vst.msk [vmem:[%s16440_s9 + $0x98] sm:$0xff] %vm96_vm0, %v9167_v32  ;;  %v9187_v36 = vmax.f32 %v16902_v37, 0.0  ;;  %v9188_v2 = vmax.f32 %v16903_v22, 0.0  ;;  %v9189_v49 = vmax.f32 %v16021_v48, 0.0  ;;  %v9190_v3 = vmax.f32 %v16025_v16, 0.0 }
 0xbaa   :  { %9232 = vst.msk [vmem:[%s16440_s9 + $0xa0] sm:$0xff] %vm96_vm0, %v9168_v35  ;;  %9233 = vst.msk [vmem:[%s16440_s9 + $0xa8] sm:$0xff] %vm96_vm0, %v9169_v10  ;;  %v16904_v25 = vld [vmem:[#allocation81_spill] sm:$0xff]  ;;  %v9192_v61 = vmax.f32 %v16033_v0, 0.0  ;;  %v16905_v18 = vld [vmem:[#allocation84_spill] sm:$0xff]  ;;  %v9194_v16 = vmax.f32 %v16041_v15, 0.0 }
 0xbab   :  { %9234 = vst.msk [vmem:[%s16440_s9 + $0xb0] sm:$0xff] %vm96_vm0, %v9170_v59  ;;  %9235 = vst.msk [vmem:[%s16440_s9 + $0xb8] sm:$0xff] %vm96_vm0, %v9171_v41  ;;  %v9191_v27 = vmax.f32 %v16904_v25, 0.0  ;;  %v9193_v48 = vmax.f32 %v16905_v18, 0.0  ;;  %v9195_v9 = vmax.f32 %v16906_v53, 0.0  ;;  %v9196_v0 = vmax.f32 %v16049_v44, 0.0 }
 0xbac   :  { %9236 = vst.msk [vmem:[%s16440_s9 + $0xc0] sm:$0xff] %vm96_vm0, %v9172_v55  ;;  %9237 = vst.msk [vmem:[%s16440_s9 + $0xc8] sm:$0xff] %vm96_vm0, %v9173_v17  ;;  %v16907_v15 = vld [vmem:[#allocation89_spill] sm:$0xff]  ;;  %v9198_v13 = vmax.f32 %v16057_v19, 0.0  ;;  %v9199_v14 = vmax.f32 %v16061_v43, 0.0  ;;  %v16908_v44 = vld [vmem:[#allocation91_spill] sm:$0xff] }
 0xbad   :  { %9238 = vst.msk [vmem:[%s16440_s9 + $0xd0] sm:$0xff] %vm96_vm0, %v9174_v63  ;;  %9239 = vst.msk [vmem:[%s16440_s9 + $0xd8] sm:$0xff] %vm96_vm0, %v9175_v28  ;;  %v9197_v50 = vmax.f32 %v16907_v15, 0.0  ;;  %v9200_v19 = vmax.f32 %v16908_v44, 0.0  ;;  %v16909_v43 = vld [vmem:[#allocation64_spill] sm:$0xff]  ;;  %v16910_v33 = vld [vmem:[#allocation66_spill] sm:$0xff] }
 0xbae   :  { %9240 = vst.msk [vmem:[%s16440_s9 + $0xe0] sm:$0xff] %vm96_vm0, %v9176_v21  ;;  %9241 = vst.msk [vmem:[%s16440_s9 + $0xe8] sm:$0xff] %vm96_vm0, %v9177_v1  ;;  %v9201_v57 = vmax.f32 %v16909_v43, 0.0  ;;  %v9202_v8 = vmax.f32 %v16910_v33, 0.0  ;;  %v16911_v62 = vld [vmem:[#allocation65_spill] sm:$0xff]  ;;  %v16912_v45 = vld [vmem:[#allocation68_spill] sm:$0xff] }
 0xbaf   :  { %9242 = vst.msk [vmem:[%s16440_s9 + $0xf0] sm:$0xff] %vm96_vm0, %v9178_v34  ;;  %9243 = vst.msk [vmem:[%s16440_s9 + $0xf8] sm:$0xff] %vm96_vm0, %v9179_v26  ;;  %v9203_v24 = vmax.f32 %v16911_v62, 0.0  ;;  %v9204_v51 = vmax.f32 %v16912_v45, 0.0  ;;  %v9205_v40 = vmax.f32 %v16085_v46, 0.0  ;;  %v9206_v5 = vmax.f32 %v16089_v54, 0.0 }
 0xbb0   :  { %9244 = vst.msk [vmem:[%s16440_s9 + $0x100] sm:$0xff] %vm96_vm0, %v9180_v52  ;;  %9245 = vst.msk [vmem:[%s16440_s9 + $0x108] sm:$0xff] %vm96_vm0, %v9181_v56  ;;  %v9207_v60 = vmax.f32 %v16093_v29, 0.0  ;;  %v9208_v46 = vmax.f32 %v16097_v47, 0.0  ;;  %v9209_v54 = vmax.f32 %v16101_v30, 0.0  ;;  %v9210_v29 = vmax.f32 %v16105_v23, 0.0 }
 0xbb1   :  { %9246 = vst.msk [vmem:[%s16440_s9 + $0x110] sm:$0xff] %vm96_vm0, %v9182_v42  ;;  %9247 = vst.msk [vmem:[%s16440_s9 + $0x118] sm:$0xff] %vm96_vm0, %v9183_v11  ;;  %v9211_v6 = vmax.f32 %v16109_v4, 0.0 }
 0xbb2   :  { %9248 = vst.msk [vmem:[%s16440_s9 + $0x120] sm:$0xff] %vm96_vm0, %v9184_v20  ;;  %9249 = vst.msk [vmem:[%s16440_s9 + $0x128] sm:$0xff] %vm96_vm0, %v9185_v7 }
 0xbb3   :  { %9250 = vst.msk [vmem:[%s16440_s9 + $0x130] sm:$0xff] %vm96_vm0, %v9186_v38  ;;  %9251 = vst.msk [vmem:[%s16440_s9 + $0x138] sm:$0xff] %vm96_vm0, %v9187_v36 }
 0xbb4   :  { %9252 = vst.msk [vmem:[%s16440_s9 + $0x140] sm:$0xff] %vm96_vm0, %v9188_v2  ;;  %9253 = vst.msk [vmem:[%s16440_s9 + $0x148] sm:$0xff] %vm96_vm0, %v9189_v49 }
 0xbb5   :  { %9254 = vst.msk [vmem:[%s16440_s9 + $0x150] sm:$0xff] %vm96_vm0, %v9190_v3  ;;  %9255 = vst.msk [vmem:[%s16440_s9 + $0x158] sm:$0xff] %vm96_vm0, %v9191_v27 }
 0xbb6   :  { %9256 = vst.msk [vmem:[%s16440_s9 + $0x160] sm:$0xff] %vm96_vm0, %v9192_v61  ;;  %9257 = vst.msk [vmem:[%s16440_s9 + $0x168] sm:$0xff] %vm96_vm0, %v9193_v48 }
 0xbb7   :  { %9258 = vst.msk [vmem:[%s16440_s9 + $0x170] sm:$0xff] %vm96_vm0, %v9194_v16  ;;  %9259 = vst.msk [vmem:[%s16440_s9 + $0x178] sm:$0xff] %vm96_vm0, %v9195_v9 }
 0xbb8   :  { %9260 = vst.msk [vmem:[%s16440_s9 + $0x180] sm:$0xff] %vm96_vm0, %v9196_v0  ;;  %9261 = vst.msk [vmem:[%s16440_s9 + $0x188] sm:$0xff] %vm96_vm0, %v9197_v50 }
 0xbb9   :  { %9262 = vst.msk [vmem:[%s16440_s9 + $0x190] sm:$0xff] %vm96_vm0, %v9198_v13  ;;  %9263 = vst.msk [vmem:[%s16440_s9 + $0x198] sm:$0xff] %vm96_vm0, %v9199_v14 }
 0xbba   :  { %9264 = vst.msk [vmem:[%s16440_s9 + $0x1a0] sm:$0xff] %vm96_vm0, %v9200_v19  ;;  %9265 = vst.msk [vmem:[%s16440_s9 + $0x1a8] sm:$0xff] %vm96_vm0, %v9201_v57 }
 0xbbb   :  { %9266 = vst.msk [vmem:[%s16440_s9 + $0x1b0] sm:$0xff] %vm96_vm0, %v9202_v8  ;;  %9267 = vst.msk [vmem:[%s16440_s9 + $0x1b8] sm:$0xff] %vm96_vm0, %v9203_v24 }
 0xbbc   :  { %9268 = vst.msk [vmem:[%s16440_s9 + $0x1c0] sm:$0xff] %vm96_vm0, %v9204_v51  ;;  %9269 = vst.msk [vmem:[%s16440_s9 + $0x1c8] sm:$0xff] %vm96_vm0, %v9205_v40 }
 0xbbd   :  { %9270 = vst.msk [vmem:[%s16440_s9 + $0x1d0] sm:$0xff] %vm96_vm0, %v9206_v5  ;;  %9271 = vst.msk [vmem:[%s16440_s9 + $0x1d8] sm:$0xff] %vm96_vm0, %v9207_v60 }
 0xbbe   :  { %9272 = vst.msk [vmem:[%s16440_s9 + $0x1e0] sm:$0xff] %vm96_vm0, %v9208_v46  ;;  %9273 = vst.msk [vmem:[%s16440_s9 + $0x1e8] sm:$0xff] %vm96_vm0, %v9209_v54 }
 0xbbf   :  { %9274 = vst.msk [vmem:[%s16440_s9 + $0x1f0] sm:$0xff] %vm96_vm0, %v9210_v29  ;;  %9275 = vst.msk [vmem:[%s16440_s9 + $0x1f8] sm:$0xff] %vm96_vm0, %v9211_v6 }

</bundles_post_ra>
